<compile_context>
chip_gen: v7x
topology: tpu7x:2x2x1
jax: 0.10.0
libtpu: 0.0.40
codegen_flags: <defaults>
</compile_context>

<pallas_src>
import numpy as np
import jax
import jax.numpy as jnp
from jax.experimental import pallas as pl
from jax.experimental.pallas import tpu as pltpu

EPS = 1e-5


# ----------------------------------------------------------------------------
# Kernel
# ----------------------------------------------------------------------------
def _cnn_kernel(x_ref, t1_ref, b1_ref, t2_ref, b2_ref, t3_ref, b3_ref,
                lw_ref, lb_ref, o_ref, pad1_ref, pad2_ref, pad3_ref):
    h1, tb, wc1 = x_ref.shape                       # (28, tb, 28*3)
    k1, k2, k3 = t1_ref.shape[0], t2_ref.shape[0], t3_ref.shape[0]
    p1, p2, p3 = k1 // 2, k2 // 2, k3 // 2
    h2, h3 = h1 // 2, h1 // 4

    def conv_bn_relu(pad_ref, t_ref, b_ref, h_out):
        """'same' stride-1 conv as k row-shifted MXU matmuls vs. block-Toeplitz
        weights, plus folded-BN shift and ReLU.  Rows ordered (row, image)."""
        acc = None
        for di in range(t_ref.shape[0]):
            a = pad_ref[di * tb:(di + h_out) * tb, :]          # (h*tb, Win*Cin) bf16
            y = jnp.dot(a, t_ref[di], preferred_element_type=jnp.float32)
            acc = y if acc is None else acc + y
        return jnp.maximum(acc + b_ref[...], 0.0)              # (h*tb, Wout*Cout) f32

    def maxpool2x2(y, h):
        """2x2/2 max pool.  Columns of y are pre-permuted (even output cols first,
        odd cols second) so width pooling is a max of two contiguous lane halves;
        height pooling is a max of two aligned sublane halves."""
        half = y.shape[1] // 2
        yw = jnp.maximum(y[:, :half], y[:, half:])             # (h*tb, half)
        z = yw.reshape(h // 2, 2 * tb, half)
        zh = jnp.maximum(z[:, :tb, :], z[:, tb:, :])
        return zh.reshape((h // 2) * tb, half)                 # ((h/2)*tb, (W/2)*C)

    # Zero only the constant border rows of the padded activation buffers
    # (interiors are fully overwritten every grid step).
    for pad_ref, p, h in ((pad1_ref, p1, h1), (pad2_ref, p2, h2), (pad3_ref, p3, h3)):
        zeros = jnp.zeros((p * tb, pad_ref.shape[1]), pad_ref.dtype)
        pad_ref[:p * tb, :] = zeros
        pad_ref[(p + h) * tb:, :] = zeros

    # ---- conv1 (7x7, 'same') + bn1 + relu1 + maxpool1 ----
    pad1_ref[p1 * tb:(p1 + h1) * tb, :] = x_ref[...].reshape(h1 * tb, wc1)
    y1 = conv_bn_relu(pad1_ref, t1_ref, b1_ref, h1)            # (28*tb, 28*c0)
    pool1 = maxpool2x2(y1, h1)                                 # (14*tb, 14*c0)

    # ---- conv2 (5x5, 'same') + bn2 + relu2 + maxpool2 ----
    pad2_ref[p2 * tb:(p2 + h2) * tb, :] = pool1.astype(pad2_ref.dtype)
    y2 = conv_bn_relu(pad2_ref, t2_ref, b2_ref, h2)            # (14*tb, 14*c1)
    pool2 = maxpool2x2(y2, h2)                                 # (7*tb, 7*c1)

    # ---- conv3 (3x3, 'same') + bn3 + relu3 ----
    pad3_ref[p3 * tb:(p3 + h3) * tb, :] = pool2.astype(pad3_ref.dtype)
    y3 = conv_bn_relu(pad3_ref, t3_ref, b3_ref, h3)            # (7*tb, 7*c2)

    # ---- flatten + linear: torch's (c, h, w) flatten order is absorbed into the
    # per-row-group weight slices lw_ref[i], so no in-kernel transpose is needed.
    acc = None
    for i in range(h3):
        f = y3[i * tb:(i + 1) * tb, :].astype(lw_ref.dtype)    # (tb, 7*c2) bf16
        y = jnp.dot(f, lw_ref[i], preferred_element_type=jnp.float32)
        acc = y if acc is None else acc + y
    o_ref[...] = acc + lb_ref[...]                             # (tb, 128) lane-dense


# ----------------------------------------------------------------------------
# Wrapper: parameter folding (BN + Toeplitz + flatten-order) + pallas_call
# ----------------------------------------------------------------------------
def _fold_bn(conv_w, conv_b, gamma, beta, mean, var):
    scale = gamma / jnp.sqrt(var + EPS)
    w = conv_w * scale[:, None, None, None]
    shift = beta + (conv_b - mean) * scale
    return w.astype(jnp.float32), shift.astype(jnp.float32)


def _toeplitz(w_scaled, w_in, interleave_pool):
    """Per-row-offset block-Toeplitz matrices for a 'same' stride-1 conv.

    T[di, ju*cin + ci, col(j)*cout + co] = w_scaled[co, ci, di, ju - j + k//2]
    (zero when out of range; width zero-padding is implicit).  With
    interleave_pool=True the output columns are permuted to (even j | odd j) so
    a 2x2 width max-pool is a max of two lane halves whose result is already in
    standard (j, c) order for the next layer.
    """
    cout, cin, k, _ = w_scaled.shape
    p = k // 2
    w_out = w_in
    sel = np.zeros((k, w_in, w_out), np.float32)        # sel[dj, ju, j]
    for dj in range(k):
        for j in range(w_out):
            ju = j + dj - p
            if 0 <= ju < w_in:
                sel[dj, ju, j] = 1.0
    wp = jnp.transpose(w_scaled, (2, 3, 1, 0))          # (di, dj, cin, cout)
    t5 = jnp.einsum('duj,edio->euijo', jnp.asarray(sel), wp)  # (k, w_in, cin, w_out, cout)
    if interleave_pool:
        order = np.concatenate([np.arange(0, w_out, 2), np.arange(1, w_out, 2)])
        t5 = t5[:, :, :, order, :]
    return t5.reshape(k, w_in * cin, w_out * cout)


def cnn_forward(x_nchw, params, *, batch_tile=32):
    """Pallas TPU implementation of CNNModel.forward (BatchNorm in eval mode)."""
    n, c_in, height, width = x_nchw.shape
    assert (c_in, height, width) == (3, 28, 28), x_nchw.shape
    tb = batch_tile
    assert tb % 8 == 0

    n_cls = params["lin_w"].shape[0]
    ncls_pad = ((n_cls + 127) // 128) * 128
    c0 = params["conv1_w"].shape[0]
    c1 = params["conv2_w"].shape[0]
    c2 = params["conv3_w"].shape[0]
    k1 = params["conv1_w"].shape[2]
    k2 = params["conv2_w"].shape[2]
    k3 = params["conv3_w"].shape[2]

    # ---- input layout: (H, N, W*Cin) rows=(row, image), lanes=(col, chan), bf16
    x = jnp.transpose(x_nchw, (2, 0, 3, 1)).reshape(height, n, width * c_in)
    n_pad = ((n + tb - 1) // tb) * tb
    if n_pad != n:
        x = jnp.pad(x, ((0, 0), (0, n_pad - n), (0, 0)))
    x = x.astype(jnp.bfloat16)

    # ---- fold BN into conv weights, build Toeplitz weights & tiled shifts ----
    w1, s1 = _fold_bn(params["conv1_w"], params["conv1_b"], params["bn1_gamma"],
                      params["bn1_beta"], params["bn1_mean"], params["bn1_var"])
    w2, s2 = _fold_bn(params["conv2_w"], params["conv2_b"], params["bn2_gamma"],
                      params["bn2_beta"], params["bn2_mean"], params["bn2_var"])
    w3, s3 = _fold_bn(params["conv3_w"], params["conv3_b"], params["bn3_gamma"],
                      params["bn3_beta"], params["bn3_mean"], params["bn3_var"])
    t1 = _toeplitz(w1, 28, True).astype(jnp.bfloat16)    # (7, 84, 84)
    t2 = _toeplitz(w2, 14, True).astype(jnp.bfloat16)    # (5, 42, 84)
    t3 = _toeplitz(w3, 7, False).astype(jnp.bfloat16)    # (3, 42, 84)
    b1 = jnp.tile(s1, 28).reshape(1, 28 * c0)
    b2 = jnp.tile(s2, 14).reshape(1, 14 * c1)
    b3 = jnp.tile(s3, 7).reshape(1, 7 * c2)

    # ---- linear: absorb torch's (c, h, w) flatten order, pad classes to 128 ----
    lw = params["lin_w"].reshape(n_cls, c2, 7, 7)        # (cls, co, i, j)
    lw = jnp.transpose(lw, (2, 3, 1, 0)).reshape(7, 7 * c2, n_cls)
    lw = jnp.pad(lw, ((0, 0), (0, 0), (0, ncls_pad - n_cls))).astype(jnp.bfloat16)
    lb = jnp.pad(params["lin_b"], (0, ncls_pad - n_cls)).reshape(1, ncls_pad)
    lb = lb.astype(jnp.float32)

    def const_spec(a):
        nd = a.ndim
        return pl.BlockSpec(a.shape, lambda b, nd=nd: (0,) * nd)

    out = pl.pallas_call(
        _cnn_kernel,
        out_shape=jax.ShapeDtypeStruct((n_pad, ncls_pad), jnp.float32),
        grid=(n_pad // tb,),
        in_specs=[
            pl.BlockSpec((28, tb, 28 * c_in), lambda b: (0, b, 0)),
            const_spec(t1), const_spec(b1),
            const_spec(t2), const_spec(b2),
            const_spec(t3), const_spec(b3),
            const_spec(lw), const_spec(lb),
        ],
        out_specs=pl.BlockSpec((tb, ncls_pad), lambda b: (b, 0)),
        scratch_shapes=[
            pltpu.VMEM(((28 + 2 * (k1 // 2)) * tb, 28 * c_in), jnp.bfloat16),  # pad1
            pltpu.VMEM(((14 + 2 * (k2 // 2)) * tb, 14 * c0), jnp.bfloat16),    # pad2
            pltpu.VMEM(((7 + 2 * (k3 // 2)) * tb, 7 * c1), jnp.bfloat16),      # pad3
        ],
        compiler_params=pltpu.CompilerParams(
            dimension_semantics=("parallel",),
            vmem_limit_bytes=32 * 1024 * 1024,
        ),
    )(x, t1, b1, t2, b2, t3, b3, lw, lb)
    return out[:n, :n_cls]


# ----------------------------------------------------------------------------
# Parameters (deterministic) and pure-JAX reference (correctness check only)
# ----------------------------------------------------------------------------
def init_params(key, n_classes=10, channel_size=(3, 6, 12), kernel_size=(7, 5, 3)):
    ks = jax.random.split(key, 20)
    c0, c1, c2 = channel_size
    k0, k1, k2 = kernel_size

    def normal(k, shape, s=0.1):
        return s * jax.random.normal(k, shape, dtype=jnp.float32)

    return {
        "conv1_w": normal(ks[0], (c0, 3, k0, k0)),
        "conv1_b": normal(ks[1], (c0,)),
        "bn1_gamma": 1.0 + normal(ks[2], (c0,)),
        "bn1_beta": normal(ks[3], (c0,)),
        "bn1_mean": normal(ks[4], (c0,)),
        "bn1_var": jax.random.uniform(ks[5], (c0,), jnp.float32, 0.5, 1.5),
        "conv2_w": normal(ks[6], (c1, c0, k1, k1)),
        "conv2_b": normal(ks[7], (c1,)),
        "bn2_gamma": 1.0 + normal(ks[8], (c1,)),
        "bn2_beta": normal(ks[9], (c1,)),
        "bn2_mean": normal(ks[10], (c1,)),
        "bn2_var": jax.random.uniform(ks[11], (c1,), jnp.float32, 0.5, 1.5),
        "conv3_w": normal(ks[12], (c2, c1, k2, k2)),
        "conv3_b": normal(ks[13], (c2,)),
        "bn3_gamma": 1.0 + normal(ks[14], (c2,)),
        "bn3_beta": normal(ks[15], (c2,)),
        "bn3_mean": normal(ks[16], (c2,)),
        "bn3_var": jax.random.uniform(ks[17], (c2,), jnp.float32, 0.5, 1.5),
        "lin_w": normal(ks[18], (n_classes, c2 * 7 * 7)),
        "lin_b": normal(ks[19], (n_classes,)),
    }


def reference_forward(x_nchw, params):
    x = x_nchw.astype(jnp.float32)

    def conv(x, w, b, pad):
        y = jax.lax.conv_general_dilated(
            x, w, window_strides=(1, 1), padding=[(pad, pad), (pad, pad)],
            dimension_numbers=("NCHW", "OIHW", "NCHW"))
        return y + b[None, :, None, None]

    def bn(x, g, be, m, v):
        return (x - m[None, :, None, None]) / jnp.sqrt(v[None, :, None, None] + EPS) \
            * g[None, :, None, None] + be[None, :, None, None]

    def pool(x):
        return jax.lax.reduce_window(x, -jnp.inf, jax.lax.max,
                                     (1, 1, 2, 2), (1, 1, 2, 2), "VALID")

    y = jnp.maximum(bn(conv(x, params["conv1_w"], params["conv1_b"], 3),
                       params["bn1_gamma"], params["bn1_beta"],
                       params["bn1_mean"], params["bn1_var"]), 0.0)
    y = pool(y)
    y = jnp.maximum(bn(conv(y, params["conv2_w"], params["conv2_b"], 2),
                       params["bn2_gamma"], params["bn2_beta"],
                       params["bn2_mean"], params["bn2_var"]), 0.0)
    y = pool(y)
    y = jnp.maximum(bn(conv(y, params["conv3_w"], params["conv3_b"], 1),
                       params["bn3_gamma"], params["bn3_beta"],
                       params["bn3_mean"], params["bn3_var"]), 0.0)
    flat = y.reshape(y.shape[0], -1)
    return flat @ params["lin_w"].T + params["lin_b"]


# ----------------------------------------------------------------------------
if __name__ == "__main__":
    key = jax.random.PRNGKey(0)
    kx, kp = jax.random.split(key)
    # Spatial must be 28x28 so the flatten matches 12*7*7 = 588.  Batch 48 with
    # batch_tile=32 exercises both the batch-padding path and a multi-step grid.
    x = jax.random.normal(kx, (48, 3, 28, 28), dtype=jnp.float32)
    params = init_params(kp)

    out = jax.block_until_ready(jax.jit(cnn_forward)(x, params))
    ref = jax.block_until_ready(reference_forward(x, params))

    assert out.shape == (48, 10), out.shape
    # bf16 MXU operands/activations => relaxed tolerance vs. the f32 reference.
    assert jnp.allclose(out, ref, rtol=3e-2, atol=3e-2), (
        float(jnp.max(jnp.abs(out - ref))))

    print("KERNEL_OK")
</pallas_src>

<mosaic_0001>
module attributes {stable_mosaic.version = 11 : i64} {
  func.func @_cnn_kernel(%arg0: i32, %arg1: memref<28x32x84xbf16, #tpu.memory_space<vmem>>, %arg2: memref<7x84x84xbf16, #tpu.memory_space<vmem>>, %arg3: memref<1x84xf32, #tpu.memory_space<vmem>>, %arg4: memref<5x42x84xbf16, #tpu.memory_space<vmem>>, %arg5: memref<1x84xf32, #tpu.memory_space<vmem>>, %arg6: memref<3x42x84xbf16, #tpu.memory_space<vmem>>, %arg7: memref<1x84xf32, #tpu.memory_space<vmem>>, %arg8: memref<7x84x128xbf16, #tpu.memory_space<vmem>>, %arg9: memref<1x128xf32, #tpu.memory_space<vmem>>, %arg10: memref<32x128xf32, #tpu.memory_space<vmem>>, %arg11: memref<1088x84xbf16, #tpu.memory_space<vmem>>, %arg12: memref<576x42xbf16, #tpu.memory_space<vmem>>, %arg13: memref<288x42xbf16, #tpu.memory_space<vmem>>) attributes {dimension_semantics = [#tpu.dimension_semantics<parallel>], iteration_bounds = array<i64: 2>, scalar_prefetch = 0 : i64, scratch_operands = 3 : i64, tpu.core_type = #tpu.core_type<tc>, window_params = [{transform_indices = @transform_0, window_bounds = array<i64: 28, 32, 84>}, {pipeline_mode = #tpu.pipeline_mode<synchronous>, transform_indices = @transform_1, window_bounds = array<i64: 7, 84, 84>}, {pipeline_mode = #tpu.pipeline_mode<synchronous>, transform_indices = @transform_2, window_bounds = array<i64: 1, 84>}, {pipeline_mode = #tpu.pipeline_mode<synchronous>, transform_indices = @transform_3, window_bounds = array<i64: 5, 42, 84>}, {pipeline_mode = #tpu.pipeline_mode<synchronous>, transform_indices = @transform_4, window_bounds = array<i64: 1, 84>}, {pipeline_mode = #tpu.pipeline_mode<synchronous>, transform_indices = @transform_5, window_bounds = array<i64: 3, 42, 84>}, {pipeline_mode = #tpu.pipeline_mode<synchronous>, transform_indices = @transform_6, window_bounds = array<i64: 1, 84>}, {pipeline_mode = #tpu.pipeline_mode<synchronous>, transform_indices = @transform_7, window_bounds = array<i64: 7, 84, 128>}, {pipeline_mode = #tpu.pipeline_mode<synchronous>, transform_indices = @transform_8, window_bounds = array<i64: 1, 128>}, {transform_indices = @transform_9, window_bounds = array<i64: 32, 128>}]} {
    %cst = arith.constant 0.000000e+00 : bf16
    %0 = vector.broadcast %cst : bf16 to vector<96x84xbf16>
    %c0 = arith.constant 0 : index
    %c0_0 = arith.constant 0 : index
    %1 = vector.load %arg11[%c0, %c0_0] : memref<1088x84xbf16, #tpu.memory_space<vmem>>, vector<96x84xbf16>
    tpu.vector_store %arg11[%c0, %c0_0], %0 {strides = array<i32>} : memref<1088x84xbf16, #tpu.memory_space<vmem>>, vector<96x84xbf16>,
    %c992 = arith.constant 992 : index
    %c0_1 = arith.constant 0 : index
    %2 = vector.load %arg11[%c992, %c0_1] : memref<1088x84xbf16, #tpu.memory_space<vmem>>, vector<96x84xbf16>
    tpu.vector_store %arg11[%c992, %c0_1], %0 {strides = array<i32>} : memref<1088x84xbf16, #tpu.memory_space<vmem>>, vector<96x84xbf16>,
    %cst_2 = arith.constant 0.000000e+00 : bf16
    %3 = vector.broadcast %cst_2 : bf16 to vector<64x42xbf16>
    %c0_3 = arith.constant 0 : index
    %c0_4 = arith.constant 0 : index
    %4 = vector.load %arg12[%c0_3, %c0_4] : memref<576x42xbf16, #tpu.memory_space<vmem>>, vector<64x42xbf16>
    tpu.vector_store %arg12[%c0_3, %c0_4], %3 {strides = array<i32>} : memref<576x42xbf16, #tpu.memory_space<vmem>>, vector<64x42xbf16>,
    %c512 = arith.constant 512 : index
    %c0_5 = arith.constant 0 : index
    %5 = vector.load %arg12[%c512, %c0_5] : memref<576x42xbf16, #tpu.memory_space<vmem>>, vector<64x42xbf16>
    tpu.vector_store %arg12[%c512, %c0_5], %3 {strides = array<i32>} : memref<576x42xbf16, #tpu.memory_space<vmem>>, vector<64x42xbf16>,
    %cst_6 = arith.constant 0.000000e+00 : bf16
    %6 = vector.broadcast %cst_6 : bf16 to vector<32x42xbf16>
    %c0_7 = arith.constant 0 : index
    %c0_8 = arith.constant 0 : index
    %7 = vector.load %arg13[%c0_7, %c0_8] : memref<288x42xbf16, #tpu.memory_space<vmem>>, vector<32x42xbf16>
    tpu.vector_store %arg13[%c0_7, %c0_8], %6 {strides = array<i32>} : memref<288x42xbf16, #tpu.memory_space<vmem>>, vector<32x42xbf16>,
    %c256 = arith.constant 256 : index
    %c0_9 = arith.constant 0 : index
    %8 = vector.load %arg13[%c256, %c0_9] : memref<288x42xbf16, #tpu.memory_space<vmem>>, vector<32x42xbf16>
    tpu.vector_store %arg13[%c256, %c0_9], %6 {strides = array<i32>} : memref<288x42xbf16, #tpu.memory_space<vmem>>, vector<32x42xbf16>,
    %c0_10 = arith.constant 0 : index
    %c0_11 = arith.constant 0 : index
    %c0_12 = arith.constant 0 : index
    %9 = vector.load %arg1[%c0_10, %c0_11, %c0_12] : memref<28x32x84xbf16, #tpu.memory_space<vmem>>, vector<28x32x84xbf16>
    %10 = vector.shape_cast %9 : vector<28x32x84xbf16> to vector<896x84xbf16>
    %c96 = arith.constant 96 : index
    %c0_13 = arith.constant 0 : index
    %11 = vector.load %arg11[%c96, %c0_13] : memref<1088x84xbf16, #tpu.memory_space<vmem>>, vector<896x84xbf16>
    tpu.vector_store %arg11[%c96, %c0_13], %10 {strides = array<i32>} : memref<1088x84xbf16, #tpu.memory_space<vmem>>, vector<896x84xbf16>,
    %c0_14 = arith.constant 0 : index
    %c0_15 = arith.constant 0 : index
    %12 = vector.load %arg11[%c0_14, %c0_15] : memref<1088x84xbf16, #tpu.memory_space<vmem>>, vector<896x84xbf16>
    %c0_16 = arith.constant 0 : index
    %c0_17 = arith.constant 0 : index
    %c0_18 = arith.constant 0 : index
    %13 = vector.load %arg2[%c0_16, %c0_17, %c0_18] : memref<7x84x84xbf16, #tpu.memory_space<vmem>>, vector<1x84x84xbf16>
    %14 = vector.shape_cast %13 : vector<1x84x84xbf16> to vector<84x84xbf16>
    %cst_19 = arith.constant dense<0.000000e+00> : vector<896x84xf32>
    %15 = tpu.matmul %12, %14, %cst_19 {dimension_numbers = #tpu.dot_dimension_numbers<[1], [0], [0], [1], [0, 0, 1, 1], [], []>} : vector<896x84xbf16>, vector<84x84xbf16>, vector<896x84xf32> -> vector<896x84xf32>
    %c32 = arith.constant 32 : index
    %c0_20 = arith.constant 0 : index
    %16 = vector.load %arg11[%c32, %c0_20] : memref<1088x84xbf16, #tpu.memory_space<vmem>>, vector<896x84xbf16>
    %c1 = arith.constant 1 : index
    %c0_21 = arith.constant 0 : index
    %c0_22 = arith.constant 0 : index
    %17 = vector.load %arg2[%c1, %c0_21, %c0_22] : memref<7x84x84xbf16, #tpu.memory_space<vmem>>, vector<1x84x84xbf16>
    %18 = vector.shape_cast %17 : vector<1x84x84xbf16> to vector<84x84xbf16>
    %cst_23 = arith.constant dense<0.000000e+00> : vector<896x84xf32>
    %19 = tpu.matmul %16, %18, %cst_23 {dimension_numbers = #tpu.dot_dimension_numbers<[1], [0], [0], [1], [0, 0, 1, 1], [], []>} : vector<896x84xbf16>, vector<84x84xbf16>, vector<896x84xf32> -> vector<896x84xf32>
    %20 = arith.addf %15, %19 : vector<896x84xf32>
    %c64 = arith.constant 64 : index
    %c0_24 = arith.constant 0 : index
    %21 = vector.load %arg11[%c64, %c0_24] : memref<1088x84xbf16, #tpu.memory_space<vmem>>, vector<896x84xbf16>
    %c2 = arith.constant 2 : index
    %c0_25 = arith.constant 0 : index
    %c0_26 = arith.constant 0 : index
    %22 = vector.load %arg2[%c2, %c0_25, %c0_26] : memref<7x84x84xbf16, #tpu.memory_space<vmem>>, vector<1x84x84xbf16>
    %23 = vector.shape_cast %22 : vector<1x84x84xbf16> to vector<84x84xbf16>
    %cst_27 = arith.constant dense<0.000000e+00> : vector<896x84xf32>
    %24 = tpu.matmul %21, %23, %cst_27 {dimension_numbers = #tpu.dot_dimension_numbers<[1], [0], [0], [1], [0, 0, 1, 1], [], []>} : vector<896x84xbf16>, vector<84x84xbf16>, vector<896x84xf32> -> vector<896x84xf32>
    %25 = arith.addf %20, %24 : vector<896x84xf32>
    %c96_28 = arith.constant 96 : index
    %c0_29 = arith.constant 0 : index
    %26 = vector.load %arg11[%c96_28, %c0_29] : memref<1088x84xbf16, #tpu.memory_space<vmem>>, vector<896x84xbf16>
    %c3 = arith.constant 3 : index
    %c0_30 = arith.constant 0 : index
    %c0_31 = arith.constant 0 : index
    %27 = vector.load %arg2[%c3, %c0_30, %c0_31] : memref<7x84x84xbf16, #tpu.memory_space<vmem>>, vector<1x84x84xbf16>
    %28 = vector.shape_cast %27 : vector<1x84x84xbf16> to vector<84x84xbf16>
    %cst_32 = arith.constant dense<0.000000e+00> : vector<896x84xf32>
    %29 = tpu.matmul %26, %28, %cst_32 {dimension_numbers = #tpu.dot_dimension_numbers<[1], [0], [0], [1], [0, 0, 1, 1], [], []>} : vector<896x84xbf16>, vector<84x84xbf16>, vector<896x84xf32> -> vector<896x84xf32>
    %30 = arith.addf %25, %29 : vector<896x84xf32>
    %c128 = arith.constant 128 : index
    %c0_33 = arith.constant 0 : index
    %31 = vector.load %arg11[%c128, %c0_33] : memref<1088x84xbf16, #tpu.memory_space<vmem>>, vector<896x84xbf16>
    %c4 = arith.constant 4 : index
    %c0_34 = arith.constant 0 : index
    %c0_35 = arith.constant 0 : index
    %32 = vector.load %arg2[%c4, %c0_34, %c0_35] : memref<7x84x84xbf16, #tpu.memory_space<vmem>>, vector<1x84x84xbf16>
    %33 = vector.shape_cast %32 : vector<1x84x84xbf16> to vector<84x84xbf16>
    %cst_36 = arith.constant dense<0.000000e+00> : vector<896x84xf32>
    %34 = tpu.matmul %31, %33, %cst_36 {dimension_numbers = #tpu.dot_dimension_numbers<[1], [0], [0], [1], [0, 0, 1, 1], [], []>} : vector<896x84xbf16>, vector<84x84xbf16>, vector<896x84xf32> -> vector<896x84xf32>
    %35 = arith.addf %30, %34 : vector<896x84xf32>
    %c160 = arith.constant 160 : index
    %c0_37 = arith.constant 0 : index
    %36 = vector.load %arg11[%c160, %c0_37] : memref<1088x84xbf16, #tpu.memory_space<vmem>>, vector<896x84xbf16>
    %c5 = arith.constant 5 : index
    %c0_38 = arith.constant 0 : index
    %c0_39 = arith.constant 0 : index
    %37 = vector.load %arg2[%c5, %c0_38, %c0_39] : memref<7x84x84xbf16, #tpu.memory_space<vmem>>, vector<1x84x84xbf16>
    %38 = vector.shape_cast %37 : vector<1x84x84xbf16> to vector<84x84xbf16>
    %cst_40 = arith.constant dense<0.000000e+00> : vector<896x84xf32>
    %39 = tpu.matmul %36, %38, %cst_40 {dimension_numbers = #tpu.dot_dimension_numbers<[1], [0], [0], [1], [0, 0, 1, 1], [], []>} : vector<896x84xbf16>, vector<84x84xbf16>, vector<896x84xf32> -> vector<896x84xf32>
    %40 = arith.addf %35, %39 : vector<896x84xf32>
    %c192 = arith.constant 192 : index
    %c0_41 = arith.constant 0 : index
    %41 = vector.load %arg11[%c192, %c0_41] : memref<1088x84xbf16, #tpu.memory_space<vmem>>, vector<896x84xbf16>
    %c6 = arith.constant 6 : index
    %c0_42 = arith.constant 0 : index
    %c0_43 = arith.constant 0 : index
    %42 = vector.load %arg2[%c6, %c0_42, %c0_43] : memref<7x84x84xbf16, #tpu.memory_space<vmem>>, vector<1x84x84xbf16>
    %43 = vector.shape_cast %42 : vector<1x84x84xbf16> to vector<84x84xbf16>
    %cst_44 = arith.constant dense<0.000000e+00> : vector<896x84xf32>
    %44 = tpu.matmul %41, %43, %cst_44 {dimension_numbers = #tpu.dot_dimension_numbers<[1], [0], [0], [1], [0, 0, 1, 1], [], []>} : vector<896x84xbf16>, vector<84x84xbf16>, vector<896x84xf32> -> vector<896x84xf32>
    %45 = arith.addf %40, %44 : vector<896x84xf32>
    %c0_45 = arith.constant 0 : index
    %c0_46 = arith.constant 0 : index
    %46 = vector.load %arg3[%c0_45, %c0_46] : memref<1x84xf32, #tpu.memory_space<vmem>>, vector<1x84xf32>
    %47 = vector.broadcast %46 : vector<1x84xf32> to vector<896x84xf32>
    %48 = arith.addf %45, %47 : vector<896x84xf32>
    %cst_47 = arith.constant 0.000000e+00 : f32
    %49 = vector.broadcast %cst_47 : f32 to vector<896x84xf32>
    %50 = arith.maximumf %48, %49 : vector<896x84xf32>
    %51 = vector.extract_strided_slice %50 {offsets = [0, 0], sizes = [896, 42], strides = [1, 1]} : vector<896x84xf32> to vector<896x42xf32>
    %52 = vector.extract_strided_slice %50 {offsets = [0, 42], sizes = [896, 42], strides = [1, 1]} : vector<896x84xf32> to vector<896x42xf32>
    %53 = arith.maximumf %51, %52 : vector<896x42xf32>
    %54 = vector.shape_cast %53 : vector<896x42xf32> to vector<14x64x42xf32>
    %55 = vector.extract_strided_slice %54 {offsets = [0, 0, 0], sizes = [14, 32, 42], strides = [1, 1, 1]} : vector<14x64x42xf32> to vector<14x32x42xf32>
    %56 = vector.extract_strided_slice %54 {offsets = [0, 32, 0], sizes = [14, 32, 42], strides = [1, 1, 1]} : vector<14x64x42xf32> to vector<14x32x42xf32>
    %57 = arith.maximumf %55, %56 : vector<14x32x42xf32>
    %58 = vector.shape_cast %57 : vector<14x32x42xf32> to vector<448x42xf32>
    %59 = arith.truncf %58 : vector<448x42xf32> to vector<448x42xbf16>
    %c64_48 = arith.constant 64 : index
    %c0_49 = arith.constant 0 : index
    %60 = vector.load %arg12[%c64_48, %c0_49] : memref<576x42xbf16, #tpu.memory_space<vmem>>, vector<448x42xbf16>
    tpu.vector_store %arg12[%c64_48, %c0_49], %59 {strides = array<i32>} : memref<576x42xbf16, #tpu.memory_space<vmem>>, vector<448x42xbf16>,
    %c0_50 = arith.constant 0 : index
    %c0_51 = arith.constant 0 : index
    %61 = vector.load %arg12[%c0_50, %c0_51] : memref<576x42xbf16, #tpu.memory_space<vmem>>, vector<448x42xbf16>
    %c0_52 = arith.constant 0 : index
    %c0_53 = arith.constant 0 : index
    %c0_54 = arith.constant 0 : index
    %62 = vector.load %arg4[%c0_52, %c0_53, %c0_54] : memref<5x42x84xbf16, #tpu.memory_space<vmem>>, vector<1x42x84xbf16>
    %63 = vector.shape_cast %62 : vector<1x42x84xbf16> to vector<42x84xbf16>
    %cst_55 = arith.constant dense<0.000000e+00> : vector<448x84xf32>
    %64 = tpu.matmul %61, %63, %cst_55 {dimension_numbers = #tpu.dot_dimension_numbers<[1], [0], [0], [1], [0, 0, 1, 1], [], []>} : vector<448x42xbf16>, vector<42x84xbf16>, vector<448x84xf32> -> vector<448x84xf32>
    %c32_56 = arith.constant 32 : index
    %c0_57 = arith.constant 0 : index
    %65 = vector.load %arg12[%c32_56, %c0_57] : memref<576x42xbf16, #tpu.memory_space<vmem>>, vector<448x42xbf16>
    %c1_58 = arith.constant 1 : index
    %c0_59 = arith.constant 0 : index
    %c0_60 = arith.constant 0 : index
    %66 = vector.load %arg4[%c1_58, %c0_59, %c0_60] : memref<5x42x84xbf16, #tpu.memory_space<vmem>>, vector<1x42x84xbf16>
    %67 = vector.shape_cast %66 : vector<1x42x84xbf16> to vector<42x84xbf16>
    %cst_61 = arith.constant dense<0.000000e+00> : vector<448x84xf32>
    %68 = tpu.matmul %65, %67, %cst_61 {dimension_numbers = #tpu.dot_dimension_numbers<[1], [0], [0], [1], [0, 0, 1, 1], [], []>} : vector<448x42xbf16>, vector<42x84xbf16>, vector<448x84xf32> -> vector<448x84xf32>
    %69 = arith.addf %64, %68 : vector<448x84xf32>
    %c64_62 = arith.constant 64 : index
    %c0_63 = arith.constant 0 : index
    %70 = vector.load %arg12[%c64_62, %c0_63] : memref<576x42xbf16, #tpu.memory_space<vmem>>, vector<448x42xbf16>
    %c2_64 = arith.constant 2 : index
    %c0_65 = arith.constant 0 : index
    %c0_66 = arith.constant 0 : index
    %71 = vector.load %arg4[%c2_64, %c0_65, %c0_66] : memref<5x42x84xbf16, #tpu.memory_space<vmem>>, vector<1x42x84xbf16>
    %72 = vector.shape_cast %71 : vector<1x42x84xbf16> to vector<42x84xbf16>
    %cst_67 = arith.constant dense<0.000000e+00> : vector<448x84xf32>
    %73 = tpu.matmul %70, %72, %cst_67 {dimension_numbers = #tpu.dot_dimension_numbers<[1], [0], [0], [1], [0, 0, 1, 1], [], []>} : vector<448x42xbf16>, vector<42x84xbf16>, vector<448x84xf32> -> vector<448x84xf32>
    %74 = arith.addf %69, %73 : vector<448x84xf32>
    %c96_68 = arith.constant 96 : index
    %c0_69 = arith.constant 0 : index
    %75 = vector.load %arg12[%c96_68, %c0_69] : memref<576x42xbf16, #tpu.memory_space<vmem>>, vector<448x42xbf16>
    %c3_70 = arith.constant 3 : index
    %c0_71 = arith.constant 0 : index
    %c0_72 = arith.constant 0 : index
    %76 = vector.load %arg4[%c3_70, %c0_71, %c0_72] : memref<5x42x84xbf16, #tpu.memory_space<vmem>>, vector<1x42x84xbf16>
    %77 = vector.shape_cast %76 : vector<1x42x84xbf16> to vector<42x84xbf16>
    %cst_73 = arith.constant dense<0.000000e+00> : vector<448x84xf32>
    %78 = tpu.matmul %75, %77, %cst_73 {dimension_numbers = #tpu.dot_dimension_numbers<[1], [0], [0], [1], [0, 0, 1, 1], [], []>} : vector<448x42xbf16>, vector<42x84xbf16>, vector<448x84xf32> -> vector<448x84xf32>
    %79 = arith.addf %74, %78 : vector<448x84xf32>
    %c128_74 = arith.constant 128 : index
    %c0_75 = arith.constant 0 : index
    %80 = vector.load %arg12[%c128_74, %c0_75] : memref<576x42xbf16, #tpu.memory_space<vmem>>, vector<448x42xbf16>
    %c4_76 = arith.constant 4 : index
    %c0_77 = arith.constant 0 : index
    %c0_78 = arith.constant 0 : index
    %81 = vector.load %arg4[%c4_76, %c0_77, %c0_78] : memref<5x42x84xbf16, #tpu.memory_space<vmem>>, vector<1x42x84xbf16>
    %82 = vector.shape_cast %81 : vector<1x42x84xbf16> to vector<42x84xbf16>
    %cst_79 = arith.constant dense<0.000000e+00> : vector<448x84xf32>
    %83 = tpu.matmul %80, %82, %cst_79 {dimension_numbers = #tpu.dot_dimension_numbers<[1], [0], [0], [1], [0, 0, 1, 1], [], []>} : vector<448x42xbf16>, vector<42x84xbf16>, vector<448x84xf32> -> vector<448x84xf32>
    %84 = arith.addf %79, %83 : vector<448x84xf32>
    %c0_80 = arith.constant 0 : index
    %c0_81 = arith.constant 0 : index
    %85 = vector.load %arg5[%c0_80, %c0_81] : memref<1x84xf32, #tpu.memory_space<vmem>>, vector<1x84xf32>
    %86 = vector.broadcast %85 : vector<1x84xf32> to vector<448x84xf32>
    %87 = arith.addf %84, %86 : vector<448x84xf32>
    %cst_82 = arith.constant 0.000000e+00 : f32
    %88 = vector.broadcast %cst_82 : f32 to vector<448x84xf32>
    %89 = arith.maximumf %87, %88 : vector<448x84xf32>
    %90 = vector.extract_strided_slice %89 {offsets = [0, 0], sizes = [448, 42], strides = [1, 1]} : vector<448x84xf32> to vector<448x42xf32>
    %91 = vector.extract_strided_slice %89 {offsets = [0, 42], sizes = [448, 42], strides = [1, 1]} : vector<448x84xf32> to vector<448x42xf32>
    %92 = arith.maximumf %90, %91 : vector<448x42xf32>
    %93 = vector.shape_cast %92 : vector<448x42xf32> to vector<7x64x42xf32>
    %94 = vector.extract_strided_slice %93 {offsets = [0, 0, 0], sizes = [7, 32, 42], strides = [1, 1, 1]} : vector<7x64x42xf32> to vector<7x32x42xf32>
    %95 = vector.extract_strided_slice %93 {offsets = [0, 32, 0], sizes = [7, 32, 42], strides = [1, 1, 1]} : vector<7x64x42xf32> to vector<7x32x42xf32>
    %96 = arith.maximumf %94, %95 : vector<7x32x42xf32>
    %97 = vector.shape_cast %96 : vector<7x32x42xf32> to vector<224x42xf32>
    %98 = arith.truncf %97 : vector<224x42xf32> to vector<224x42xbf16>
    %c32_83 = arith.constant 32 : index
    %c0_84 = arith.constant 0 : index
    %99 = vector.load %arg13[%c32_83, %c0_84] : memref<288x42xbf16, #tpu.memory_space<vmem>>, vector<224x42xbf16>
    tpu.vector_store %arg13[%c32_83, %c0_84], %98 {strides = array<i32>} : memref<288x42xbf16, #tpu.memory_space<vmem>>, vector<224x42xbf16>,
    %c0_85 = arith.constant 0 : index
    %c0_86 = arith.constant 0 : index
    %100 = vector.load %arg13[%c0_85, %c0_86] : memref<288x42xbf16, #tpu.memory_space<vmem>>, vector<224x42xbf16>
    %c0_87 = arith.constant 0 : index
    %c0_88 = arith.constant 0 : index
    %c0_89 = arith.constant 0 : index
    %101 = vector.load %arg6[%c0_87, %c0_88, %c0_89] : memref<3x42x84xbf16, #tpu.memory_space<vmem>>, vector<1x42x84xbf16>
    %102 = vector.shape_cast %101 : vector<1x42x84xbf16> to vector<42x84xbf16>
    %cst_90 = arith.constant dense<0.000000e+00> : vector<224x84xf32>
    %103 = tpu.matmul %100, %102, %cst_90 {dimension_numbers = #tpu.dot_dimension_numbers<[1], [0], [0], [1], [0, 0, 1, 1], [], []>} : vector<224x42xbf16>, vector<42x84xbf16>, vector<224x84xf32> -> vector<224x84xf32>
    %c32_91 = arith.constant 32 : index
    %c0_92 = arith.constant 0 : index
    %104 = vector.load %arg13[%c32_91, %c0_92] : memref<288x42xbf16, #tpu.memory_space<vmem>>, vector<224x42xbf16>
    %c1_93 = arith.constant 1 : index
    %c0_94 = arith.constant 0 : index
    %c0_95 = arith.constant 0 : index
    %105 = vector.load %arg6[%c1_93, %c0_94, %c0_95] : memref<3x42x84xbf16, #tpu.memory_space<vmem>>, vector<1x42x84xbf16>
    %106 = vector.shape_cast %105 : vector<1x42x84xbf16> to vector<42x84xbf16>
    %cst_96 = arith.constant dense<0.000000e+00> : vector<224x84xf32>
    %107 = tpu.matmul %104, %106, %cst_96 {dimension_numbers = #tpu.dot_dimension_numbers<[1], [0], [0], [1], [0, 0, 1, 1], [], []>} : vector<224x42xbf16>, vector<42x84xbf16>, vector<224x84xf32> -> vector<224x84xf32>
    %108 = arith.addf %103, %107 : vector<224x84xf32>
    %c64_97 = arith.constant 64 : index
    %c0_98 = arith.constant 0 : index
    %109 = vector.load %arg13[%c64_97, %c0_98] : memref<288x42xbf16, #tpu.memory_space<vmem>>, vector<224x42xbf16>
    %c2_99 = arith.constant 2 : index
    %c0_100 = arith.constant 0 : index
    %c0_101 = arith.constant 0 : index
    %110 = vector.load %arg6[%c2_99, %c0_100, %c0_101] : memref<3x42x84xbf16, #tpu.memory_space<vmem>>, vector<1x42x84xbf16>
    %111 = vector.shape_cast %110 : vector<1x42x84xbf16> to vector<42x84xbf16>
    %cst_102 = arith.constant dense<0.000000e+00> : vector<224x84xf32>
    %112 = tpu.matmul %109, %111, %cst_102 {dimension_numbers = #tpu.dot_dimension_numbers<[1], [0], [0], [1], [0, 0, 1, 1], [], []>} : vector<224x42xbf16>, vector<42x84xbf16>, vector<224x84xf32> -> vector<224x84xf32>
    %113 = arith.addf %108, %112 : vector<224x84xf32>
    %c0_103 = arith.constant 0 : index
    %c0_104 = arith.constant 0 : index
    %114 = vector.load %arg7[%c0_103, %c0_104] : memref<1x84xf32, #tpu.memory_space<vmem>>, vector<1x84xf32>
    %115 = vector.broadcast %114 : vector<1x84xf32> to vector<224x84xf32>
    %116 = arith.addf %113, %115 : vector<224x84xf32>
    %cst_105 = arith.constant 0.000000e+00 : f32
    %117 = vector.broadcast %cst_105 : f32 to vector<224x84xf32>
    %118 = arith.maximumf %116, %117 : vector<224x84xf32>
    %119 = vector.extract_strided_slice %118 {offsets = [0, 0], sizes = [32, 84], strides = [1, 1]} : vector<224x84xf32> to vector<32x84xf32>
    %120 = arith.truncf %119 : vector<32x84xf32> to vector<32x84xbf16>
    %c0_106 = arith.constant 0 : index
    %c0_107 = arith.constant 0 : index
    %c0_108 = arith.constant 0 : index
    %121 = vector.load %arg8[%c0_106, %c0_107, %c0_108] : memref<7x84x128xbf16, #tpu.memory_space<vmem>>, vector<1x84x128xbf16>
    %122 = vector.shape_cast %121 : vector<1x84x128xbf16> to vector<84x128xbf16>
    %cst_109 = arith.constant dense<0.000000e+00> : vector<32x128xf32>
    %123 = tpu.matmul %120, %122, %cst_109 {dimension_numbers = #tpu.dot_dimension_numbers<[1], [0], [0], [1], [0, 0, 1, 1], [], []>} : vector<32x84xbf16>, vector<84x128xbf16>, vector<32x128xf32> -> vector<32x128xf32>
    %124 = vector.extract_strided_slice %118 {offsets = [32, 0], sizes = [32, 84], strides = [1, 1]} : vector<224x84xf32> to vector<32x84xf32>
    %125 = arith.truncf %124 : vector<32x84xf32> to vector<32x84xbf16>
    %c1_110 = arith.constant 1 : index
    %c0_111 = arith.constant 0 : index
    %c0_112 = arith.constant 0 : index
    %126 = vector.load %arg8[%c1_110, %c0_111, %c0_112] : memref<7x84x128xbf16, #tpu.memory_space<vmem>>, vector<1x84x128xbf16>
    %127 = vector.shape_cast %126 : vector<1x84x128xbf16> to vector<84x128xbf16>
    %cst_113 = arith.constant dense<0.000000e+00> : vector<32x128xf32>
    %128 = tpu.matmul %125, %127, %cst_113 {dimension_numbers = #tpu.dot_dimension_numbers<[1], [0], [0], [1], [0, 0, 1, 1], [], []>} : vector<32x84xbf16>, vector<84x128xbf16>, vector<32x128xf32> -> vector<32x128xf32>
    %129 = arith.addf %123, %128 : vector<32x128xf32>
    %130 = vector.extract_strided_slice %118 {offsets = [64, 0], sizes = [32, 84], strides = [1, 1]} : vector<224x84xf32> to vector<32x84xf32>
    %131 = arith.truncf %130 : vector<32x84xf32> to vector<32x84xbf16>
    %c2_114 = arith.constant 2 : index
    %c0_115 = arith.constant 0 : index
    %c0_116 = arith.constant 0 : index
    %132 = vector.load %arg8[%c2_114, %c0_115, %c0_116] : memref<7x84x128xbf16, #tpu.memory_space<vmem>>, vector<1x84x128xbf16>
    %133 = vector.shape_cast %132 : vector<1x84x128xbf16> to vector<84x128xbf16>
    %cst_117 = arith.constant dense<0.000000e+00> : vector<32x128xf32>
    %134 = tpu.matmul %131, %133, %cst_117 {dimension_numbers = #tpu.dot_dimension_numbers<[1], [0], [0], [1], [0, 0, 1, 1], [], []>} : vector<32x84xbf16>, vector<84x128xbf16>, vector<32x128xf32> -> vector<32x128xf32>
    %135 = arith.addf %129, %134 : vector<32x128xf32>
    %136 = vector.extract_strided_slice %118 {offsets = [96, 0], sizes = [32, 84], strides = [1, 1]} : vector<224x84xf32> to vector<32x84xf32>
    %137 = arith.truncf %136 : vector<32x84xf32> to vector<32x84xbf16>
    %c3_118 = arith.constant 3 : index
    %c0_119 = arith.constant 0 : index
    %c0_120 = arith.constant 0 : index
    %138 = vector.load %arg8[%c3_118, %c0_119, %c0_120] : memref<7x84x128xbf16, #tpu.memory_space<vmem>>, vector<1x84x128xbf16>
    %139 = vector.shape_cast %138 : vector<1x84x128xbf16> to vector<84x128xbf16>
    %cst_121 = arith.constant dense<0.000000e+00> : vector<32x128xf32>
    %140 = tpu.matmul %137, %139, %cst_121 {dimension_numbers = #tpu.dot_dimension_numbers<[1], [0], [0], [1], [0, 0, 1, 1], [], []>} : vector<32x84xbf16>, vector<84x128xbf16>, vector<32x128xf32> -> vector<32x128xf32>
    %141 = arith.addf %135, %140 : vector<32x128xf32>
    %142 = vector.extract_strided_slice %118 {offsets = [128, 0], sizes = [32, 84], strides = [1, 1]} : vector<224x84xf32> to vector<32x84xf32>
    %143 = arith.truncf %142 : vector<32x84xf32> to vector<32x84xbf16>
    %c4_122 = arith.constant 4 : index
    %c0_123 = arith.constant 0 : index
    %c0_124 = arith.constant 0 : index
    %144 = vector.load %arg8[%c4_122, %c0_123, %c0_124] : memref<7x84x128xbf16, #tpu.memory_space<vmem>>, vector<1x84x128xbf16>
    %145 = vector.shape_cast %144 : vector<1x84x128xbf16> to vector<84x128xbf16>
    %cst_125 = arith.constant dense<0.000000e+00> : vector<32x128xf32>
    %146 = tpu.matmul %143, %145, %cst_125 {dimension_numbers = #tpu.dot_dimension_numbers<[1], [0], [0], [1], [0, 0, 1, 1], [], []>} : vector<32x84xbf16>, vector<84x128xbf16>, vector<32x128xf32> -> vector<32x128xf32>
    %147 = arith.addf %141, %146 : vector<32x128xf32>
    %148 = vector.extract_strided_slice %118 {offsets = [160, 0], sizes = [32, 84], strides = [1, 1]} : vector<224x84xf32> to vector<32x84xf32>
    %149 = arith.truncf %148 : vector<32x84xf32> to vector<32x84xbf16>
    %c5_126 = arith.constant 5 : index
    %c0_127 = arith.constant 0 : index
    %c0_128 = arith.constant 0 : index
    %150 = vector.load %arg8[%c5_126, %c0_127, %c0_128] : memref<7x84x128xbf16, #tpu.memory_space<vmem>>, vector<1x84x128xbf16>
    %151 = vector.shape_cast %150 : vector<1x84x128xbf16> to vector<84x128xbf16>
    %cst_129 = arith.constant dense<0.000000e+00> : vector<32x128xf32>
    %152 = tpu.matmul %149, %151, %cst_129 {dimension_numbers = #tpu.dot_dimension_numbers<[1], [0], [0], [1], [0, 0, 1, 1], [], []>} : vector<32x84xbf16>, vector<84x128xbf16>, vector<32x128xf32> -> vector<32x128xf32>
    %153 = arith.addf %147, %152 : vector<32x128xf32>
    %154 = vector.extract_strided_slice %118 {offsets = [192, 0], sizes = [32, 84], strides = [1, 1]} : vector<224x84xf32> to vector<32x84xf32>
    %155 = arith.truncf %154 : vector<32x84xf32> to vector<32x84xbf16>
    %c6_130 = arith.constant 6 : index
    %c0_131 = arith.constant 0 : index
    %c0_132 = arith.constant 0 : index
    %156 = vector.load %arg8[%c6_130, %c0_131, %c0_132] : memref<7x84x128xbf16, #tpu.memory_space<vmem>>, vector<1x84x128xbf16>
    %157 = vector.shape_cast %156 : vector<1x84x128xbf16> to vector<84x128xbf16>
    %cst_133 = arith.constant dense<0.000000e+00> : vector<32x128xf32>
    %158 = tpu.matmul %155, %157, %cst_133 {dimension_numbers = #tpu.dot_dimension_numbers<[1], [0], [0], [1], [0, 0, 1, 1], [], []>} : vector<32x84xbf16>, vector<84x128xbf16>, vector<32x128xf32> -> vector<32x128xf32>
    %159 = arith.addf %153, %158 : vector<32x128xf32>
    %c0_134 = arith.constant 0 : index
    %c0_135 = arith.constant 0 : index
    %160 = vector.load %arg9[%c0_134, %c0_135] : memref<1x128xf32, #tpu.memory_space<vmem>>, vector<1x128xf32>
    %161 = vector.broadcast %160 : vector<1x128xf32> to vector<32x128xf32>
    %162 = arith.addf %159, %161 : vector<32x128xf32>
    %c0_136 = arith.constant 0 : index
    %c0_137 = arith.constant 0 : index
    %163 = vector.load %arg10[%c0_136, %c0_137] : memref<32x128xf32, #tpu.memory_space<vmem>>, vector<32x128xf32>
    tpu.vector_store %arg10[%c0_136, %c0_137], %162 {strides = array<i32>} : memref<32x128xf32, #tpu.memory_space<vmem>>, vector<32x128xf32>,
    return
  }
  func.func @transform_0(%arg0: i32) -> (i32, i32, i32) {
    %c0_i32 = arith.constant 0 : i32
    %c0_i32_0 = arith.constant 0 : i32
    %c0_i32_1 = arith.constant 0 : i32
    return %c0_i32, %arg0, %c0_i32_0 : i32, i32, i32
  }
  func.func @transform_1(%arg0: i32) -> (i32, i32, i32) {
    %c0_i32 = arith.constant 0 : i32
    %c0_i32_0 = arith.constant 0 : i32
    %c0_i32_1 = arith.constant 0 : i32
    %c0_i32_2 = arith.constant 0 : i32
    return %c0_i32, %c0_i32_0, %c0_i32_1 : i32, i32, i32
  }
  func.func @transform_2(%arg0: i32) -> (i32, i32) {
    %c0_i32 = arith.constant 0 : i32
    %c0_i32_0 = arith.constant 0 : i32
    %c0_i32_1 = arith.constant 0 : i32
    return %c0_i32, %c0_i32_0 : i32, i32
  }
  func.func @transform_3(%arg0: i32) -> (i32, i32, i32) {
    %c0_i32 = arith.constant 0 : i32
    %c0_i32_0 = arith.constant 0 : i32
    %c0_i32_1 = arith.constant 0 : i32
    %c0_i32_2 = arith.constant 0 : i32
    return %c0_i32, %c0_i32_0, %c0_i32_1 : i32, i32, i32
  }
  func.func @transform_4(%arg0: i32) -> (i32, i32) {
    %c0_i32 = arith.constant 0 : i32
    %c0_i32_0 = arith.constant 0 : i32
    %c0_i32_1 = arith.constant 0 : i32
    return %c0_i32, %c0_i32_0 : i32, i32
  }
  func.func @transform_5(%arg0: i32) -> (i32, i32, i32) {
    %c0_i32 = arith.constant 0 : i32
    %c0_i32_0 = arith.constant 0 : i32
    %c0_i32_1 = arith.constant 0 : i32
    %c0_i32_2 = arith.constant 0 : i32
    return %c0_i32, %c0_i32_0, %c0_i32_1 : i32, i32, i32
  }
  func.func @transform_6(%arg0: i32) -> (i32, i32) {
    %c0_i32 = arith.constant 0 : i32
    %c0_i32_0 = arith.constant 0 : i32
    %c0_i32_1 = arith.constant 0 : i32
    return %c0_i32, %c0_i32_0 : i32, i32
  }
  func.func @transform_7(%arg0: i32) -> (i32, i32, i32) {
    %c0_i32 = arith.constant 0 : i32
    %c0_i32_0 = arith.constant 0 : i32
    %c0_i32_1 = arith.constant 0 : i32
    %c0_i32_2 = arith.constant 0 : i32
    return %c0_i32, %c0_i32_0, %c0_i32_1 : i32, i32, i32
  }
  func.func @transform_8(%arg0: i32) -> (i32, i32) {
    %c0_i32 = arith.constant 0 : i32
    %c0_i32_0 = arith.constant 0 : i32
    %c0_i32_1 = arith.constant 0 : i32
    return %c0_i32, %c0_i32_0 : i32, i32
  }
  func.func @transform_9(%arg0: i32) -> (i32, i32) {
    %c0_i32 = arith.constant 0 : i32
    %c0_i32_0 = arith.constant 0 : i32
    return %arg0, %c0_i32 : i32, i32
  }
}

</mosaic_0001>

<bundles_post_ra>
// kernel: tile.18
= control target key start
LH: loop header
LB: loop body
LE: loop exit
PB: predicated region body
PF: predicated region fallthrough
CT: control target
= control target key end

     0   :  { %s40_s0 = inlined_call_operand.vmem [shape: f32[3], index: 0, kind: input, shape index: {}]   ;;  %s41_s1 = inlined_call_operand.vmem [shape: f32[28,3], index: 1, kind: output, shape index: {}]  }
   0x1   :  { %v4_v0 = vld [vmem:[%s40_s0] ss:$0 sm:$0xff] }
   0x2   :  { %5 = vst [vmem:[%s41_s1] sm:$0xff] %v4_v0  ;;  %12 = vst [vmem:[%s41_s1 + $0x8] sm:$0xff] %v4_v0 }
   0x3   :  { %13 = vst [vmem:[%s41_s1 + $0x10] sm:$0xff] %v4_v0  ;;  %14 = vst [vmem:[%s41_s1 + $0x18] sm:$0xff] %v4_v0 }

// kernel: tile.19
= control target key start
LH: loop header
LB: loop body
LE: loop exit
PB: predicated region body
PF: predicated region fallthrough
CT: control target
= control target key end

     0   :  { %s227_s10 = smov 81   ;;  %s228_s11 = smov 75   ;;  %vm3_vm0 = vcmask 23552   ;;  %vm9_vm1 = vcmask 687752   ;;  %vm15_vm2 = vcmask 663152   ;;  %vm21_vm3 = vcmask 638552   ;;  %s351_s0 = inlined_call_operand.vmem [shape: f32[28,3], index: 0, kind: input, shape index: {}]   ;;  %s352_s1 = inlined_call_operand.vmem [shape: f32[1,84], index: 1, kind: output, shape index: {}]  }
   0x1   :  { %v173_v0 = vld [vmem:[%s351_s0 + $0x1b] sm:$0x1]   ;;  %v175_v1 = vld [vmem:[%s351_s0 + $0x19] sm:$0x1]   ;;  %v174_v2 = vld [vmem:[%s351_s0 + $0x1a] sm:$0x1]  }
   0x2   :  { %7 = vrot.lane.b32.xlu0 %v173_v0, %s227_s10  ;;  %19 = vrot.lane.b32.xlu1 %v175_v1, %s228_s11  ;;  %v176_v3 = vld [vmem:[%s351_s0 + $0x18] sm:$0x1]   ;;  %s229_s16 = smov 78   ;;  %s230_s17 = smov 72   ;;  %v177_v4 = vld [vmem:[%s351_s0 + $0x17] sm:$0x1]  }
   0x3   :  { %v178_v5 = vld [vmem:[%s351_s0 + $0x16] sm:$0x1]   ;;  %s231_s22 = smov 69   ;;  %s232_s23 = smov 66   ;;  %v179_v6 = vld [vmem:[%s351_s0 + $0x15] sm:$0x1]  }
   0x4   :  { %v180_v7 = vld [vmem:[%s351_s0 + $0x14] sm:$0x1]   ;;  %s233_s28 = smov 63   ;;  %s234_s29 = smov 60   ;;  %v181_v8 = vld [vmem:[%s351_s0 + $0x13] sm:$0x1]  }
   0x5   :  { %v2_v9 = vld [vmem:[%s351_s0] sm:$0x1]   ;;  %v182_v10 = vld [vmem:[%s351_s0 + $0x12] sm:$0x1]   ;;  %s235_s7 = smov 57   ;;  %s236_s8 = smov 54  }
   0x6   :  { %13 = vrot.lane.b32.xlu0 %v174_v2, %s229_s16  ;;  %25 = vrot.lane.b32.xlu1 %v176_v3, %s230_s17  ;;  %4 = vst.msk [vmem:[#allocation0] sm:$0x1] %vm3_vm0, %v2_v9   ;;  %v183_v11 = vld [vmem:[%s351_s0 + $0x11] sm:$0x1]   ;;  %v184_v12 = vld [vmem:[%s351_s0 + $0x10] sm:$0x1]  }
   0x7   :  { %s237_s13 = smov 51   ;;  %s238_s14 = smov 48   ;;  %v185_v13 = vld [vmem:[%s351_s0 + $0xf] sm:$0x1]   ;;  %v186_v14 = vld [vmem:[%s351_s0 + $0xe] sm:$0x1]  }
   0x8   :  { %s239_s19 = smov 45   ;;  %s240_s20 = smov 42   ;;  %v187_v15 = vld [vmem:[%s351_s0 + $0xd] sm:$0x1]   ;;  %v188_v16 = vld [vmem:[%s351_s0 + $0xc] sm:$0x1]  }
   0x9   :  { %s241_s25 = smov 39   ;;  %s242_s26 = smov 36   ;;  %v189_v17 = vld [vmem:[%s351_s0 + $0xb] sm:$0x1]   ;;  %v190_v18 = vld [vmem:[%s351_s0 + $0xa] sm:$0x1]  }
   0xa   :  { %31 = vrot.lane.b32.xlu0 %v177_v4, %s231_s22  ;;  %37 = vrot.lane.b32.xlu1 %v178_v5, %s232_s23  ;;  %s243_s2 = smov 33   ;;  %s244_s3 = smov 30   ;;  %v191_v19 = vld [vmem:[%s351_s0 + $0x9] sm:$0x1]   ;;  %v192_v20 = vld [vmem:[%s351_s0 + $0x8] sm:$0x1]  }
   0xb   :  { %s246_s9 = smov 24   ;;  %v193_v21 = vld [vmem:[%s351_s0 + $0x7] sm:$0x1]   ;;  %v194_v22 = vld [vmem:[%s351_s0 + $0x6] sm:$0x1]   ;;  %s248_s15 = smov 18  }
   0xc   :  { %v195_v23 = vld [vmem:[%s351_s0 + $0x5] sm:$0x1]   ;;  %v196_v24 = vld [vmem:[%s351_s0 + $0x4] sm:$0x1]   ;;  %s250_s21 = smov 12   ;;  %s252_s27 = smov 6  }
   0xd   :  { %v197_v25 = vld [vmem:[%s351_s0 + $0x3] sm:$0x1]   ;;  %v198_v26 = vld [vmem:[%s351_s0 + $0x2] sm:$0x1]   ;;  %v199_v27 = vld [vmem:[%s351_s0 + $0x1] sm:$0x1]  }
   0xe   :  { %43 = vrot.lane.b32.xlu0 %v179_v6, %s233_s28  ;;  %49 = vrot.lane.b32.xlu1 %v180_v7, %s234_s29  ;;  %s253_s0 = smov 3   ;;  %vm27_vm4 = vcmask 613952   ;;  %vm33_vm5 = vcmask 589352   ;;  %vm39_vm6 = vcmask 564752   ;;  %vm45_vm7 = vcmask 540152  }
   0xf   :  { %vm51_vm8 = vcmask 515552   ;;  %vm57_vm9 = vcmask 490952   ;;  %vm63_vm10 = vcmask 466352   ;;  %vm69_vm11 = vcmask 441752  }
  0x10   :  { %vm75_vm12 = vcmask 417152   ;;  %vm81_vm13 = vcmask 392552   ;;  %vm87_vm14 = vcmask 367952   ;;  %vm93_vm15 = vcmask 343352  }
  0x11   :  { %vm99_vm0 = vcmask 318752  }
  0x12   :  { %55 = vrot.lane.b32.xlu0 %v181_v8, %s235_s7  ;;  %61 = vrot.lane.b32.xlu1 %v182_v10, %s236_s8  ;;  %s245_s8 = smov 27  }
  0x16   :  { %67 = vrot.lane.b32.xlu0 %v183_v11, %s237_s13  ;;  %73 = vrot.lane.b32.xlu1 %v184_v12, %s238_s14  ;;  %s247_s14 = smov 21  }
  0x1a   :  { %79 = vrot.lane.b32.xlu0 %v185_v13, %s239_s19  ;;  %85 = vrot.lane.b32.xlu1 %v186_v14, %s240_s20  ;;  %s249_s20 = smov 15  }
  0x1e   :  { %91 = vrot.lane.b32.xlu0 %v187_v15, %s241_s25  ;;  %97 = vrot.lane.b32.xlu1 %v188_v16, %s242_s26  ;;  %s251_s26 = smov 9  }
  0x22   :  { %103 = vrot.lane.b32.xlu0 %v189_v17, %s243_s2  ;;  %109 = vrot.lane.b32.xlu1 %v190_v18, %s244_s3 }
  0x26   :  { %115 = vrot.lane.b32.xlu0 %v191_v19, %s245_s8  ;;  %121 = vrot.lane.b32.xlu1 %v192_v20, %s246_s9 }
  0x2a   :  { %127 = vrot.lane.b32.xlu0 %v193_v21, %s247_s14  ;;  %133 = vrot.lane.b32.xlu1 %v194_v22, %s248_s15 }
  0x2e   :  { %139 = vrot.lane.b32.xlu0 %v195_v23, %s249_s20  ;;  %145 = vrot.lane.b32.xlu1 %v196_v24, %s250_s21 }
  0x32   :  { %151 = vrot.lane.b32.xlu0 %v197_v25, %s251_s26  ;;  %157 = vrot.lane.b32.xlu1 %v198_v26, %s252_s27 }
  0x36   :  { %163 = vrot.lane.b32.xlu0 %v199_v27, %s253_s0 }
  0x74   :  { %v8_v28 = vpop.permute.xlu0 %7   ;;  %v20_v29 = vpop.permute.xlu1 %19  }
  0x75   :  { %10 = vst.msk [vmem:[#allocation0] sm:$0x1] %vm9_vm1, %v8_v28   ;;  %vm105_vm1 = vcmask 294152  }
  0x78   :  { %v14_v30 = vpop.permute.xlu0 %13   ;;  %v26_v31 = vpop.permute.xlu1 %25  }
  0x79   :  { %16 = vst.msk [vmem:[#allocation0] sm:$0x1] %vm15_vm2, %v14_v30   ;;  %vm111_vm2 = vcmask 269552  }
  0x7a   :  { %22 = vst.msk [vmem:[#allocation0] sm:$0x1] %vm21_vm3, %v20_v29   ;;  %vm117_vm3 = vcmask 244952  }
  0x7b   :  { %28 = vst.msk [vmem:[#allocation0] sm:$0x1] %vm27_vm4, %v26_v31   ;;  %vm123_vm4 = vcmask 220352  }
  0x7c   :  { %v32_v32 = vpop.permute.xlu0 %31   ;;  %v38_v33 = vpop.permute.xlu1 %37  }
  0x7d   :  { %34 = vst.msk [vmem:[#allocation0] sm:$0x1] %vm33_vm5, %v32_v32   ;;  %vm129_vm5 = vcmask 195752  }
  0x7e   :  { %40 = vst.msk [vmem:[#allocation0] sm:$0x1] %vm39_vm6, %v38_v33   ;;  %vm135_vm6 = vcmask 171152  }
  0x80   :  { %v44_v34 = vpop.permute.xlu0 %43   ;;  %v50_v35 = vpop.permute.xlu1 %49  }
  0x81   :  { %46 = vst.msk [vmem:[#allocation0] sm:$0x1] %vm45_vm7, %v44_v34   ;;  %vm141_vm7 = vcmask 146552  }
  0x82   :  { %52 = vst.msk [vmem:[#allocation0] sm:$0x1] %vm51_vm8, %v50_v35   ;;  %vm147_vm8 = vcmask 121952  }
  0x84   :  { %v56_v36 = vpop.permute.xlu0 %55   ;;  %v62_v37 = vpop.permute.xlu1 %61  }
  0x85   :  { %58 = vst.msk [vmem:[#allocation0] sm:$0x1] %vm57_vm9, %v56_v36   ;;  %vm153_vm9 = vcmask 97352  }
  0x86   :  { %64 = vst.msk [vmem:[#allocation0] sm:$0x1] %vm63_vm10, %v62_v37   ;;  %vm159_vm10 = vcmask 72752  }
  0x88   :  { %v68_v38 = vpop.permute.xlu0 %67   ;;  %v74_v39 = vpop.permute.xlu1 %73  }
  0x89   :  { %70 = vst.msk [vmem:[#allocation0] sm:$0x1] %vm69_vm11, %v68_v38   ;;  %vm165_vm11 = vcmask 48152  }
  0x8a   :  { %76 = vst.msk [vmem:[#allocation0] sm:$0x1] %vm75_vm12, %v74_v39  }
  0x8c   :  { %v80_v40 = vpop.permute.xlu0 %79   ;;  %v86_v41 = vpop.permute.xlu1 %85  }
  0x8d   :  { %82 = vst.msk [vmem:[#allocation0] sm:$0x1] %vm81_vm13, %v80_v40  }
  0x8e   :  { %88 = vst.msk [vmem:[#allocation0] sm:$0x1] %vm87_vm14, %v86_v41  }
  0x90   :  { %v92_v42 = vpop.permute.xlu0 %91   ;;  %v98_v43 = vpop.permute.xlu1 %97  }
  0x91   :  { %94 = vst.msk [vmem:[#allocation0] sm:$0x1] %vm93_vm15, %v92_v42  }
  0x92   :  { %100 = vst.msk [vmem:[#allocation0] sm:$0x1] %vm99_vm0, %v98_v43  }
  0x94   :  { %v104_v44 = vpop.permute.xlu0 %103   ;;  %v110_v45 = vpop.permute.xlu1 %109  }
  0x95   :  { %106 = vst.msk [vmem:[#allocation0] sm:$0x1] %vm105_vm1, %v104_v44  }
  0x96   :  { %112 = vst.msk [vmem:[#allocation0] sm:$0x1] %vm111_vm2, %v110_v45  }
  0x98   :  { %v116_v46 = vpop.permute.xlu0 %115   ;;  %v122_v47 = vpop.permute.xlu1 %121  }
  0x99   :  { %118 = vst.msk [vmem:[#allocation0] sm:$0x1] %vm117_vm3, %v116_v46  }
  0x9a   :  { %124 = vst.msk [vmem:[#allocation0] sm:$0x1] %vm123_vm4, %v122_v47  }
  0x9c   :  { %v128_v48 = vpop.permute.xlu0 %127   ;;  %v134_v49 = vpop.permute.xlu1 %133  }
  0x9d   :  { %130 = vst.msk [vmem:[#allocation0] sm:$0x1] %vm129_vm5, %v128_v48  }
  0x9e   :  { %136 = vst.msk [vmem:[#allocation0] sm:$0x1] %vm135_vm6, %v134_v49  }
  0xa0   :  { %v140_v50 = vpop.permute.xlu0 %139   ;;  %v146_v51 = vpop.permute.xlu1 %145  }
  0xa1   :  { %142 = vst.msk [vmem:[#allocation0] sm:$0x1] %vm141_vm7, %v140_v50  }
  0xa2   :  { %148 = vst.msk [vmem:[#allocation0] sm:$0x1] %vm147_vm8, %v146_v51  }
  0xa4   :  { %v152_v52 = vpop.permute.xlu0 %151   ;;  %v158_v53 = vpop.permute.xlu1 %157  }
  0xa5   :  { %154 = vst.msk [vmem:[#allocation0] sm:$0x1] %vm153_vm9, %v152_v52  }
  0xa6   :  { %160 = vst.msk [vmem:[#allocation0] sm:$0x1] %vm159_vm10, %v158_v53  }
  0xa8   :  { %v164_v54 = vpop.permute.xlu0 %163  }
  0xa9   :  { %166 = vst.msk [vmem:[#allocation0] sm:$0x1] %vm165_vm11, %v164_v54  }
  0xb0   :  { %v170_v55 = vld [vmem:[#allocation0] sm:$0x1] }
  0xb1   :  { %172 = vst [vmem:[%s352_s1] sm:$0x1] %v170_v55 }

// kernel: tile.23
= control target key start
LH: loop header
LB: loop body
LE: loop exit
PB: predicated region body
PF: predicated region fallthrough
CT: control target
= control target key end

     0   :  { %s28_s0 = inlined_call_operand.vmem [shape: f32[6], index: 0, kind: input, shape index: {}]   ;;  %s29_s1 = inlined_call_operand.vmem [shape: f32[14,6], index: 1, kind: output, shape index: {}]  }
   0x1   :  { %v4_v0 = vld [vmem:[%s28_s0] ss:$0 sm:$0xff] }
   0x2   :  { %5 = vst [vmem:[%s29_s1] sm:$0xff] %v4_v0  ;;  %8 = vst [vmem:[%s29_s1 + $0x8] sm:$0xff] %v4_v0 }

// kernel: tile.24
= control target key start
LH: loop header
LB: loop body
LE: loop exit
PB: predicated region body
PF: predicated region fallthrough
CT: control target
= control target key end

     0   :  { %s115_s10 = smov 78   ;;  %s116_s11 = smov 66   ;;  %vm3_vm0 = vcmask 48128   ;;  %vm9_vm1 = vcmask 687728   ;;  %vm15_vm2 = vcmask 638528   ;;  %vm21_vm3 = vcmask 589328   ;;  %s183_s0 = inlined_call_operand.vmem [shape: f32[14,6], index: 0, kind: input, shape index: {}]   ;;  %s184_s1 = inlined_call_operand.vmem [shape: f32[1,84], index: 1, kind: output, shape index: {}]  }
   0x1   :  { %v89_v0 = vld [vmem:[%s183_s0 + $0xd] sm:$0x1]   ;;  %v91_v1 = vld [vmem:[%s183_s0 + $0xb] sm:$0x1]   ;;  %v90_v2 = vld [vmem:[%s183_s0 + $0xc] sm:$0x1]  }
   0x2   :  { %7 = vrot.lane.b32.xlu0 %v89_v0, %s115_s10  ;;  %19 = vrot.lane.b32.xlu1 %v91_v1, %s116_s11  ;;  %v92_v3 = vld [vmem:[%s183_s0 + $0xa] sm:$0x1]   ;;  %s117_s16 = smov 72   ;;  %s118_s17 = smov 60   ;;  %v93_v4 = vld [vmem:[%s183_s0 + $0x9] sm:$0x1]  }
   0x3   :  { %v94_v5 = vld [vmem:[%s183_s0 + $0x8] sm:$0x1]   ;;  %v2_v6 = vld [vmem:[%s183_s0] sm:$0x1]   ;;  %s119_s24 = smov 54   ;;  %s120_s25 = smov 48  }
   0x4   :  { %4 = vst.msk [vmem:[#allocation0] sm:$0x1] %vm3_vm0, %v2_v6   ;;  %v95_v7 = vld [vmem:[%s183_s0 + $0x7] sm:$0x1]   ;;  %v96_v8 = vld [vmem:[%s183_s0 + $0x6] sm:$0x1]  }
   0x5   :  { %s121_s30 = smov 42   ;;  %s122_s2 = smov 36   ;;  %v97_v9 = vld [vmem:[%s183_s0 + $0x5] sm:$0x1]   ;;  %v98_v10 = vld [vmem:[%s183_s0 + $0x4] sm:$0x1]  }
   0x6   :  { %13 = vrot.lane.b32.xlu0 %v90_v2, %s117_s16  ;;  %25 = vrot.lane.b32.xlu1 %v92_v3, %s118_s17  ;;  %s123_s7 = smov 30   ;;  %s124_s8 = smov 24   ;;  %v99_v11 = vld [vmem:[%s183_s0 + $0x3] sm:$0x1]   ;;  %v100_v12 = vld [vmem:[%s183_s0 + $0x2] sm:$0x1]  }
   0x7   :  { %s125_s13 = smov 18   ;;  %s126_s14 = smov 12   ;;  %v101_v13 = vld [vmem:[%s183_s0 + $0x1] sm:$0x1]   ;;  %vm27_vm4 = vcmask 540128   ;;  %vm33_vm5 = vcmask 490928  }
   0x8   :  { %s127_s0 = smov 6   ;;  %vm39_vm6 = vcmask 441728   ;;  %vm45_vm7 = vcmask 392528   ;;  %vm51_vm8 = vcmask 343328   ;;  %vm57_vm9 = vcmask 294128  }
   0x9   :  { %vm63_vm10 = vcmask 244928   ;;  %vm69_vm11 = vcmask 195728   ;;  %vm75_vm12 = vcmask 146528   ;;  %vm81_vm13 = vcmask 97328  }
   0xa   :  { %31 = vrot.lane.b32.xlu0 %v93_v4, %s119_s24  ;;  %37 = vrot.lane.b32.xlu1 %v94_v5, %s120_s25 }
   0xe   :  { %43 = vrot.lane.b32.xlu0 %v95_v7, %s121_s30  ;;  %49 = vrot.lane.b32.xlu1 %v96_v8, %s122_s2 }
  0x12   :  { %55 = vrot.lane.b32.xlu0 %v97_v9, %s123_s7  ;;  %61 = vrot.lane.b32.xlu1 %v98_v10, %s124_s8 }
  0x16   :  { %67 = vrot.lane.b32.xlu0 %v99_v11, %s125_s13  ;;  %73 = vrot.lane.b32.xlu1 %v100_v12, %s126_s14 }
  0x1a   :  { %79 = vrot.lane.b32.xlu0 %v101_v13, %s127_s0 }
  0x74   :  { %v8_v14 = vpop.permute.xlu0 %7   ;;  %v20_v15 = vpop.permute.xlu1 %19  }
  0x75   :  { %10 = vst.msk [vmem:[#allocation0] sm:$0x1] %vm9_vm1, %v8_v14  }
  0x78   :  { %v14_v16 = vpop.permute.xlu0 %13   ;;  %v26_v17 = vpop.permute.xlu1 %25  }
  0x79   :  { %16 = vst.msk [vmem:[#allocation0] sm:$0x1] %vm15_vm2, %v14_v16  }
  0x7a   :  { %22 = vst.msk [vmem:[#allocation0] sm:$0x1] %vm21_vm3, %v20_v15  }
  0x7b   :  { %28 = vst.msk [vmem:[#allocation0] sm:$0x1] %vm27_vm4, %v26_v17  }
  0x7c   :  { %v32_v18 = vpop.permute.xlu0 %31   ;;  %v38_v19 = vpop.permute.xlu1 %37  }
  0x7d   :  { %34 = vst.msk [vmem:[#allocation0] sm:$0x1] %vm33_vm5, %v32_v18  }
  0x7e   :  { %40 = vst.msk [vmem:[#allocation0] sm:$0x1] %vm39_vm6, %v38_v19  }
  0x80   :  { %v44_v20 = vpop.permute.xlu0 %43   ;;  %v50_v21 = vpop.permute.xlu1 %49  }
  0x81   :  { %46 = vst.msk [vmem:[#allocation0] sm:$0x1] %vm45_vm7, %v44_v20  }
  0x82   :  { %52 = vst.msk [vmem:[#allocation0] sm:$0x1] %vm51_vm8, %v50_v21  }
  0x84   :  { %v56_v22 = vpop.permute.xlu0 %55   ;;  %v62_v23 = vpop.permute.xlu1 %61  }
  0x85   :  { %58 = vst.msk [vmem:[#allocation0] sm:$0x1] %vm57_vm9, %v56_v22  }
  0x86   :  { %64 = vst.msk [vmem:[#allocation0] sm:$0x1] %vm63_vm10, %v62_v23  }
  0x88   :  { %v68_v24 = vpop.permute.xlu0 %67   ;;  %v74_v25 = vpop.permute.xlu1 %73  }
  0x89   :  { %70 = vst.msk [vmem:[#allocation0] sm:$0x1] %vm69_vm11, %v68_v24  }
  0x8a   :  { %76 = vst.msk [vmem:[#allocation0] sm:$0x1] %vm75_vm12, %v74_v25  }
  0x8c   :  { %v80_v26 = vpop.permute.xlu0 %79  }
  0x8d   :  { %82 = vst.msk [vmem:[#allocation0] sm:$0x1] %vm81_vm13, %v80_v26  }
  0x94   :  { %v86_v27 = vld [vmem:[#allocation0] sm:$0x1] }
  0x95   :  { %88 = vst [vmem:[%s184_s1] sm:$0x1] %v86_v27 }

// kernel: tile.28
= control target key start
LH: loop header
LB: loop body
LE: loop exit
PB: predicated region body
PF: predicated region fallthrough
CT: control target
= control target key end

     0   :  { %s22_s0 = inlined_call_operand.vmem [shape: f32[12], index: 0, kind: input, shape index: {}]   ;;  %s23_s1 = inlined_call_operand.vmem [shape: f32[7,12], index: 1, kind: output, shape index: {}]  }
   0x1   :  { %v4_v0 = vld [vmem:[%s22_s0] ss:$0 sm:$0xff] }
   0x2   :  { %5 = vst [vmem:[%s23_s1] sm:$0xff] %v4_v0 }

// kernel: tile.29
= control target key start
LH: loop header
LB: loop body
LE: loop exit
PB: predicated region body
PF: predicated region fallthrough
CT: control target
= control target key end

     0   :  { %s59_s10 = smov 72   ;;  %s60_s11 = smov 48   ;;  %vm3_vm0 = vcmask 97280   ;;  %vm9_vm1 = vcmask 687680   ;;  %vm15_vm2 = vcmask 589280   ;;  %vm21_vm3 = vcmask 490880   ;;  %s99_s0 = inlined_call_operand.vmem [shape: f32[7,12], index: 0, kind: input, shape index: {}]   ;;  %s100_s1 = inlined_call_operand.vmem [shape: f32[1,84], index: 1, kind: output, shape index: {}]  }
   0x1   :  { %v47_v0 = vld [vmem:[%s99_s0 + $0x6] sm:$0x1]   ;;  %v49_v1 = vld [vmem:[%s99_s0 + $0x4] sm:$0x1]   ;;  %v48_v2 = vld [vmem:[%s99_s0 + $0x5] sm:$0x1]  }
   0x2   :  { %7 = vrot.lane.b32.xlu0 %v47_v0, %s59_s10  ;;  %19 = vrot.lane.b32.xlu1 %v49_v1, %s60_s11  ;;  %v50_v3 = vld [vmem:[%s99_s0 + $0x3] sm:$0x1]   ;;  %v2_v4 = vld [vmem:[%s99_s0] sm:$0x1]   ;;  %s61_s18 = smov 60   ;;  %s62_s19 = smov 36  }
   0x3   :  { %4 = vst.msk [vmem:[#allocation0] sm:$0x1] %vm3_vm0, %v2_v4   ;;  %v51_v5 = vld [vmem:[%s99_s0 + $0x2] sm:$0x1]   ;;  %v52_v6 = vld [vmem:[%s99_s0 + $0x1] sm:$0x1]  }
   0x4   :  { %s63_s0 = smov 24   ;;  %s64_s24 = smov 12   ;;  %vm27_vm4 = vcmask 392480   ;;  %vm33_vm5 = vcmask 294080   ;;  %vm39_vm6 = vcmask 195680  }
   0x6   :  { %13 = vrot.lane.b32.xlu0 %v48_v2, %s61_s18  ;;  %25 = vrot.lane.b32.xlu1 %v50_v3, %s62_s19 }
   0xa   :  { %31 = vrot.lane.b32.xlu0 %v51_v5, %s63_s0  ;;  %37 = vrot.lane.b32.xlu1 %v52_v6, %s64_s24 }
  0x74   :  { %v8_v7 = vpop.permute.xlu0 %7   ;;  %v20_v8 = vpop.permute.xlu1 %19  }
  0x75   :  { %10 = vst.msk [vmem:[#allocation0] sm:$0x1] %vm9_vm1, %v8_v7  }
  0x78   :  { %v14_v9 = vpop.permute.xlu0 %13   ;;  %v26_v10 = vpop.permute.xlu1 %25  }
  0x79   :  { %16 = vst.msk [vmem:[#allocation0] sm:$0x1] %vm15_vm2, %v14_v9  }
  0x7a   :  { %22 = vst.msk [vmem:[#allocation0] sm:$0x1] %vm21_vm3, %v20_v8  }
  0x7b   :  { %28 = vst.msk [vmem:[#allocation0] sm:$0x1] %vm27_vm4, %v26_v10  }
  0x7c   :  { %v32_v11 = vpop.permute.xlu0 %31   ;;  %v38_v12 = vpop.permute.xlu1 %37  }
  0x7d   :  { %34 = vst.msk [vmem:[#allocation0] sm:$0x1] %vm33_vm5, %v32_v11  }
  0x7e   :  { %40 = vst.msk [vmem:[#allocation0] sm:$0x1] %vm39_vm6, %v38_v12  }
  0x85   :  { %v44_v13 = vld [vmem:[#allocation0] sm:$0x1] }
  0x86   :  { %46 = vst [vmem:[%s100_s1] sm:$0x1] %v44_v13 }

// kernel: cnn_forward.1
= control target key start
LH: loop header
LB: loop body
LE: loop exit
PB: predicated region body
PF: predicated region fallthrough
CT: control target
= control target key end

     0   :  { %s16676_s30 = smov 0   ;;  %s16678_s10 = smov 0   ;;  %s20704_s0 = inlined_call_operand.vmem [shape: bf16[28,64,84], index: 0, kind: input, shape index: {}]   ;;  %s20705_s1 = inlined_call_operand.vmem [shape: bf16[7,84,84], index: 1, kind: input, shape index: {}]   ;;  %s20706_s2 = inlined_call_operand.vmem [shape: f32[1,84], index: 2, kind: input, shape index: {}]   ;;  %s20707_s3 = inlined_call_operand.vmem [shape: bf16[5,42,84], index: 3, kind: input, shape index: {}]   ;;  %s20708_s4 = inlined_call_operand.vmem [shape: f32[1,84], index: 4, kind: input, shape index: {}]   ;;  %s20709_s5 = inlined_call_operand.vmem [shape: bf16[3,42,84], index: 5, kind: input, shape index: {}]   ;;  %s20710_s6 = inlined_call_operand.vmem [shape: f32[1,84], index: 6, kind: input, shape index: {}]   ;;  %s20711_s7 = inlined_call_operand.vmem [shape: bf16[7,84,128], index: 7, kind: input, shape index: {}]   ;;  %s20712_s8 = inlined_call_operand.vmem [shape: f32[1,128], index: 8, kind: input, shape index: {}]   ;;  %s20713_s9 = inlined_call_operand.vmem [shape: f32[64,128], index: 9, kind: output, shape index: {}]  }
   0x1   :  { %s16680_s11 = smov 0  }
   0x2 LB: > { %s11926_s12 = sadd.s32 4294967295, %s16622_s11   ;;  %s16693_s13 = sadd.s32 1, %s16622_s11   ;;  %s16622_s11 = sphi %s16680_s11, %s21404_s11   ;;  %s16618_s10 = sphi %s16678_s10, %s21403_s10   ;;  %s16614_s30 = sphi %s16676_s30, %s21402_s30  }
   0x3   : > { %s23_s14 = ssub.s32 %s16622_s11, %s16693_s13  ;;  %s26_s15 = sadd.s32 1, %s16618_s10 }
   0x4   : > { %p24_p0 = scmp.eq.s32.totalorder %s23_s14, 0  ;;  %p33_p1 = scmp.ne.s32.totalorder %s16618_s10, %s16614_s30 }
   0x5   : > { %p34_p2 = scmp.eq.s32.totalorder %s16622_s11, 0  ;;  %p11929_p4 = scmp.ge.s32.totalorder %s16622_s11, 2 }
   0x6   : > { %s16702_s16 = scalar_select %p24_p0, %s16618_s10, %s26_s15  }
   0x7   : > { %p35_p3 = por %p34_p2, %p33_p1  ;;  %277 = sbr.rel (%p11929_p4) target bundleno = 46 (0x2e), region = 48 }
   0xe   : > { %280 = sbr.rel (!%p35_p3) target bundleno = 46 (0x2e), region = 52  ;;  %s282_s17 = sand.u32 (%p35_p3), 1, %s16618_s10  }
   0xf   : > { %s12861_s18 = sshll.u32 (%p35_p3), %s16622_s11, 4  ;;  %s15961_s19 = smul.u32 (%p35_p3), 448, %s282_s17 }
  0x10   : > { %s16710_s22 = scalar_lea.vmem (%p35_p3), %s20704_s0, %s12861_s18 }
  0x11   : > { %v303_v0 = vld [vmem:[%s16710_s22] sm:$0xff] (%p35_p3)   ;;  %v307_v1 = vld [vmem:[%s16710_s22 + $0x8] sm:$0xff] (%p35_p3)   ;;  %s16718_s23 = scalar_lea.vmem (%p35_p3), [#allocation5], %s15961_s19 }
  0x12   : > { %v311_v2 = vld [vmem:[%s16710_s22 + $0x20] sm:$0xff] (%p35_p3)   ;;  %v315_v3 = vld [vmem:[%s16710_s22 + $0x28] sm:$0xff] (%p35_p3)   ;;  %304 = vst [vmem:[%s16718_s23] sm:$0xff] (%p35_p3), %v303_v0   ;;  %308 = vst [vmem:[%s16718_s23 + $0x8] sm:$0xff] (%p35_p3), %v307_v1  }
  0x13   : > { %v319_v4 = vld [vmem:[%s16710_s22 + $0x40] sm:$0xff] (%p35_p3)   ;;  %v323_v5 = vld [vmem:[%s16710_s22 + $0x48] sm:$0xff] (%p35_p3)   ;;  %312 = vst [vmem:[%s16718_s23 + $0x10] sm:$0xff] (%p35_p3), %v311_v2   ;;  %316 = vst [vmem:[%s16718_s23 + $0x18] sm:$0xff] (%p35_p3), %v315_v3  }
  0x14   : > { %320 = vst [vmem:[%s16718_s23 + $0x20] sm:$0xff] (%p35_p3), %v319_v4   ;;  %324 = vst [vmem:[%s16718_s23 + $0x28] sm:$0xff] (%p35_p3), %v323_v5   ;;  %v327_v6 = vld [vmem:[%s16710_s22 + $0x60] sm:$0xff] (%p35_p3)   ;;  %v331_v7 = vld [vmem:[%s16710_s22 + $0x68] sm:$0xff] (%p35_p3)  }
  0x15   : > { %v335_v8 = vld [vmem:[%s16710_s22 + $0x80] sm:$0xff]   ;;  %328 = vst [vmem:[%s16718_s23 + $0x30] sm:$0xff] %v327_v6   ;;  %332 = vst [vmem:[%s16718_s23 + $0x38] sm:$0xff] %v331_v7   ;;  %v339_v9 = vld [vmem:[%s16710_s22 + $0x88] sm:$0xff]  }
  0x16   : > { %336 = vst [vmem:[%s16718_s23 + $0x40] sm:$0xff] %v335_v8   ;;  %v343_v10 = vld [vmem:[%s16710_s22 + $0xa0] sm:$0xff]   ;;  %v347_v11 = vld [vmem:[%s16710_s22 + $0xa8] sm:$0xff]   ;;  %340 = vst [vmem:[%s16718_s23 + $0x48] sm:$0xff] %v339_v9  }
  0x17   : > { %344 = vst [vmem:[%s16718_s23 + $0x50] sm:$0xff] %v343_v10   ;;  %348 = vst [vmem:[%s16718_s23 + $0x58] sm:$0xff] %v347_v11   ;;  %v351_v12 = vld [vmem:[%s16710_s22 + $0xc0] sm:$0xff]   ;;  %v355_v13 = vld [vmem:[%s16710_s22 + $0xc8] sm:$0xff]  }
  0x18   : > { %v359_v14 = vld [vmem:[%s16710_s22 + $0xe0] sm:$0xff]   ;;  %352 = vst [vmem:[%s16718_s23 + $0x60] sm:$0xff] %v351_v12   ;;  %356 = vst [vmem:[%s16718_s23 + $0x68] sm:$0xff] %v355_v13   ;;  %v363_v15 = vld [vmem:[%s16710_s22 + $0xe8] sm:$0xff]  }
  0x19   : > { %360 = vst [vmem:[%s16718_s23 + $0x70] sm:$0xff] %v359_v14   ;;  %v367_v16 = vld [vmem:[%s16710_s22 + $0x100] sm:$0xff]   ;;  %v371_v17 = vld [vmem:[%s16710_s22 + $0x108] sm:$0xff]   ;;  %364 = vst [vmem:[%s16718_s23 + $0x78] sm:$0xff] %v363_v15  }
  0x1a   : > { %368 = vst [vmem:[%s16718_s23 + $0x80] sm:$0xff] %v367_v16   ;;  %372 = vst [vmem:[%s16718_s23 + $0x88] sm:$0xff] %v371_v17   ;;  %v375_v18 = vld [vmem:[%s16710_s22 + $0x120] sm:$0xff]   ;;  %v379_v19 = vld [vmem:[%s16710_s22 + $0x128] sm:$0xff]  }
  0x1b   : > { %v383_v20 = vld [vmem:[%s16710_s22 + $0x140] sm:$0xff]   ;;  %376 = vst [vmem:[%s16718_s23 + $0x90] sm:$0xff] %v375_v18   ;;  %380 = vst [vmem:[%s16718_s23 + $0x98] sm:$0xff] %v379_v19   ;;  %v387_v21 = vld [vmem:[%s16710_s22 + $0x148] sm:$0xff]  }
  0x1c   : > { %384 = vst [vmem:[%s16718_s23 + $0xa0] sm:$0xff] %v383_v20   ;;  %v391_v22 = vld [vmem:[%s16710_s22 + $0x160] sm:$0xff]   ;;  %v395_v23 = vld [vmem:[%s16710_s22 + $0x168] sm:$0xff]   ;;  %388 = vst [vmem:[%s16718_s23 + $0xa8] sm:$0xff] %v387_v21  }
  0x1d   : > { %392 = vst [vmem:[%s16718_s23 + $0xb0] sm:$0xff] %v391_v22   ;;  %396 = vst [vmem:[%s16718_s23 + $0xb8] sm:$0xff] %v395_v23   ;;  %v399_v24 = vld [vmem:[%s16710_s22 + $0x180] sm:$0xff]   ;;  %v403_v25 = vld [vmem:[%s16710_s22 + $0x188] sm:$0xff]  }
  0x1e   : > { %v407_v26 = vld [vmem:[%s16710_s22 + $0x1a0] sm:$0xff]   ;;  %400 = vst [vmem:[%s16718_s23 + $0xc0] sm:$0xff] %v399_v24   ;;  %404 = vst [vmem:[%s16718_s23 + $0xc8] sm:$0xff] %v403_v25   ;;  %v411_v27 = vld [vmem:[%s16710_s22 + $0x1a8] sm:$0xff]  }
  0x1f   : > { %408 = vst [vmem:[%s16718_s23 + $0xd0] sm:$0xff] %v407_v26   ;;  %v415_v28 = vld [vmem:[%s16710_s22 + $0x1c0] sm:$0xff]   ;;  %v419_v29 = vld [vmem:[%s16710_s22 + $0x1c8] sm:$0xff]   ;;  %412 = vst [vmem:[%s16718_s23 + $0xd8] sm:$0xff] %v411_v27  }
  0x20   : > { %416 = vst [vmem:[%s16718_s23 + $0xe0] sm:$0xff] %v415_v28   ;;  %420 = vst [vmem:[%s16718_s23 + $0xe8] sm:$0xff] %v419_v29   ;;  %v423_v30 = vld [vmem:[%s16710_s22 + $0x1e0] sm:$0xff]   ;;  %v427_v31 = vld [vmem:[%s16710_s22 + $0x1e8] sm:$0xff]  }
  0x21   : > { %v431_v32 = vld [vmem:[%s16710_s22 + $0x200] sm:$0xff]   ;;  %424 = vst [vmem:[%s16718_s23 + $0xf0] sm:$0xff] %v423_v30   ;;  %428 = vst [vmem:[%s16718_s23 + $0xf8] sm:$0xff] %v427_v31   ;;  %v435_v33 = vld [vmem:[%s16710_s22 + $0x208] sm:$0xff]  }
  0x22   : > { %432 = vst [vmem:[%s16718_s23 + $0x100] sm:$0xff] %v431_v32   ;;  %v439_v34 = vld [vmem:[%s16710_s22 + $0x220] sm:$0xff]   ;;  %v443_v35 = vld [vmem:[%s16710_s22 + $0x228] sm:$0xff]   ;;  %436 = vst [vmem:[%s16718_s23 + $0x108] sm:$0xff] %v435_v33  }
  0x23   : > { %440 = vst [vmem:[%s16718_s23 + $0x110] sm:$0xff] %v439_v34   ;;  %444 = vst [vmem:[%s16718_s23 + $0x118] sm:$0xff] %v443_v35   ;;  %v447_v36 = vld [vmem:[%s16710_s22 + $0x240] sm:$0xff]   ;;  %v451_v37 = vld [vmem:[%s16710_s22 + $0x248] sm:$0xff]  }
  0x24   : > { %v455_v38 = vld [vmem:[%s16710_s22 + $0x260] sm:$0xff]   ;;  %448 = vst [vmem:[%s16718_s23 + $0x120] sm:$0xff] %v447_v36   ;;  %452 = vst [vmem:[%s16718_s23 + $0x128] sm:$0xff] %v451_v37   ;;  %v459_v39 = vld [vmem:[%s16710_s22 + $0x268] sm:$0xff]  }
  0x25   : > { %456 = vst [vmem:[%s16718_s23 + $0x130] sm:$0xff] %v455_v38   ;;  %v463_v40 = vld [vmem:[%s16710_s22 + $0x280] sm:$0xff]   ;;  %v467_v41 = vld [vmem:[%s16710_s22 + $0x288] sm:$0xff]   ;;  %460 = vst [vmem:[%s16718_s23 + $0x138] sm:$0xff] %v459_v39  }
  0x26   : > { %464 = vst [vmem:[%s16718_s23 + $0x140] sm:$0xff] %v463_v40   ;;  %468 = vst [vmem:[%s16718_s23 + $0x148] sm:$0xff] %v467_v41   ;;  %v471_v42 = vld [vmem:[%s16710_s22 + $0x2a0] sm:$0xff]   ;;  %v475_v43 = vld [vmem:[%s16710_s22 + $0x2a8] sm:$0xff]  }
  0x27   : > { %v479_v44 = vld [vmem:[%s16710_s22 + $0x2c0] sm:$0xff]   ;;  %472 = vst [vmem:[%s16718_s23 + $0x150] sm:$0xff] %v471_v42   ;;  %476 = vst [vmem:[%s16718_s23 + $0x158] sm:$0xff] %v475_v43   ;;  %v483_v45 = vld [vmem:[%s16710_s22 + $0x2c8] sm:$0xff]  }
  0x28   : > { %480 = vst [vmem:[%s16718_s23 + $0x160] sm:$0xff] %v479_v44   ;;  %v487_v46 = vld [vmem:[%s16710_s22 + $0x2e0] sm:$0xff]   ;;  %v491_v47 = vld [vmem:[%s16710_s22 + $0x2e8] sm:$0xff]   ;;  %484 = vst [vmem:[%s16718_s23 + $0x168] sm:$0xff] %v483_v45  }
  0x29   : > { %488 = vst [vmem:[%s16718_s23 + $0x170] sm:$0xff] %v487_v46   ;;  %492 = vst [vmem:[%s16718_s23 + $0x178] sm:$0xff] %v491_v47   ;;  %v495_v48 = vld [vmem:[%s16710_s22 + $0x300] sm:$0xff]   ;;  %v499_v49 = vld [vmem:[%s16710_s22 + $0x308] sm:$0xff]  }
  0x2a   : > { %v503_v50 = vld [vmem:[%s16710_s22 + $0x320] sm:$0xff]   ;;  %496 = vst [vmem:[%s16718_s23 + $0x180] sm:$0xff] %v495_v48   ;;  %500 = vst [vmem:[%s16718_s23 + $0x188] sm:$0xff] %v499_v49   ;;  %v507_v51 = vld [vmem:[%s16710_s22 + $0x328] sm:$0xff]  }
  0x2b   : > { %504 = vst [vmem:[%s16718_s23 + $0x190] sm:$0xff] %v503_v50   ;;  %v511_v52 = vld [vmem:[%s16710_s22 + $0x340] sm:$0xff]   ;;  %v515_v53 = vld [vmem:[%s16710_s22 + $0x348] sm:$0xff]   ;;  %508 = vst [vmem:[%s16718_s23 + $0x198] sm:$0xff] %v507_v51  }
  0x2c   : > { %512 = vst [vmem:[%s16718_s23 + $0x1a0] sm:$0xff] %v511_v52   ;;  %516 = vst [vmem:[%s16718_s23 + $0x1a8] sm:$0xff] %v515_v53   ;;  %v519_v54 = vld [vmem:[%s16710_s22 + $0x360] sm:$0xff]   ;;  %v523_v55 = vld [vmem:[%s16710_s22 + $0x368] sm:$0xff]  }
  0x2d   : > { %520 = vst [vmem:[%s16718_s23 + $0x1b0] sm:$0xff] %v519_v54   ;;  %524 = vst [vmem:[%s16718_s23 + $0x1b8] sm:$0xff] %v523_v55  }
  0x2e PF: > { %p11932_p5 = scmp.ge.s32.totalorder %s16622_s11, 1  ;;  %p772_p6 = scmp.lt.s32.totalorder %s16622_s11, 3 }
  0x30   : > { %p773_p7 = pnand %p11932_p5, %p772_p6 }
  0x32   : > { %776 = sbr.rel (%p773_p7) target bundleno = 3100 (0xc1c), region = 93 }
  0x39   : > { %v16409_v56 = vld [vmem:[%s20705_s1] sm:$0xff]   ;;  %v16410_v57 = vld [vmem:[%s20705_s1 + $0x8] sm:$0xff]   ;;  %vm822_vm0 = vcmask 687104   ;;  %v20714_v58 = vmov 0   ;;  %s779_s28 = sand.u32 1, %s16614_s30   ;;  %v16411_v59 = vld [vmem:[%s20705_s1 + $0x10] sm:$0xff]  }
  0x3a   : > { %13682 = vmatprep.subr.bf16.mxu0 %v16409_v56  ;;  %823 = vst.msk [vmem:[#allocation2] sm:$0xff] %vm822_vm0, %v20714_v58  ;;  %824 = vst.msk [vmem:[#allocation2 + $0x8] sm:$0xff] %vm822_vm0, %v20714_v58  ;;  %s15962_s15 = smul.u32 448, %s779_s28  ;;  %v16412_v60 = vld [vmem:[%s20705_s1 + $0x18] sm:$0xff]   ;;  %v16413_v0 = vld [vmem:[%s20705_s1 + $0x20] sm:$0xff]   ;;  %vm1634_vm1 = vcmask 1041408  }
  0x3b   : > { %13683 = vmatpush3.bf16.msra.mxu0 %v16409_v56  ;;  %825 = vst.msk [vmem:[#allocation2 + $0x10] sm:$0xff] %vm822_vm0, %v20714_v58  ;;  %826 = vst.msk [vmem:[#allocation2 + $0x18] sm:$0xff] %vm822_vm0, %v20714_v58  ;;  %v16414_v4 = vld [vmem:[%s20705_s1 + $0x28] ss:$0 sps:$4 sm:$0x33]   ;;  %v16415_v10 = vld [vmem:[%s20705_s1 + $0x58] sm:$0xff]  }
  0x3c   : > { %827 = vst.msk [vmem:[#allocation2 + $0x20] sm:$0xff] %vm822_vm0, %v20714_v58  ;;  %828 = vst.msk [vmem:[#allocation2 + $0x28] sm:$0xff] %vm822_vm0, %v20714_v58  ;;  %13684 = vmatprep.subr.bf16.mxu0 %v16410_v57  ;;  %s16865_s19 = scalar_lea.vmem [#allocation5], %s15962_s15  ;;  %v16892_v9 = vsel %vm1634_vm1, %v16414_v4, 0  ;;  %v16416_v15 = vld [vmem:[%s20705_s1 + $0x60] sm:$0xff]   ;;  %v16421_v18 = vld [vmem:[%s20705_s1 + $0x68] sm:$0xff]  }
  0x3d   : > { %829 = vst.msk [vmem:[#allocation2 + $0x1f0] sm:$0xff] %vm822_vm0, %v20714_v58  ;;  %830 = vst.msk [vmem:[#allocation2 + $0x1f8] sm:$0xff] %vm822_vm0, %v20714_v58  ;;  %v16417_v61 = vld [vmem:[%s16865_s19] sm:$0xff]   ;;  %v16418_v62 = vld [vmem:[%s16865_s19 + $0x8] sm:$0xff]   ;;  %vm835_vm2 = vcmask 343040   ;;  %s16625_s21 = smov 86  }
  0x3e   : > { %831 = vst.msk [vmem:[#allocation2 + $0x200] sm:$0xff] %vm822_vm0, %v20714_v58  ;;  %832 = vst.msk [vmem:[#allocation2 + $0x208] sm:$0xff] %vm822_vm0, %v20714_v58  ;;  %v16419_v2 = vld [vmem:[%s16865_s19 + $0x10] sm:$0xff]   ;;  %v16420_v3 = vld [vmem:[%s16865_s19 + $0x18] sm:$0xff]   ;;  %vm8014_vm3 = vcmask 1044480  }
  0x3f   : > { %833 = vst.msk [vmem:[#allocation2 + $0x210] sm:$0xff] %vm822_vm0, %v20714_v58  ;;  %834 = vst.msk [vmem:[#allocation2 + $0x218] sm:$0xff] %vm822_vm0, %v20714_v58  ;;  %13685 = vmatpush3.bf16.msra.mxu0 %v16410_v57  ;;  %v16422_v5 = vld [vmem:[%s16865_s19 + $0x20] sm:$0xff]   ;;  %v16423_v6 = vld [vmem:[%s16865_s19 + $0x28] sm:$0xff]  }
  0x40   : > { %13686 = vmatprep.subr.bf16.mxu0 %v16411_v59  ;;  %1296 = vst.msk [vmem:[#allocation2 + $0x30] sm:$0xff] %vm822_vm0, %v16417_v61  ;;  %1297 = vst.msk [vmem:[#allocation2 + $0x38] sm:$0xff] %vm822_vm0, %v16418_v62  ;;  %v16424_v7 = vld [vmem:[%s16865_s19 + $0x30] sm:$0xff]   ;;  %v16425_v8 = vld [vmem:[%s16865_s19 + $0x38] sm:$0xff]  }
  0x41   : > { %v1352_v63 = vld [vmem:[#allocation2] sm:$0xff]  ;;  %1298 = vst.msk [vmem:[#allocation2 + $0x40] sm:$0xff] %vm822_vm0, %v16419_v2  ;;  %1299 = vst.msk [vmem:[#allocation2 + $0x48] sm:$0xff] %vm822_vm0, %v16420_v3  ;;  %v16427_v11 = vld [vmem:[%s16865_s19 + $0x40] sm:$0xff]  }
  0x42   : > { %13694 = vmatprep.mubr.msk.bf16.mxu0 %vm822_vm0, %v1352_v63  ;;  %v1354_v1 = vld [vmem:[#allocation2 + $0x10] sm:$0xff]  ;;  %1300 = vst.msk [vmem:[#allocation2 + $0x50] sm:$0xff] %vm822_vm0, %v16422_v5  ;;  %1301 = vst.msk [vmem:[#allocation2 + $0x58] sm:$0xff] %vm822_vm0, %v16423_v6  ;;  %v1353_v12 = vld [vmem:[#allocation2 + $0x8] sm:$0xff] }
  0x43   : > { %13687 = vmatpush3.bf16.msra.mxu0 %v16411_v59  ;;  %13570 = vmatprep.mubr.msk.bf16.mxu1 %vm822_vm0, %v1354_v1  ;;  %1302 = vst.msk [vmem:[#allocation2 + $0x60] sm:$0xff] %vm822_vm0, %v16424_v7  ;;  %1303 = vst.msk [vmem:[#allocation2 + $0x68] sm:$0xff] %vm822_vm0, %v16425_v8  ;;  %v16428_v13 = vld [vmem:[%s16865_s19 + $0x48] sm:$0xff]   ;;  %v16429_v14 = vld [vmem:[%s16865_s19 + $0x50] sm:$0xff]  }
  0x44   : > { %13688 = vmatprep.subr.bf16.mxu0 %v16412_v60  ;;  %1304 = vst.msk [vmem:[#allocation2 + $0x70] sm:$0xff] %vm822_vm0, %v16427_v11  ;;  %1305 = vst.msk [vmem:[#allocation2 + $0x78] sm:$0xff] %vm822_vm0, %v16428_v13  ;;  %v16430_v16 = vld [vmem:[%s16865_s19 + $0x58] sm:$0xff]   ;;  %v16432_v17 = vld [vmem:[%s16865_s19 + $0x60] sm:$0xff]  }
  0x45   : > { %1306 = vst.msk [vmem:[#allocation2 + $0x80] sm:$0xff] %vm822_vm0, %v16429_v14  ;;  %1307 = vst.msk [vmem:[#allocation2 + $0x88] sm:$0xff] %vm822_vm0, %v16430_v16  ;;  %v16433_v19 = vld [vmem:[%s16865_s19 + $0x68] sm:$0xff]   ;;  %v16434_v21 = vld [vmem:[%s16865_s19 + $0x70] sm:$0xff]  }
  0x46   : > { %1308 = vst.msk [vmem:[#allocation2 + $0x90] sm:$0xff] %vm822_vm0, %v16432_v17  ;;  %v1355_v20 = vld [vmem:[#allocation2 + $0x18] sm:$0xff]  ;;  %v16919_v22 = vld [vmem:[#allocation2 + $0x20] sm:$0xff]  ;;  %1309 = vst.msk [vmem:[#allocation2 + $0x98] sm:$0xff] %vm822_vm0, %v16433_v19 }
  0x47   : > { %13689 = vmatpush3.bf16.msra.mxu0 %v16412_v60  ;;  %v16435_v23 = vld [vmem:[%s16865_s19 + $0x78] sm:$0xff]   ;;  %v16426_v24 = vld [vmem:[%s20705_s1 + $0x70] sm:$0xff]   ;;  %1310 = vst.msk [vmem:[#allocation2 + $0xa0] sm:$0xff] %vm822_vm0, %v16434_v21  ;;  %v16438_v26 = vld [vmem:[%s16865_s19 + $0x88] sm:$0xff]  }
  0x48   : > { %13690 = vmatprep.subr.bf16.mxu0 %v16413_v0  ;;  %1311 = vst.msk [vmem:[#allocation2 + $0xa8] sm:$0xff] %vm822_vm0, %v16435_v23  ;;  %v16436_v25 = vld [vmem:[%s16865_s19 + $0x80] sm:$0xff]   ;;  %v16431_v27 = vld [vmem:[%s20705_s1 + $0x78] sm:$0xff]   ;;  %v16439_v28 = vld [vmem:[%s16865_s19 + $0x90] sm:$0xff]  }
  0x49   : > { %1312 = vst.msk [vmem:[#allocation2 + $0xb0] sm:$0xff] %vm822_vm0, %v16436_v25  ;;  %1313 = vst.msk [vmem:[#allocation2 + $0xb8] sm:$0xff] %vm822_vm0, %v16438_v26  ;;  %v16440_v29 = vld [vmem:[%s16865_s19 + $0x98] sm:$0xff]   ;;  %v16944_v31 = vld [vmem:[#allocation2 + $0x30] sm:$0xff] }
  0x4a   : > { %1314 = vst.msk [vmem:[#allocation2 + $0xc0] sm:$0xff] %vm822_vm0, %v16439_v28  ;;  %v16941_v30 = vld [vmem:[#allocation2 + $0x28] sm:$0xff]  ;;  %1315 = vst.msk [vmem:[#allocation2 + $0xc8] sm:$0xff] %vm822_vm0, %v16440_v29  ;;  %v16437_v32 = vld [vmem:[%s20705_s1 + $0x80] ss:$0 sps:$4 sm:$0x33]  }
  0x4b   : > { %13691 = vmatpush3.bf16.msra.mxu0 %v16413_v0  ;;  %v2912_v33 = vsel %vm1634_vm1, %v16437_v32, 0  ;;  %v16958_v34 = vld [vmem:[%s20705_s1 + $0x84] sm:$0xff]   ;;  %v16960_v35 = vld [vmem:[#allocation2 + $0x38] sm:$0xff]  ;;  %v16971_v38 = vld [vmem:[#allocation2 + $0x50] sm:$0xff] }
  0x4c   : > { %15939 = vmatprep.subr.msk.bf16.mxu0 %vm1634_vm1, %v16414_v4  ;;  %v16962_v36 = vld [vmem:[#allocation2 + $0x40] sm:$0xff]  ;;  %v16969_v37 = vld [vmem:[#allocation2 + $0x48] sm:$0xff]  ;;  %v16977_v39 = vld [vmem:[#allocation2 + $0x58] sm:$0xff] }
  0x4d   : > { %v16979_v40 = vld [vmem:[#allocation2 + $0x60] sm:$0xff]  ;;  %v16985_v41 = vld [vmem:[#allocation2 + $0x68] sm:$0xff]  ;;  %v16987_v42 = vld [vmem:[#allocation2 + $0x70] sm:$0xff] }
  0x4e   : > { %v16993_v43 = vld [vmem:[#allocation2 + $0x78] sm:$0xff]  ;;  %v16995_v44 = vld [vmem:[#allocation2 + $0x80] sm:$0xff]  ;;  %v16444_v45 = vld [vmem:[%s16865_s19 + $0xa0] sm:$0xff]  }
  0x4f   : > { %13693 = vmatpush3.bf16.msra.mxu0 %v16892_v9  ;;  %v16445_v46 = vld [vmem:[%s16865_s19 + $0xa8] sm:$0xff]   ;;  %1316 = vst.msk [vmem:[#allocation2 + $0xd0] sm:$0xff] %vm822_vm0, %v16444_v45  ;;  %v17005_v47 = vld [vmem:[#allocation2 + $0x88] sm:$0xff]  ;;  %v16446_v48 = vld [vmem:[%s16865_s19 + $0xb0] sm:$0xff]  }
  0x50   : > { %13806 = vmatprep.subr.bf16.mxu0 %v16415_v10  ;;  %1317 = vst.msk [vmem:[#allocation2 + $0xd8] sm:$0xff] %vm822_vm0, %v16445_v46  ;;  %v17008_v49 = vld [vmem:[#allocation2 + $0x90] sm:$0xff]  ;;  %v16447_v50 = vld [vmem:[%s16865_s19 + $0xb8] sm:$0xff]   ;;  %1318 = vst.msk [vmem:[#allocation2 + $0xe0] sm:$0xff] %vm822_vm0, %v16446_v48 }
  0x51   : > { %1319 = vst.msk [vmem:[#allocation2 + $0xe8] sm:$0xff] %vm822_vm0, %v16447_v50  ;;  %v17017_v51 = vld [vmem:[#allocation2 + $0x98] sm:$0xff]  ;;  %v16448_v52 = vld [vmem:[%s16865_s19 + $0xc0] sm:$0xff]   ;;  %v17020_v53 = vld [vmem:[#allocation2 + $0xa0] sm:$0xff] }
  0x52   : > { %13695 = vmatmul.mubr.msk.bf16.vlgmr.msra.gmra.mrb[0].mxu0 %vm822_vm0, %v1353_v12  ;;  %v16449_v54 = vld [vmem:[%s16865_s19 + $0xc8] sm:$0xff]   ;;  %1320 = vst.msk [vmem:[#allocation2 + $0xf0] sm:$0xff] %vm822_vm0, %v16448_v52  ;;  %v17029_v55 = vld [vmem:[#allocation2 + $0xa8] sm:$0xff]  ;;  %v16450_v56 = vld [vmem:[%s16865_s19 + $0xd0] sm:$0xff]  }
  0x53   : > { %13807 = vmatpush3.bf16.msra.mxu0 %v16415_v10  ;;  %13698 = vmatprep.mubr.msk.bf16.mxu0 %vm822_vm0, %v1354_v1  ;;  %1321 = vst.msk [vmem:[#allocation2 + $0xf8] sm:$0xff] %vm822_vm0, %v16449_v54  ;;  %v17032_v57 = vld [vmem:[#allocation2 + $0xb0] sm:$0xff]  ;;  %v16451_v59 = vld [vmem:[%s16865_s19 + $0xd8] sm:$0xff]   ;;  %1322 = vst.msk [vmem:[#allocation2 + $0x100] sm:$0xff] %vm822_vm0, %v16450_v56 }
  0x54   : > { %13808 = vmatprep.subr.bf16.mxu0 %v16416_v15  ;;  %1323 = vst.msk [vmem:[#allocation2 + $0x108] sm:$0xff] %vm822_vm0, %v16451_v59  ;;  %v17041_v60 = vld [vmem:[#allocation2 + $0xb8] sm:$0xff]  ;;  %v16453_v61 = vld [vmem:[%s16865_s19 + $0xe0] sm:$0xff]   ;;  %v17044_v62 = vld [vmem:[#allocation2 + $0xc0] sm:$0xff] }
  0x55   : > { %v16454_v63 = vld [vmem:[%s16865_s19 + $0xe8] sm:$0xff]   ;;  %1324 = vst.msk [vmem:[#allocation2 + $0x110] sm:$0xff] %vm822_vm0, %v16453_v61  ;;  %v17053_v0 = vld [vmem:[#allocation2 + $0xc8] sm:$0xff]  ;;  %v16455_v1 = vld [vmem:[%s16865_s19 + $0xf0] sm:$0xff]  }
  0x56   : > { %1325 = vst.msk [vmem:[#allocation2 + $0x118] sm:$0xff] %vm822_vm0, %v16454_v63  ;;  %v16456_v2 = vld [vmem:[%s16865_s19 + $0xf8] sm:$0xff]   ;;  %1326 = vst.msk [vmem:[#allocation2 + $0x120] sm:$0xff] %vm822_vm0, %v16455_v1  ;;  %v16457_v3 = vld [vmem:[%s16865_s19 + $0x100] sm:$0xff]  }
  0x57   : > { %13809 = vmatpush3.bf16.msra.mxu0 %v16416_v15  ;;  %1327 = vst.msk [vmem:[#allocation2 + $0x128] sm:$0xff] %vm822_vm0, %v16456_v2  ;;  %v16442_v4 = vld [vmem:[%s20705_s1 + $0x8c] sm:$0xff]   ;;  %v16458_v5 = vld [vmem:[%s16865_s19 + $0x108] sm:$0xff]   ;;  %1328 = vst.msk [vmem:[#allocation2 + $0x130] sm:$0xff] %vm822_vm0, %v16457_v3 }
  0x58   : > { %13810 = vmatprep.subr.bf16.mxu0 %v16421_v18  ;;  %v16443_v6 = vld [vmem:[%s20705_s1 + $0x94] sm:$0xff]   ;;  %1329 = vst.msk [vmem:[#allocation2 + $0x138] sm:$0xff] %vm822_vm0, %v16458_v5  ;;  %v16459_v7 = vld [vmem:[%s16865_s19 + $0x110] sm:$0xff]   ;;  %v16460_v10 = vld [vmem:[%s16865_s19 + $0x118] sm:$0xff]  }
  0x59   : > { %v16452_v8 = vld [vmem:[%s20705_s1 + $0x9c] sm:$0xff]   ;;  %1330 = vst.msk [vmem:[#allocation2 + $0x140] sm:$0xff] %vm822_vm0, %v16459_v7  ;;  %1331 = vst.msk [vmem:[#allocation2 + $0x148] sm:$0xff] %vm822_vm0, %v16460_v10  ;;  %v16462_v11 = vld [vmem:[%s16865_s19 + $0x120] sm:$0xff]  }
  0x5a   : > { %13699 = vmatmul.mubr.msk.bf16.gmra.mrb[4].mxu0 %vm822_vm0, %v1355_v20  ;;  %v16463_v12 = vld [vmem:[%s16865_s19 + $0x128] sm:$0xff]   ;;  %1332 = vst.msk [vmem:[#allocation2 + $0x150] sm:$0xff] %vm822_vm0, %v16462_v11  ;;  %v16461_v13 = vld [vmem:[%s20705_s1 + $0xa4] sm:$0xff]   ;;  %v16466_v16 = vld [vmem:[%s16865_s19 + $0x140] sm:$0xff]  }
  0x5b   : > { %13702 = vmatprep.mubr.msk.bf16.mxu0 %vm822_vm0, %v16919_v22  ;;  %13811 = vmatpush3.bf16.msra.mxu0 %v16421_v18  ;;  %1333 = vst.msk [vmem:[#allocation2 + $0x158] sm:$0xff] %vm822_vm0, %v16463_v12  ;;  %v16464_v14 = vld [vmem:[%s16865_s19 + $0x130] sm:$0xff]   ;;  %v16465_v15 = vld [vmem:[%s16865_s19 + $0x138] sm:$0xff]   ;;  %v16467_v17 = vld [vmem:[%s16865_s19 + $0x148] sm:$0xff]  }
  0x5c   : > { %13812 = vmatprep.subr.bf16.mxu0 %v16426_v24  ;;  %1334 = vst.msk [vmem:[#allocation2 + $0x160] sm:$0xff] %vm822_vm0, %v16464_v14  ;;  %1335 = vst.msk [vmem:[#allocation2 + $0x168] sm:$0xff] %vm822_vm0, %v16465_v15  ;;  %v16468_v18 = vld [vmem:[%s16865_s19 + $0x150] sm:$0xff]   ;;  %v16469_v19 = vld [vmem:[%s16865_s19 + $0x158] sm:$0xff]  }
  0x5d   : > { %1336 = vst.msk [vmem:[#allocation2 + $0x170] sm:$0xff] %vm822_vm0, %v16466_v16  ;;  %1337 = vst.msk [vmem:[#allocation2 + $0x178] sm:$0xff] %vm822_vm0, %v16467_v17  ;;  %v16470_v20 = vld [vmem:[%s16865_s19 + $0x160] sm:$0xff]   ;;  %v16471_v21 = vld [vmem:[%s16865_s19 + $0x168] sm:$0xff]  }
  0x5e   : > { %1338 = vst.msk [vmem:[#allocation2 + $0x180] sm:$0xff] %vm822_vm0, %v16468_v18  ;;  %1339 = vst.msk [vmem:[#allocation2 + $0x188] sm:$0xff] %vm822_vm0, %v16469_v19  ;;  %v16474_v23 = vld [vmem:[%s16865_s19 + $0x178] sm:$0xff]   ;;  %v16475_v26 = vld [vmem:[%s16865_s19 + $0x180] sm:$0xff]  }
  0x5f   : > { %13813 = vmatpush3.bf16.msra.mxu0 %v16426_v24  ;;  %1340 = vst.msk [vmem:[#allocation2 + $0x190] sm:$0xff] %vm822_vm0, %v16470_v20  ;;  %1341 = vst.msk [vmem:[#allocation2 + $0x198] sm:$0xff] %vm822_vm0, %v16471_v21  ;;  %v16472_v24 = vld [vmem:[%s20705_s1 + $0xac] ss:$0 sps:$4 sm:$0x33]   ;;  %v16477_v28 = vld [vmem:[%s16865_s19 + $0x190] sm:$0xff]  }
  0x60   : > { %13814 = vmatprep.subr.bf16.mxu0 %v16431_v27  ;;  %1343 = vst.msk [vmem:[#allocation2 + $0x1a8] sm:$0xff] %vm822_vm0, %v16474_v23  ;;  %v3777_v25 = vsel %vm1634_vm1, %v16472_v24, 0  ;;  %1344 = vst.msk [vmem:[#allocation2 + $0x1b0] sm:$0xff] %vm822_vm0, %v16475_v26  ;;  %v16478_v29 = vld [vmem:[%s16865_s19 + $0x198] sm:$0xff]   ;;  %v17173_v45 = vld [vmem:[#allocation2 + $0xe0] sm:$0xff] }
  0x61   : > { %1346 = vst.msk [vmem:[#allocation2 + $0x1c0] sm:$0xff] %vm822_vm0, %v16477_v28  ;;  %1347 = vst.msk [vmem:[#allocation2 + $0x1c8] sm:$0xff] %vm822_vm0, %v16478_v29  ;;  %v17179_v46 = vld [vmem:[#allocation2 + $0xe8] sm:$0xff]  ;;  %v17181_v48 = vld [vmem:[#allocation2 + $0xf0] sm:$0xff] }
  0x62   : > { %13703 = vmatmul.mubr.msk.bf16.gmra.mrb[8].mxu0 %vm822_vm0, %v16941_v30  ;;  %v17188_v50 = vld [vmem:[%s20705_s1 + $0xb0] sm:$0xff]   ;;  %v17193_v52 = vld [vmem:[#allocation2 + $0xf8] sm:$0xff]  ;;  %v17195_v54 = vld [vmem:[#allocation2 + $0x100] sm:$0xff] }
  0x63   : > { %13706 = vmatprep.mubr.msk.bf16.mxu0 %vm822_vm0, %v16944_v31  ;;  %13815 = vmatpush3.bf16.msra.mxu0 %v16431_v27  ;;  %v16476_v27 = vld [vmem:[%s16865_s19 + $0x188] sm:$0xff]   ;;  %v17201_v56 = vld [vmem:[#allocation2 + $0x108] sm:$0xff]  ;;  %v17203_v59 = vld [vmem:[#allocation2 + $0x110] sm:$0xff] }
  0x64   : > { %15941 = vmatprep.subr.msk.bf16.mxu0 %vm1634_vm1, %v16437_v32  ;;  %1345 = vst.msk [vmem:[#allocation2 + $0x1b8] sm:$0xff] %vm822_vm0, %v16476_v27  ;;  %v17162_v32 = vld [vmem:[#allocation2 + $0xd0] sm:$0xff]  ;;  %v17209_v61 = vld [vmem:[#allocation2 + $0x118] sm:$0xff]  ;;  %v17211_v63 = vld [vmem:[#allocation2 + $0x120] sm:$0xff] }
  0x65   : > { %v17217_v1 = vld [vmem:[#allocation2 + $0x128] sm:$0xff]  ;;  %v17219_v2 = vld [vmem:[#allocation2 + $0x130] sm:$0xff]  ;;  %v17225_v3 = vld [vmem:[#allocation2 + $0x138] sm:$0xff] }
  0x66   : > { %v17233_v5 = vld [vmem:[#allocation2 + $0x148] sm:$0xff]  ;;  %v17241_v7 = vld [vmem:[#allocation2 + $0x158] sm:$0xff]  ;;  %v17251_v11 = vld [vmem:[#allocation2 + $0x170] sm:$0xff] }
  0x67   : > { %13817 = vmatpush3.bf16.msra.mxu0 %v2912_v33  ;;  %v16480_v33 = vld [vmem:[%s16865_s19 + $0x1a8] sm:$0xff]   ;;  %v17249_v10 = vld [vmem:[#allocation2 + $0x168] sm:$0xff]  ;;  %v17267_v15 = vld [vmem:[#allocation2 + $0x190] sm:$0xff] }
  0x68   : > { %13930 = vmatprep.subr.bf16.mxu0 %v16958_v34  ;;  %1349 = vst.msk [vmem:[#allocation2 + $0x1d8] sm:$0xff] %vm822_vm0, %v16480_v33  ;;  %v17257_v12 = vld [vmem:[#allocation2 + $0x178] sm:$0xff]  ;;  %v17265_v14 = vld [vmem:[#allocation2 + $0x188] sm:$0xff]  ;;  %v17283_v19 = vld [vmem:[#allocation2 + $0x1b0] sm:$0xff] }
  0x69   : > { %v17273_v16 = vld [vmem:[#allocation2 + $0x198] sm:$0xff]  ;;  %v17281_v18 = vld [vmem:[#allocation2 + $0x1a8] sm:$0xff]  ;;  %v17291_v21 = vld [vmem:[#allocation2 + $0x1c0] sm:$0xff] }
  0x6a   : > { %13707 = vmatmul.mubr.msk.bf16.gmra.mrb[12].mxu0 %vm822_vm0, %v16960_v35  ;;  %v16483_v26 = vld [vmem:[%s20705_s1 + $0xc0] sm:$0xff]   ;;  %v17451_v27 = vld [vmem:[#allocation2 + $0x50] sm:$0xff] }
  0x6b   : > { %13710 = vmatprep.mubr.msk.bf16.mxu0 %vm822_vm0, %v16962_v36  ;;  %v17289_v20 = vld [vmem:[#allocation2 + $0x1b8] sm:$0xff]  ;;  %v16490_v28 = vld [vmem:[%s20705_s1 + $0xe4] sm:$0xff]   ;;  %v16491_v29 = vld [vmem:[%s20705_s1 + $0xec] sm:$0xff]  }
  0x6c   : > { %v17464_v33 = vld [vmem:[#allocation2 + $0x60] sm:$0xff] }
  0x72   : > { %13711 = vmatmul.mubr.msk.bf16.gmra.mrb[16].mxu0 %vm822_vm0, %v16969_v37 }
  0x73   : > { %13714 = vmatprep.mubr.msk.bf16.mxu0 %vm822_vm0, %v16971_v38 }
  0x7a   : > { %13715 = vmatmul.mubr.msk.bf16.gmra.mrb[20].mxu0 %vm822_vm0, %v16977_v39 }
  0x7b   : > { %13718 = vmatprep.mubr.msk.bf16.mxu0 %vm822_vm0, %v16979_v40 }
  0x82   : > { %13719 = vmatmul.mubr.msk.bf16.gmra.mrb[24].mxu0 %vm822_vm0, %v16985_v41 }
  0x83   : > { %13722 = vmatprep.mubr.msk.bf16.mxu0 %vm822_vm0, %v16987_v42 }
  0x8a   : > { %13723 = vmatmul.mubr.msk.bf16.gmra.mrb[28].mxu0 %vm822_vm0, %v16993_v43 }
  0x8b   : > { %13726 = vmatprep.mubr.msk.bf16.mxu0 %vm822_vm0, %v16995_v44 }
  0x92   : > { %13727 = vmatmul.mubr.msk.bf16.gmra.mrb[32].mxu0 %vm822_vm0, %v17005_v47 }
  0x93   : > { %13730 = vmatprep.mubr.msk.bf16.mxu0 %vm822_vm0, %v17008_v49 }
  0x9a   : > { %13731 = vmatmul.mubr.msk.bf16.gmra.mrb[36].mxu0 %vm822_vm0, %v17017_v51 }
  0x9b   : > { %13734 = vmatprep.mubr.msk.bf16.mxu0 %vm822_vm0, %v17020_v53 }
  0xa2   : > { %13735 = vmatmul.mubr.msk.bf16.gmra.mrb[40].mxu0 %vm822_vm0, %v17029_v55 }
  0xa3   : > { %13738 = vmatprep.mubr.msk.bf16.mxu0 %vm822_vm0, %v17032_v57 }
  0xaa   : > { %13739 = vmatmul.mubr.msk.bf16.gmra.mrb[44].mxu0 %vm822_vm0, %v17041_v60 }
  0xab   : > { %13742 = vmatprep.mubr.msk.bf16.mxu0 %vm822_vm0, %v17044_v62 }
  0xb2   : > { %13743 = vmatmul.mubr.msk.bf16.gmra.mrb[48].mxu0 %vm822_vm0, %v17053_v0 }
  0xb3   : > { %13818 = vmatprep.mubr.msk.bf16.mxu0 %vm822_vm0, %v16919_v22  ;;  %v16473_v22 = vld [vmem:[%s16865_s19 + $0x170] sm:$0xff]  }
  0xb4   : > { %1342 = vst.msk [vmem:[#allocation2 + $0x1a0] sm:$0xff] %vm822_vm0, %v16473_v22  ;;  %v17297_v22 = vld [vmem:[#allocation2 + $0x1c8] sm:$0xff] }
  0xba   : > { %13819 = vmatmul.mubr.msk.bf16.vlgmr.msra.gmra.mrb[0].mxu0 %vm822_vm0, %v16941_v30  ;;  %v16479_v30 = vld [vmem:[%s16865_s19 + $0x1a0] sm:$0xff]  }
  0xbb   : > { %13931 = vmatpush3.bf16.msra.mxu0 %v16958_v34  ;;  %13822 = vmatprep.mubr.msk.bf16.mxu0 %vm822_vm0, %v16944_v31  ;;  %1348 = vst.msk [vmem:[#allocation2 + $0x1d0] sm:$0xff] %vm822_vm0, %v16479_v30  ;;  %v17171_v34 = vld [vmem:[#allocation2 + $0xd8] sm:$0xff]  ;;  %v17275_v17 = vld [vmem:[#allocation2 + $0x1a0] sm:$0xff] }
  0xbc   : > { %13932 = vmatprep.subr.bf16.mxu0 %v16442_v4  ;;  %v17462_v30 = vld [vmem:[#allocation2 + $0x58] sm:$0xff] }
  0xbf   : > { %13933 = vmatpush3.bf16.msra.mxu0 %v16442_v4  ;;  %v17227_v4 = vld [vmem:[#allocation2 + $0x140] sm:$0xff] }
  0xc0   : > { %13934 = vmatprep.subr.bf16.mxu0 %v16443_v6 }
  0xc2   : > { %13823 = vmatmul.mubr.msk.bf16.gmra.mrb[4].mxu0 %vm822_vm0, %v16960_v35  ;;  %v17299_v23 = vld [vmem:[#allocation2 + $0x1d0] sm:$0xff] }
  0xc3   : > { %13826 = vmatprep.mubr.msk.bf16.mxu0 %vm822_vm0, %v16962_v36  ;;  %13935 = vmatpush3.bf16.msra.mxu0 %v16443_v6  ;;  %v17235_v6 = vld [vmem:[#allocation2 + $0x150] sm:$0xff] }
  0xc4   : > { %13936 = vmatprep.subr.bf16.mxu0 %v16452_v8 }
  0xc7   : > { %13937 = vmatpush3.bf16.msra.mxu0 %v16452_v8  ;;  %v17243_v8 = vld [vmem:[#allocation2 + $0x160] sm:$0xff] }
  0xc8   : > { %13938 = vmatprep.subr.bf16.mxu0 %v16461_v13 }
  0xca   : > { %13827 = vmatmul.mubr.msk.bf16.gmra.mrb[8].mxu0 %vm822_vm0, %v16969_v37 }
  0xcb   : > { %13830 = vmatprep.mubr.msk.bf16.mxu0 %vm822_vm0, %v16971_v38  ;;  %13939 = vmatpush3.bf16.msra.mxu0 %v16461_v13  ;;  %v17259_v13 = vld [vmem:[#allocation2 + $0x180] sm:$0xff] }
  0xcc   : > { %15942 = vmatprep.subr.msk.bf16.mxu0 %vm1634_vm1, %v16472_v24  ;;  %v17305_v24 = vld [vmem:[#allocation2 + $0x1d8] sm:$0xff] }
  0xcf   : > { %13941 = vmatpush3.bf16.msra.mxu0 %v3777_v25  ;;  %v16482_v25 = vld [vmem:[%s20705_s1 + $0xb8] sm:$0xff]  }
  0xd0   : > { %14054 = vmatprep.subr.bf16.mxu0 %v17188_v50 }
  0xd2   : > { %13831 = vmatmul.mubr.msk.bf16.gmra.mrb[12].mxu0 %vm822_vm0, %v16977_v39 }
  0xd3   : > { %13834 = vmatprep.mubr.msk.bf16.mxu0 %vm822_vm0, %v16979_v40 }
  0xda   : > { %13835 = vmatmul.mubr.msk.bf16.gmra.mrb[16].mxu0 %vm822_vm0, %v16985_v41 }
  0xdb   : > { %13838 = vmatprep.mubr.msk.bf16.mxu0 %vm822_vm0, %v16987_v42 }
  0xe2   : > { %13839 = vmatmul.mubr.msk.bf16.gmra.mrb[20].mxu0 %vm822_vm0, %v16993_v43 }
  0xe3   : > { %13842 = vmatprep.mubr.msk.bf16.mxu0 %vm822_vm0, %v16995_v44 }
  0xea   : > { %13843 = vmatmul.mubr.msk.bf16.gmra.mrb[24].mxu0 %vm822_vm0, %v17005_v47 }
  0xeb   : > { %13846 = vmatprep.mubr.msk.bf16.mxu0 %vm822_vm0, %v17008_v49 }
  0xf2   : > { %13847 = vmatmul.mubr.msk.bf16.gmra.mrb[28].mxu0 %vm822_vm0, %v17017_v51 }
  0xf3   : > { %13850 = vmatprep.mubr.msk.bf16.mxu0 %vm822_vm0, %v17020_v53 }
  0xfa   : > { %13851 = vmatmul.mubr.msk.bf16.gmra.mrb[32].mxu0 %vm822_vm0, %v17029_v55 }
  0xfb   : > { %13854 = vmatprep.mubr.msk.bf16.mxu0 %vm822_vm0, %v17032_v57 }
 0x102   : > { %13855 = vmatmul.mubr.msk.bf16.gmra.mrb[36].mxu0 %vm822_vm0, %v17041_v60 }
 0x103   : > { %13858 = vmatprep.mubr.msk.bf16.mxu0 %vm822_vm0, %v17044_v62 }
 0x10a   : > { %13859 = vmatmul.mubr.msk.bf16.gmra.mrb[40].mxu0 %vm822_vm0, %v17053_v0 }
 0x10b   : > { %13862 = vmatprep.mubr.msk.bf16.mxu0 %vm822_vm0, %v17162_v32 }
 0x112   : > { %13863 = vmatmul.mubr.msk.bf16.gmra.mrb[44].mxu0 %vm822_vm0, %v17171_v34 }
 0x113   : > { %13866 = vmatprep.mubr.msk.bf16.mxu0 %vm822_vm0, %v17173_v45 }
 0x11a   : > { %13867 = vmatmul.mubr.msk.bf16.gmra.mrb[48].mxu0 %vm822_vm0, %v17179_v46 }
 0x11b   : > { %13870 = vmatprep.mubr.msk.bf16.mxu0 %vm822_vm0, %v17181_v48 }
 0x122   : > { %13871 = vmatmul.mubr.msk.bf16.gmra.mrb[52].mxu0 %vm822_vm0, %v17193_v52 }
 0x123   : > { %13874 = vmatprep.mubr.msk.bf16.mxu0 %vm822_vm0, %v17195_v54 }
 0x12a   : > { %13875 = vmatmul.mubr.msk.bf16.gmra.mrb[56].mxu0 %vm822_vm0, %v17201_v56 }
 0x12b   : > { %13878 = vmatprep.mubr.msk.bf16.mxu0 %vm822_vm0, %v17203_v59 }
 0x132   : > { %13879 = vmatmul.mubr.msk.bf16.gmra.mrb[60].mxu0 %vm822_vm0, %v17209_v61 }
 0x133   : > { %13882 = vmatprep.mubr.msk.bf16.mxu0 %vm822_vm0, %v17211_v63 }
 0x13a   : > { %13883 = vmatmul.mubr.msk.bf16.gmra.mrb[64].mxu0 %vm822_vm0, %v17217_v1 }
 0x13b   : > { %13886 = vmatprep.mubr.msk.bf16.mxu0 %vm822_vm0, %v17219_v2 }
 0x142   : > { %13887 = vmatmul.mubr.msk.bf16.gmra.mrb[68].mxu0 %vm822_vm0, %v17225_v3 }
 0x143   : > { %13890 = vmatprep.mubr.msk.bf16.mxu0 %vm822_vm0, %v17227_v4 }
 0x14a   : > { %13891 = vmatmul.mubr.msk.bf16.gmra.mrb[72].mxu0 %vm822_vm0, %v17233_v5 }
 0x14b   : > { %13894 = vmatprep.mubr.msk.bf16.mxu0 %vm822_vm0, %v17235_v6 }
 0x152   : > { %13895 = vmatmul.mubr.msk.bf16.gmra.mrb[76].mxu0 %vm822_vm0, %v17241_v7 }
 0x153   : > { %13898 = vmatprep.mubr.msk.bf16.mxu0 %vm822_vm0, %v17243_v8 }
 0x15a   : > { %13899 = vmatmul.mubr.msk.bf16.gmra.mrb[80].mxu0 %vm822_vm0, %v17249_v10 }
 0x15b   : > { %13902 = vmatprep.mubr.msk.bf16.mxu0 %vm822_vm0, %v17251_v11 }
 0x162   : > { %13903 = vmatmul.mubr.msk.bf16.gmra.mrb[84].mxu0 %vm822_vm0, %v17257_v12 }
 0x163   : > { %13906 = vmatprep.mubr.msk.bf16.mxu0 %vm822_vm0, %v17259_v13 }
 0x16a   : > { %13907 = vmatmul.mubr.msk.bf16.gmra.mrb[88].mxu0 %vm822_vm0, %v17265_v14 }
 0x16b   : > { %13910 = vmatprep.mubr.msk.bf16.mxu0 %vm822_vm0, %v17267_v15 }
 0x172   : > { %13911 = vmatmul.mubr.msk.bf16.gmra.mrb[92].mxu0 %vm822_vm0, %v17273_v16 }
 0x173   : > { %13914 = vmatprep.mubr.msk.bf16.mxu0 %vm822_vm0, %v17275_v17 }
 0x17a   : > { %13915 = vmatmul.mubr.msk.bf16.gmra.mrb[96].mxu0 %vm822_vm0, %v17281_v18 }
 0x17b   : > { %13918 = vmatprep.mubr.msk.bf16.mxu0 %vm822_vm0, %v17283_v19 }
 0x182   : > { %13919 = vmatmul.mubr.msk.bf16.gmra.mrb[100].mxu0 %vm822_vm0, %v17289_v20 }
 0x183   : > { %13922 = vmatprep.mubr.msk.bf16.mxu0 %vm822_vm0, %v17291_v21 }
 0x18a   : > { %13923 = vmatmul.mubr.msk.bf16.gmra.mrb[104].mxu0 %vm822_vm0, %v17297_v22 }
 0x18b   : > { %13926 = vmatprep.mubr.msk.bf16.mxu0 %vm822_vm0, %v17299_v23 }
 0x192   : > { %13927 = vmatmul.mubr.msk.bf16.gmra.mrb[108].mxu0 %vm822_vm0, %v17305_v24 }
 0x193   : > { %13942 = vmatprep.mubr.msk.bf16.mxu0 %vm822_vm0, %v16944_v31  ;;  %v16484_v31 = vld [vmem:[%s20705_s1 + $0xc8] sm:$0xff]  }
 0x19a   : > { %13943 = vmatmul.mubr.msk.bf16.vlgmr.msra.gmra.mrb[0].mxu0 %vm822_vm0, %v16960_v35  ;;  %v16485_v35 = vld [vmem:[%s20705_s1 + $0xd0] sm:$0xff]  }
 0x19b   : > { %14055 = vmatpush3.bf16.msra.mxu0 %v17188_v50  ;;  %13946 = vmatprep.mubr.msk.bf16.mxu0 %vm822_vm0, %v16962_v36  ;;  %v16486_v36 = vld [vmem:[%s20705_s1 + $0xd8] ss:$0 sps:$4 sm:$0x33]  }
 0x19c   : > { %14056 = vmatprep.subr.bf16.mxu0 %v16482_v25  ;;  %v16492_v50 = vld [vmem:[%s20705_s1 + $0xf4] sm:$0xff]  }
 0x19f   : > { %14057 = vmatpush3.bf16.msra.mxu0 %v16482_v25  ;;  %v17473_v25 = vld [vmem:[#allocation2 + $0x68] sm:$0xff] }
 0x1a0   : > { %14058 = vmatprep.subr.bf16.mxu0 %v16483_v26 }
 0x1a2   : > { %13947 = vmatmul.mubr.msk.bf16.gmra.mrb[4].mxu0 %vm822_vm0, %v16969_v37  ;;  %v4642_v37 = vsel %vm1634_vm1, %v16486_v36, 0 }
 0x1a3   : > { %13950 = vmatprep.mubr.msk.bf16.mxu0 %vm822_vm0, %v16971_v38  ;;  %14059 = vmatpush3.bf16.msra.mxu0 %v16483_v26  ;;  %v16487_v38 = vld [vmem:[%s16865_s19 + $0x1b0] sm:$0xff]   ;;  %v17475_v26 = vld [vmem:[#allocation2 + $0x70] sm:$0xff] }
 0x1a4   : > { %14060 = vmatprep.subr.bf16.mxu0 %v16484_v31  ;;  %1350 = vst.msk [vmem:[#allocation2 + $0x1e0] sm:$0xff] %vm822_vm0, %v16487_v38  ;;  %v16495_v38 = vld [vmem:[%s20705_s1 + $0x34] sm:$0xff]  }
 0x1a7   : > { %14061 = vmatpush3.bf16.msra.mxu0 %v16484_v31  ;;  %v16493_v31 = vld [vmem:[%s20705_s1 + $0xfc] sm:$0xff]  }
 0x1a8   : > { %14062 = vmatprep.subr.bf16.mxu0 %v16485_v35 }
 0x1aa   : > { %13951 = vmatmul.mubr.msk.bf16.gmra.mrb[8].mxu0 %vm822_vm0, %v16977_v39  ;;  %v16488_v39 = vld [vmem:[%s16865_s19 + $0x1b8] sm:$0xff]  }
 0x1ab   : > { %13954 = vmatprep.mubr.msk.bf16.mxu0 %vm822_vm0, %v16979_v40  ;;  %14063 = vmatpush3.bf16.msra.mxu0 %v16485_v35  ;;  %1351 = vst.msk [vmem:[#allocation2 + $0x1e8] sm:$0xff] %vm822_vm0, %v16488_v39  ;;  %v16489_v40 = vld [vmem:[%s20705_s1 + $0xdc] sm:$0xff]   ;;  %v16496_v39 = vld [vmem:[%s20705_s1 + $0x104] ss:$0 sps:$4 sm:$0x33]  }
 0x1ac   : > { %15943 = vmatprep.subr.msk.bf16.mxu0 %vm1634_vm1, %v16486_v36  ;;  %v17484_v35 = vld [vmem:[#allocation2 + $0x78] sm:$0xff]  ;;  %v17486_v36 = vld [vmem:[#allocation2 + $0x80] sm:$0xff] }
 0x1af   : > { %14065 = vmatpush3.bf16.msra.mxu0 %v4642_v37  ;;  %v16494_v37 = vld [vmem:[%s20705_s1 + $0x2c] sm:$0xff]  }
 0x1b0   : > { %14178 = vmatprep.subr.bf16.mxu0 %v16489_v40  ;;  %13558 = vmatprep.subr.bf16.mxu1 %v16494_v37 }
 0x1b1   : > { %13559 = vmatpush3.bf16.msra.mxu1 %v16494_v37  ;;  %v16575_v37 = vld [vmem:[#allocation2 + $0x20] sm:$0xff] }
 0x1b2   : > { %13955 = vmatmul.mubr.msk.bf16.gmra.mrb[12].mxu0 %vm822_vm0, %v16985_v41  ;;  %v17440_v41 = vld [vmem:[#allocation2 + $0x1e0] sm:$0xff]  ;;  %13560 = vmatprep.subr.bf16.mxu1 %v16495_v38 }
 0x1b3   : > { %13958 = vmatprep.mubr.msk.bf16.mxu0 %vm822_vm0, %v16987_v42  ;;  %v17446_v42 = vld [vmem:[#allocation2 + $0x1e8] sm:$0xff] }
 0x1b5   : > { %13561 = vmatpush3.bf16.msra.mxu1 %v16495_v38  ;;  %v16578_v38 = vld [vmem:[#allocation2 + $0x28] sm:$0xff] }
 0x1ba   : > { %13959 = vmatmul.mubr.msk.bf16.gmra.mrb[16].mxu0 %vm822_vm0, %v16993_v43  ;;  %v4372_v43 = vld [vmem:[#allocation2 + $0x40] sm:$0xff] }
 0x1bb   : > { %13962 = vmatprep.mubr.msk.bf16.mxu0 %vm822_vm0, %v16995_v44  ;;  %v4373_v44 = vld [vmem:[#allocation2 + $0x48] sm:$0xff] }
 0x1c2   : > { %13963 = vmatmul.mubr.msk.bf16.gmra.mrb[20].mxu0 %vm822_vm0, %v17005_v47 }
 0x1c3   : > { %13966 = vmatprep.mubr.msk.bf16.mxu0 %vm822_vm0, %v17008_v49 }
 0x1ca   : > { %13967 = vmatmul.mubr.msk.bf16.gmra.mrb[24].mxu0 %vm822_vm0, %v17017_v51 }
 0x1cb   : > { %13970 = vmatprep.mubr.msk.bf16.mxu0 %vm822_vm0, %v17020_v53 }
 0x1d2   : > { %13971 = vmatmul.mubr.msk.bf16.gmra.mrb[28].mxu0 %vm822_vm0, %v17029_v55 }
 0x1d3   : > { %13974 = vmatprep.mubr.msk.bf16.mxu0 %vm822_vm0, %v17032_v57 }
 0x1da   : > { %13975 = vmatmul.mubr.msk.bf16.gmra.mrb[32].mxu0 %vm822_vm0, %v17041_v60 }
 0x1db   : > { %13978 = vmatprep.mubr.msk.bf16.mxu0 %vm822_vm0, %v17044_v62 }
 0x1e2   : > { %13979 = vmatmul.mubr.msk.bf16.gmra.mrb[36].mxu0 %vm822_vm0, %v17053_v0 }
 0x1e3   : > { %13982 = vmatprep.mubr.msk.bf16.mxu0 %vm822_vm0, %v17162_v32 }
 0x1ea   : > { %13983 = vmatmul.mubr.msk.bf16.gmra.mrb[40].mxu0 %vm822_vm0, %v17171_v34 }
 0x1eb   : > { %13986 = vmatprep.mubr.msk.bf16.mxu0 %vm822_vm0, %v17173_v45 }
 0x1f2   : > { %13987 = vmatmul.mubr.msk.bf16.gmra.mrb[44].mxu0 %vm822_vm0, %v17179_v46 }
 0x1f3   : > { %13990 = vmatprep.mubr.msk.bf16.mxu0 %vm822_vm0, %v17181_v48 }
 0x1fa   : > { %13991 = vmatmul.mubr.msk.bf16.gmra.mrb[48].mxu0 %vm822_vm0, %v17193_v52 }
 0x1fb   : > { %13994 = vmatprep.mubr.msk.bf16.mxu0 %vm822_vm0, %v17195_v54 }
 0x202   : > { %13995 = vmatmul.mubr.msk.bf16.gmra.mrb[52].mxu0 %vm822_vm0, %v17201_v56 }
 0x203   : > { %13998 = vmatprep.mubr.msk.bf16.mxu0 %vm822_vm0, %v17203_v59 }
 0x20a   : > { %13999 = vmatmul.mubr.msk.bf16.gmra.mrb[56].mxu0 %vm822_vm0, %v17209_v61 }
 0x20b   : > { %14002 = vmatprep.mubr.msk.bf16.mxu0 %vm822_vm0, %v17211_v63 }
 0x212   : > { %14003 = vmatmul.mubr.msk.bf16.gmra.mrb[60].mxu0 %vm822_vm0, %v17217_v1 }
 0x213   : > { %14006 = vmatprep.mubr.msk.bf16.mxu0 %vm822_vm0, %v17219_v2 }
 0x21a   : > { %14007 = vmatmul.mubr.msk.bf16.gmra.mrb[64].mxu0 %vm822_vm0, %v17225_v3 }
 0x21b   : > { %14010 = vmatprep.mubr.msk.bf16.mxu0 %vm822_vm0, %v17227_v4 }
 0x222   : > { %14011 = vmatmul.mubr.msk.bf16.gmra.mrb[68].mxu0 %vm822_vm0, %v17233_v5 }
 0x223   : > { %14014 = vmatprep.mubr.msk.bf16.mxu0 %vm822_vm0, %v17235_v6 }
 0x22a   : > { %14015 = vmatmul.mubr.msk.bf16.gmra.mrb[72].mxu0 %vm822_vm0, %v17241_v7 }
 0x22b   : > { %14018 = vmatprep.mubr.msk.bf16.mxu0 %vm822_vm0, %v17243_v8 }
 0x232   : > { %14019 = vmatmul.mubr.msk.bf16.gmra.mrb[76].mxu0 %vm822_vm0, %v17249_v10 }
 0x233   : > { %14022 = vmatprep.mubr.msk.bf16.mxu0 %vm822_vm0, %v17251_v11 }
 0x23a   : > { %14023 = vmatmul.mubr.msk.bf16.gmra.mrb[80].mxu0 %vm822_vm0, %v17257_v12 }
 0x23b   : > { %14026 = vmatprep.mubr.msk.bf16.mxu0 %vm822_vm0, %v17259_v13 }
 0x242   : > { %14027 = vmatmul.mubr.msk.bf16.gmra.mrb[84].mxu0 %vm822_vm0, %v17265_v14 }
 0x243   : > { %14030 = vmatprep.mubr.msk.bf16.mxu0 %vm822_vm0, %v17267_v15 }
 0x24a   : > { %14031 = vmatmul.mubr.msk.bf16.gmra.mrb[88].mxu0 %vm822_vm0, %v17273_v16 }
 0x24b   : > { %14034 = vmatprep.mubr.msk.bf16.mxu0 %vm822_vm0, %v17275_v17 }
 0x252   : > { %14035 = vmatmul.mubr.msk.bf16.gmra.mrb[92].mxu0 %vm822_vm0, %v17281_v18 }
 0x253   : > { %14038 = vmatprep.mubr.msk.bf16.mxu0 %vm822_vm0, %v17283_v19 }
 0x25a   : > { %14039 = vmatmul.mubr.msk.bf16.gmra.mrb[96].mxu0 %vm822_vm0, %v17289_v20 }
 0x25b   : > { %14042 = vmatprep.mubr.msk.bf16.mxu0 %vm822_vm0, %v17291_v21 }
 0x262   : > { %14043 = vmatmul.mubr.msk.bf16.gmra.mrb[100].mxu0 %vm822_vm0, %v17297_v22 }
 0x263   : > { %14046 = vmatprep.mubr.msk.bf16.mxu0 %vm822_vm0, %v17299_v23 }
 0x26a   : > { %14047 = vmatmul.mubr.msk.bf16.gmra.mrb[104].mxu0 %vm822_vm0, %v17305_v24 }
 0x26b   : > { %14050 = vmatprep.mubr.msk.bf16.mxu0 %vm822_vm0, %v17440_v41 }
 0x272   : > { %14051 = vmatmul.mubr.msk.bf16.gmra.mrb[108].mxu0 %vm822_vm0, %v17446_v42 }
 0x273   : > { %14066 = vmatprep.mubr.msk.bf16.mxu0 %vm822_vm0, %v4372_v43  ;;  %v5507_v43 = vsel %vm1634_vm1, %v16496_v39, 0 }
 0x27a   : > { %14067 = vmatmul.mubr.msk.bf16.vlgmr.msra.gmra.mrb[0].mxu0 %vm822_vm0, %v4373_v44  ;;  %v16498_v44 = vld [vmem:[%s20705_s1 + $0x44] sm:$0xff]  }
 0x27b   : > { %14179 = vmatpush3.bf16.msra.mxu0 %v16489_v40  ;;  %14070 = vmatprep.mubr.msk.bf16.mxu0 %vm822_vm0, %v17451_v27  ;;  %v16497_v40 = vld [vmem:[%s20705_s1 + $0x3c] sm:$0xff]  }
 0x27c   : > { %14180 = vmatprep.subr.bf16.mxu0 %v16490_v28  ;;  %13562 = vmatprep.subr.bf16.mxu1 %v16497_v40 }
 0x27d   : > { %13563 = vmatpush3.bf16.msra.mxu1 %v16497_v40  ;;  %v16582_v40 = vld [vmem:[#allocation2 + $0x38] sm:$0xff] }
 0x27e   : > { %13564 = vmatprep.subr.bf16.mxu1 %v16498_v44 }
 0x27f   : > { %14181 = vmatpush3.bf16.msra.mxu0 %v16490_v28  ;;  %v16499_v28 = vld [vmem:[%s20705_s1 + $0x4c] sm:$0xff]  }
 0x280   : > { %14182 = vmatprep.subr.bf16.mxu0 %v16491_v29 }
 0x281   : > { %13565 = vmatpush3.bf16.msra.mxu1 %v16498_v44  ;;  %v16585_v44 = vld [vmem:[#allocation2 + $0x48] sm:$0xff] }
 0x282   : > { %14071 = vmatmul.mubr.msk.bf16.gmra.mrb[4].mxu0 %vm822_vm0, %v17462_v30  ;;  %13566 = vmatprep.subr.bf16.mxu1 %v16499_v28 }
 0x283   : > { %14074 = vmatprep.mubr.msk.bf16.mxu0 %vm822_vm0, %v17464_v33  ;;  %14183 = vmatpush3.bf16.msra.mxu0 %v16491_v29  ;;  %v16500_v29 = vld [vmem:[%s20705_s1 + $0x54] ss:$0 sps:$4 sm:$0x33]  }
 0x284   : > { %14184 = vmatprep.subr.bf16.mxu0 %v16492_v50 }
 0x285   : > { %13567 = vmatpush3.bf16.msra.mxu1 %v16499_v28  ;;  %v16586_v28 = vld [vmem:[#allocation2 + $0x50] sm:$0xff] }
 0x286   : > { %15938 = vmatprep.subr.msk.bf16.mxu1 %vm1634_vm1, %v16500_v29 }
 0x287   : > { %14185 = vmatpush3.bf16.msra.mxu0 %v16492_v50  ;;  %v1636_v50 = vsel %vm1634_vm1, %v16500_v29, 0  ;;  %v16590_v29 = vld [vmem:[#allocation2 + $0x70] sm:$0xff] }
 0x288   : > { %14186 = vmatprep.subr.bf16.mxu0 %v16493_v31 }
 0x289   : > { %13569 = vmatpush3.bf16.msra.mxu1 %v1636_v50  ;;  %v17810_v50 = vld [vmem:[#allocation2 + $0xa8] sm:$0xff] }
 0x28a   : > { %14075 = vmatmul.mubr.msk.bf16.gmra.mrb[8].mxu0 %vm822_vm0, %v17473_v25 }
 0x28b   : > { %14078 = vmatprep.mubr.msk.bf16.mxu0 %vm822_vm0, %v17475_v26  ;;  %14187 = vmatpush3.bf16.msra.mxu0 %v16493_v31  ;;  %v16574_v31 = vld [vmem:[#allocation2 + $0x18] sm:$0xff] }
 0x28c   : > { %15944 = vmatprep.subr.msk.bf16.mxu0 %vm1634_vm1, %v16496_v39  ;;  %13571 = vmatmul.mubr.msk.bf16.vlgmr.msra.gmra.mrb[0].mxu1 %vm822_vm0, %v16574_v31  ;;  %v16579_v39 = vld [vmem:[#allocation2 + $0x30] sm:$0xff] }
 0x28d   : > { %13574 = vmatprep.mubr.msk.bf16.mxu1 %vm822_vm0, %v16575_v37  ;;  %v17816_v31 = vld [vmem:[#allocation2 + $0xb0] sm:$0xff]  ;;  %v17824_v37 = vld [vmem:[#allocation2 + $0x198] sm:$0xff] }
 0x28f   : > { %14189 = vmatpush3.bf16.msra.mxu0 %v5507_v43  ;;  %v16583_v43 = vld [vmem:[#allocation2 + $0x40] sm:$0xff] }
 0x292   : > { %14079 = vmatmul.mubr.msk.bf16.gmra.mrb[12].mxu0 %vm822_vm0, %v17484_v35 }
 0x293   : > { %14082 = vmatprep.mubr.msk.bf16.mxu0 %vm822_vm0, %v17486_v36 }
 0x294   : > { %13575 = vmatmul.mubr.msk.bf16.gmra.mrb[4].mxu1 %vm822_vm0, %v16578_v38  ;;  %v17832_v38 = vld [vmem:[#allocation2 + $0xc0] sm:$0xff] }
 0x295   : > { %13578 = vmatprep.mubr.msk.bf16.mxu1 %vm822_vm0, %v16579_v39  ;;  %v17840_v39 = vld [vmem:[#allocation2 + $0x1a8] sm:$0xff] }
 0x29a   : > { %14083 = vmatmul.mubr.msk.bf16.gmra.mrb[16].mxu0 %vm822_vm0, %v17005_v47 }
 0x29b   : > { %14086 = vmatprep.mubr.msk.bf16.mxu0 %vm822_vm0, %v17008_v49 }
 0x29c   : > { %13579 = vmatmul.mubr.msk.bf16.gmra.mrb[8].mxu1 %vm822_vm0, %v16582_v40  ;;  %v16506_v40 = vld [vmem:[%s20705_s1 + $0x130] ss:$0 sps:$4 sm:$0x33]  }
 0x29d   : > { %13582 = vmatprep.mubr.msk.bf16.mxu1 %vm822_vm0, %v16583_v43  ;;  %v6372_v43 = vsel %vm1634_vm1, %v16506_v40, 0 }
 0x2a2   : > { %14087 = vmatmul.mubr.msk.bf16.gmra.mrb[20].mxu0 %vm822_vm0, %v17017_v51 }
 0x2a3   : > { %14090 = vmatprep.mubr.msk.bf16.mxu0 %vm822_vm0, %v17020_v53 }
 0x2a4   : > { %13583 = vmatmul.mubr.msk.bf16.gmra.mrb[12].mxu1 %vm822_vm0, %v16585_v44  ;;  %v17871_v44 = vld [vmem:[#allocation2 + $0x1c8] sm:$0xff] }
 0x2a5   : > { %13586 = vmatprep.mubr.msk.bf16.mxu1 %vm822_vm0, %v16586_v28  ;;  %v17987_v28 = vld [vmem:[#allocation2 + $0x1d0] sm:$0xff] }
 0x2aa   : > { %14091 = vmatmul.mubr.msk.bf16.gmra.mrb[24].mxu0 %vm822_vm0, %v17029_v55 }
 0x2ab   : > { %14094 = vmatprep.mubr.msk.bf16.mxu0 %vm822_vm0, %v17032_v57 }
 0x2b2   : > { %14095 = vmatmul.mubr.msk.bf16.gmra.mrb[28].mxu0 %vm822_vm0, %v17041_v60 }
 0x2b3   : > { %14098 = vmatprep.mubr.msk.bf16.mxu0 %vm822_vm0, %v17044_v62 }
 0x2ba   : > { %14099 = vmatmul.mubr.msk.bf16.gmra.mrb[32].mxu0 %vm822_vm0, %v17053_v0 }
 0x2bb   : > { %14102 = vmatprep.mubr.msk.bf16.mxu0 %vm822_vm0, %v17162_v32  ;;  %v16573_v32 = vld [vmem:[%s20705_s1] sm:$0xff]  }
 0x2bc   : > { %14950 = vmatprep.subr.bf16.mxu1 %v16573_v32 }
 0x2bd   : > { %14956 = vmatpush3.bf16.msra.mxu1 %v16573_v32  ;;  %v17812_v32 = vld [vmem:[#allocation2 + $0x190] sm:$0xff] }
 0x2c2   : > { %14103 = vmatmul.mubr.msk.bf16.gmra.mrb[36].mxu0 %vm822_vm0, %v17171_v34  ;;  %v16576_v34 = vld [vmem:[%s20705_s1 + $0x8] sm:$0xff]  }
 0x2c3   : > { %14106 = vmatprep.mubr.msk.bf16.mxu0 %vm822_vm0, %v17173_v45  ;;  %14951 = vmatprep.subr.bf16.mxu1 %v16576_v34  ;;  %v16577_v45 = vld [vmem:[%s20705_s1 + $0x10] sm:$0xff]  }
 0x2c4   : > { %14957 = vmatpush3.bf16.msra.mxu1 %v16576_v34  ;;  %v17826_v34 = vld [vmem:[#allocation2 + $0xb8] sm:$0xff] }
 0x2c5   : > { %14952 = vmatprep.subr.bf16.mxu1 %v16577_v45 }
 0x2c8   : > { %14958 = vmatpush3.bf16.msra.mxu1 %v16577_v45  ;;  %v17828_v45 = vld [vmem:[#allocation2 + $0x1a0] sm:$0xff] }
 0x2ca   : > { %14107 = vmatmul.mubr.msk.bf16.gmra.mrb[40].mxu0 %vm822_vm0, %v17179_v46  ;;  %v16580_v46 = vld [vmem:[%s20705_s1 + $0x18] sm:$0xff]  }
 0x2cb   : > { %14110 = vmatprep.mubr.msk.bf16.mxu0 %vm822_vm0, %v17181_v48  ;;  %14953 = vmatprep.subr.bf16.mxu1 %v16580_v46  ;;  %v16581_v48 = vld [vmem:[%s20705_s1 + $0x20] sm:$0xff]  }
 0x2cc   : > { %14959 = vmatpush3.bf16.msra.mxu1 %v16580_v46  ;;  %v17842_v46 = vld [vmem:[#allocation2 + $0xc8] sm:$0xff] }
 0x2cd   : > { %14954 = vmatprep.subr.bf16.mxu1 %v16581_v48 }
 0x2d0   : > { %14960 = vmatpush3.bf16.msra.mxu1 %v16581_v48  ;;  %v17844_v48 = vld [vmem:[#allocation2 + $0x1b0] sm:$0xff] }
 0x2d2   : > { %14111 = vmatmul.mubr.msk.bf16.gmra.mrb[44].mxu0 %vm822_vm0, %v17193_v52  ;;  %v16584_v52 = vld [vmem:[%s20705_s1 + $0x28] ss:$0 sps:$4 sm:$0x33]  }
 0x2d3   : > { %14114 = vmatprep.mubr.msk.bf16.mxu0 %vm822_vm0, %v17195_v54  ;;  %15940 = vmatprep.subr.msk.bf16.mxu1 %vm1634_vm1, %v16584_v52  ;;  %v17579_v54 = vld [vmem:[%s20705_s1 + $0x108] sm:$0xff]   ;;  %v17859_v52 = vld [vmem:[#allocation2 + $0x1b8] sm:$0xff] }
 0x2d4   : > { %14302 = vmatprep.subr.bf16.mxu0 %v17579_v54  ;;  %14961 = vmatpush3.bf16.msra.mxu1 %v16892_v9  ;;  %v16589_v9 = vld [vmem:[#allocation2 + $0x68] sm:$0xff] }
 0x2da   : > { %14115 = vmatmul.mubr.msk.bf16.gmra.mrb[48].mxu0 %vm822_vm0, %v17201_v56  ;;  %v16587_v56 = vld [vmem:[#allocation2 + $0x58] sm:$0xff] }
 0x2db   : > { %14118 = vmatprep.mubr.msk.bf16.mxu0 %vm822_vm0, %v17203_v59  ;;  %13587 = vmatmul.mubr.msk.bf16.gmra.mrb[16].mxu1 %vm822_vm0, %v16587_v56  ;;  %v16588_v59 = vld [vmem:[#allocation2 + $0x60] sm:$0xff] }
 0x2dc   : > { %13590 = vmatprep.mubr.msk.bf16.mxu1 %vm822_vm0, %v16588_v59 }
 0x2e2   : > { %14119 = vmatmul.mubr.msk.bf16.gmra.mrb[52].mxu0 %vm822_vm0, %v17209_v61  ;;  %v16591_v61 = vld [vmem:[#allocation2 + $0x78] sm:$0xff] }
 0x2e3   : > { %14122 = vmatprep.mubr.msk.bf16.mxu0 %vm822_vm0, %v17211_v63  ;;  %13591 = vmatmul.mubr.msk.bf16.gmra.mrb[20].mxu1 %vm822_vm0, %v16589_v9  ;;  %v16592_v63 = vld [vmem:[#allocation2 + $0x80] sm:$0xff] }
 0x2e4   : > { %13594 = vmatprep.mubr.msk.bf16.mxu1 %vm822_vm0, %v16590_v29 }
 0x2ea   : > { %14123 = vmatmul.mubr.msk.bf16.gmra.mrb[56].mxu0 %vm822_vm0, %v17217_v1  ;;  %v17699_v1 = vld [vmem:[#allocation2 + $0x118] sm:$0xff] }
 0x2eb   : > { %14126 = vmatprep.mubr.msk.bf16.mxu0 %vm822_vm0, %v17219_v2  ;;  %13595 = vmatmul.mubr.msk.bf16.gmra.mrb[24].mxu1 %vm822_vm0, %v16591_v61  ;;  %v17701_v2 = vld [vmem:[#allocation2 + $0x120] sm:$0xff]  ;;  %v18003_v61 = vld [vmem:[#allocation2 + $0x1d8] sm:$0xff] }
 0x2ec   : > { %13598 = vmatprep.mubr.msk.bf16.mxu1 %vm822_vm0, %v16592_v63 }
 0x2f2   : > { %14127 = vmatmul.mubr.msk.bf16.gmra.mrb[60].mxu0 %vm822_vm0, %v17225_v3  ;;  %v17705_v3 = vld [vmem:[#allocation2 + $0x1f0] sm:$0xff] }
 0x2f3   : > { %14130 = vmatprep.mubr.msk.bf16.mxu0 %vm822_vm0, %v17227_v4  ;;  %13599 = vmatmul.mubr.msk.bf16.gmra.mrb[28].mxu1 %vm822_vm0, %v17005_v47  ;;  %v17641_v47 = vld [vmem:[#allocation2 + $0xd0] sm:$0xff]  ;;  %v17713_v4 = vld [vmem:[#allocation2 + $0x128] sm:$0xff] }
 0x2f4   : > { %13602 = vmatprep.mubr.msk.bf16.mxu1 %vm822_vm0, %v17008_v49  ;;  %v17651_v49 = vld [vmem:[#allocation2 + $0xd8] sm:$0xff] }
 0x2fa   : > { %14131 = vmatmul.mubr.msk.bf16.gmra.mrb[64].mxu0 %vm822_vm0, %v17233_v5  ;;  %v17715_v5 = vld [vmem:[#allocation2 + $0x1f8] sm:$0xff] }
 0x2fb   : > { %14134 = vmatprep.mubr.msk.bf16.mxu0 %vm822_vm0, %v17235_v6  ;;  %13603 = vmatmul.mubr.msk.bf16.gmra.mrb[32].mxu1 %vm822_vm0, %v17017_v51  ;;  %v17653_v51 = vld [vmem:[#allocation2 + $0xe0] sm:$0xff]  ;;  %v17717_v6 = vld [vmem:[#allocation2 + $0x130] sm:$0xff] }
 0x2fc   : > { %13606 = vmatprep.mubr.msk.bf16.mxu1 %vm822_vm0, %v17020_v53  ;;  %v17663_v53 = vld [vmem:[#allocation2 + $0xe8] sm:$0xff] }
 0x302   : > { %14135 = vmatmul.mubr.msk.bf16.gmra.mrb[68].mxu0 %vm822_vm0, %v17241_v7  ;;  %v17727_v7 = vld [vmem:[#allocation2 + $0x138] sm:$0xff] }
 0x303   : > { %14138 = vmatprep.mubr.msk.bf16.mxu0 %vm822_vm0, %v17243_v8  ;;  %13607 = vmatmul.mubr.msk.bf16.gmra.mrb[36].mxu1 %vm822_vm0, %v17029_v55  ;;  %v17665_v55 = vld [vmem:[#allocation2 + $0xf0] sm:$0xff]  ;;  %v17729_v8 = vld [vmem:[#allocation2 + $0x140] sm:$0xff] }
 0x304   : > { %13610 = vmatprep.mubr.msk.bf16.mxu1 %vm822_vm0, %v17032_v57  ;;  %v17675_v57 = vld [vmem:[#allocation2 + $0xf8] sm:$0xff] }
 0x30a   : > { %14139 = vmatmul.mubr.msk.bf16.gmra.mrb[72].mxu0 %vm822_vm0, %v17249_v10  ;;  %v16502_v10 = vld [vmem:[%s20705_s1 + $0x110] sm:$0xff]  }
 0x30b   : > { %14142 = vmatprep.mubr.msk.bf16.mxu0 %vm822_vm0, %v17251_v11  ;;  %13611 = vmatmul.mubr.msk.bf16.gmra.mrb[40].mxu1 %vm822_vm0, %v17041_v60  ;;  %v17677_v60 = vld [vmem:[#allocation2 + $0x100] sm:$0xff]  ;;  %v16503_v11 = vld [vmem:[%s20705_s1 + $0x118] sm:$0xff]  }
 0x30c   : > { %13614 = vmatprep.mubr.msk.bf16.mxu1 %vm822_vm0, %v17044_v62  ;;  %v17687_v62 = vld [vmem:[#allocation2 + $0x108] sm:$0xff] }
 0x312   : > { %14143 = vmatmul.mubr.msk.bf16.gmra.mrb[76].mxu0 %vm822_vm0, %v17257_v12  ;;  %v17746_v12 = vld [vmem:[#allocation2 + $0x148] sm:$0xff] }
 0x313   : > { %14146 = vmatprep.mubr.msk.bf16.mxu0 %vm822_vm0, %v17259_v13  ;;  %13615 = vmatmul.mubr.msk.bf16.gmra.mrb[44].mxu1 %vm822_vm0, %v17053_v0  ;;  %v17689_v0 = vld [vmem:[#allocation2 + $0x110] sm:$0xff] }
 0x314   : > { %13618 = vmatprep.mubr.msk.bf16.mxu1 %vm822_vm0, %v17641_v47  ;;  %v17748_v13 = vld [vmem:[#allocation2 + $0x150] sm:$0xff] }
 0x31a   : > { %14147 = vmatmul.mubr.msk.bf16.gmra.mrb[80].mxu0 %vm822_vm0, %v17265_v14  ;;  %v16504_v14 = vld [vmem:[%s20705_s1 + $0x120] sm:$0xff]  }
 0x31b   : > { %14150 = vmatprep.mubr.msk.bf16.mxu0 %vm822_vm0, %v17267_v15  ;;  %13619 = vmatmul.mubr.msk.bf16.gmra.mrb[48].mxu1 %vm822_vm0, %v17651_v49  ;;  %v17761_v15 = vld [vmem:[#allocation2 + $0x158] sm:$0xff] }
 0x31c   : > { %13622 = vmatprep.mubr.msk.bf16.mxu1 %vm822_vm0, %v17653_v51 }
 0x322   : > { %14151 = vmatmul.mubr.msk.bf16.gmra.mrb[84].mxu0 %vm822_vm0, %v17273_v16  ;;  %v17763_v16 = vld [vmem:[#allocation2 + $0x160] sm:$0xff] }
 0x323   : > { %14154 = vmatprep.mubr.msk.bf16.mxu0 %vm822_vm0, %v17275_v17  ;;  %13623 = vmatmul.mubr.msk.bf16.gmra.mrb[52].mxu1 %vm822_vm0, %v17663_v53  ;;  %v16505_v17 = vld [vmem:[%s20705_s1 + $0x128] sm:$0xff]  }
 0x324   : > { %13626 = vmatprep.mubr.msk.bf16.mxu1 %vm822_vm0, %v17665_v55 }
 0x32a   : > { %14155 = vmatmul.mubr.msk.bf16.gmra.mrb[88].mxu0 %vm822_vm0, %v17281_v18  ;;  %v17776_v18 = vld [vmem:[#allocation2 + $0x168] sm:$0xff] }
 0x32b   : > { %14158 = vmatprep.mubr.msk.bf16.mxu0 %vm822_vm0, %v17283_v19  ;;  %13627 = vmatmul.mubr.msk.bf16.gmra.mrb[56].mxu1 %vm822_vm0, %v17675_v57  ;;  %v17778_v19 = vld [vmem:[#allocation2 + $0x88] sm:$0xff] }
 0x32c   : > { %13630 = vmatprep.mubr.msk.bf16.mxu1 %vm822_vm0, %v17677_v60 }
 0x332   : > { %14159 = vmatmul.mubr.msk.bf16.gmra.mrb[92].mxu0 %vm822_vm0, %v17289_v20  ;;  %v17780_v20 = vld [vmem:[#allocation2 + $0x170] sm:$0xff] }
 0x333   : > { %14162 = vmatprep.mubr.msk.bf16.mxu0 %vm822_vm0, %v17291_v21  ;;  %13631 = vmatmul.mubr.msk.bf16.gmra.mrb[60].mxu1 %vm822_vm0, %v17687_v62  ;;  %v17784_v21 = vld [vmem:[#allocation2 + $0x90] sm:$0xff] }
 0x334   : > { %13634 = vmatprep.mubr.msk.bf16.mxu1 %vm822_vm0, %v17689_v0 }
 0x33a   : > { %14163 = vmatmul.mubr.msk.bf16.gmra.mrb[96].mxu0 %vm822_vm0, %v17297_v22  ;;  %v17792_v22 = vld [vmem:[#allocation2 + $0x178] sm:$0xff] }
 0x33b   : > { %14166 = vmatprep.mubr.msk.bf16.mxu0 %vm822_vm0, %v17299_v23  ;;  %13635 = vmatmul.mubr.msk.bf16.gmra.mrb[64].mxu1 %vm822_vm0, %v17699_v1  ;;  %v17794_v23 = vld [vmem:[#allocation2 + $0x98] sm:$0xff] }
 0x33c   : > { %13638 = vmatprep.mubr.msk.bf16.mxu1 %vm822_vm0, %v17701_v2 }
 0x342   : > { %14167 = vmatmul.mubr.msk.bf16.gmra.mrb[100].mxu0 %vm822_vm0, %v17305_v24  ;;  %v17796_v24 = vld [vmem:[#allocation2 + $0x180] sm:$0xff] }
 0x343   : > { %14170 = vmatprep.mubr.msk.bf16.mxu0 %vm822_vm0, %v17440_v41  ;;  %13639 = vmatmul.mubr.msk.bf16.gmra.mrb[68].mxu1 %vm822_vm0, %v17713_v4 }
 0x344   : > { %13642 = vmatprep.mubr.msk.bf16.mxu1 %vm822_vm0, %v17717_v6 }
 0x34a   : > { %14171 = vmatmul.mubr.msk.bf16.gmra.mrb[104].mxu0 %vm822_vm0, %v17446_v42 }
 0x34b   : > { %14174 = vmatprep.mubr.msk.bf16.mxu0 %vm822_vm0, %v17705_v3  ;;  %13643 = vmatmul.mubr.msk.bf16.gmra.mrb[72].mxu1 %vm822_vm0, %v17727_v7 }
 0x34c   : > { %13646 = vmatprep.mubr.msk.bf16.mxu1 %vm822_vm0, %v17729_v8 }
 0x352   : > { %14175 = vmatmul.mubr.msk.bf16.gmra.mrb[108].mxu0 %vm822_vm0, %v17715_v5 }
 0x353   : > { %14190 = vmatprep.mubr.msk.bf16.mxu0 %vm822_vm0, %v17451_v27  ;;  %13647 = vmatmul.mubr.msk.bf16.gmra.mrb[76].mxu1 %vm822_vm0, %v17746_v12  ;;  %v17800_v27 = vld [vmem:[#allocation2 + $0xa0] sm:$0xff] }
 0x354   : > { %13650 = vmatprep.mubr.msk.bf16.mxu1 %vm822_vm0, %v17748_v13 }
 0x35a   : > { %14191 = vmatmul.mubr.msk.bf16.vlgmr.msra.gmra.mrb[0].mxu0 %vm822_vm0, %v17462_v30  ;;  %v17808_v30 = vld [vmem:[#allocation2 + $0x188] sm:$0xff] }
 0x35b   : > { %14303 = vmatpush3.bf16.msra.mxu0 %v17579_v54  ;;  %14194 = vmatprep.mubr.msk.bf16.mxu0 %vm822_vm0, %v17464_v33  ;;  %v17861_v54 = vld [vmem:[#allocation2 + $0x1c0] sm:$0xff] }
 0x35c   : > { %14304 = vmatprep.subr.bf16.mxu0 %v16502_v10  ;;  %13651 = vmatmul.mubr.msk.bf16.gmra.mrb[80].mxu1 %vm822_vm0, %v17761_v15 }
 0x35d   : > { %13654 = vmatprep.mubr.msk.bf16.mxu1 %vm822_vm0, %v17763_v16 }
 0x35f   : > { %14305 = vmatpush3.bf16.msra.mxu0 %v16502_v10  ;;  %v17993_v56 = vpop.f32.mrb[0].mxu1 }
 0x360   : > { %14306 = vmatprep.subr.bf16.mxu0 %v16503_v11  ;;  %v17997_v59 = vpop.f32.mrb[1].mxu1 }
 0x361   : > { %v17999_v9 = vpop.f32.mrb[2].mxu1 }
 0x362   : > { %14195 = vmatmul.mubr.msk.bf16.gmra.mrb[4].mxu0 %vm822_vm0, %v17473_v25  ;;  %v18001_v29 = vpop.f32.mrb[3].mxu1 }
 0x363   : > { %14198 = vmatprep.mubr.msk.bf16.mxu0 %vm822_vm0, %v17475_v26  ;;  %14307 = vmatpush3.bf16.msra.mxu0 %v16503_v11 }
 0x364   : > { %14308 = vmatprep.subr.bf16.mxu0 %v16504_v14  ;;  %13655 = vmatmul.mubr.msk.bf16.gmra.mrb[84].mxu1 %vm822_vm0, %v17776_v18 }
 0x365   : > { %13658 = vmatprep.mubr.msk.bf16.mxu1 %vm822_vm0, %v17780_v20 }
 0x367   : > { %14309 = vmatpush3.bf16.msra.mxu0 %v16504_v14  ;;  %v18009_v63 = vpop.f32.mrb[4].mxu1 }
 0x368   : > { %14310 = vmatprep.subr.bf16.mxu0 %v16505_v17  ;;  %v18013_v10 = vpop.f32.mrb[5].mxu1 }
 0x369   : > { %20940 = vst [vmem:[#allocation6_spill] sm:$0xff] %v18013_v10  ;;  %v18015_v11 = vpop.f32.mrb[6].mxu1 }
 0x36a   : > { %14199 = vmatmul.mubr.msk.bf16.gmra.mrb[8].mxu0 %vm822_vm0, %v17484_v35  ;;  %20941 = vst [vmem:[#allocation7_spill] sm:$0xff] %v18015_v11  ;;  %v18017_v14 = vpop.f32.mrb[7].mxu1 }
 0x36b   : > { %14202 = vmatprep.mubr.msk.bf16.mxu0 %vm822_vm0, %v17486_v36  ;;  %14311 = vmatpush3.bf16.msra.mxu0 %v16505_v17  ;;  %20942 = vst [vmem:[#allocation8_spill] sm:$0xff] %v18017_v14 }
 0x36c   : > { %13659 = vmatmul.mubr.msk.bf16.gmra.mrb[88].mxu1 %vm822_vm0, %v17792_v22  ;;  %15945 = vmatprep.subr.msk.bf16.mxu0 %vm1634_vm1, %v16506_v40 }
 0x36d   : > { %13662 = vmatprep.mubr.msk.bf16.mxu1 %vm822_vm0, %v17796_v24 }
 0x36f   : > { %14313 = vmatpush3.bf16.msra.mxu0 %v6372_v43  ;;  %v18021_v17 = vpop.f32.mrb[8].mxu1 }
 0x370   : > { %20943 = vst [vmem:[#allocation9_spill] sm:$0xff] %v18021_v17  ;;  %v18025_v40 = vpop.f32.mrb[9].mxu1 }
 0x371   : > { %20944 = vst [vmem:[#allocation10_spill] sm:$0xff] %v18025_v40  ;;  %v18027_v43 = vpop.f32.mrb[10].mxu1  ;;  %v18045_v40 = vld [vmem:[#allocation2 + $0x208] sm:$0xff] }
 0x372   : > { %14203 = vmatmul.mubr.msk.bf16.gmra.mrb[12].mxu0 %vm822_vm0, %v17778_v19  ;;  %20945 = vst [vmem:[#allocation11_spill] sm:$0xff] %v18027_v43  ;;  %v18029_v58 = vpop.f32.mrb[11].mxu1 }
 0x373   : > { %14206 = vmatprep.mubr.msk.bf16.mxu0 %vm822_vm0, %v17784_v21  ;;  %20946 = vst [vmem:[#allocation12_spill] sm:$0xff] %v18029_v58 }
 0x374   : > { %13663 = vmatmul.mubr.msk.bf16.gmra.mrb[92].mxu1 %vm822_vm0, %v17808_v30 }
 0x375   : > { %13666 = vmatprep.mubr.msk.bf16.mxu1 %vm822_vm0, %v17812_v32 }
 0x377   : > { %v18035_v14 = vpop.f32.mrb[12].mxu1 }
 0x378   : > { %20947 = vst [vmem:[#allocation13_spill] sm:$0xff] %v18035_v14 }
 0x37a   : > { %14207 = vmatmul.mubr.msk.bf16.gmra.mrb[16].mxu0 %vm822_vm0, %v17794_v23 }
 0x37b   : > { %14210 = vmatprep.mubr.msk.bf16.mxu0 %vm822_vm0, %v17800_v27 }
 0x37c   : > { %13667 = vmatmul.mubr.msk.bf16.gmra.mrb[96].mxu1 %vm822_vm0, %v17824_v37 }
 0x37d   : > { %13670 = vmatprep.mubr.msk.bf16.mxu1 %vm822_vm0, %v17828_v45 }
 0x382   : > { %14211 = vmatmul.mubr.msk.bf16.gmra.mrb[20].mxu0 %vm822_vm0, %v17810_v50 }
 0x383   : > { %14214 = vmatprep.mubr.msk.bf16.mxu0 %vm822_vm0, %v17816_v31 }
 0x384   : > { %13671 = vmatmul.mubr.msk.bf16.gmra.mrb[100].mxu1 %vm822_vm0, %v17840_v39 }
 0x385   : > { %13674 = vmatprep.mubr.msk.bf16.mxu1 %vm822_vm0, %v17844_v48 }
 0x38a   : > { %14215 = vmatmul.mubr.msk.bf16.gmra.mrb[24].mxu0 %vm822_vm0, %v17826_v34 }
 0x38b   : > { %14218 = vmatprep.mubr.msk.bf16.mxu0 %vm822_vm0, %v17832_v38 }
 0x38c   : > { %13675 = vmatmul.mubr.msk.bf16.gmra.mrb[104].mxu1 %vm822_vm0, %v17859_v52 }
 0x38d   : > { %13678 = vmatprep.mubr.msk.bf16.mxu1 %vm822_vm0, %v17861_v54 }
 0x392   : > { %14219 = vmatmul.mubr.msk.bf16.gmra.mrb[28].mxu0 %vm822_vm0, %v17842_v46 }
 0x393   : > { %14222 = vmatprep.mubr.msk.bf16.mxu0 %vm822_vm0, %v17641_v47 }
 0x394   : > { %13679 = vmatmul.mubr.msk.bf16.gmra.mrb[108].mxu1 %vm822_vm0, %v17871_v44 }
 0x395   : > { %13746 = vmatprep.mubr.msk.bf16.mxu1 %vm822_vm0, %v17641_v47 }
 0x39a   : > { %14223 = vmatmul.mubr.msk.bf16.gmra.mrb[32].mxu0 %vm822_vm0, %v17651_v49 }
 0x39b   : > { %14226 = vmatprep.mubr.msk.bf16.mxu0 %vm822_vm0, %v17653_v51 }
 0x39c   : > { %13747 = vmatmul.mubr.msk.bf16.vlgmr.msra.gmra.mrb[52].mxu1 %vm822_vm0, %v17651_v49 }
 0x39d   : > { %13750 = vmatprep.mubr.msk.bf16.mxu1 %vm822_vm0, %v17653_v51 }
 0x3a2   : > { %14227 = vmatmul.mubr.msk.bf16.gmra.mrb[36].mxu0 %vm822_vm0, %v17663_v53 }
 0x3a3   : > { %14230 = vmatprep.mubr.msk.bf16.mxu0 %vm822_vm0, %v17665_v55 }
 0x3a4   : > { %13751 = vmatmul.mubr.msk.bf16.gmra.mrb[56].mxu1 %vm822_vm0, %v17663_v53 }
 0x3a5   : > { %13754 = vmatprep.mubr.msk.bf16.mxu1 %vm822_vm0, %v17665_v55 }
 0x3aa   : > { %14231 = vmatmul.mubr.msk.bf16.gmra.mrb[40].mxu0 %vm822_vm0, %v17675_v57 }
 0x3ab   : > { %14234 = vmatprep.mubr.msk.bf16.mxu0 %vm822_vm0, %v17677_v60 }
 0x3ac   : > { %13755 = vmatmul.mubr.msk.bf16.gmra.mrb[60].mxu1 %vm822_vm0, %v17675_v57 }
 0x3ad   : > { %13758 = vmatprep.mubr.msk.bf16.mxu1 %vm822_vm0, %v17677_v60 }
 0x3b2   : > { %14235 = vmatmul.mubr.msk.bf16.gmra.mrb[44].mxu0 %vm822_vm0, %v17687_v62 }
 0x3b3   : > { %14238 = vmatprep.mubr.msk.bf16.mxu0 %vm822_vm0, %v17689_v0 }
 0x3b4   : > { %13759 = vmatmul.mubr.msk.bf16.gmra.mrb[64].mxu1 %vm822_vm0, %v17687_v62 }
 0x3b5   : > { %13762 = vmatprep.mubr.msk.bf16.mxu1 %vm822_vm0, %v17689_v0 }
 0x3ba   : > { %14239 = vmatmul.mubr.msk.bf16.gmra.mrb[48].mxu0 %vm822_vm0, %v17699_v1 }
 0x3bb   : > { %14242 = vmatprep.mubr.msk.bf16.mxu0 %vm822_vm0, %v17701_v2 }
 0x3bc   : > { %13763 = vmatmul.mubr.msk.bf16.gmra.mrb[68].mxu1 %vm822_vm0, %v17699_v1 }
 0x3bd   : > { %13766 = vmatprep.mubr.msk.bf16.mxu1 %vm822_vm0, %v17701_v2 }
 0x3c2   : > { %14243 = vmatmul.mubr.msk.bf16.gmra.mrb[52].mxu0 %vm822_vm0, %v17713_v4 }
 0x3c3   : > { %14246 = vmatprep.mubr.msk.bf16.mxu0 %vm822_vm0, %v17717_v6 }
 0x3c4   : > { %13767 = vmatmul.mubr.msk.bf16.gmra.mrb[72].mxu1 %vm822_vm0, %v17713_v4 }
 0x3c5   : > { %13770 = vmatprep.mubr.msk.bf16.mxu1 %vm822_vm0, %v17717_v6 }
 0x3ca   : > { %14247 = vmatmul.mubr.msk.bf16.gmra.mrb[56].mxu0 %vm822_vm0, %v17727_v7 }
 0x3cb   : > { %14250 = vmatprep.mubr.msk.bf16.mxu0 %vm822_vm0, %v17729_v8 }
 0x3cc   : > { %13771 = vmatmul.mubr.msk.bf16.gmra.mrb[76].mxu1 %vm822_vm0, %v17727_v7 }
 0x3cd   : > { %13774 = vmatprep.mubr.msk.bf16.mxu1 %vm822_vm0, %v17729_v8 }
 0x3d2   : > { %14251 = vmatmul.mubr.msk.bf16.gmra.mrb[60].mxu0 %vm822_vm0, %v17746_v12 }
 0x3d3   : > { %14254 = vmatprep.mubr.msk.bf16.mxu0 %vm822_vm0, %v17748_v13 }
 0x3d4   : > { %13775 = vmatmul.mubr.msk.bf16.gmra.mrb[80].mxu1 %vm822_vm0, %v17746_v12 }
 0x3d5   : > { %13778 = vmatprep.mubr.msk.bf16.mxu1 %vm822_vm0, %v17748_v13 }
 0x3da   : > { %14255 = vmatmul.mubr.msk.bf16.gmra.mrb[64].mxu0 %vm822_vm0, %v17761_v15 }
 0x3db   : > { %14258 = vmatprep.mubr.msk.bf16.mxu0 %vm822_vm0, %v17763_v16 }
 0x3dc   : > { %13779 = vmatmul.mubr.msk.bf16.gmra.mrb[84].mxu1 %vm822_vm0, %v17761_v15 }
 0x3dd   : > { %13782 = vmatprep.mubr.msk.bf16.mxu1 %vm822_vm0, %v17763_v16 }
 0x3e2   : > { %14259 = vmatmul.mubr.msk.bf16.gmra.mrb[68].mxu0 %vm822_vm0, %v17776_v18 }
 0x3e3   : > { %14262 = vmatprep.mubr.msk.bf16.mxu0 %vm822_vm0, %v17780_v20 }
 0x3e4   : > { %13783 = vmatmul.mubr.msk.bf16.gmra.mrb[88].mxu1 %vm822_vm0, %v17776_v18 }
 0x3e5   : > { %13786 = vmatprep.mubr.msk.bf16.mxu1 %vm822_vm0, %v17780_v20 }
 0x3ea   : > { %14263 = vmatmul.mubr.msk.bf16.gmra.mrb[72].mxu0 %vm822_vm0, %v17792_v22 }
 0x3eb   : > { %14266 = vmatprep.mubr.msk.bf16.mxu0 %vm822_vm0, %v17796_v24 }
 0x3ec   : > { %13787 = vmatmul.mubr.msk.bf16.gmra.mrb[92].mxu1 %vm822_vm0, %v17792_v22 }
 0x3ed   : > { %13790 = vmatprep.mubr.msk.bf16.mxu1 %vm822_vm0, %v17796_v24 }
 0x3f2   : > { %14267 = vmatmul.mubr.msk.bf16.gmra.mrb[76].mxu0 %vm822_vm0, %v17808_v30 }
 0x3f3   : > { %14270 = vmatprep.mubr.msk.bf16.mxu0 %vm822_vm0, %v17812_v32 }
 0x3f4   : > { %13791 = vmatmul.mubr.msk.bf16.gmra.mrb[96].mxu1 %vm822_vm0, %v17808_v30 }
 0x3f5   : > { %13794 = vmatprep.mubr.msk.bf16.mxu1 %vm822_vm0, %v17812_v32 }
 0x3fa   : > { %14271 = vmatmul.mubr.msk.bf16.gmra.mrb[80].mxu0 %vm822_vm0, %v17824_v37 }
 0x3fb   : > { %14274 = vmatprep.mubr.msk.bf16.mxu0 %vm822_vm0, %v17828_v45 }
 0x3fc   : > { %13795 = vmatmul.mubr.msk.bf16.gmra.mrb[100].mxu1 %vm822_vm0, %v17824_v37 }
 0x3fd   : > { %13798 = vmatprep.mubr.msk.bf16.mxu1 %vm822_vm0, %v17828_v45 }
 0x402   : > { %14275 = vmatmul.mubr.msk.bf16.gmra.mrb[84].mxu0 %vm822_vm0, %v17840_v39 }
 0x403   : > { %14278 = vmatprep.mubr.msk.bf16.mxu0 %vm822_vm0, %v17844_v48 }
 0x404   : > { %13799 = vmatmul.mubr.msk.bf16.gmra.mrb[104].mxu1 %vm822_vm0, %v17840_v39 }
 0x405   : > { %13802 = vmatprep.mubr.msk.bf16.mxu1 %vm822_vm0, %v17844_v48 }
 0x40a   : > { %14279 = vmatmul.mubr.msk.bf16.gmra.mrb[88].mxu0 %vm822_vm0, %v17859_v52 }
 0x40b   : > { %14282 = vmatprep.mubr.msk.bf16.mxu0 %vm822_vm0, %v17861_v54 }
 0x40c   : > { %13803 = vmatmul.mubr.msk.bf16.gmra.mrb[108].mxu1 %vm822_vm0, %v17859_v52 }
 0x412   : > { %14283 = vmatmul.mubr.msk.bf16.gmra.mrb[92].mxu0 %vm822_vm0, %v17871_v44 }
 0x413   : > { %14286 = vmatprep.mubr.msk.bf16.mxu0 %vm822_vm0, %v17987_v28 }
 0x41a   : > { %14287 = vmatmul.mubr.msk.bf16.gmra.mrb[96].mxu0 %vm822_vm0, %v18003_v61 }
 0x41b   : > { %14290 = vmatprep.mubr.msk.bf16.mxu0 %vm822_vm0, %v17440_v41  ;;  %v18031_v41 = vld [vmem:[#allocation2 + $0x200] sm:$0xff] }
 0x422   : > { %14291 = vmatmul.mubr.msk.bf16.gmra.mrb[100].mxu0 %vm822_vm0, %v17446_v42  ;;  %v18039_v42 = vpop.f32.mrb[13].mxu1 }
 0x423   : > { %14294 = vmatprep.mubr.msk.bf16.mxu0 %vm822_vm0, %v17705_v3  ;;  %20948 = vst [vmem:[#allocation14_spill] sm:$0xff] %v18039_v42  ;;  %v18041_v17 = vpop.f32.mrb[14].mxu1 }
 0x424   : > { %20949 = vst [vmem:[#allocation15_spill] sm:$0xff] %v18041_v17  ;;  %v18043_v11 = vpop.f32.mrb[15].mxu1 }
 0x425   : > { %20950 = vst [vmem:[#allocation16_spill] sm:$0xff] %v18043_v11  ;;  %v18049_v58 = vpop.f32.mrb[16].mxu1 }
 0x426   : > { %20951 = vst [vmem:[#allocation17_spill] sm:$0xff] %v18049_v58  ;;  %v18053_v14 = vpop.f32.mrb[17].mxu1 }
 0x427   : > { %v18055_v43 = vpop.f32.mrb[18].mxu1 }
 0x428   : > { %v18057_v10 = vpop.f32.mrb[19].mxu1 }
 0x429   : > { %20952 = vst [vmem:[#allocation18_spill] sm:$0xff] %v18057_v10  ;;  %v18061_v11 = vpop.f32.mrb[20].mxu1 }
 0x42a   : > { %14295 = vmatmul.mubr.msk.bf16.gmra.mrb[104].mxu0 %vm822_vm0, %v17715_v5  ;;  %20953 = vst [vmem:[#allocation19_spill] sm:$0xff] %v18061_v11  ;;  %v18065_v17 = vpop.f32.mrb[21].mxu1 }
 0x42b   : > { %14298 = vmatprep.mubr.msk.bf16.mxu0 %vm822_vm0, %v18031_v41  ;;  %v18067_v58 = vpop.f32.mrb[22].mxu1 }
 0x42c   : > { %v18069_v42 = vpop.f32.mrb[23].mxu1 }
 0x42d   : > { %20954 = vst [vmem:[#allocation20_spill] sm:$0xff] %v18069_v42 }
 0x432   : > { %14299 = vmatmul.mubr.msk.bf16.gmra.mrb[108].mxu0 %vm822_vm0, %v18045_v40 }
 0x433   : > { %14314 = vmatprep.mubr.msk.bf16.mxu0 %vm822_vm0, %v17464_v33  ;;  %v18073_v33 = vpop.f32.mrb[24].mxu1 }
 0x434   : > { %20955 = vst [vmem:[#allocation21_spill] sm:$0xff] %v18073_v33 }
 0x43a   : > { %14315 = vmatmul.mubr.msk.bf16.vlgmr.msra.gmra.mrb[0].mxu0 %vm822_vm0, %v17473_v25  ;;  %v18077_v25 = vpop.f32.mrb[25].mxu1 }
 0x43b   : > { %14318 = vmatprep.mubr.msk.bf16.mxu0 %vm822_vm0, %v17475_v26  ;;  %v18079_v11 = vpop.f32.mrb[26].mxu1 }
 0x43c   : > { %v18081_v10 = vpop.f32.mrb[27].mxu1 }
 0x43d   : > { %20956 = vst [vmem:[#allocation22_spill] sm:$0xff] %v18081_v10  ;;  %v18085_v26 = vpop.f32.mrb[28].mxu1 }
 0x43e   : > { %20957 = vst [vmem:[#allocation23_spill] sm:$0xff] %v18085_v26 }
 0x442   : > { %14319 = vmatmul.mubr.msk.bf16.gmra.mrb[4].mxu0 %vm822_vm0, %v17484_v35  ;;  %v18089_v35 = vpop.f32.mrb[29].mxu1 }
 0x443   : > { %14322 = vmatprep.mubr.msk.bf16.mxu0 %vm822_vm0, %v17486_v36  ;;  %v18091_v33 = vpop.f32.mrb[30].mxu1 }
 0x444   : > { %v18093_v42 = vpop.f32.mrb[31].mxu1 }
 0x445   : > { %20958 = vst [vmem:[#allocation24_spill] sm:$0xff] %v18093_v42  ;;  %v18097_v36 = vpop.f32.mrb[32].mxu1 }
 0x446   : > { %20959 = vst [vmem:[#allocation25_spill] sm:$0xff] %v18097_v36 }
 0x44a   : > { %14323 = vmatmul.mubr.msk.bf16.gmra.mrb[8].mxu0 %vm822_vm0, %v17778_v19  ;;  %v18101_v19 = vpop.f32.mrb[33].mxu1 }
 0x44b   : > { %14326 = vmatprep.mubr.msk.bf16.mxu0 %vm822_vm0, %v17784_v21  ;;  %v18103_v26 = vpop.f32.mrb[34].mxu1 }
 0x44c   : > { %v18105_v10 = vpop.f32.mrb[35].mxu1 }
 0x44d   : > { %20960 = vst [vmem:[#allocation26_spill] sm:$0xff] %v18105_v10  ;;  %v18109_v21 = vpop.f32.mrb[36].mxu1 }
 0x44e   : > { %20961 = vst [vmem:[#allocation27_spill] sm:$0xff] %v18109_v21 }
 0x452   : > { %14327 = vmatmul.mubr.msk.bf16.gmra.mrb[12].mxu0 %vm822_vm0, %v17794_v23  ;;  %v18113_v23 = vpop.f32.mrb[37].mxu1 }
 0x453   : > { %14330 = vmatprep.mubr.msk.bf16.mxu0 %vm822_vm0, %v17800_v27  ;;  %v18115_v36 = vpop.f32.mrb[38].mxu1 }
 0x454   : > { %v18117_v42 = vpop.f32.mrb[39].mxu1 }
 0x455   : > { %20962 = vst [vmem:[#allocation28_spill] sm:$0xff] %v18117_v42  ;;  %v18121_v27 = vpop.f32.mrb[40].mxu1 }
 0x456   : > { %20963 = vst [vmem:[#allocation29_spill] sm:$0xff] %v18121_v27 }
 0x45a   : > { %14331 = vmatmul.mubr.msk.bf16.gmra.mrb[16].mxu0 %vm822_vm0, %v17810_v50  ;;  %v18125_v50 = vpop.f32.mrb[41].mxu1 }
 0x45b   : > { %14334 = vmatprep.mubr.msk.bf16.mxu0 %vm822_vm0, %v17816_v31  ;;  %v18127_v21 = vpop.f32.mrb[42].mxu1 }
 0x45c   : > { %v18129_v10 = vpop.f32.mrb[43].mxu1 }
 0x45d   : > { %20964 = vst [vmem:[#allocation30_spill] sm:$0xff] %v18129_v10  ;;  %v18133_v31 = vpop.f32.mrb[44].mxu1 }
 0x45e   : > { %20965 = vst [vmem:[#allocation31_spill] sm:$0xff] %v18133_v31 }
 0x462   : > { %14335 = vmatmul.mubr.msk.bf16.gmra.mrb[20].mxu0 %vm822_vm0, %v17826_v34  ;;  %v18137_v34 = vpop.f32.mrb[45].mxu1 }
 0x463   : > { %14338 = vmatprep.mubr.msk.bf16.mxu0 %vm822_vm0, %v17832_v38  ;;  %v18139_v27 = vpop.f32.mrb[46].mxu1 }
 0x464   : > { %v18141_v42 = vpop.f32.mrb[47].mxu1 }
 0x465   : > { %20966 = vst [vmem:[#allocation32_spill] sm:$0xff] %v18141_v42  ;;  %v18145_v38 = vpop.f32.mrb[48].mxu1 }
 0x466   : > { %20967 = vst [vmem:[#allocation33_spill] sm:$0xff] %v18145_v38 }
 0x46a   : > { %14339 = vmatmul.mubr.msk.bf16.gmra.mrb[24].mxu0 %vm822_vm0, %v17842_v46  ;;  %v18149_v46 = vpop.f32.mrb[49].mxu1 }
 0x46b   : > { %14342 = vmatprep.mubr.msk.bf16.mxu0 %vm822_vm0, %v17641_v47  ;;  %v18151_v31 = vpop.f32.mrb[50].mxu1 }
 0x46c   : > { %v18153_v10 = vpop.f32.mrb[51].mxu1 }
 0x46d   : > { %20968 = vst [vmem:[#allocation34_spill] sm:$0xff] %v18153_v10 }
 0x46f   : > { %v18157_v47 = vpop.f32.mrb[52].mxu1 }
 0x470   : > { %20969 = vst [vmem:[#allocation35_spill] sm:$0xff] %v18157_v47 }
 0x472   : > { %14343 = vmatmul.mubr.msk.bf16.gmra.mrb[28].mxu0 %vm822_vm0, %v17651_v49  ;;  %v18161_v49 = vpop.f32.mrb[53].mxu1 }
 0x473   : > { %14346 = vmatprep.mubr.msk.bf16.mxu0 %vm822_vm0, %v17653_v51  ;;  %v18163_v38 = vpop.f32.mrb[54].mxu1 }
 0x474   : > { %v18165_v42 = vpop.f32.mrb[55].mxu1 }
 0x475   : > { %20970 = vst [vmem:[#allocation36_spill] sm:$0xff] %v18165_v42 }
 0x477   : > { %v18169_v51 = vpop.f32.mrb[56].mxu1 }
 0x478   : > { %20971 = vst [vmem:[#allocation37_spill] sm:$0xff] %v18169_v51 }
 0x47a   : > { %14347 = vmatmul.mubr.msk.bf16.gmra.mrb[32].mxu0 %vm822_vm0, %v17663_v53  ;;  %v18173_v53 = vpop.f32.mrb[57].mxu1 }
 0x47b   : > { %14350 = vmatprep.mubr.msk.bf16.mxu0 %vm822_vm0, %v17665_v55  ;;  %v18175_v47 = vpop.f32.mrb[58].mxu1 }
 0x47c   : > { %v18177_v10 = vpop.f32.mrb[59].mxu1 }
 0x47d   : > { %20972 = vst [vmem:[#allocation38_spill] sm:$0xff] %v18177_v10 }
 0x47f   : > { %v18181_v55 = vpop.f32.mrb[60].mxu1 }
 0x480   : > { %20973 = vst [vmem:[#allocation39_spill] sm:$0xff] %v18181_v55 }
 0x482   : > { %14351 = vmatmul.mubr.msk.bf16.gmra.mrb[36].mxu0 %vm822_vm0, %v17675_v57  ;;  %v18185_v57 = vpop.f32.mrb[61].mxu1 }
 0x483   : > { %14354 = vmatprep.mubr.msk.bf16.mxu0 %vm822_vm0, %v17677_v60  ;;  %v18187_v51 = vpop.f32.mrb[62].mxu1 }
 0x484   : > { %v18189_v42 = vpop.f32.mrb[63].mxu1 }
 0x485   : > { %20974 = vst [vmem:[#allocation40_spill] sm:$0xff] %v18189_v42 }
 0x487   : > { %v18193_v60 = vpop.f32.mrb[64].mxu1 }
 0x488   : > { %20975 = vst [vmem:[#allocation41_spill] sm:$0xff] %v18193_v60 }
 0x48a   : > { %14355 = vmatmul.mubr.msk.bf16.gmra.mrb[40].mxu0 %vm822_vm0, %v17687_v62  ;;  %v18197_v62 = vpop.f32.mrb[65].mxu1 }
 0x48b   : > { %14358 = vmatprep.mubr.msk.bf16.mxu0 %vm822_vm0, %v17689_v0  ;;  %v18199_v55 = vpop.f32.mrb[66].mxu1 }
 0x48c   : > { %v18201_v10 = vpop.f32.mrb[67].mxu1 }
 0x48d   : > { %20976 = vst [vmem:[#allocation42_spill] sm:$0xff] %v18201_v10 }
 0x48f   : > { %v18205_v0 = vpop.f32.mrb[68].mxu1 }
 0x490   : > { %20977 = vst [vmem:[#allocation43_spill] sm:$0xff] %v18205_v0 }
 0x492   : > { %14359 = vmatmul.mubr.msk.bf16.gmra.mrb[44].mxu0 %vm822_vm0, %v17699_v1  ;;  %v18209_v1 = vpop.f32.mrb[69].mxu1 }
 0x493   : > { %14362 = vmatprep.mubr.msk.bf16.mxu0 %vm822_vm0, %v17701_v2  ;;  %v18211_v60 = vpop.f32.mrb[70].mxu1 }
 0x494   : > { %v18213_v42 = vpop.f32.mrb[71].mxu1 }
 0x495   : > { %20978 = vst [vmem:[#allocation44_spill] sm:$0xff] %v18213_v42 }
 0x497   : > { %v18217_v2 = vpop.f32.mrb[72].mxu1 }
 0x498   : > { %20979 = vst [vmem:[#allocation45_spill] sm:$0xff] %v18217_v2 }
 0x49a   : > { %14363 = vmatmul.mubr.msk.bf16.gmra.mrb[48].mxu0 %vm822_vm0, %v17713_v4  ;;  %v18221_v4 = vpop.f32.mrb[73].mxu1 }
 0x49b   : > { %14366 = vmatprep.mubr.msk.bf16.mxu0 %vm822_vm0, %v17717_v6  ;;  %v18223_v0 = vpop.f32.mrb[74].mxu1 }
 0x49c   : > { %v18225_v10 = vpop.f32.mrb[75].mxu1 }
 0x49d   : > { %20980 = vst [vmem:[#allocation46_spill] sm:$0xff] %v18225_v10 }
 0x49f   : > { %v18229_v6 = vpop.f32.mrb[76].mxu1 }
 0x4a0   : > { %20981 = vst [vmem:[#allocation47_spill] sm:$0xff] %v18229_v6 }
 0x4a2   : > { %14367 = vmatmul.mubr.msk.bf16.gmra.mrb[52].mxu0 %vm822_vm0, %v17727_v7  ;;  %v18233_v7 = vpop.f32.mrb[77].mxu1 }
 0x4a3   : > { %14370 = vmatprep.mubr.msk.bf16.mxu0 %vm822_vm0, %v17729_v8  ;;  %v18235_v2 = vpop.f32.mrb[78].mxu1 }
 0x4a4   : > { %v18237_v42 = vpop.f32.mrb[79].mxu1 }
 0x4a5   : > { %20982 = vst [vmem:[#allocation48_spill] sm:$0xff] %v18237_v42 }
 0x4a7   : > { %v18241_v8 = vpop.f32.mrb[80].mxu1 }
 0x4a8   : > { %20983 = vst [vmem:[#allocation49_spill] sm:$0xff] %v18241_v8 }
 0x4aa   : > { %14371 = vmatmul.mubr.msk.bf16.gmra.mrb[56].mxu0 %vm822_vm0, %v17746_v12  ;;  %v18245_v12 = vpop.f32.mrb[81].mxu1 }
 0x4ab   : > { %14374 = vmatprep.mubr.msk.bf16.mxu0 %vm822_vm0, %v17748_v13  ;;  %20984 = vst [vmem:[#allocation50_spill] sm:$0xff] %v18245_v12  ;;  %v18247_v6 = vpop.f32.mrb[82].mxu1 }
 0x4ac   : > { %20985 = vst [vmem:[#allocation51_spill] sm:$0xff] %v18247_v6  ;;  %v18249_v10 = vpop.f32.mrb[83].mxu1 }
 0x4ad   : > { %20986 = vst [vmem:[#allocation52_spill] sm:$0xff] %v18249_v10 }
 0x4af   : > { %v18253_v13 = vpop.f32.mrb[84].mxu1 }
 0x4b0   : > { %20987 = vst [vmem:[#allocation53_spill] sm:$0xff] %v18253_v13 }
 0x4b2   : > { %14375 = vmatmul.mubr.msk.bf16.gmra.mrb[60].mxu0 %vm822_vm0, %v17761_v15  ;;  %v18257_v15 = vpop.f32.mrb[85].mxu1 }
 0x4b3   : > { %14378 = vmatprep.mubr.msk.bf16.mxu0 %vm822_vm0, %v17763_v16  ;;  %20988 = vst [vmem:[#allocation54_spill] sm:$0xff] %v18257_v15  ;;  %v18259_v8 = vpop.f32.mrb[86].mxu1 }
 0x4b4   : > { %20989 = vst [vmem:[#allocation55_spill] sm:$0xff] %v18259_v8  ;;  %v18261_v42 = vpop.f32.mrb[87].mxu1 }
 0x4b5   : > { %20990 = vst [vmem:[#allocation56_spill] sm:$0xff] %v18261_v42 }
 0x4b7   : > { %v18265_v16 = vpop.f32.mrb[88].mxu1 }
 0x4b8   : > { %20991 = vst [vmem:[#allocation57_spill] sm:$0xff] %v18265_v16 }
 0x4ba   : > { %14379 = vmatmul.mubr.msk.bf16.gmra.mrb[64].mxu0 %vm822_vm0, %v17776_v18  ;;  %v18269_v18 = vpop.f32.mrb[89].mxu1 }
 0x4bb   : > { %14382 = vmatprep.mubr.msk.bf16.mxu0 %vm822_vm0, %v17780_v20  ;;  %20992 = vst [vmem:[#allocation58_spill] sm:$0xff] %v18269_v18  ;;  %v18271_v13 = vpop.f32.mrb[90].mxu1 }
 0x4bc   : > { %20993 = vst [vmem:[#allocation59_spill] sm:$0xff] %v18271_v13  ;;  %v18273_v10 = vpop.f32.mrb[91].mxu1 }
 0x4bd   : > { %20994 = vst [vmem:[#allocation60_spill] sm:$0xff] %v18273_v10 }
 0x4bf   : > { %v18277_v20 = vpop.f32.mrb[92].mxu1 }
 0x4c0   : > { %20995 = vst [vmem:[#allocation61_spill] sm:$0xff] %v18277_v20 }
 0x4c2   : > { %14383 = vmatmul.mubr.msk.bf16.gmra.mrb[68].mxu0 %vm822_vm0, %v17792_v22  ;;  %v18281_v22 = vpop.f32.mrb[93].mxu1 }
 0x4c3   : > { %14386 = vmatprep.mubr.msk.bf16.mxu0 %vm822_vm0, %v17796_v24  ;;  %20996 = vst [vmem:[#allocation62_spill] sm:$0xff] %v18281_v22  ;;  %v18283_v16 = vpop.f32.mrb[94].mxu1 }
 0x4c4   : > { %20997 = vst [vmem:[#allocation63_spill] sm:$0xff] %v18283_v16  ;;  %v18285_v42 = vpop.f32.mrb[95].mxu1 }
 0x4c5   : > { %20998 = vst [vmem:[#allocation64_spill] sm:$0xff] %v18285_v42 }
 0x4c7   : > { %v18289_v24 = vpop.f32.mrb[96].mxu1 }
 0x4c8   : > { %20999 = vst [vmem:[#allocation65_spill] sm:$0xff] %v18289_v24 }
 0x4ca   : > { %14387 = vmatmul.mubr.msk.bf16.gmra.mrb[72].mxu0 %vm822_vm0, %v17808_v30  ;;  %v18293_v30 = vpop.f32.mrb[97].mxu1 }
 0x4cb   : > { %14390 = vmatprep.mubr.msk.bf16.mxu0 %vm822_vm0, %v17812_v32  ;;  %21000 = vst [vmem:[#allocation66_spill] sm:$0xff] %v18293_v30  ;;  %v18295_v20 = vpop.f32.mrb[98].mxu1  ;;  %v21021_v30 = vld [vmem:[#allocation11_spill] sm:$0xff] }
 0x4cc   : > { %21001 = vst [vmem:[#allocation67_spill] sm:$0xff] %v18295_v20  ;;  %v18297_v10 = vpop.f32.mrb[99].mxu1 }
 0x4cd   : > { %21002 = vst [vmem:[#allocation68_spill] sm:$0xff] %v18297_v10 }
 0x4cf   : > { %v18301_v32 = vpop.f32.mrb[100].mxu1 }
 0x4d0   : > { %21003 = vst [vmem:[#allocation69_spill] sm:$0xff] %v18301_v32 }
 0x4d2   : > { %14391 = vmatmul.mubr.msk.bf16.gmra.mrb[76].mxu0 %vm822_vm0, %v17824_v37  ;;  %v18305_v37 = vpop.f32.mrb[101].mxu1 }
 0x4d3   : > { %14394 = vmatprep.mubr.msk.bf16.mxu0 %vm822_vm0, %v17828_v45  ;;  %21004 = vst [vmem:[#allocation70_spill] sm:$0xff] %v18305_v37  ;;  %v18307_v24 = vpop.f32.mrb[102].mxu1 }
 0x4d4   : > { %21005 = vst [vmem:[#allocation71_spill] sm:$0xff] %v18307_v24  ;;  %v18309_v42 = vpop.f32.mrb[103].mxu1 }
 0x4d5   : > { %21006 = vst [vmem:[#allocation72_spill] sm:$0xff] %v18309_v42 }
 0x4d7   : > { %v18313_v45 = vpop.f32.mrb[104].mxu1 }
 0x4d8   : > { %21007 = vst [vmem:[#allocation73_spill] sm:$0xff] %v18313_v45 }
 0x4da   : > { %14395 = vmatmul.mubr.msk.bf16.gmra.mrb[80].mxu0 %vm822_vm0, %v17840_v39  ;;  %v18317_v39 = vpop.f32.mrb[105].mxu1 }
 0x4db   : > { %14398 = vmatprep.mubr.msk.bf16.mxu0 %vm822_vm0, %v17844_v48  ;;  %21008 = vst [vmem:[#allocation74_spill] sm:$0xff] %v18317_v39  ;;  %v18319_v32 = vpop.f32.mrb[106].mxu1  ;;  %v16509_v39 = vld [vmem:[%s20707_s3 + $0x28] sm:$0x1f]  }
 0x4dc   : > { %21009 = vst [vmem:[#allocation75_spill] sm:$0xff] %v18319_v32  ;;  %v18321_v10 = vpop.f32.mrb[107].mxu1 }
 0x4dd   : > { %21010 = vst [vmem:[#allocation76_spill] sm:$0xff] %v18321_v10  ;;  %v6151_v10 = vld [vmem:[#allocation2 + $0x1e8] sm:$0xff] }
 0x4df   : > { %v18325_v48 = vpop.f32.mrb[108].mxu1 }
 0x4e0   : > { %21011 = vst [vmem:[#allocation77_spill] sm:$0xff] %v18325_v48 }
 0x4e2   : > { %14399 = vmatmul.mubr.msk.bf16.gmra.mrb[84].mxu0 %vm822_vm0, %v17859_v52  ;;  %v18329_v52 = vpop.f32.mrb[109].mxu1 }
 0x4e3   : > { %14402 = vmatprep.mubr.msk.bf16.mxu0 %vm822_vm0, %v17861_v54  ;;  %21012 = vst [vmem:[#allocation78_spill] sm:$0xff] %v18329_v52  ;;  %v18331_v45 = vpop.f32.mrb[110].mxu1  ;;  %v6150_v54 = vld [vmem:[#allocation2 + $0x1e0] sm:$0xff] }
 0x4e4   : > { %21013 = vst [vmem:[#allocation79_spill] sm:$0xff] %v18331_v45  ;;  %v18333_v42 = vpop.f32.mrb[111].mxu1 }
 0x4e5   : > { %21014 = vst [vmem:[#allocation80_spill] sm:$0xff] %v18333_v42  ;;  %v6157_v42 = vld [vmem:[#allocation2 + $0x218] sm:$0xff] }
 0x4ea   : > { %14403 = vmatmul.mubr.msk.bf16.gmra.mrb[88].mxu0 %vm822_vm0, %v17871_v44  ;;  %v6156_v44 = vld [vmem:[#allocation2 + $0x210] sm:$0xff] }
 0x4eb   : > { %14406 = vmatprep.mubr.msk.bf16.mxu0 %vm822_vm0, %v17987_v28 }
 0x4f2   : > { %14407 = vmatmul.mubr.msk.bf16.gmra.mrb[92].mxu0 %vm822_vm0, %v18003_v61  ;;  %v18351_v61 = vld [vmem:[%s20706_s2] ss:$0 sm:$0xff] }
 0x4f3   : > { %14410 = vmatprep.mubr.msk.bf16.mxu0 %vm822_vm0, %v6150_v54 }
 0x4fa   : > { %14411 = vmatmul.mubr.msk.bf16.gmra.mrb[96].mxu0 %vm822_vm0, %v6151_v10 }
 0x4fb   : > { %14414 = vmatprep.mubr.msk.bf16.mxu0 %vm822_vm0, %v17705_v3  ;;  %v16507_v3 = vld [vmem:[%s20707_s3 + $0x18] sm:$0xff]  }
 0x4fc   : > { %14426 = vmatprep.subr.bf16.mxu1 %v16507_v3 }
 0x4fd   : > { %14427 = vmatpush3.bf16.msra.mxu1 %v16507_v3 }
 0x502   : > { %14415 = vmatmul.mubr.msk.bf16.gmra.mrb[100].mxu0 %vm822_vm0, %v17715_v5 }
 0x503   : > { %14418 = vmatprep.mubr.msk.bf16.mxu0 %vm822_vm0, %v18031_v41 }
 0x50a   : > { %14419 = vmatmul.mubr.msk.bf16.gmra.mrb[104].mxu0 %vm822_vm0, %v18045_v40 }
 0x50b   : > { %14422 = vmatprep.mubr.msk.bf16.mxu0 %vm822_vm0, %v6156_v44 }
 0x50d   : > { %v14316_v28 = vpop.f32.mrb[0].mxu0 }
 0x50e   : > { %v14962_v5 = vadd.f32 %v14316_v28, %v17993_v56  ;;  %v6408_v10 = vpop.f32.mrb[1].mxu0 }
 0x50f   : > { %v14963_v41 = vadd.f32 %v6408_v10, %v17997_v59  ;;  %v14317_v54 = vpop.f32.mrb[2].mxu0 }
 0x510   : > { %v18359_v40 = vadd.f32 %v14962_v5, %v18351_v61  ;;  %v14964_v44 = vadd.f32 %v14317_v54, %v17999_v9  ;;  %v6411_v45 = vpop.f32.mrb[3].mxu0  ;;  %v16508_v9 = vld [vmem:[%s20707_s3 + $0x20] sm:$0xff]   ;;  %v21015_v5 = vmov 0   ;;  %v21016_v54 = vld [vmem:[#allocation6_spill] sm:$0xff] }
 0x511   : > { %v18363_v52 = vadd.f32 %v14963_v41, %v18351_v61  ;;  %v14965_v48 = vadd.f32 %v6411_v45, %v18001_v29  ;;  %836 = vst.msk [vmem:[#allocation3] sm:$0xff] %vm835_vm2, %v21015_v5  ;;  %837 = vst.msk [vmem:[#allocation3 + $0x8] sm:$0xff] %vm835_vm2, %v21015_v5  ;;  %14428 = vmatprep.subr.bf16.mxu1 %v16508_v9 }
 0x512   : > { %v18367_v56 = vadd.f32 %v14964_v44, %v18351_v61  ;;  %14423 = vmatmul.mubr.msk.bf16.gmra.mrb[108].mxu0 %vm822_vm0, %v6157_v42  ;;  %v20716_v28 = vmax.f32 %v18359_v40, 0.0  ;;  %838 = vst.msk [vmem:[#allocation3 + $0x10] sm:$0xff] %vm835_vm2, %v21015_v5  ;;  %839 = vst.msk [vmem:[#allocation3 + $0x18] sm:$0xff] %vm835_vm2, %v21015_v5  ;;  %14429 = vmatpush3.bf16.msra.mxu1 %v16508_v9 }
 0x513   : > { %v18371_v59 = vadd.f32 %v14965_v48, %v18351_v61  ;;  %840 = vst.msk [vmem:[#allocation3 + $0x100] sm:$0xff] %vm835_vm2, %v21015_v5  ;;  %841 = vst.msk [vmem:[#allocation3 + $0x108] sm:$0xff] %vm835_vm2, %v21015_v5  ;;  %v20717_v29 = vmax.f32 %v18363_v52, 0.0  ;;  %15946 = vmatprep.subr.msk.bf16.mxu1 %vm8014_vm3, %v16509_v39 }
 0x514   : > { %v20719_v3 = vmax.f32 %v18367_v56, 0.0  ;;  %842 = vst.msk [vmem:[#allocation3 + $0x110] sm:$0xff] %vm835_vm2, %v21015_v5  ;;  %843 = vst.msk [vmem:[#allocation3 + $0x118] sm:$0xff] %vm835_vm2, %v21015_v5 }
 0x515   : > { %844 = vst.msk [vmem:[#allocation4] sm:$0xff] %vm835_vm2, %v21015_v5  ;;  %845 = vst.msk [vmem:[#allocation4 + $0x8] sm:$0xff] %vm835_vm2, %v21015_v5  ;;  %v20718_v42 = vmax.f32 %v18371_v59, 0.0  ;;  %v14320_v45 = vpop.f32.mrb[4].mxu0 }
 0x516   : > { %846 = vst.msk [vmem:[#allocation4 + $0x80] sm:$0xff] %vm835_vm2, %v21015_v5  ;;  %847 = vst.msk [vmem:[#allocation4 + $0x88] sm:$0xff] %vm835_vm2, %v21015_v5  ;;  %v14966_v48 = vadd.f32 %v14320_v45, %v18009_v63  ;;  %v6424_v10 = vpop.f32.mrb[5].mxu0  ;;  %v15999_v41 = vpack.i.bf16 %v20719_v3, %v20716_v28  ;;  %v21017_v45 = vld [vmem:[#allocation7_spill] sm:$0xff]  ;;  %v21020_v3 = vld [vmem:[#allocation10_spill] sm:$0xff] }
 0x517   : > { %v14967_v44 = vadd.f32 %v6424_v10, %v21016_v54  ;;  %v14321_v32 = vpop.f32.mrb[6].mxu0  ;;  %v15989_v5 = vpack.i.bf16 %v20718_v42, %v20717_v29  ;;  %v21018_v54 = vld [vmem:[#allocation8_spill] sm:$0xff]  ;;  %v8016_v29 = vsel %vm8014_vm3, %v16509_v39, 0 }
 0x518   : > { %v18418_v63 = vadd.f32 %v14966_v48, %v18351_v61  ;;  %v14968_v24 = vadd.f32 %v14321_v32, %v21017_v45  ;;  %16000 = vrot.lane.b32.xlu1 %v15999_v41, %s16625_s21  ;;  %v6427_v9 = vpop.f32.mrb[7].mxu0  ;;  %14431 = vmatpush3.bf16.msra.mxu1 %v8016_v29 }
 0x519   : > { %v18423_v10 = vadd.f32 %v14967_v44, %v18351_v61  ;;  %v14969_v28 = vadd.f32 %v6427_v9, %v21018_v54  ;;  %15990 = vrot.lane.b32.xlu0 %v15989_v5, %s16625_s21  ;;  %v7872_v41 = vld [vmem:[#allocation3 + $0x10] sm:$0xff]  ;;  %v7873_v9 = vld [vmem:[#allocation3 + $0x18] sm:$0xff] }
 0x51a   : > { %v18430_v48 = vadd.f32 %v14968_v24, %v18351_v61  ;;  %v20722_v45 = vmax.f32 %v18418_v63, 0.0  ;;  %14432 = vmatprep.mubr.msk.bf16.mxu1 %vm835_vm2, %v7872_v41  ;;  %v21019_v24 = vld [vmem:[#allocation9_spill] sm:$0xff] }
 0x51b   : > { %v18433_v32 = vadd.f32 %v14969_v28, %v18351_v61  ;;  %v20720_v5 = vmax.f32 %v18423_v10, 0.0  ;;  %14433 = vmatmul.mubr.msk.bf16.vlgmr.msra.gmra.mrb[112].mxu1 %vm835_vm2, %v7873_v9 }
 0x51c   : > { %v20723_v44 = vmax.f32 %v18430_v48, 0.0 }
 0x51d   : > { %v20721_v54 = vmax.f32 %v18433_v32, 0.0  ;;  %v14324_v39 = vpop.f32.mrb[8].mxu0 }
 0x51e   : > { %v14970_v29 = vadd.f32 %v14324_v39, %v21019_v24  ;;  %v6440_v42 = vpop.f32.mrb[9].mxu0  ;;  %v16004_v28 = vpack.i.bf16 %v20723_v44, %v20722_v45  ;;  %v21022_v24 = vld [vmem:[#allocation12_spill] sm:$0xff] }
 0x51f   : > { %v14971_v37 = vadd.f32 %v6440_v42, %v21020_v3  ;;  %v14325_v20 = vpop.f32.mrb[10].mxu0  ;;  %v15994_v41 = vpack.i.bf16 %v20721_v54, %v20720_v5 }
 0x520   : > { %v14972_v16 = vadd.f32 %v14325_v20, %v21021_v30  ;;  %16005 = vrot.lane.b32.xlu1 %v16004_v28, %s16625_s21  ;;  %v6443_v9 = vpop.f32.mrb[11].mxu0  ;;  %v18465_v5 = vadd.f32 %v14970_v29, %v18351_v61  ;;  %v21025_v29 = vld [vmem:[#allocation15_spill] sm:$0xff] }
 0x521   : > { %v18454_v39 = vadd.f32 %v14971_v37, %v18351_v61  ;;  %v14973_v22 = vadd.f32 %v6443_v9, %v21022_v24  ;;  %15995 = vrot.lane.b32.xlu0 %v15994_v41, %s16625_s21  ;;  %v21023_v37 = vld [vmem:[#allocation13_spill] sm:$0xff]  ;;  %v21024_v41 = vld [vmem:[#allocation14_spill] sm:$0xff] }
 0x522   : > { %v18459_v3 = vadd.f32 %v14972_v16, %v18351_v61  ;;  %v20726_v18 = vmax.f32 %v18465_v5, 0.0 }
 0x523   : > { %v18462_v42 = vadd.f32 %v14973_v22, %v18351_v61  ;;  %v20724_v20 = vmax.f32 %v18454_v39, 0.0 }
 0x524   : > { %v20727_v9 = vmax.f32 %v18459_v3, 0.0 }
 0x525   : > { %v20725_v30 = vmax.f32 %v18462_v42, 0.0  ;;  %v14328_v28 = vpop.f32.mrb[12].mxu0 }
 0x526   : > { %v14974_v54 = vadd.f32 %v14328_v28, %v21023_v37  ;;  %v6456_v45 = vpop.f32.mrb[13].mxu0  ;;  %v21026_v28 = vld [vmem:[#allocation16_spill] sm:$0xff] }
 0x527   : > { %v14975_v24 = vadd.f32 %v6456_v45, %v21024_v41  ;;  %v14329_v16 = vpop.f32.mrb[14].mxu0  ;;  %v16009_v22 = vpack.i.bf16 %v20725_v30, %v20724_v20 }
 0x528   : > { %v14976_v44 = vadd.f32 %v14329_v16, %v21025_v29  ;;  %v6459_v13 = vpop.f32.mrb[15].mxu0  ;;  %v16014_v16 = vpack.i.bf16 %v20727_v9, %v20726_v18  ;;  %v18494_v29 = vadd.f32 %v14974_v54, %v18351_v61 }
 0x529   : > { %v18479_v8 = vadd.f32 %v14975_v24, %v18351_v61  ;;  %v14977_v37 = vadd.f32 %v6459_v13, %v21026_v28  ;;  %16010 = vrot.lane.b32.xlu0 %v16009_v22, %s16625_s21 }
 0x52a   : > { %v18484_v45 = vadd.f32 %v14976_v44, %v18351_v61  ;;  %21027 = vst [vmem:[#allocation6_spill] sm:$0xff] %v18494_v29  ;;  %v21028_v44 = vld [vmem:[#allocation17_spill] sm:$0xff]  ;;  %v20730_v6 = vmax.f32 %v18494_v29, 0.0 }
 0x52b   : > { %v18487_v41 = vadd.f32 %v14977_v37, %v18351_v61  ;;  %v20728_v24 = vmax.f32 %v18479_v8, 0.0 }
 0x52c   : > { %v20731_v37 = vmax.f32 %v18484_v45, 0.0 }
 0x52d   : > { %v20729_v13 = vmax.f32 %v18487_v41, 0.0  ;;  %v14332_v28 = vpop.f32.mrb[16].mxu0  ;;  %16015 = vrot.lane.b32.xlu0 %v16014_v16, %s16625_s21 }
 0x52e   : > { %v14978_v22 = vadd.f32 %v14332_v28, %v21028_v44  ;;  %v6472_v20 = vpop.f32.mrb[17].mxu0  ;;  %v21029_v28 = vld [vmem:[#allocation18_spill] sm:$0xff] }
 0x52f   : > { %v14979_v30 = vadd.f32 %v6472_v20, %v18053_v14  ;;  %v14333_v15 = vpop.f32.mrb[18].mxu0  ;;  %v16019_v54 = vpack.i.bf16 %v20729_v13, %v20728_v24 }
 0x530   : > { %v14980_v18 = vadd.f32 %v14333_v15, %v18055_v43  ;;  %v6475_v9 = vpop.f32.mrb[19].mxu0  ;;  %v16024_v43 = vpack.i.bf16 %v20731_v37, %v20730_v6  ;;  %v18524_v15 = vadd.f32 %v14978_v22, %v18351_v61 }
 0x531   : > { %v18509_v16 = vadd.f32 %v14979_v30, %v18351_v61  ;;  %v14981_v44 = vadd.f32 %v6475_v9, %v21029_v28  ;;  %16020 = vrot.lane.b32.xlu1 %v16019_v54, %s16625_s21 }
 0x532   : > { %v18514_v14 = vadd.f32 %v14980_v18, %v18351_v61  ;;  %21031 = vst [vmem:[#allocation8_spill] sm:$0xff] %v18524_v15  ;;  %v21032_v18 = vld [vmem:[#allocation19_spill] sm:$0xff]  ;;  %v20736_v29 = vmax.f32 %v18524_v15, 0.0 }
 0x533   : > { %v18517_v20 = vadd.f32 %v14981_v44, %v18351_v61  ;;  %v20733_v30 = vmax.f32 %v18509_v16, 0.0 }
 0x534   : > { %21030 = vst [vmem:[#allocation7_spill] sm:$0xff] %v18514_v14  ;;  %v20737_v44 = vmax.f32 %v18514_v14, 0.0 }
 0x535   : > { %v20734_v9 = vmax.f32 %v18517_v20, 0.0  ;;  %v14336_v28 = vpop.f32.mrb[20].mxu0  ;;  %16025 = vrot.lane.b32.xlu1 %v16024_v43, %s16625_s21 }
 0x536   : > { %v14982_v54 = vadd.f32 %v14336_v28, %v21032_v18  ;;  %v6488_v24 = vpop.f32.mrb[21].mxu0  ;;  %v21033_v28 = vld [vmem:[#allocation20_spill] sm:$0xff] }
 0x537   : > { %v14983_v13 = vadd.f32 %v6488_v24, %v18065_v17  ;;  %v14337_v12 = vpop.f32.mrb[22].mxu0  ;;  %v16029_v22 = vpack.i.bf16 %v20734_v9, %v20733_v30 }
 0x538   : > { %v14984_v6 = vadd.f32 %v14337_v12, %v18067_v58  ;;  %v6491_v37 = vpop.f32.mrb[23].mxu0  ;;  %v16034_v58 = vpack.i.bf16 %v20737_v44, %v20736_v29  ;;  %v18554_v12 = vadd.f32 %v14982_v54, %v18351_v61 }
 0x539   : > { %v18539_v43 = vadd.f32 %v14983_v13, %v18351_v61  ;;  %v14985_v18 = vadd.f32 %v6491_v37, %v21033_v28  ;;  %16030 = vrot.lane.b32.xlu0 %v16029_v22, %s16625_s21 }
 0x53a   : > { %v18544_v17 = vadd.f32 %v14984_v6, %v18351_v61  ;;  %21035 = vst [vmem:[#allocation10_spill] sm:$0xff] %v18554_v12  ;;  %v21036_v6 = vld [vmem:[#allocation21_spill] sm:$0xff]  ;;  %v20742_v14 = vmax.f32 %v18554_v12, 0.0 }
 0x53b   : > { %v18547_v24 = vadd.f32 %v14985_v18, %v18351_v61  ;;  %v20739_v13 = vmax.f32 %v18539_v43, 0.0 }
 0x53c   : > { %21034 = vst [vmem:[#allocation9_spill] sm:$0xff] %v18544_v17  ;;  %v20743_v18 = vmax.f32 %v18544_v17, 0.0 }
 0x53d   : > { %v20740_v37 = vmax.f32 %v18547_v24, 0.0  ;;  %v14340_v28 = vpop.f32.mrb[24].mxu0  ;;  %16035 = vrot.lane.b32.xlu0 %v16034_v58, %s16625_s21 }
 0x53e   : > { %v14986_v22 = vadd.f32 %v14340_v28, %v21036_v6  ;;  %v6504_v30 = vpop.f32.mrb[25].mxu0  ;;  %v21037_v28 = vld [vmem:[#allocation22_spill] sm:$0xff] }
 0x53f   : > { %v14987_v9 = vadd.f32 %v6504_v30, %v18077_v25  ;;  %v14341_v15 = vpop.f32.mrb[26].mxu0  ;;  %v16039_v54 = vpack.i.bf16 %v20740_v37, %v20739_v13 }
 0x540   : > { %v14988_v29 = vadd.f32 %v14341_v15, %v18079_v11  ;;  %v6507_v44 = vpop.f32.mrb[27].mxu0  ;;  %v16044_v11 = vpack.i.bf16 %v20743_v18, %v20742_v14  ;;  %v18584_v15 = vadd.f32 %v14986_v22, %v18351_v61 }
 0x541   : > { %v18569_v58 = vadd.f32 %v14987_v9, %v18351_v61  ;;  %v14989_v6 = vadd.f32 %v6507_v44, %v21037_v28  ;;  %16040 = vrot.lane.b32.xlu1 %v16039_v54, %s16625_s21 }
 0x542   : > { %v18574_v25 = vadd.f32 %v14988_v29, %v18351_v61  ;;  %21039 = vst [vmem:[#allocation12_spill] sm:$0xff] %v18584_v15  ;;  %v21040_v29 = vld [vmem:[#allocation23_spill] sm:$0xff]  ;;  %v20748_v17 = vmax.f32 %v18584_v15, 0.0 }
 0x543   : > { %v18577_v30 = vadd.f32 %v14989_v6, %v18351_v61  ;;  %v20745_v9 = vmax.f32 %v18569_v58, 0.0 }
 0x544   : > { %21038 = vst [vmem:[#allocation11_spill] sm:$0xff] %v18574_v25  ;;  %v20749_v6 = vmax.f32 %v18574_v25, 0.0 }
 0x545   : > { %v20746_v44 = vmax.f32 %v18577_v30, 0.0  ;;  %v14344_v28 = vpop.f32.mrb[28].mxu0  ;;  %16045 = vrot.lane.b32.xlu1 %v16044_v11, %s16625_s21 }
 0x546   : > { %v14990_v54 = vadd.f32 %v14344_v28, %v21040_v29  ;;  %v6520_v13 = vpop.f32.mrb[29].mxu0  ;;  %v21041_v28 = vld [vmem:[#allocation24_spill] sm:$0xff] }
 0x547   : > { %v14991_v37 = vadd.f32 %v6520_v13, %v18089_v35  ;;  %v14345_v12 = vpop.f32.mrb[30].mxu0  ;;  %v16049_v22 = vpack.i.bf16 %v20746_v44, %v20745_v9 }
 0x548   : > { %v14992_v14 = vadd.f32 %v14345_v12, %v18091_v33  ;;  %v6523_v18 = vpop.f32.mrb[31].mxu0  ;;  %v16054_v33 = vpack.i.bf16 %v20749_v6, %v20748_v17  ;;  %v18614_v12 = vadd.f32 %v14990_v54, %v18351_v61 }
 0x549   : > { %v18599_v11 = vadd.f32 %v14991_v37, %v18351_v61  ;;  %v14993_v29 = vadd.f32 %v6523_v18, %v21041_v28  ;;  %16050 = vrot.lane.b32.xlu0 %v16049_v22, %s16625_s21 }
 0x54a   : > { %v18604_v35 = vadd.f32 %v14992_v14, %v18351_v61  ;;  %21043 = vst [vmem:[#allocation14_spill] sm:$0xff] %v18614_v12  ;;  %v21044_v14 = vld [vmem:[#allocation25_spill] sm:$0xff]  ;;  %v20754_v25 = vmax.f32 %v18614_v12, 0.0 }
 0x54b   : > { %v18607_v13 = vadd.f32 %v14993_v29, %v18351_v61  ;;  %v20751_v37 = vmax.f32 %v18599_v11, 0.0 }
 0x54c   : > { %21042 = vst [vmem:[#allocation13_spill] sm:$0xff] %v18604_v35  ;;  %v20755_v29 = vmax.f32 %v18604_v35, 0.0 }
 0x54d   : > { %v20752_v18 = vmax.f32 %v18607_v13, 0.0  ;;  %v14348_v28 = vpop.f32.mrb[32].mxu0  ;;  %16055 = vrot.lane.b32.xlu0 %v16054_v33, %s16625_s21 }
 0x54e   : > { %v14994_v22 = vadd.f32 %v14348_v28, %v21044_v14  ;;  %v6536_v9 = vpop.f32.mrb[33].mxu0  ;;  %v21045_v28 = vld [vmem:[#allocation26_spill] sm:$0xff] }
 0x54f   : > { %v14995_v44 = vadd.f32 %v6536_v9, %v18101_v19  ;;  %v14349_v15 = vpop.f32.mrb[34].mxu0  ;;  %v16059_v54 = vpack.i.bf16 %v20752_v18, %v20751_v37 }
 0x550   : > { %v14996_v17 = vadd.f32 %v14349_v15, %v18103_v26  ;;  %v6539_v6 = vpop.f32.mrb[35].mxu0  ;;  %v16064_v26 = vpack.i.bf16 %v20755_v29, %v20754_v25  ;;  %v18644_v15 = vadd.f32 %v14994_v22, %v18351_v61 }
 0x551   : > { %v18629_v33 = vadd.f32 %v14995_v44, %v18351_v61  ;;  %v14997_v14 = vadd.f32 %v6539_v6, %v21045_v28  ;;  %16060 = vrot.lane.b32.xlu1 %v16059_v54, %s16625_s21 }
 0x552   : > { %v18634_v19 = vadd.f32 %v14996_v17, %v18351_v61  ;;  %21047 = vst [vmem:[#allocation16_spill] sm:$0xff] %v18644_v15  ;;  %v21048_v17 = vld [vmem:[#allocation27_spill] sm:$0xff]  ;;  %v20760_v35 = vmax.f32 %v18644_v15, 0.0 }
 0x553   : > { %v18637_v9 = vadd.f32 %v14997_v14, %v18351_v61  ;;  %v20757_v44 = vmax.f32 %v18629_v33, 0.0 }
 0x554   : > { %21046 = vst [vmem:[#allocation15_spill] sm:$0xff] %v18634_v19  ;;  %v20761_v14 = vmax.f32 %v18634_v19, 0.0 }
 0x555   : > { %v20758_v6 = vmax.f32 %v18637_v9, 0.0  ;;  %v14352_v28 = vpop.f32.mrb[36].mxu0  ;;  %16065 = vrot.lane.b32.xlu1 %v16064_v26, %s16625_s21 }
 0x556   : > { %v14998_v54 = vadd.f32 %v14352_v28, %v21048_v17  ;;  %v6552_v37 = vpop.f32.mrb[37].mxu0  ;;  %v21049_v28 = vld [vmem:[#allocation28_spill] sm:$0xff] }
 0x557   : > { %v14999_v18 = vadd.f32 %v6552_v37, %v18113_v23  ;;  %v14353_v12 = vpop.f32.mrb[38].mxu0  ;;  %v16069_v22 = vpack.i.bf16 %v20758_v6, %v20757_v44 }
 0x558   : > { %v15000_v25 = vadd.f32 %v14353_v12, %v18115_v36  ;;  %v6555_v29 = vpop.f32.mrb[39].mxu0  ;;  %v16074_v36 = vpack.i.bf16 %v20761_v14, %v20760_v35  ;;  %v18674_v12 = vadd.f32 %v14998_v54, %v18351_v61 }
 0x559   : > { %v18659_v26 = vadd.f32 %v14999_v18, %v18351_v61  ;;  %v15001_v17 = vadd.f32 %v6555_v29, %v21049_v28  ;;  %16070 = vrot.lane.b32.xlu0 %v16069_v22, %s16625_s21 }
 0x55a   : > { %v18664_v23 = vadd.f32 %v15000_v25, %v18351_v61  ;;  %21051 = vst [vmem:[#allocation18_spill] sm:$0xff] %v18674_v12  ;;  %v21052_v25 = vld [vmem:[#allocation29_spill] sm:$0xff]  ;;  %v20766_v19 = vmax.f32 %v18674_v12, 0.0 }
 0x55b   : > { %v18667_v37 = vadd.f32 %v15001_v17, %v18351_v61  ;;  %v20763_v18 = vmax.f32 %v18659_v26, 0.0 }
 0x55c   : > { %21050 = vst [vmem:[#allocation17_spill] sm:$0xff] %v18664_v23  ;;  %v20767_v17 = vmax.f32 %v18664_v23, 0.0 }
 0x55d   : > { %v20764_v29 = vmax.f32 %v18667_v37, 0.0  ;;  %v14356_v28 = vpop.f32.mrb[40].mxu0  ;;  %16075 = vrot.lane.b32.xlu0 %v16074_v36, %s16625_s21 }
 0x55e   : > { %v15002_v22 = vadd.f32 %v14356_v28, %v21052_v25  ;;  %v6568_v44 = vpop.f32.mrb[41].mxu0  ;;  %v21053_v28 = vld [vmem:[#allocation30_spill] sm:$0xff] }
 0x55f   : > { %v15003_v6 = vadd.f32 %v6568_v44, %v18125_v50  ;;  %v14357_v15 = vpop.f32.mrb[42].mxu0  ;;  %v16079_v54 = vpack.i.bf16 %v20764_v29, %v20763_v18 }
 0x560   : > { %v15004_v35 = vadd.f32 %v14357_v15, %v18127_v21  ;;  %v6571_v14 = vpop.f32.mrb[43].mxu0  ;;  %v16084_v21 = vpack.i.bf16 %v20767_v17, %v20766_v19  ;;  %v18704_v15 = vadd.f32 %v15002_v22, %v18351_v61 }
 0x561   : > { %v18689_v36 = vadd.f32 %v15003_v6, %v18351_v61  ;;  %v15005_v25 = vadd.f32 %v6571_v14, %v21053_v28  ;;  %16080 = vrot.lane.b32.xlu1 %v16079_v54, %s16625_s21 }
 0x562   : > { %v18694_v50 = vadd.f32 %v15004_v35, %v18351_v61  ;;  %21055 = vst [vmem:[#allocation20_spill] sm:$0xff] %v18704_v15  ;;  %v21056_v35 = vld [vmem:[#allocation31_spill] sm:$0xff]  ;;  %v20772_v23 = vmax.f32 %v18704_v15, 0.0 }
 0x563   : > { %v18697_v44 = vadd.f32 %v15005_v25, %v18351_v61  ;;  %v20769_v6 = vmax.f32 %v18689_v36, 0.0 }
 0x564   : > { %21054 = vst [vmem:[#allocation19_spill] sm:$0xff] %v18694_v50  ;;  %v20773_v25 = vmax.f32 %v18694_v50, 0.0 }
 0x565   : > { %v20770_v14 = vmax.f32 %v18697_v44, 0.0  ;;  %v14360_v28 = vpop.f32.mrb[44].mxu0  ;;  %16085 = vrot.lane.b32.xlu1 %v16084_v21, %s16625_s21 }
 0x566   : > { %v15006_v54 = vadd.f32 %v14360_v28, %v21056_v35  ;;  %v6584_v18 = vpop.f32.mrb[45].mxu0  ;;  %v21057_v28 = vld [vmem:[#allocation32_spill] sm:$0xff] }
 0x567   : > { %v15007_v29 = vadd.f32 %v6584_v18, %v18137_v34  ;;  %v14361_v12 = vpop.f32.mrb[46].mxu0  ;;  %v16089_v22 = vpack.i.bf16 %v20770_v14, %v20769_v6 }
 0x568   : > { %v15008_v19 = vadd.f32 %v14361_v12, %v18139_v27  ;;  %v6587_v17 = vpop.f32.mrb[47].mxu0  ;;  %v16094_v27 = vpack.i.bf16 %v20773_v25, %v20772_v23  ;;  %v18734_v12 = vadd.f32 %v15006_v54, %v18351_v61 }
 0x569   : > { %v18719_v21 = vadd.f32 %v15007_v29, %v18351_v61  ;;  %v15009_v35 = vadd.f32 %v6587_v17, %v21057_v28  ;;  %16090 = vrot.lane.b32.xlu0 %v16089_v22, %s16625_s21 }
 0x56a   : > { %v18724_v34 = vadd.f32 %v15008_v19, %v18351_v61  ;;  %21059 = vst [vmem:[#allocation22_spill] sm:$0xff] %v18734_v12  ;;  %v21060_v19 = vld [vmem:[#allocation33_spill] sm:$0xff]  ;;  %v20778_v50 = vmax.f32 %v18734_v12, 0.0 }
 0x56b   : > { %v18727_v18 = vadd.f32 %v15009_v35, %v18351_v61  ;;  %v20775_v29 = vmax.f32 %v18719_v21, 0.0 }
 0x56c   : > { %21058 = vst [vmem:[#allocation21_spill] sm:$0xff] %v18724_v34  ;;  %v20779_v35 = vmax.f32 %v18724_v34, 0.0 }
 0x56d   : > { %v20776_v17 = vmax.f32 %v18727_v18, 0.0  ;;  %v14364_v28 = vpop.f32.mrb[48].mxu0  ;;  %16095 = vrot.lane.b32.xlu0 %v16094_v27, %s16625_s21 }
 0x56e   : > { %v15010_v22 = vadd.f32 %v14364_v28, %v21060_v19  ;;  %v6600_v6 = vpop.f32.mrb[49].mxu0  ;;  %v21062_v28 = vld [vmem:[#allocation34_spill] sm:$0xff] }
 0x56f   : > { %v15011_v14 = vadd.f32 %v6600_v6, %v18149_v46  ;;  %v14365_v15 = vpop.f32.mrb[50].mxu0  ;;  %v16099_v54 = vpack.i.bf16 %v20776_v17, %v20775_v29 }
 0x570   : > { %v15012_v23 = vadd.f32 %v14365_v15, %v18151_v31  ;;  %v6603_v25 = vpop.f32.mrb[51].mxu0  ;;  %v16104_v31 = vpack.i.bf16 %v20779_v35, %v20778_v50  ;;  %v18764_v15 = vadd.f32 %v15010_v22, %v18351_v61 }
 0x571   : > { %v18749_v27 = vadd.f32 %v15011_v14, %v18351_v61  ;;  %v15013_v19 = vadd.f32 %v6603_v25, %v21062_v28  ;;  %16100 = vrot.lane.b32.xlu1 %v16099_v54, %s16625_s21 }
 0x572   : > { %v18754_v46 = vadd.f32 %v15012_v23, %v18351_v61  ;;  %21064 = vst [vmem:[#allocation25_spill] sm:$0xff] %v18764_v15  ;;  %v21065_v23 = vld [vmem:[#allocation35_spill] sm:$0xff]  ;;  %v20784_v34 = vmax.f32 %v18764_v15, 0.0 }
 0x573   : > { %21061 = vst [vmem:[#allocation23_spill] sm:$0xff] %v18749_v27  ;;  %v18757_v6 = vadd.f32 %v15013_v19, %v18351_v61  ;;  %v20781_v14 = vmax.f32 %v18749_v27, 0.0 }
 0x574   : > { %21063 = vst [vmem:[#allocation24_spill] sm:$0xff] %v18754_v46  ;;  %v20785_v19 = vmax.f32 %v18754_v46, 0.0 }
 0x575   : > { %v20782_v25 = vmax.f32 %v18757_v6, 0.0  ;;  %v14368_v28 = vpop.f32.mrb[52].mxu0  ;;  %16105 = vrot.lane.b32.xlu1 %v16104_v31, %s16625_s21 }
 0x576   : > { %v15014_v54 = vadd.f32 %v14368_v28, %v21065_v23  ;;  %v6616_v29 = vpop.f32.mrb[53].mxu0  ;;  %v21067_v28 = vld [vmem:[#allocation36_spill] sm:$0xff] }
 0x577   : > { %v15015_v17 = vadd.f32 %v6616_v29, %v18161_v49  ;;  %v14369_v12 = vpop.f32.mrb[54].mxu0  ;;  %v16109_v22 = vpack.i.bf16 %v20782_v25, %v20781_v14 }
 0x578   : > { %v15016_v50 = vadd.f32 %v14369_v12, %v18163_v38  ;;  %v6619_v35 = vpop.f32.mrb[55].mxu0  ;;  %v16114_v38 = vpack.i.bf16 %v20785_v19, %v20784_v34  ;;  %v18794_v12 = vadd.f32 %v15014_v54, %v18351_v61 }
 0x579   : > { %v18779_v31 = vadd.f32 %v15015_v17, %v18351_v61  ;;  %v15017_v23 = vadd.f32 %v6619_v35, %v21067_v28  ;;  %16110 = vrot.lane.b32.xlu0 %v16109_v22, %s16625_s21 }
 0x57a   : > { %v18784_v49 = vadd.f32 %v15016_v50, %v18351_v61  ;;  %21070 = vst [vmem:[#allocation29_spill] sm:$0xff] %v18794_v12  ;;  %v21071_v50 = vld [vmem:[#allocation37_spill] sm:$0xff]  ;;  %v20790_v46 = vmax.f32 %v18794_v12, 0.0 }
 0x57b   : > { %21066 = vst [vmem:[#allocation26_spill] sm:$0xff] %v18779_v31  ;;  %v18787_v29 = vadd.f32 %v15017_v23, %v18351_v61  ;;  %v20787_v17 = vmax.f32 %v18779_v31, 0.0 }
 0x57c   : > { %21068 = vst [vmem:[#allocation27_spill] sm:$0xff] %v18784_v49  ;;  %v20791_v23 = vmax.f32 %v18784_v49, 0.0 }
 0x57d   : > { %21069 = vst [vmem:[#allocation28_spill] sm:$0xff] %v18787_v29  ;;  %v20788_v35 = vmax.f32 %v18787_v29, 0.0  ;;  %v14372_v28 = vpop.f32.mrb[56].mxu0  ;;  %16115 = vrot.lane.b32.xlu0 %v16114_v38, %s16625_s21 }
 0x57e   : > { %v15018_v22 = vadd.f32 %v14372_v28, %v21071_v50  ;;  %v6632_v14 = vpop.f32.mrb[57].mxu0  ;;  %v21073_v28 = vld [vmem:[#allocation38_spill] sm:$0xff] }
 0x57f   : > { %v15019_v25 = vadd.f32 %v6632_v14, %v18173_v53  ;;  %v14373_v15 = vpop.f32.mrb[58].mxu0  ;;  %v16119_v54 = vpack.i.bf16 %v20788_v35, %v20787_v17  ;;  %v16510_v53 = vld [vmem:[%s20707_s3] sm:$0xff]  }
 0x580   : > { %v15020_v34 = vadd.f32 %v14373_v15, %v18175_v47  ;;  %v6635_v19 = vpop.f32.mrb[59].mxu0  ;;  %v16124_v47 = vpack.i.bf16 %v20791_v23, %v20790_v46  ;;  %14488 = vmatprep.subr.bf16.mxu1 %v16510_v53  ;;  %v18827_v15 = vadd.f32 %v15018_v22, %v18351_v61 }
 0x581   : > { %v18809_v38 = vadd.f32 %v15019_v25, %v18351_v61  ;;  %v15021_v50 = vadd.f32 %v6635_v19, %v21073_v28  ;;  %16120 = vrot.lane.b32.xlu1 %v16119_v54, %s16625_s21  ;;  %14489 = vmatpush3.bf16.msra.mxu1 %v16510_v53 }
 0x582   : > { %v18817_v14 = vadd.f32 %v15020_v34, %v18351_v61  ;;  %21076 = vst [vmem:[#allocation33_spill] sm:$0xff] %v18827_v15  ;;  %v21077_v34 = vld [vmem:[#allocation39_spill] sm:$0xff]  ;;  %v20799_v31 = vmax.f32 %v18827_v15, 0.0  ;;  %v21084_v15 = vmax.f32 %v18359_v40, 0.0  ;;  %v21087_v40 = vmax.f32 %v18363_v52, 0.0 }
 0x583   : > { %21072 = vst [vmem:[#allocation30_spill] sm:$0xff] %v18809_v38  ;;  %v18820_v17 = vadd.f32 %v15021_v50, %v18351_v61  ;;  %v20794_v25 = vmax.f32 %v18809_v38, 0.0 }
 0x584   : > { %21074 = vst [vmem:[#allocation31_spill] sm:$0xff] %v18817_v14  ;;  %v20800_v35 = vmax.f32 %v18817_v14, 0.0 }
 0x585   : > { %21075 = vst [vmem:[#allocation32_spill] sm:$0xff] %v18820_v17  ;;  %v20795_v19 = vmax.f32 %v18820_v17, 0.0  ;;  %v14376_v54 = vpop.f32.mrb[60].mxu0  ;;  %16125 = vrot.lane.b32.xlu1 %v16124_v47, %s16625_s21  ;;  %v21079_v47 = vld [vmem:[#allocation40_spill] sm:$0xff] }
 0x586   : > { %v15022_v28 = vadd.f32 %v14376_v54, %v21077_v34  ;;  %v6648_v50 = vpop.f32.mrb[61].mxu0 }
 0x587   : > { %v15023_v12 = vadd.f32 %v6648_v50, %v18185_v57  ;;  %v14377_v46 = vpop.f32.mrb[62].mxu0  ;;  %v16129_v22 = vpack.i.bf16 %v20795_v19, %v20794_v25  ;;  %v21081_v19 = vld [vmem:[#allocation41_spill] sm:$0xff] }
 0x588   : > { %v15024_v23 = vadd.f32 %v14377_v46, %v18187_v51  ;;  %v6651_v49 = vpop.f32.mrb[63].mxu0  ;;  %v16134_v51 = vpack.i.bf16 %v20800_v35, %v20799_v31  ;;  %v18857_v46 = vadd.f32 %v15022_v28, %v18351_v61 }
 0x589   : > { %v18842_v53 = vadd.f32 %v15023_v12, %v18351_v61  ;;  %v15025_v54 = vadd.f32 %v6651_v49, %v21079_v47  ;;  %16130 = vrot.lane.b32.xlu0 %v16129_v22, %s16625_s21 }
 0x58a   : > { %v18847_v57 = vadd.f32 %v15024_v23, %v18351_v61  ;;  %v16001_v50 = vpop.permute.xlu1 %16000  ;;  %21080 = vst [vmem:[#allocation35_spill] sm:$0xff] %v18857_v46 }
 0x58b   : > { %21078 = vst [vmem:[#allocation34_spill] sm:$0xff] %v18842_v53  ;;  %v18850_v34 = vadd.f32 %v15025_v54, %v18351_v61  ;;  %v15991_v25 = vpop.permute.xlu0 %15990  ;;  %v20805_v49 = vmax.f32 %v18842_v53, 0.0  ;;  %v16003_v23 = vunpack.i.h.bf16 %v16001_v50  ;;  %v16002_v47 = vunpack.i.l.bf16 %v16001_v50 }
 0x58c   : > { %v15993_v54 = vunpack.i.h.bf16 %v15991_v25  ;;  %v15992_v14 = vunpack.i.l.bf16 %v15991_v25  ;;  %v20808_v50 = vmax.f32 %v18857_v46, 0.0  ;;  %v21085_v25 = vmax.f32 %v18371_v59, 0.0 }
 0x58d   : > { %v20806_v12 = vmax.f32 %v18850_v34, 0.0  ;;  %v14380_v22 = vpop.f32.mrb[64].mxu0  ;;  %16135 = vrot.lane.b32.xlu0 %v16134_v51, %s16625_s21  ;;  %v7648_v53 = vmax.f32 %v21084_v15, %v16002_v47 }
 0x58e   : > { %v15026_v38 = vadd.f32 %v14380_v22, %v21081_v19  ;;  %v6664_v17 = vpop.f32.mrb[65].mxu0  ;;  %v21082_v19 = vld [vmem:[#allocation42_spill] sm:$0xff]  ;;  %v7646_v15 = vmax.f32 %v21087_v40, %v15992_v14  ;;  %v21092_v40 = vld [vmem:[#allocation43_spill] sm:$0xff] }
 0x58f   : > { %v15027_v31 = vadd.f32 %v6664_v17, %v18197_v62  ;;  %v14381_v35 = vpop.f32.mrb[66].mxu0  ;;  %v16139_v28 = vpack.i.bf16 %v20806_v12, %v20805_v49  ;;  %v21083_v62 = vmax.f32 %v18367_v56, 0.0  ;;  %v7647_v49 = vmax.f32 %v21085_v25, %v15993_v54 }
 0x590   : > { %v15028_v29 = vadd.f32 %v14381_v35, %v18199_v55  ;;  %v6667_v51 = vpop.f32.mrb[67].mxu0  ;;  %v21086_v56 = vmax.f32 %v18847_v57, 0.0  ;;  %v18895_v59 = vadd.f32 %v15026_v38, %v18351_v61  ;;  %v21089_v25 = vmax.f32 %v18418_v63, 0.0 }
 0x591   : > { %v18872_v27 = vadd.f32 %v15027_v31, %v18351_v61  ;;  %v15029_v22 = vadd.f32 %v6667_v51, %v21082_v19  ;;  %16140 = vrot.lane.b32.xlu1 %v16139_v28, %s16625_s21  ;;  %v7649_v17 = vmax.f32 %v21083_v62, %v16003_v23  ;;  %v21090_v38 = vmax.f32 %v18433_v32, 0.0 }
 0x592   : > { %v18883_v55 = vadd.f32 %v15028_v29, %v18351_v61  ;;  %v16006_v35 = vpop.permute.xlu1 %16005  ;;  %v16144_v23 = vpack.i.bf16 %v21086_v56, %v20808_v50 }
 0x593   : > { %v18886_v31 = vadd.f32 %v15029_v22, %v18351_v61  ;;  %v16008_v12 = vunpack.i.h.bf16 %v16006_v35  ;;  %v16007_v51 = vunpack.i.l.bf16 %v16006_v35  ;;  %v15996_v19 = vpop.permute.xlu0 %15995  ;;  %v21088_v22 = vmax.f32 %v18430_v48, 0.0 }
 0x594   : > { %v15998_v29 = vunpack.i.h.bf16 %v15996_v19  ;;  %v15997_v47 = vunpack.i.l.bf16 %v15996_v19  ;;  %v21091_v19 = vmax.f32 %v18423_v10, 0.0  ;;  %v20811_v10 = vmax.f32 %v18895_v59, 0.0 }
 0x595   : > { %v7653_v62 = vmax.f32 %v21088_v22, %v16008_v12  ;;  %v7652_v35 = vmax.f32 %v21089_v25, %v16007_v51  ;;  %v14384_v46 = vpop.f32.mrb[68].mxu0  ;;  %16145 = vrot.lane.b32.xlu1 %v16144_v23, %s16625_s21  ;;  %v21093_v51 = vmax.f32 %v18872_v27, 0.0  ;;  %v21094_v23 = vmax.f32 %v18886_v31, 0.0 }
 0x596   : > { %v7651_v14 = vmax.f32 %v21090_v38, %v15998_v29  ;;  %v7650_v56 = vmax.f32 %v21091_v19, %v15997_v47  ;;  %v15030_v50 = vadd.f32 %v14384_v46, %v21092_v40  ;;  %v6680_v28 = vpop.f32.mrb[69].mxu0 }
 0x597   : > { %v7761_v54 = vmax.f32 %v7649_v17, %v7653_v62  ;;  %v7760_v48 = vmax.f32 %v7648_v53, %v7652_v35  ;;  %v15031_v12 = vadd.f32 %v6680_v28, %v18209_v1  ;;  %v14385_v63 = vpop.f32.mrb[70].mxu0  ;;  %v16149_v22 = vpack.i.bf16 %v21094_v23, %v21093_v51  ;;  %v21095_v53 = vld [vmem:[#allocation44_spill] sm:$0xff] }
 0x598   : > { %v7759_v25 = vmax.f32 %v7647_v49, %v7651_v14  ;;  %v7758_v52 = vmax.f32 %v7646_v15, %v7650_v56  ;;  %v15032_v32 = vadd.f32 %v14385_v63, %v18211_v60  ;;  %v6683_v29 = vpop.f32.mrb[71].mxu0  ;;  %v21096_v60 = vmax.f32 %v18883_v55, 0.0  ;;  %v21097_v14 = vld [vmem:[#allocation45_spill] sm:$0xff] }
 0x599   : > { %v7815_v47 = vpack.c.bf16 %v7761_v54, %v7760_v48  ;;  %v18918_v46 = vadd.f32 %v15031_v12, %v18351_v61  ;;  %v15033_v17 = vadd.f32 %v6683_v29, %v21095_v53  ;;  %16150 = vrot.lane.b32.xlu0 %v16149_v22, %s16625_s21  ;;  %v18935_v62 = vadd.f32 %v15030_v50, %v18351_v61  ;;  %v21098_v29 = vld [vmem:[#allocation46_spill] sm:$0xff] }
 0x59a   : > { %v7814_v1 = vpack.c.bf16 %v7759_v25, %v7758_v52  ;;  %v18924_v28 = vadd.f32 %v15032_v32, %v18351_v61  ;;  %v16154_v15 = vpack.i.bf16 %v21096_v60, %v20811_v10 }
 0x59b   : > { %7843 = vst.msk [vmem:[#allocation3 + $0x28] sm:$0xff] %vm835_vm2, %v7815_v47  ;;  %v18927_v49 = vadd.f32 %v15033_v17, %v18351_v61  ;;  %v16011_v54 = vpop.permute.xlu0 %16010  ;;  %v20822_v35 = vmax.f32 %v18918_v46, 0.0  ;;  %v20809_v25 = vmax.f32 %v18935_v62, 0.0  ;;  %v21099_v17 = vmax.f32 %v18462_v42, 0.0 }
 0x59c   : > { %7842 = vst.msk [vmem:[#allocation3 + $0x20] sm:$0xff] %vm835_vm2, %v7814_v1  ;;  %v20810_v40 = vmax.f32 %v18924_v28, 0.0  ;;  %v16013_v48 = vunpack.i.h.bf16 %v16011_v54  ;;  %v16012_v51 = vunpack.i.l.bf16 %v16011_v54 }
 0x59d   : > { %v20823_v52 = vmax.f32 %v18927_v49, 0.0  ;;  %v14388_v38 = vpop.f32.mrb[72].mxu0  ;;  %16155 = vrot.lane.b32.xlu0 %v16154_v15, %s16625_s21 }
 0x59e   : > { %v15034_v19 = vadd.f32 %v14388_v38, %v21097_v14  ;;  %v6696_v56 = vpop.f32.mrb[73].mxu0  ;;  %v7655_v1 = vmax.f32 %v21099_v17, %v16013_v48  ;;  %v16164_v54 = vpack.i.bf16 %v20810_v40, %v20809_v25  ;;  %v21100_v38 = vmax.f32 %v18454_v39, 0.0 }
 0x59f   : > { %v15035_v12 = vadd.f32 %v6696_v56, %v18221_v4  ;;  %v14389_v63 = vpop.f32.mrb[74].mxu0  ;;  %v16159_v50 = vpack.i.bf16 %v20823_v52, %v20822_v35  ;;  %v16016_v53 = vpop.permute.xlu0 %16015 }
 0x5a0   : > { %v15036_v23 = vadd.f32 %v14389_v63, %v18223_v0  ;;  %v6699_v22 = vpop.f32.mrb[75].mxu0  ;;  %v7654_v14 = vmax.f32 %v21100_v38, %v16012_v51  ;;  %v18969_v56 = vadd.f32 %v15034_v19, %v18351_v61  ;;  %v21101_v19 = vmax.f32 %v18487_v41, 0.0 }
 0x5a1   : > { %v18950_v32 = vadd.f32 %v15035_v12, %v18351_v61  ;;  %v15037_v47 = vadd.f32 %v6699_v22, %v21098_v29  ;;  %16160 = vrot.lane.b32.xlu1 %v16159_v50, %s16625_s21  ;;  %v16018_v50 = vunpack.i.h.bf16 %v16016_v53 }
 0x5a2   : > { %v18955_v4 = vadd.f32 %v15036_v23, %v18351_v61  ;;  %v7875_v42 = vld [vmem:[#allocation3 + $0x28] sm:$0xff]  ;;  %v16017_v23 = vunpack.i.l.bf16 %v16016_v53 }
 0x5a3   : > { %v18960_v60 = vadd.f32 %v15037_v47, %v18351_v61  ;;  %v16021_v0 = vpop.permute.xlu1 %16020  ;;  %v7874_v15 = vld [vmem:[#allocation3 + $0x20] sm:$0xff]  ;;  %v20812_v48 = vmax.f32 %v18950_v32, 0.0  ;;  %v21102_v47 = vmax.f32 %v18479_v8, 0.0 }
 0x5a4   : > { %v16023_v12 = vunpack.i.h.bf16 %v16021_v0  ;;  %v16022_v63 = vunpack.i.l.bf16 %v16021_v0  ;;  %14436 = vmatprep.mubr.msk.bf16.mxu1 %vm835_vm2, %v7874_v15  ;;  %v20817_v39 = vmax.f32 %v18955_v4, 0.0  ;;  %v21103_v0 = vld [vmem:[#allocation47_spill] sm:$0xff] }
 0x5a5   : > { %v20813_v22 = vmax.f32 %v18960_v60, 0.0  ;;  %v14392_v29 = vpop.f32.mrb[76].mxu0  ;;  %14437 = vmatmul.mubr.msk.bf16.gmra.mrb[116].mxu1 %vm835_vm2, %v7875_v42  ;;  %16165 = vrot.lane.b32.xlu1 %v16164_v54, %s16625_s21  ;;  %v20816_v42 = vmax.f32 %v18969_v56, 0.0 }
 0x5a6   : > { %v7659_v51 = vmax.f32 %v21101_v19, %v16023_v12  ;;  %v7658_v17 = vmax.f32 %v21102_v47, %v16022_v63  ;;  %v15038_v15 = vadd.f32 %v14392_v29, %v21103_v0  ;;  %v6712_v38 = vpop.f32.mrb[77].mxu0  ;;  %v21105_v0 = vmax.f32 %v18459_v3, 0.0 }
 0x5a7   : > { %v15039_v53 = vadd.f32 %v6712_v38, %v18233_v7  ;;  %v14393_v25 = vpop.f32.mrb[78].mxu0  ;;  %v16026_v40 = vpop.permute.xlu1 %16025  ;;  %v16169_v54 = vpack.i.bf16 %v20813_v22, %v20812_v48  ;;  %v21104_v7 = vld [vmem:[#allocation48_spill] sm:$0xff]  ;;  %v21106_v48 = vmax.f32 %v18465_v5, 0.0 }
 0x5a8   : > { %v7763_v10 = vmax.f32 %v7655_v1, %v7659_v51  ;;  %v7762_v41 = vmax.f32 %v7654_v14, %v7658_v17  ;;  %v15040_v12 = vadd.f32 %v14393_v25, %v18235_v2  ;;  %v6715_v8 = vpop.f32.mrb[79].mxu0  ;;  %v16028_v29 = vunpack.i.h.bf16 %v16026_v40  ;;  %v21108_v51 = vld [vmem:[#allocation6_spill] sm:$0xff] }
 0x5a9   : > { %v18990_v63 = vadd.f32 %v15039_v53, %v18351_v61  ;;  %v16027_v19 = vunpack.i.l.bf16 %v16026_v40  ;;  %v15041_v47 = vadd.f32 %v6715_v8, %v21104_v7  ;;  %16170 = vrot.lane.b32.xlu0 %v16169_v54, %s16625_s21  ;;  %v7657_v38 = vmax.f32 %v21105_v0, %v16018_v50  ;;  %v21111_v7 = vld [vmem:[#allocation50_spill] sm:$0xff] }
 0x5aa   : > { %v7656_v22 = vmax.f32 %v21106_v48, %v16017_v23  ;;  %v7816_v1 = vpack.c.bf16 %v7763_v10, %v7762_v41  ;;  %v16174_v2 = vpack.i.bf16 %v20817_v39, %v20816_v42  ;;  %v19003_v25 = vadd.f32 %v15040_v12, %v18351_v61  ;;  %v16511_v48 = vld [vmem:[%s20707_s3 + $0x8] sm:$0xff]  }
 0x5ab   : > { %v21107_v40 = vmax.f32 %v18484_v45, 0.0  ;;  %v21109_v17 = vmax.f32 %v21108_v51, 0.0  ;;  %v19010_v3 = vadd.f32 %v15041_v47, %v18351_v61  ;;  %v19014_v5 = vadd.f32 %v15038_v15, %v18351_v61  ;;  %v16031_v10 = vpop.permute.xlu0 %16030  ;;  %v21110_v12 = vld [vmem:[#allocation49_spill] sm:$0xff]  ;;  %14490 = vmatprep.subr.bf16.mxu1 %v16511_v48 }
 0x5ac   : > { %7844 = vst.msk [vmem:[#allocation3 + $0x30] sm:$0xff] %vm835_vm2, %v7816_v1  ;;  %v20818_v50 = vmax.f32 %v18990_v63, 0.0  ;;  %v20815_v15 = vmax.f32 %v19003_v25, 0.0  ;;  %14491 = vmatpush3.bf16.msra.mxu1 %v16511_v48  ;;  %v21112_v1 = vld [vmem:[#allocation51_spill] sm:$0xff]  ;;  %v16032_v51 = vunpack.i.l.bf16 %v16031_v10 }
 0x5ad   : > { %v7661_v14 = vmax.f32 %v21107_v40, %v16028_v29  ;;  %v7660_v53 = vmax.f32 %v21109_v17, %v16027_v19  ;;  %v20819_v54 = vmax.f32 %v19010_v3, 0.0  ;;  %v14396_v41 = vpop.f32.mrb[80].mxu0  ;;  %16175 = vrot.lane.b32.xlu0 %v16174_v2, %s16625_s21 }
 0x5ae   : > { %v15042_v8 = vadd.f32 %v14396_v41, %v21110_v12  ;;  %v6728_v29 = vpop.f32.mrb[81].mxu0 }
 0x5af   : > { %v7765_v45 = vmax.f32 %v7657_v38, %v7661_v14  ;;  %v7764_v23 = vmax.f32 %v7656_v22, %v7660_v53  ;;  %v15043_v47 = vadd.f32 %v6728_v29, %v21111_v7  ;;  %v14397_v0 = vpop.f32.mrb[82].mxu0  ;;  %v16179_v22 = vpack.i.bf16 %v20819_v54, %v20818_v50  ;;  %v21113_v53 = vld [vmem:[#allocation52_spill] sm:$0xff] }
 0x5b0   : > { %v16033_v38 = vunpack.i.h.bf16 %v16031_v10  ;;  %v15044_v40 = vadd.f32 %v14397_v0, %v21112_v1  ;;  %v6731_v2 = vpop.f32.mrb[83].mxu0  ;;  %v20814_v14 = vmax.f32 %v19014_v5, 0.0  ;;  %v21115_v1 = vmax.f32 %v18509_v16, 0.0 }
 0x5b1   : > { %v7817_v19 = vpack.c.bf16 %v7765_v45, %v7764_v23  ;;  %v19033_v17 = vadd.f32 %v15043_v47, %v18351_v61  ;;  %v15045_v45 = vadd.f32 %v6731_v2, %v21113_v53  ;;  %16180 = vrot.lane.b32.xlu1 %v16179_v22, %s16625_s21  ;;  %v16036_v23 = vpop.permute.xlu0 %16035  ;;  %v19052_v47 = vld [vmem:[%s20706_s2] ss:$0 sm:$0xff] }
 0x5b2   : > { %v19038_v41 = vadd.f32 %v15044_v40, %v18351_v61  ;;  %v16184_v10 = vpack.i.bf16 %v20815_v15, %v20814_v14  ;;  %v19055_v0 = vadd.f32 %v19052_v47, %v15042_v8  ;;  %v7662_v40 = vmax.f32 %v21115_v1, %v16032_v51  ;;  %v21118_v15 = vld [vmem:[#allocation53_spill] sm:$0xff]  ;;  %v21119_v51 = vld [vmem:[#allocation54_spill] sm:$0xff] }
 0x5b3   : > { %7845 = vst.msk [vmem:[#allocation3 + $0x38] sm:$0xff] %vm835_vm2, %v7817_v19  ;;  %v19041_v48 = vadd.f32 %v15045_v45, %v18351_v61  ;;  %v16041_v12 = vpop.permute.xlu1 %16040  ;;  %v7876_v29 = vld [vmem:[#allocation3 + $0x30] sm:$0xff]  ;;  %v21114_v19 = vmax.f32 %v18517_v20, 0.0  ;;  %v20820_v2 = vmax.f32 %v19033_v17, 0.0  ;;  %v16038_v53 = vunpack.i.h.bf16 %v16036_v23 }
 0x5b4   : > { %v16043_v61 = vunpack.i.h.bf16 %v16041_v12  ;;  %v16042_v22 = vunpack.i.l.bf16 %v16041_v12  ;;  %14440 = vmatprep.mubr.msk.bf16.mxu1 %vm835_vm2, %v7876_v29  ;;  %v16037_v45 = vunpack.i.l.bf16 %v16036_v23  ;;  %v21117_v14 = vmax.f32 %v18539_v43, 0.0  ;;  %v21120_v43 = vld [vmem:[#allocation55_spill] sm:$0xff] }
 0x5b5   : > { %v7663_v7 = vmax.f32 %v21114_v19, %v16033_v38  ;;  %v20821_v20 = vmax.f32 %v19041_v48, 0.0  ;;  %v14400_v38 = vpop.f32.mrb[84].mxu0  ;;  %16185 = vrot.lane.b32.xlu1 %v16184_v10, %s16625_s21  ;;  %v21116_v19 = vmax.f32 %v18547_v24, 0.0  ;;  %v20826_v24 = vmax.f32 %v19055_v0, 0.0 }
 0x5b6   : > { %v7666_v12 = vmax.f32 %v21117_v14, %v16042_v22  ;;  %v15046_v29 = vadd.f32 %v14400_v38, %v21118_v15  ;;  %v6744_v42 = vpop.f32.mrb[85].mxu0 }
 0x5b7   : > { %v7667_v8 = vmax.f32 %v21116_v19, %v16043_v61  ;;  %v15047_v1 = vadd.f32 %v6744_v42, %v21119_v51  ;;  %v14401_v39 = vpop.f32.mrb[86].mxu0  ;;  %v16046_v50 = vpop.permute.xlu1 %16045  ;;  %v16189_v23 = vpack.i.bf16 %v20821_v20, %v20820_v2  ;;  %v21121_v51 = vld [vmem:[#allocation56_spill] sm:$0xff]  ;;  %v21122_v2 = vld [vmem:[#allocation7_spill] sm:$0xff] }
 0x5b8   : > { %v7766_v61 = vmax.f32 %v7662_v40, %v7666_v12  ;;  %v15048_v14 = vadd.f32 %v14401_v39, %v21120_v43  ;;  %v6747_v22 = vpop.f32.mrb[87].mxu0  ;;  %v16048_v19 = vunpack.i.h.bf16 %v16046_v50  ;;  %v16047_v42 = vunpack.i.l.bf16 %v16046_v50  ;;  %v21128_v50 = vld [vmem:[#allocation10_spill] sm:$0xff] }
 0x5b9   : > { %v7767_v10 = vmax.f32 %v7663_v7, %v7667_v8  ;;  %v19077_v38 = vadd.f32 %v19052_v47, %v15047_v1  ;;  %v15049_v54 = vadd.f32 %v6747_v22, %v21121_v51  ;;  %16190 = vrot.lane.b32.xlu0 %v16189_v23, %s16625_s21  ;;  %v21123_v20 = vmax.f32 %v21122_v2, 0.0  ;;  %v21124_v7 = vld [vmem:[#allocation8_spill] sm:$0xff]  ;;  %v21126_v1 = vld [vmem:[#allocation9_spill] sm:$0xff] }
 0x5ba   : > { %v7877_v15 = vld [vmem:[#allocation3 + $0x38] sm:$0xff]  ;;  %v21125_v40 = vmax.f32 %v21124_v7, 0.0  ;;  %v19087_v12 = vadd.f32 %v19052_v47, %v15048_v14  ;;  %v21127_v43 = vmax.f32 %v21126_v1, 0.0  ;;  %v21129_v16 = vmax.f32 %v21128_v50, 0.0 }
 0x5bb   : > { %14441 = vmatmul.mubr.msk.bf16.gmra.mrb[120].mxu1 %vm835_vm2, %v7877_v15  ;;  %v7665_v35 = vmax.f32 %v21123_v20, %v16038_v53  ;;  %v7818_v39 = vpack.c.bf16 %v7767_v10, %v7766_v61  ;;  %v19094_v15 = vadd.f32 %v19052_v47, %v15049_v54  ;;  %v21130_v2 = vmax.f32 %v19038_v41, 0.0 }
 0x5bc   : > { %v7664_v8 = vmax.f32 %v21125_v40, %v16037_v45  ;;  %v7669_v52 = vmax.f32 %v21127_v43, %v16048_v19  ;;  %v7668_v22 = vmax.f32 %v21129_v16, %v16047_v42  ;;  %v19102_v20 = vadd.f32 %v19052_v47, %v15046_v29  ;;  %v16051_v45 = vpop.permute.xlu0 %16050  ;;  %v21132_v19 = vld [vmem:[#allocation57_spill] sm:$0xff] }
 0x5bd   : > { %v16194_v53 = vpack.i.bf16 %v21130_v2, %v20826_v24  ;;  %7846 = vst.msk [vmem:[#allocation3 + $0x40] sm:$0xff] %vm835_vm2, %v7818_v39  ;;  %v20827_v23 = vmax.f32 %v19077_v38, 0.0  ;;  %v20828_v16 = vmax.f32 %v19094_v15, 0.0  ;;  %v14404_v14 = vpop.f32.mrb[88].mxu0  ;;  %v20825_v54 = vmax.f32 %v19087_v12, 0.0  ;;  %v21133_v39 = vld [vmem:[#allocation58_spill] sm:$0xff] }
 0x5be   : > { %21131 = vst [vmem:[#allocation36_spill] sm:$0xff] %v19102_v20  ;;  %v7769_v10 = vmax.f32 %v7665_v35, %v7669_v52  ;;  %v7768_v61 = vmax.f32 %v7664_v8, %v7668_v22  ;;  %v15050_v42 = vadd.f32 %v14404_v14, %v21132_v19  ;;  %v6760_v51 = vpop.f32.mrb[89].mxu0  ;;  %v16053_v40 = vunpack.i.h.bf16 %v16051_v45  ;;  %v21134_v8 = vld [vmem:[#allocation59_spill] sm:$0xff] }
 0x5bf   : > { %16195 = vrot.lane.b32.xlu0 %v16194_v53, %s16625_s21  ;;  %v15051_v29 = vadd.f32 %v6760_v51, %v21133_v39  ;;  %v14405_v1 = vpop.f32.mrb[90].mxu0  ;;  %v16199_v35 = vpack.i.bf16 %v20828_v16, %v20827_v23  ;;  %v16052_v52 = vunpack.i.l.bf16 %v16051_v45  ;;  %v20824_v22 = vmax.f32 %v19102_v20, 0.0  ;;  %v21136_v53 = vld [vmem:[#allocation60_spill] sm:$0xff]  ;;  %v21144_v23 = vld [vmem:[#allocation62_spill] sm:$0xff] }
 0x5c0   : > { %v7819_v7 = vpack.c.bf16 %v7769_v10, %v7768_v61  ;;  %v15052_v43 = vadd.f32 %v14405_v1, %v21134_v8  ;;  %v6763_v50 = vpop.f32.mrb[91].mxu0  ;;  %v16056_v14 = vpop.permute.xlu0 %16055  ;;  %v21137_v45 = vmax.f32 %v18577_v30, 0.0  ;;  %v19139_v8 = vadd.f32 %v19052_v47, %v15050_v42 }
 0x5c1   : > { %v19118_v2 = vadd.f32 %v19052_v47, %v15051_v29  ;;  %v15053_v10 = vadd.f32 %v6763_v50, %v21136_v53  ;;  %16200 = vrot.lane.b32.xlu1 %v16199_v35, %s16625_s21  ;;  %v21140_v29 = vmax.f32 %v18569_v58, 0.0  ;;  %v16058_v50 = vunpack.i.h.bf16 %v16056_v14 }
 0x5c2   : > { %7847 = vst.msk [vmem:[#allocation3 + $0x48] sm:$0xff] %vm835_vm2, %v7819_v7  ;;  %v19123_v61 = vadd.f32 %v19052_v47, %v15052_v43  ;;  %v7671_v19 = vmax.f32 %v21137_v45, %v16053_v40  ;;  %v16204_v7 = vpack.i.bf16 %v20825_v54, %v20824_v22  ;;  %v16057_v53 = vunpack.i.l.bf16 %v16056_v14  ;;  %v21143_v22 = vld [vmem:[#allocation61_spill] sm:$0xff] }
 0x5c3   : > { %21135 = vst [vmem:[#allocation37_spill] sm:$0xff] %v19118_v2  ;;  %v19128_v51 = vadd.f32 %v19052_v47, %v15053_v10  ;;  %v16061_v39 = vpop.permute.xlu1 %16060  ;;  %v7670_v35 = vmax.f32 %v21140_v29, %v16052_v52  ;;  %v21141_v52 = vmax.f32 %v18607_v13, 0.0  ;;  %v21142_v29 = vmax.f32 %v18599_v11, 0.0 }
 0x5c4   : > { %v19130_v1 = vld [vmem:[#allocation3 + $0x40] sm:$0xff]  ;;  %v16063_v43 = vunpack.i.h.bf16 %v16061_v39  ;;  %v16062_v30 = vunpack.i.l.bf16 %v16061_v39  ;;  %v21145_v10 = vmax.f32 %v19118_v2, 0.0  ;;  %v20835_v58 = vmax.f32 %v19139_v8, 0.0  ;;  %v21158_v2 = vld [vmem:[#allocation14_spill] sm:$0xff] }
 0x5c5   : > { %21138 = vst [vmem:[#allocation38_spill] sm:$0xff] %v19128_v51  ;;  %21139 = vst [vmem:[#allocation39_spill] sm:$0xff] %v19130_v1  ;;  %14444 = vmatprep.mubr.msk.bf16.mxu1 %vm835_vm2, %v19130_v1  ;;  %v14408_v45 = vpop.f32.mrb[92].mxu0  ;;  %16205 = vrot.lane.b32.xlu1 %v16204_v7, %s16625_s21  ;;  %v21146_v1 = vmax.f32 %v19128_v51, 0.0 }
 0x5c6   : > { %v7675_v42 = vmax.f32 %v21141_v52, %v16063_v43  ;;  %v7674_v39 = vmax.f32 %v21142_v29, %v16062_v30  ;;  %v15054_v54 = vadd.f32 %v14408_v45, %v21143_v22  ;;  %v6776_v24 = vpop.f32.mrb[93].mxu0  ;;  %v21147_v43 = vld [vmem:[#allocation63_spill] sm:$0xff]  ;;  %v21149_v45 = vld [vmem:[#allocation64_spill] sm:$0xff] }
 0x5c7   : > { %v15055_v16 = vadd.f32 %v6776_v24, %v21144_v23  ;;  %v14409_v40 = vpop.f32.mrb[94].mxu0  ;;  %v16066_v14 = vpop.permute.xlu1 %16065  ;;  %v16209_v7 = vpack.i.bf16 %v21146_v1, %v21145_v10  ;;  %v21150_v1 = vld [vmem:[#allocation11_spill] sm:$0xff]  ;;  %v21152_v10 = vld [vmem:[#allocation12_spill] sm:$0xff] }
 0x5c8   : > { %v7771_v20 = vmax.f32 %v7671_v19, %v7675_v42  ;;  %v7770_v13 = vmax.f32 %v7670_v35, %v7674_v39  ;;  %v15056_v52 = vadd.f32 %v14409_v40, %v21147_v43  ;;  %v6779_v11 = vpop.f32.mrb[95].mxu0  ;;  %v16068_v24 = vunpack.i.h.bf16 %v16066_v14 }
 0x5c9   : > { %v19159_v30 = vld [vmem:[#allocation3 + $0x48] sm:$0xff]  ;;  %v19162_v22 = vadd.f32 %v19052_v47, %v15055_v16  ;;  %v16067_v23 = vunpack.i.l.bf16 %v16066_v14  ;;  %v15057_v29 = vadd.f32 %v6779_v11, %v21149_v45  ;;  %16210 = vrot.lane.b32.xlu0 %v16209_v7, %s16625_s21  ;;  %v21151_v19 = vmax.f32 %v21150_v1, 0.0 }
 0x5ca   : > { %21148 = vst [vmem:[#allocation40_spill] sm:$0xff] %v19159_v30  ;;  %14445 = vmatmul.mubr.msk.bf16.gmra.mrb[124].mxu1 %vm835_vm2, %v19159_v30  ;;  %v21153_v40 = vmax.f32 %v21152_v10, 0.0  ;;  %v7820_v39 = vpack.c.bf16 %v7771_v20, %v7770_v13  ;;  %v21154_v16 = vmax.f32 %v19123_v61, 0.0  ;;  %v19177_v14 = vadd.f32 %v19052_v47, %v15056_v52  ;;  %v21156_v11 = vld [vmem:[#allocation13_spill] sm:$0xff] }
 0x5cb   : > { %v7673_v35 = vmax.f32 %v21151_v19, %v16058_v50  ;;  %v21157_v45 = vmax.f32 %v21156_v11, 0.0  ;;  %v21159_v7 = vmax.f32 %v21158_v2, 0.0  ;;  %v19184_v50 = vadd.f32 %v19052_v47, %v15057_v29  ;;  %v21161_v2 = vld [vmem:[#allocation65_spill] sm:$0xff] }
 0x5cc   : > { %v7672_v42 = vmax.f32 %v21153_v40, %v16057_v53  ;;  %v16214_v43 = vpack.i.bf16 %v21154_v16, %v20835_v58  ;;  %21155 = vst [vmem:[#allocation41_spill] sm:$0xff] %v19177_v14  ;;  %7848 = vst.msk [vmem:[#allocation3 + $0x50] sm:$0xff] %vm835_vm2, %v7820_v39  ;;  %v19188_v20 = vadd.f32 %v19052_v47, %v15054_v54  ;;  %v16071_v53 = vpop.permute.xlu0 %16070  ;;  %v20836_v13 = vmax.f32 %v19162_v22, 0.0  ;;  %v21162_v39 = vld [vmem:[#allocation66_spill] sm:$0xff] }
 0x5cd   : > { %v7677_v30 = vmax.f32 %v21157_v45, %v16068_v24  ;;  %v7676_v51 = vmax.f32 %v21159_v7, %v16067_v23  ;;  %v20839_v19 = vmax.f32 %v19184_v50, 0.0  ;;  %v14412_v10 = vpop.f32.mrb[96].mxu0  ;;  %v20838_v29 = vmax.f32 %v19177_v14, 0.0 }
 0x5ce   : > { %21160 = vst [vmem:[#allocation42_spill] sm:$0xff] %v19188_v20  ;;  %16215 = vrot.lane.b32.xlu0 %v16214_v43, %s16625_s21  ;;  %v15058_v24 = vadd.f32 %v14412_v10, %v21161_v2  ;;  %v6792_v23 = vpop.f32.mrb[97].mxu0  ;;  %v16512_v43 = vld [vmem:[%s20707_s3 + $0x10] sm:$0x1f]   ;;  %v20837_v45 = vmax.f32 %v19188_v20, 0.0  ;;  %v16072_v7 = vunpack.i.l.bf16 %v16071_v53 }
 0x5cf   : > { %v7773_v1 = vmax.f32 %v7673_v35, %v7677_v30  ;;  %v7772_v52 = vmax.f32 %v7672_v42, %v7676_v51  ;;  %v15059_v16 = vadd.f32 %v6792_v23, %v21162_v39  ;;  %v14413_v54 = vpop.f32.mrb[98].mxu0  ;;  %v16219_v30 = vpack.i.bf16 %v20839_v19, %v20836_v13  ;;  %v21163_v35 = vld [vmem:[#allocation67_spill] sm:$0xff]  ;;  %15947 = vmatprep.subr.msk.bf16.mxu1 %vm8014_vm3, %v16512_v43  ;;  %v21172_v19 = vld [vmem:[#allocation69_spill] sm:$0xff] }
 0x5d0   : > { %v16073_v51 = vunpack.i.h.bf16 %v16071_v53  ;;  %v15060_v42 = vadd.f32 %v14413_v54, %v21163_v35  ;;  %v6795_v11 = vpop.f32.mrb[99].mxu0  ;;  %v16076_v2 = vpop.permute.xlu0 %16075  ;;  %v16224_v53 = vpack.i.bf16 %v20838_v29, %v20837_v45 }
 0x5d1   : > { %v7821_v40 = vpack.c.bf16 %v7773_v1, %v7772_v52  ;;  %v19207_v1 = vadd.f32 %v19052_v47, %v15059_v16  ;;  %v21165_v52 = vld [vmem:[#allocation68_spill] sm:$0xff]  ;;  %16220 = vrot.lane.b32.xlu1 %v16219_v30, %s16625_s21  ;;  %v21167_v16 = vmax.f32 %v18637_v9, 0.0  ;;  %v16078_v45 = vunpack.i.h.bf16 %v16076_v2 }
 0x5d2   : > { %v15061_v10 = vadd.f32 %v6795_v11, %v21165_v52  ;;  %v19213_v23 = vadd.f32 %v19052_v47, %v15060_v42  ;;  %v19228_v11 = vadd.f32 %v19052_v47, %v15058_v24  ;;  %v16077_v9 = vunpack.i.l.bf16 %v16076_v2 }
 0x5d3   : > { %7849 = vst.msk [vmem:[#allocation3 + $0x58] sm:$0xff] %vm835_vm2, %v7821_v40  ;;  %21164 = vst [vmem:[#allocation43_spill] sm:$0xff] %v19207_v1  ;;  %v16081_v54 = vpop.permute.xlu1 %16080  ;;  %v19218_v35 = vld [vmem:[#allocation3 + $0x50] sm:$0xff]  ;;  %v8299_v40 = vsel %vm8014_vm3, %v16512_v43, 0  ;;  %v7679_v30 = vmax.f32 %v21167_v16, %v16073_v51  ;;  %v21170_v24 = vmax.f32 %v18667_v37, 0.0  ;;  %v21174_v43 = vmax.f32 %v19207_v1, 0.0 }
 0x5d4   : > { %v19216_v39 = vadd.f32 %v19052_v47, %v15061_v10  ;;  %21166 = vst [vmem:[#allocation44_spill] sm:$0xff] %v19218_v35  ;;  %21168 = vst [vmem:[#allocation45_spill] sm:$0xff] %v19228_v11  ;;  %v16083_v42 = vunpack.i.h.bf16 %v16081_v54  ;;  %v16082_v52 = vunpack.i.l.bf16 %v16081_v54  ;;  %14448 = vmatprep.mubr.msk.bf16.mxu1 %vm835_vm2, %v19218_v35  ;;  %14493 = vmatpush3.bf16.msra.mxu1 %v8299_v40  ;;  %v21169_v10 = vmax.f32 %v18629_v33, 0.0  ;;  %v21178_v33 = vld [vmem:[#allocation72_spill] sm:$0xff]  ;;  %v21186_v1 = vld [vmem:[#allocation18_spill] sm:$0xff] }
 0x5d5   : > { %v14416_v29 = vpop.f32.mrb[100].mxu0  ;;  %16225 = vrot.lane.b32.xlu1 %v16224_v53, %s16625_s21  ;;  %v21171_v54 = vmax.f32 %v18659_v26, 0.0  ;;  %v21176_v26 = vld [vmem:[#allocation71_spill] sm:$0xff] }
 0x5d6   : > { %v7678_v58 = vmax.f32 %v21169_v10, %v16072_v7  ;;  %v7683_v51 = vmax.f32 %v21170_v24, %v16083_v42  ;;  %v15062_v40 = vadd.f32 %v14416_v29, %v21172_v19  ;;  %v6808_v35 = vpop.f32.mrb[101].mxu0  ;;  %v21173_v7 = vld [vmem:[#allocation70_spill] sm:$0xff]  ;;  %v21175_v53 = vmax.f32 %v19216_v39, 0.0 }
 0x5d7   : > { %v7682_v16 = vmax.f32 %v21171_v54, %v16082_v52  ;;  %v15063_v10 = vadd.f32 %v6808_v35, %v21173_v7  ;;  %v14417_v13 = vpop.f32.mrb[102].mxu0  ;;  %v16086_v20 = vpop.permute.xlu1 %16085 }
 0x5d8   : > { %v16229_v2 = vpack.i.bf16 %v21175_v53, %v21174_v43  ;;  %v7775_v42 = vmax.f32 %v7679_v30, %v7683_v51  ;;  %v15064_v52 = vadd.f32 %v14417_v13, %v21176_v26  ;;  %v6811_v54 = vpop.f32.mrb[103].mxu0  ;;  %v16088_v35 = vunpack.i.h.bf16 %v16086_v20  ;;  %v21179_v43 = vld [vmem:[#allocation15_spill] sm:$0xff]  ;;  %v21181_v51 = vld [vmem:[#allocation16_spill] sm:$0xff] }
 0x5d9   : > { %v7774_v24 = vmax.f32 %v7678_v58, %v7682_v16  ;;  %v19253_v29 = vadd.f32 %v19052_v47, %v15063_v10  ;;  %v16087_v7 = vunpack.i.l.bf16 %v16086_v20  ;;  %v15065_v14 = vadd.f32 %v6811_v54, %v21178_v33  ;;  %v21184_v10 = vld [vmem:[#allocation17_spill] sm:$0xff] }
 0x5da   : > { %v19250_v19 = vld [vmem:[#allocation3 + $0x58] sm:$0xff]  ;;  %16230 = vrot.lane.b32.xlu0 %v16229_v2, %s16625_s21  ;;  %v21180_v30 = vmax.f32 %v21179_v43, 0.0  ;;  %v21182_v13 = vmax.f32 %v21181_v51, 0.0  ;;  %v19264_v26 = vadd.f32 %v19052_v47, %v15064_v52  ;;  %v21185_v37 = vmax.f32 %v21184_v10, 0.0  ;;  %v21192_v10 = vld [vmem:[#allocation74_spill] sm:$0xff] }
 0x5db   : > { %21177 = vst [vmem:[#allocation46_spill] sm:$0xff] %v19250_v19  ;;  %14449 = vmatmul.mubr.msk.bf16.gmra.mrb[128].mxu1 %vm835_vm2, %v19250_v19  ;;  %v7822_v53 = vpack.c.bf16 %v7775_v42, %v7774_v24  ;;  %v21187_v33 = vmax.f32 %v21186_v1, 0.0  ;;  %v19271_v19 = vadd.f32 %v19052_v47, %v15065_v14  ;;  %v21188_v2 = vmax.f32 %v19228_v11, 0.0  ;;  %v16091_v42 = vpop.permute.xlu0 %16090 }
 0x5dc   : > { %v7681_v58 = vmax.f32 %v21180_v30, %v16078_v45  ;;  %v7680_v16 = vmax.f32 %v21182_v13, %v16077_v9  ;;  %21183 = vst [vmem:[#allocation47_spill] sm:$0xff] %v19264_v26  ;;  %v7685_v20 = vmax.f32 %v21185_v37, %v16088_v35  ;;  %v21189_v45 = vmax.f32 %v19213_v23, 0.0 }
 0x5dd   : > { %v7684_v54 = vmax.f32 %v21187_v33, %v16087_v7  ;;  %7850 = vst.msk [vmem:[#allocation3 + $0x60] sm:$0xff] %vm835_vm2, %v7822_v53  ;;  %v19279_v9 = vadd.f32 %v19052_v47, %v15062_v40  ;;  %v20847_v24 = vmax.f32 %v19253_v29, 0.0  ;;  %v20850_v1 = vmax.f32 %v19271_v19, 0.0  ;;  %v14420_v35 = vpop.f32.mrb[104].mxu0  ;;  %v21191_v7 = vld [vmem:[#allocation73_spill] sm:$0xff] }
 0x5de   : > { %v16234_v43 = vpack.i.bf16 %v21189_v45, %v21188_v2  ;;  %v7777_v37 = vmax.f32 %v7681_v58, %v7685_v20  ;;  %v20849_v14 = vmax.f32 %v19264_v26, 0.0  ;;  %v15066_v30 = vadd.f32 %v14420_v35, %v21191_v7  ;;  %v6824_v51 = vpop.f32.mrb[105].mxu0  ;;  %v21193_v20 = vld [vmem:[#allocation75_spill] sm:$0xff] }
 0x5df   : > { %21190 = vst [vmem:[#allocation48_spill] sm:$0xff] %v19279_v9  ;;  %v7776_v52 = vmax.f32 %v7680_v16, %v7684_v54  ;;  %v16093_v53 = vunpack.i.h.bf16 %v16091_v42  ;;  %v15067_v40 = vadd.f32 %v6824_v51, %v21192_v10  ;;  %v14421_v33 = vpop.f32.mrb[106].mxu0  ;;  %v16239_v58 = vpack.i.bf16 %v20850_v1, %v20847_v24  ;;  %v16096_v7 = vpop.permute.xlu0 %16095 }
 0x5e0   : > { %16235 = vrot.lane.b32.xlu0 %v16234_v43, %s16625_s21  ;;  %v16092_v16 = vunpack.i.l.bf16 %v16091_v42  ;;  %v15068_v54 = vadd.f32 %v14421_v33, %v21193_v20  ;;  %v6827_v2 = vpop.f32.mrb[107].mxu0  ;;  %v20848_v45 = vmax.f32 %v19279_v9, 0.0  ;;  %v21196_v42 = vmax.f32 %v18697_v44, 0.0 }
 0x5e1   : > { %v7823_v13 = vpack.c.bf16 %v7777_v37, %v7776_v52  ;;  %v19295_v43 = vadd.f32 %v19052_v47, %v15067_v40  ;;  %v21195_v37 = vld [vmem:[#allocation76_spill] sm:$0xff]  ;;  %16240 = vrot.lane.b32.xlu1 %v16239_v58, %s16625_s21  ;;  %v21199_v40 = vmax.f32 %v18689_v36, 0.0 }
 0x5e2   : > { %v15069_v52 = vadd.f32 %v6827_v2, %v21195_v37  ;;  %v19300_v35 = vadd.f32 %v19052_v47, %v15068_v54  ;;  %v7687_v51 = vmax.f32 %v21196_v42, %v16093_v53  ;;  %v19316_v54 = vadd.f32 %v19052_v47, %v15066_v30 }
 0x5e3   : > { %7851 = vst.msk [vmem:[#allocation3 + $0x68] sm:$0xff] %vm835_vm2, %v7823_v13  ;;  %21194 = vst [vmem:[#allocation6_spill] sm:$0xff] %v19295_v43  ;;  %v16101_v33 = vpop.permute.xlu1 %16100  ;;  %v16244_v13 = vpack.i.bf16 %v20849_v14, %v20848_v45  ;;  %v7686_v58 = vmax.f32 %v21199_v40, %v16092_v16  ;;  %v16098_v37 = vunpack.i.h.bf16 %v16096_v7  ;;  %v21200_v16 = vmax.f32 %v18727_v18, 0.0  ;;  %v21202_v45 = vld [vmem:[#allocation77_spill] sm:$0xff] }
 0x5e4   : > { %v19305_v10 = vadd.f32 %v19052_v47, %v15069_v52  ;;  %v19307_v20 = vld [vmem:[#allocation3 + $0x60] sm:$0xff]  ;;  %v16103_v2 = vunpack.i.h.bf16 %v16101_v33  ;;  %v16102_v44 = vunpack.i.l.bf16 %v16101_v33  ;;  %v16097_v52 = vunpack.i.l.bf16 %v16096_v7 }
 0x5e5   : > { %21198 = vst [vmem:[#allocation50_spill] sm:$0xff] %v19307_v20  ;;  %14452 = vmatprep.mubr.msk.bf16.mxu1 %vm835_vm2, %v19307_v20  ;;  %v14424_v24 = vpop.f32.mrb[108].mxu0  ;;  %16245 = vrot.lane.b32.xlu1 %v16244_v13, %s16625_s21  ;;  %v21201_v40 = vmax.f32 %v18719_v21, 0.0  ;;  %v21203_v20 = vld [vmem:[#allocation78_spill] sm:$0xff]  ;;  %v21204_v42 = vmax.f32 %v19295_v43, 0.0  ;;  %v20860_v36 = vmax.f32 %v19316_v54, 0.0 }
 0x5e6   : > { %21197 = vst [vmem:[#allocation49_spill] sm:$0xff] %v19305_v10  ;;  %v7691_v30 = vmax.f32 %v21200_v16, %v16103_v2  ;;  %v15070_v14 = vadd.f32 %v14424_v24, %v21202_v45  ;;  %v6840_v1 = vpop.f32.mrb[109].mxu0  ;;  %v21205_v26 = vmax.f32 %v19305_v10, 0.0  ;;  %v21206_v2 = vld [vmem:[#allocation79_spill] sm:$0xff]  ;;  %v21216_v43 = vld [vmem:[#allocation22_spill] sm:$0xff] }
 0x5e7   : > { %v7690_v33 = vmax.f32 %v21201_v40, %v16102_v44  ;;  %v15071_v53 = vadd.f32 %v6840_v1, %v21203_v20  ;;  %v14425_v9 = vpop.f32.mrb[110].mxu0  ;;  %v16106_v7 = vpop.permute.xlu1 %16105  ;;  %v21208_v20 = vld [vmem:[#allocation80_spill] sm:$0xff] }
 0x5e8   : > { %v16249_v13 = vpack.i.bf16 %v21205_v26, %v21204_v42  ;;  %v7779_v11 = vmax.f32 %v7687_v51, %v7691_v30  ;;  %v15072_v16 = vadd.f32 %v14425_v9, %v21206_v2  ;;  %v6843_v21 = vpop.f32.mrb[111].mxu0  ;;  %v16108_v1 = vunpack.i.h.bf16 %v16106_v7  ;;  %v21209_v26 = vld [vmem:[#allocation19_spill] sm:$0xff]  ;;  %v21211_v42 = vld [vmem:[#allocation20_spill] sm:$0xff] }
 0x5e9   : > { %v7778_v18 = vmax.f32 %v7686_v58, %v7690_v33  ;;  %v19339_v24 = vadd.f32 %v19052_v47, %v15071_v53  ;;  %v16107_v45 = vunpack.i.l.bf16 %v16106_v7  ;;  %v15073_v40 = vadd.f32 %v6843_v21, %v21208_v20  ;;  %v21214_v21 = vld [vmem:[#allocation21_spill] sm:$0xff] }
 0x5ea   : > { %v19336_v44 = vld [vmem:[#allocation3 + $0x68] sm:$0xff]  ;;  %16250 = vrot.lane.b32.xlu0 %v16249_v13, %s16625_s21  ;;  %v21210_v51 = vmax.f32 %v21209_v26, 0.0  ;;  %v21212_v9 = vmax.f32 %v21211_v42, 0.0  ;;  %v21213_v53 = vmax.f32 %v19300_v35, 0.0  ;;  %v19354_v7 = vadd.f32 %v19052_v47, %v15072_v16 }
 0x5eb   : > { %21207 = vst [vmem:[#allocation51_spill] sm:$0xff] %v19336_v44  ;;  %14453 = vmatmul.mubr.msk.bf16.gmra.mrb[132].mxu1 %vm835_vm2, %v19336_v44  ;;  %v7824_v33 = vpack.c.bf16 %v7779_v11, %v7778_v18  ;;  %v21215_v20 = vmax.f32 %v21214_v21, 0.0  ;;  %v21217_v13 = vmax.f32 %v21216_v43, 0.0  ;;  %v19365_v11 = vadd.f32 %v19052_v47, %v15070_v14 }
 0x5ec   : > { %v7689_v58 = vmax.f32 %v21210_v51, %v16098_v37  ;;  %v7688_v30 = vmax.f32 %v21212_v9, %v16097_v52  ;;  %v16254_v2 = vpack.i.bf16 %v21213_v53, %v20860_v36  ;;  %v19361_v37 = vadd.f32 %v19052_v47, %v15073_v40  ;;  %v16111_v52 = vpop.permute.xlu0 %16110  ;;  %v19378_v47 = vld [vmem:[%s20707_s3 + $0x30] sm:$0xff]  }
 0x5ed   : > { %v7693_v44 = vmax.f32 %v21215_v20, %v16108_v1  ;;  %v7692_v10 = vmax.f32 %v21217_v13, %v16107_v45  ;;  %7852 = vst.msk [vmem:[#allocation3 + $0x70] sm:$0xff] %vm835_vm2, %v7824_v33  ;;  %v20863_v18 = vmax.f32 %v19339_v24, 0.0  ;;  %v20862_v43 = vmax.f32 %v19354_v7, 0.0  ;;  %21218 = vst [vmem:[#allocation52_spill] sm:$0xff] %v19378_v47  ;;  %14550 = vmatprep.subr.bf16.mxu1 %v19378_v47  ;;  %v21221_v20 = vld [vmem:[#allocation23_spill] sm:$0xff]  ;;  %v21225_v36 = vld [vmem:[#allocation26_spill] sm:$0xff] }
 0x5ee   : > { %v20864_v51 = vmax.f32 %v19361_v37, 0.0  ;;  %16255 = vrot.lane.b32.xlu0 %v16254_v2, %s16625_s21  ;;  %v20861_v14 = vmax.f32 %v19365_v11, 0.0  ;;  %v21220_v53 = vmax.f32 %v18757_v6, 0.0  ;;  %v21222_v13 = vmax.f32 %v21221_v20, 0.0 }
 0x5ef   : > { %v7781_v26 = vmax.f32 %v7689_v58, %v7693_v44  ;;  %v7780_v16 = vmax.f32 %v7688_v30, %v7692_v10  ;;  %v16113_v10 = vunpack.i.h.bf16 %v16111_v52  ;;  %v16112_v44 = vunpack.i.l.bf16 %v16111_v52 }
 0x5f0   : > { %v16259_v45 = vpack.i.bf16 %v20864_v51, %v20863_v18  ;;  %v16116_v40 = vpop.permute.xlu0 %16115  ;;  %v16264_v9 = vpack.i.bf16 %v20862_v43, %v20861_v14  ;;  %v21226_v14 = vmax.f32 %v21225_v36, 0.0 }
 0x5f1   : > { %v7825_v1 = vpack.c.bf16 %v7781_v26, %v7780_v16  ;;  %v7695_v2 = vmax.f32 %v21220_v53, %v16113_v10  ;;  %v16118_v21 = vunpack.i.h.bf16 %v16116_v40  ;;  %v7694_v52 = vmax.f32 %v21222_v13, %v16112_v44  ;;  %v21223_v16 = vld [vmem:[#allocation28_spill] sm:$0xff]  ;;  %v21229_v44 = vld [vmem:[#allocation25_spill] sm:$0xff]  ;;  %v21231_v13 = vld [vmem:[#allocation27_spill] sm:$0xff] }
 0x5f2   : > { %16260 = vrot.lane.b32.xlu1 %v16259_v45, %s16625_s21  ;;  %v16117_v26 = vunpack.i.l.bf16 %v16116_v40  ;;  %v21227_v10 = vld [vmem:[#allocation24_spill] sm:$0xff]  ;;  %v21230_v40 = vmax.f32 %v21229_v44, 0.0  ;;  %v21232_v36 = vmax.f32 %v21231_v13, 0.0 }
 0x5f3   : > { %7853 = vst.msk [vmem:[#allocation3 + $0x78] sm:$0xff] %vm835_vm2, %v7825_v1  ;;  %v16121_v58 = vpop.permute.xlu1 %16120  ;;  %v21224_v1 = vmax.f32 %v21223_v16, 0.0  ;;  %v21228_v53 = vmax.f32 %v21227_v10, 0.0 }
 0x5f4   : > { %v19384_v42 = vld [vmem:[#allocation3 + $0x70] sm:$0xff]  ;;  %v16123_v30 = vunpack.i.h.bf16 %v16121_v58  ;;  %v16122_v33 = vunpack.i.l.bf16 %v16121_v58  ;;  %v7696_v20 = vmax.f32 %v21230_v40, %v16117_v26 }
 0x5f5   : > { %21219 = vst [vmem:[#allocation53_spill] sm:$0xff] %v19384_v42  ;;  %14456 = vmatprep.mubr.msk.bf16.mxu1 %vm835_vm2, %v19384_v42  ;;  %v21238_v40 = vld [vmem:[#allocation30_spill] sm:$0xff] }
 0x5f6   : > { %16265 = vrot.lane.b32.xlu1 %v16264_v9, %s16625_s21  ;;  %v7699_v45 = vmax.f32 %v21224_v1, %v16123_v30  ;;  %v7698_v43 = vmax.f32 %v21226_v14, %v16122_v33  ;;  %v7697_v9 = vmax.f32 %v21228_v53, %v16118_v21  ;;  %v21233_v33 = vld [vmem:[#allocation29_spill] sm:$0xff] }
 0x5f7   : > { %v16126_v58 = vpop.permute.xlu1 %16125 }
 0x5f8   : > { %v7783_v18 = vmax.f32 %v7695_v2, %v7699_v45  ;;  %v7782_v51 = vmax.f32 %v7694_v52, %v7698_v43  ;;  %v16128_v42 = vunpack.i.h.bf16 %v16126_v58  ;;  %v16127_v47 = vunpack.i.l.bf16 %v16126_v58 }
 0x5f9   : > { %v21234_v2 = vmax.f32 %v21233_v33, 0.0  ;;  %v21241_v33 = vld [vmem:[#allocation34_spill] sm:$0xff] }
 0x5fa   : > { %v19401_v6 = vld [vmem:[#allocation3 + $0x78] sm:$0xff]  ;;  %v7826_v30 = vpack.c.bf16 %v7783_v18, %v7782_v51  ;;  %v7701_v14 = vmax.f32 %v21232_v36, %v16128_v42  ;;  %v21240_v36 = vmax.f32 %v18850_v34, 0.0 }
 0x5fb   : > { %14457 = vmatmul.mubr.msk.bf16.gmra.mrb[136].mxu1 %vm835_vm2, %v19401_v6  ;;  %v7700_v43 = vmax.f32 %v21234_v2, %v16127_v47  ;;  %v16131_v1 = vpop.permute.xlu0 %16130  ;;  %v21236_v47 = vld [vmem:[#allocation32_spill] sm:$0xff]  ;;  %v21242_v2 = vmax.f32 %v21241_v33, 0.0 }
 0x5fc   : > { %7854 = vst.msk [vmem:[#allocation3 + $0x80] sm:$0xff] %vm835_vm2, %v7826_v30  ;;  %v7785_v52 = vmax.f32 %v7697_v9, %v7701_v14  ;;  %v16133_v21 = vunpack.i.h.bf16 %v16131_v1  ;;  %v16132_v58 = vunpack.i.l.bf16 %v16131_v1  ;;  %v21237_v42 = vmax.f32 %v21236_v47, 0.0 }
 0x5fd   : > { %v7784_v16 = vmax.f32 %v7696_v20, %v7700_v43  ;;  %v21239_v20 = vmax.f32 %v21238_v40, 0.0  ;;  %v21247_v40 = vmax.f32 %v18847_v57, 0.0 }
 0x5fe   : > { %v7703_v44 = vmax.f32 %v21237_v42, %v16133_v21  ;;  %v21243_v21 = vld [vmem:[#allocation31_spill] sm:$0xff] }
 0x5ff   : > { %v7827_v45 = vpack.c.bf16 %v7785_v52, %v7784_v16  ;;  %v16136_v10 = vpop.permute.xlu0 %16135  ;;  %v7702_v30 = vmax.f32 %v21239_v20, %v16132_v58  ;;  %v21244_v47 = vmax.f32 %v21243_v21, 0.0  ;;  %v21248_v20 = vld [vmem:[#allocation35_spill] sm:$0xff] }
 0x600   : > { %v16138_v9 = vunpack.i.h.bf16 %v16136_v10  ;;  %v16137_v13 = vunpack.i.l.bf16 %v16136_v10  ;;  %v21245_v10 = vld [vmem:[#allocation33_spill] sm:$0xff] }
 0x601   : > { %7855 = vst.msk [vmem:[#allocation3 + $0x88] sm:$0xff] %vm835_vm2, %v7827_v45  ;;  %v21246_v42 = vmax.f32 %v21245_v10, 0.0 }
 0x602   : > { %v7705_v58 = vmax.f32 %v21244_v47, %v16138_v9  ;;  %v21251_v47 = vmax.f32 %v18872_v27, 0.0  ;;  %v21254_v27 = vmax.f32 %v18883_v55, 0.0 }
 0x603   : > { %v16141_v53 = vpop.permute.xlu1 %16140  ;;  %v19415_v26 = vld [vmem:[#allocation3 + $0x80] sm:$0xff]  ;;  %v7704_v34 = vmax.f32 %v21246_v42, %v16137_v13  ;;  %v21252_v42 = vmax.f32 %v18927_v49, 0.0 }
 0x604   : > { %21235 = vst [vmem:[#allocation54_spill] sm:$0xff] %v19415_v26  ;;  %v16143_v18 = vunpack.i.h.bf16 %v16141_v53  ;;  %v16142_v51 = vunpack.i.l.bf16 %v16141_v53  ;;  %14460 = vmatprep.mubr.msk.bf16.mxu1 %vm835_vm2, %v19415_v26 }
 0x606   : > { %v7707_v14 = vmax.f32 %v21240_v36, %v16143_v18  ;;  %v7706_v43 = vmax.f32 %v21242_v2, %v16142_v51  ;;  %v21249_v36 = vmax.f32 %v21248_v20, 0.0 }
 0x607   : > { %v16146_v52 = vpop.permute.xlu1 %16145 }
 0x608   : > { %v19427_v16 = vld [vmem:[#allocation3 + $0x88] sm:$0xff]  ;;  %v7787_v1 = vmax.f32 %v7703_v44, %v7707_v14  ;;  %v7786_v45 = vmax.f32 %v7702_v30, %v7706_v43  ;;  %v16148_v53 = vunpack.i.h.bf16 %v16146_v52  ;;  %v16147_v26 = vunpack.i.l.bf16 %v16146_v52 }
 0x609   : > { %14461 = vmatmul.mubr.msk.bf16.gmra.mrb[140].mxu1 %vm835_vm2, %v19427_v16 }
 0x60a   : > { %v7828_v18 = vpack.c.bf16 %v7787_v1, %v7786_v45  ;;  %v7709_v51 = vmax.f32 %v21247_v40, %v16148_v53  ;;  %v7708_v33 = vmax.f32 %v21249_v36, %v16147_v26  ;;  %v21250_v26 = vmax.f32 %v18886_v31, 0.0 }
 0x60b   : > { %v16151_v14 = vpop.permute.xlu0 %16150 }
 0x60c   : > { %7856 = vst.msk [vmem:[#allocation3 + $0x90] sm:$0xff] %vm835_vm2, %v7828_v18  ;;  %v7789_v44 = vmax.f32 %v7705_v58, %v7709_v51  ;;  %v7788_v30 = vmax.f32 %v7704_v34, %v7708_v33  ;;  %v16153_v43 = vunpack.i.h.bf16 %v16151_v14  ;;  %v16152_v9 = vunpack.i.l.bf16 %v16151_v14 }
 0x60d   : > { %v21253_v18 = vmax.f32 %v18918_v46, 0.0  ;;  %v21255_v14 = vmax.f32 %v18895_v59, 0.0  ;;  %v21256_v46 = vmax.f32 %v18924_v28, 0.0 }
 0x60e   : > { %v7829_v2 = vpack.c.bf16 %v7789_v44, %v7788_v30  ;;  %v7711_v45 = vmax.f32 %v21250_v26, %v16153_v43  ;;  %v7710_v58 = vmax.f32 %v21251_v47, %v16152_v9  ;;  %v21257_v9 = vmax.f32 %v18935_v62, 0.0 }
 0x60f   : > { %v16156_v52 = vpop.permute.xlu0 %16155  ;;  %v21258_v62 = vmax.f32 %v18960_v60, 0.0 }
 0x610   : > { %7857 = vst.msk [vmem:[#allocation3 + $0x98] sm:$0xff] %vm835_vm2, %v7829_v2  ;;  %v16158_v53 = vunpack.i.h.bf16 %v16156_v52  ;;  %v16157_v10 = vunpack.i.l.bf16 %v16156_v52 }
 0x612   : > { %v7713_v31 = vmax.f32 %v21254_v27, %v16158_v53  ;;  %v7712_v49 = vmax.f32 %v21255_v14, %v16157_v10 }
 0x613   : > { %v16161_v21 = vpop.permute.xlu1 %16160  ;;  %v19441_v13 = vld [vmem:[#allocation3 + $0x90] sm:$0xff] }
 0x614   : > { %v16163_v1 = vunpack.i.h.bf16 %v16161_v21  ;;  %v16162_v57 = vunpack.i.l.bf16 %v16161_v21  ;;  %14464 = vmatprep.mubr.msk.bf16.mxu1 %vm835_vm2, %v19441_v13 }
 0x616   : > { %v7715_v34 = vmax.f32 %v21252_v42, %v16163_v1  ;;  %v7714_v40 = vmax.f32 %v21253_v18, %v16162_v57 }
 0x617   : > { %v16166_v51 = vpop.permute.xlu1 %16165  ;;  %v19453_v20 = vld [vmem:[#allocation3 + $0x98] sm:$0xff] }
 0x618   : > { %v7791_v36 = vmax.f32 %v7711_v45, %v7715_v34  ;;  %v7790_v33 = vmax.f32 %v7710_v58, %v7714_v40  ;;  %v16168_v44 = vunpack.i.h.bf16 %v16166_v51  ;;  %v16167_v30 = vunpack.i.l.bf16 %v16166_v51  ;;  %14465 = vmatmul.mubr.msk.bf16.gmra.mrb[144].mxu1 %vm835_vm2, %v19453_v20 }
 0x619   : > { %v21259_v34 = vmax.f32 %v18950_v32, 0.0  ;;  %v21260_v51 = vmax.f32 %v19010_v3, 0.0  ;;  %v21262_v32 = vmax.f32 %v18955_v4, 0.0 }
 0x61a   : > { %v7830_v2 = vpack.c.bf16 %v7791_v36, %v7790_v33  ;;  %v7717_v43 = vmax.f32 %v21256_v46, %v16168_v44  ;;  %v7716_v52 = vmax.f32 %v21257_v9, %v16167_v30  ;;  %v21261_v33 = vmax.f32 %v18990_v63, 0.0 }
 0x61b   : > { %v16171_v57 = vpop.permute.xlu0 %16170  ;;  %v21263_v46 = vmax.f32 %v18969_v56, 0.0  ;;  %v21264_v63 = vmax.f32 %v19003_v25, 0.0 }
 0x61c   : > { %7858 = vst.msk [vmem:[#allocation3 + $0xa0] sm:$0xff] %vm835_vm2, %v7830_v2  ;;  %v7793_v21 = vmax.f32 %v7713_v31, %v7717_v43  ;;  %v7792_v1 = vmax.f32 %v7712_v49, %v7716_v52  ;;  %v16173_v55 = vunpack.i.h.bf16 %v16171_v57  ;;  %v16172_v45 = vunpack.i.l.bf16 %v16171_v57 }
 0x61d   : > { %v21265_v52 = vmax.f32 %v19014_v5, 0.0  ;;  %v21266_v5 = vmax.f32 %v19041_v48, 0.0 }
 0x61e   : > { %v7831_v26 = vpack.c.bf16 %v7793_v21, %v7792_v1  ;;  %v7719_v10 = vmax.f32 %v21258_v62, %v16173_v55  ;;  %v7718_v18 = vmax.f32 %v21259_v34, %v16172_v45 }
 0x61f   : > { %v16176_v53 = vpop.permute.xlu0 %16175 }
 0x620   : > { %7859 = vst.msk [vmem:[#allocation3 + $0xa8] sm:$0xff] %vm835_vm2, %v7831_v26  ;;  %v16178_v42 = vunpack.i.h.bf16 %v16176_v53  ;;  %v16177_v40 = vunpack.i.l.bf16 %v16176_v53 }
 0x622   : > { %v7721_v60 = vmax.f32 %v21262_v32, %v16178_v42  ;;  %v7720_v3 = vmax.f32 %v21263_v46, %v16177_v40  ;;  %v21273_v46 = vld [vmem:[#allocation36_spill] sm:$0xff] }
 0x623   : > { %v16181_v59 = vpop.permute.xlu1 %16180  ;;  %v19467_v47 = vld [vmem:[#allocation3 + $0xa0] sm:$0xff] }
 0x624   : > { %v16183_v58 = vunpack.i.h.bf16 %v16181_v59  ;;  %v16182_v28 = vunpack.i.l.bf16 %v16181_v59  ;;  %14468 = vmatprep.mubr.msk.bf16.mxu1 %vm835_vm2, %v19467_v47 }
 0x626   : > { %v7723_v36 = vmax.f32 %v21260_v51, %v16183_v58  ;;  %v7722_v44 = vmax.f32 %v21261_v33, %v16182_v28  ;;  %v21269_v51 = vmax.f32 %v19077_v38, 0.0  ;;  %v21272_v38 = vmax.f32 %v19087_v12, 0.0 }
 0x627   : > { %v16186_v30 = vpop.permute.xlu1 %16185  ;;  %v19479_v27 = vld [vmem:[#allocation3 + $0xa8] sm:$0xff] }
 0x628   : > { %v7795_v31 = vmax.f32 %v7719_v10, %v7723_v36  ;;  %v7794_v14 = vmax.f32 %v7718_v18, %v7722_v44  ;;  %v16188_v49 = vunpack.i.h.bf16 %v16186_v30  ;;  %v16187_v2 = vunpack.i.l.bf16 %v16186_v30  ;;  %14469 = vmatmul.mubr.msk.bf16.gmra.mrb[148].mxu1 %vm835_vm2, %v19479_v27 }
 0x629   : > { %v21267_v10 = vmax.f32 %v19033_v17, 0.0  ;;  %v21268_v18 = vmax.f32 %v19094_v15, 0.0  ;;  %v21270_v17 = vmax.f32 %v19038_v41, 0.0 }
 0x62a   : > { %v7832_v43 = vpack.c.bf16 %v7795_v31, %v7794_v14  ;;  %v7725_v9 = vmax.f32 %v21264_v63, %v16188_v49  ;;  %v7724_v21 = vmax.f32 %v21265_v52, %v16187_v2  ;;  %v21271_v2 = vmax.f32 %v19055_v0, 0.0 }
 0x62b   : > { %v16191_v26 = vpop.permute.xlu0 %16190 }
 0x62c   : > { %7860 = vst.msk [vmem:[#allocation3 + $0xb0] sm:$0xff] %vm835_vm2, %v7832_v43  ;;  %v7797_v1 = vmax.f32 %v7721_v60, %v7725_v9  ;;  %v7796_v57 = vmax.f32 %v7720_v3, %v7724_v21  ;;  %v16193_v4 = vunpack.i.h.bf16 %v16191_v26  ;;  %v16192_v45 = vunpack.i.l.bf16 %v16191_v26 }
 0x62d   : > { %v21274_v3 = vmax.f32 %v21273_v46, 0.0 }
 0x62e   : > { %v7833_v55 = vpack.c.bf16 %v7797_v1, %v7796_v57  ;;  %v7727_v28 = vmax.f32 %v21266_v5, %v16193_v4  ;;  %v7726_v42 = vmax.f32 %v21267_v10, %v16192_v45  ;;  %v21275_v4 = vld [vmem:[#allocation38_spill] sm:$0xff] }
 0x62f   : > { %v21276_v45 = vmax.f32 %v21275_v4, 0.0 }
 0x630   : > { %7861 = vst.msk [vmem:[#allocation3 + $0xb8] sm:$0xff] %vm835_vm2, %v7833_v55 }
 0x631   : > { %v16196_v53 = vpop.permute.xlu0 %16195 }
 0x632   : > { %v16198_v62 = vunpack.i.h.bf16 %v16196_v53  ;;  %v16197_v34 = vunpack.i.l.bf16 %v16196_v53 }
 0x633   : > { %v16201_v56 = vpop.permute.xlu1 %16200  ;;  %v19493_v59 = vld [vmem:[#allocation3 + $0xb0] sm:$0xff] }
 0x634   : > { %v16203_v58 = vunpack.i.h.bf16 %v16201_v56  ;;  %v16202_v25 = vunpack.i.l.bf16 %v16201_v56  ;;  %14472 = vmatprep.mubr.msk.bf16.mxu1 %vm835_vm2, %v19493_v59  ;;  %v7729_v48 = vmax.f32 %v21270_v17, %v16198_v62  ;;  %v7728_v15 = vmax.f32 %v21271_v2, %v16197_v34 }
 0x635   : > { %v21279_v62 = vmax.f32 %v19184_v50, 0.0 }
 0x636   : > { %v7731_v40 = vmax.f32 %v21268_v18, %v16203_v58  ;;  %v7730_v36 = vmax.f32 %v21269_v51, %v16202_v25  ;;  %v21277_v58 = vld [vmem:[#allocation37_spill] sm:$0xff] }
 0x637   : > { %v16206_v33 = vpop.permute.xlu1 %16205  ;;  %v19505_v44 = vld [vmem:[#allocation3 + $0xb8] sm:$0xff]  ;;  %v21278_v25 = vmax.f32 %v21277_v58, 0.0  ;;  %v21291_v58 = vmax.f32 %v19253_v29, 0.0 }
 0x638   : > { %v7799_v30 = vmax.f32 %v7727_v28, %v7731_v40  ;;  %v7798_v31 = vmax.f32 %v7726_v42, %v7730_v36  ;;  %v16208_v14 = vunpack.i.h.bf16 %v16206_v33  ;;  %v16207_v49 = vunpack.i.l.bf16 %v16206_v33  ;;  %14473 = vmatmul.mubr.msk.bf16.gmra.mrb[152].mxu1 %vm835_vm2, %v19505_v44 }
 0x639   : > { %v21280_v42 = vmax.f32 %v19162_v22, 0.0 }
 0x63a   : > { %v7834_v32 = vpack.c.bf16 %v7799_v30, %v7798_v31  ;;  %v7733_v60 = vmax.f32 %v21272_v38, %v16208_v14  ;;  %v7732_v43 = vmax.f32 %v21274_v3, %v16207_v49  ;;  %v21281_v31 = vmax.f32 %v19123_v61, 0.0 }
 0x63b   : > { %v16211_v52 = vpop.permute.xlu0 %16210  ;;  %v21282_v49 = vmax.f32 %v19139_v8, 0.0 }
 0x63c   : > { %7862 = vst.msk [vmem:[#allocation3 + $0xc0] sm:$0xff] %vm835_vm2, %v7834_v32  ;;  %v7801_v63 = vmax.f32 %v7729_v48, %v7733_v60  ;;  %v7800_v9 = vmax.f32 %v7728_v15, %v7732_v43  ;;  %v16213_v41 = vunpack.i.h.bf16 %v16211_v52  ;;  %v16212_v1 = vunpack.i.l.bf16 %v16211_v52  ;;  %v21283_v48 = vld [vmem:[#allocation41_spill] sm:$0xff]  ;;  %v21285_v15 = vld [vmem:[#allocation42_spill] sm:$0xff] }
 0x63d   : > { %v21284_v22 = vmax.f32 %v21283_v48, 0.0  ;;  %v21286_v32 = vmax.f32 %v21285_v15, 0.0 }
 0x63e   : > { %v7835_v21 = vpack.c.bf16 %v7801_v63, %v7800_v9  ;;  %v7735_v53 = vmax.f32 %v21276_v45, %v16213_v41  ;;  %v7734_v5 = vmax.f32 %v21278_v25, %v16212_v1  ;;  %v21287_v1 = vmax.f32 %v19216_v39, 0.0 }
 0x63f   : > { %v21292_v39 = vmax.f32 %v19213_v23, 0.0 }
 0x640   : > { %7863 = vst.msk [vmem:[#allocation3 + $0xc8] sm:$0xff] %vm835_vm2, %v7835_v21  ;;  %v16216_v57 = vpop.permute.xlu0 %16215 }
 0x641   : > { %v16218_v56 = vunpack.i.h.bf16 %v16216_v57  ;;  %v16217_v28 = vunpack.i.l.bf16 %v16216_v57 }
 0x643   : > { %v16221_v0 = vpop.permute.xlu1 %16220  ;;  %v19519_v26 = vld [vmem:[#allocation3 + $0xc0] sm:$0xff]  ;;  %v7737_v14 = vmax.f32 %v21281_v31, %v16218_v56  ;;  %v7736_v50 = vmax.f32 %v21282_v49, %v16217_v28 }
 0x644   : > { %v16223_v55 = vunpack.i.h.bf16 %v16221_v0  ;;  %v16222_v12 = vunpack.i.l.bf16 %v16221_v0  ;;  %14476 = vmatprep.mubr.msk.bf16.mxu1 %vm835_vm2, %v19519_v26 }
 0x646   : > { %v7739_v10 = vmax.f32 %v21279_v62, %v16223_v55  ;;  %v7738_v34 = vmax.f32 %v21280_v42, %v16222_v12  ;;  %v21288_v55 = vld [vmem:[#allocation43_spill] sm:$0xff] }
 0x647   : > { %v16226_v18 = vpop.permute.xlu1 %16225  ;;  %v19531_v40 = vld [vmem:[#allocation3 + $0xc8] sm:$0xff]  ;;  %v21289_v12 = vmax.f32 %v21288_v55, 0.0  ;;  %v21304_v55 = vmax.f32 %v19339_v24, 0.0 }
 0x648   : > { %v7803_v51 = vmax.f32 %v7735_v53, %v7739_v10  ;;  %v7802_v36 = vmax.f32 %v7734_v5, %v7738_v34  ;;  %v16228_v33 = vunpack.i.h.bf16 %v16226_v18  ;;  %v16227_v30 = vunpack.i.l.bf16 %v16226_v18  ;;  %14477 = vmatmul.mubr.msk.bf16.gmra.mrb[156].mxu1 %vm835_vm2, %v19531_v40 }
 0x649   : > { %v21290_v53 = vmax.f32 %v19271_v19, 0.0 }
 0x64a   : > { %v7836_v17 = vpack.c.bf16 %v7803_v51, %v7802_v36  ;;  %v7741_v2 = vmax.f32 %v21284_v22, %v16228_v33  ;;  %v7740_v38 = vmax.f32 %v21286_v32, %v16227_v30  ;;  %v21293_v51 = vld [vmem:[#allocation45_spill] sm:$0xff]  ;;  %v21295_v30 = vld [vmem:[#allocation47_spill] sm:$0xff] }
 0x64b   : > { %v21294_v36 = vmax.f32 %v21293_v51, 0.0  ;;  %v21296_v29 = vmax.f32 %v21295_v30, 0.0 }
 0x64c   : > { %7864 = vst.msk [vmem:[#allocation3 + $0xd0] sm:$0xff] %vm835_vm2, %v7836_v17  ;;  %v7805_v60 = vmax.f32 %v7737_v14, %v7741_v2  ;;  %v7804_v46 = vmax.f32 %v7736_v50, %v7740_v38  ;;  %v16231_v3 = vpop.permute.xlu0 %16230  ;;  %v21297_v14 = vld [vmem:[#allocation48_spill] sm:$0xff] }
 0x64d   : > { %v16233_v61 = vunpack.i.h.bf16 %v16231_v3  ;;  %v16232_v63 = vunpack.i.l.bf16 %v16231_v3  ;;  %v21298_v49 = vmax.f32 %v21297_v14, 0.0  ;;  %v16595_v14 = vld [vmem:[#allocation3 + $0x18] sm:$0xff] }
 0x64e   : > { %v7837_v43 = vpack.c.bf16 %v7805_v60, %v7804_v46 }
 0x64f   : > { %v7743_v57 = vmax.f32 %v21287_v1, %v16233_v61  ;;  %v7742_v4 = vmax.f32 %v21289_v12, %v16232_v63 }
 0x650   : > { %7865 = vst.msk [vmem:[#allocation3 + $0xd8] sm:$0xff] %vm835_vm2, %v7837_v43  ;;  %v21299_v43 = vld [vmem:[#allocation49_spill] sm:$0xff] }
 0x651   : > { %v21300_v61 = vmax.f32 %v21299_v43, 0.0  ;;  %v8558_v43 = vld [vmem:[#allocation3 + $0x20] sm:$0xff] }
 0x652   : > { %v16236_v9 = vpop.permute.xlu0 %16235 }
 0x653   : > { %v16241_v8 = vpop.permute.xlu1 %16240  ;;  %v19545_v52 = vld [vmem:[#allocation3 + $0xd0] sm:$0xff]  ;;  %v16238_v0 = vunpack.i.h.bf16 %v16236_v9  ;;  %v16237_v45 = vunpack.i.l.bf16 %v16236_v9 }
 0x654   : > { %v16243_v21 = vunpack.i.h.bf16 %v16241_v8  ;;  %v16242_v41 = vunpack.i.l.bf16 %v16241_v8  ;;  %14480 = vmatprep.mubr.msk.bf16.mxu1 %vm835_vm2, %v19545_v52  ;;  %v21301_v8 = vld [vmem:[#allocation6_spill] sm:$0xff] }
 0x655   : > { %v7745_v18 = vmax.f32 %v21292_v39, %v16238_v0  ;;  %v7744_v19 = vmax.f32 %v21294_v36, %v16237_v45 }
 0x656   : > { %v7747_v56 = vmax.f32 %v21290_v53, %v16243_v21  ;;  %v7746_v25 = vmax.f32 %v21291_v58, %v16242_v41  ;;  %v21302_v21 = vmax.f32 %v21301_v8, 0.0  ;;  %v16518_v8 = vld [vmem:[%s20707_s3 + $0x58] sm:$0x1f]  }
 0x657   : > { %v16246_v5 = vpop.permute.xlu1 %16245  ;;  %v19557_v28 = vld [vmem:[#allocation3 + $0xd8] sm:$0xff] }
 0x658   : > { %v7807_v62 = vmax.f32 %v7743_v57, %v7747_v56  ;;  %v7806_v10 = vmax.f32 %v7742_v4, %v7746_v25  ;;  %v16248_v42 = vunpack.i.h.bf16 %v16246_v5  ;;  %v16247_v34 = vunpack.i.l.bf16 %v16246_v5  ;;  %14481 = vmatmul.mubr.msk.bf16.gmra.mrb[160].mxu1 %vm835_vm2, %v19557_v28  ;;  %v7870_v4 = vld [vmem:[#allocation3] sm:$0xff] }
 0x659   : > { %v21303_v57 = vmax.f32 %v19361_v37, 0.0  ;;  %v21306_v37 = vmax.f32 %v19316_v54, 0.0  ;;  %v21309_v54 = vld [vmem:[#allocation52_spill] sm:$0xff] }
 0x65a   : > { %v7838_v33 = vpack.c.bf16 %v7807_v62, %v7806_v10  ;;  %v7749_v31 = vmax.f32 %v21296_v29, %v16248_v42  ;;  %v7748_v50 = vmax.f32 %v21298_v49, %v16247_v34  ;;  %v21305_v62 = vmax.f32 %v19300_v35, 0.0  ;;  %v16514_v35 = vld [vmem:[%s20707_s3 + $0x38] sm:$0xff]   ;;  %v16596_v49 = vld [vmem:[#allocation3 + $0x20] sm:$0xff] }
 0x65b   : > { %v21307_v34 = vmax.f32 %v19354_v7, 0.0  ;;  %v16594_v7 = vld [vmem:[#allocation3 + $0x10] sm:$0xff] }
 0x65c   : > { %7866 = vst.msk [vmem:[#allocation3 + $0xe0] sm:$0xff] %vm835_vm2, %v7838_v33  ;;  %v7809_v17 = vmax.f32 %v7745_v18, %v7749_v31  ;;  %v7808_v48 = vmax.f32 %v7744_v19, %v7748_v50  ;;  %v16251_v22 = vpop.permute.xlu0 %16250  ;;  %v21308_v18 = vmax.f32 %v19365_v11, 0.0  ;;  %v7871_v33 = vld [vmem:[#allocation3 + $0x8] sm:$0xff]  ;;  %v16515_v11 = vld [vmem:[%s20707_s3 + $0x40] sm:$0x1f]  }
 0x65d   : > { %v16253_v23 = vunpack.i.h.bf16 %v16251_v22  ;;  %v16252_v15 = vunpack.i.l.bf16 %v16251_v22  ;;  %v8695_v29 = vsel %vm8014_vm3, %v16515_v11, 0  ;;  %v16516_v31 = vld [vmem:[%s20707_s3 + $0x48] sm:$0xff]   ;;  %v21310_v22 = vld [vmem:[#allocation39_spill] sm:$0xff] }
 0x65e   : > { %v7839_v2 = vpack.c.bf16 %v7809_v17, %v7808_v48  ;;  %v16597_v50 = vld [vmem:[#allocation3 + $0x28] sm:$0xff]  ;;  %v16598_v17 = vld [vmem:[#allocation3 + $0x30] sm:$0xff]  ;;  %v16599_v48 = vld [vmem:[#allocation3 + $0x38] sm:$0xff] }
 0x65f   : > { %v7751_v63 = vmax.f32 %v21300_v61, %v16253_v23  ;;  %v7750_v41 = vmax.f32 %v21302_v21, %v16252_v15  ;;  %v21312_v23 = vld [vmem:[#allocation44_spill] sm:$0xff]  ;;  %v21313_v15 = vld [vmem:[#allocation46_spill] sm:$0xff]  ;;  %v9147_v21 = vsel %vm8014_vm3, %v16518_v8, 0 }
 0x660   : > { %7867 = vst.msk [vmem:[#allocation3 + $0xe8] sm:$0xff] %vm835_vm2, %v7839_v2  ;;  %v16256_v32 = vpop.permute.xlu0 %16255  ;;  %v21311_v2 = vld [vmem:[#allocation40_spill] sm:$0xff]  ;;  %v16517_v61 = vld [vmem:[%s20707_s3 + $0x50] sm:$0xff]  }
 0x661   : > { %v16258_v9 = vunpack.i.h.bf16 %v16256_v32  ;;  %v16257_v1 = vunpack.i.l.bf16 %v16256_v32  ;;  %v21314_v32 = vld [vmem:[#allocation50_spill] sm:$0xff] }
 0x663   : > { %v19571_v60 = vld [vmem:[#allocation3 + $0xe0] sm:$0xff]  ;;  %v7753_v10 = vmax.f32 %v21305_v62, %v16258_v9  ;;  %v7752_v24 = vmax.f32 %v21306_v37, %v16257_v1  ;;  %v8560_v9 = vld [vmem:[#allocation3 + $0x30] sm:$0xff]  ;;  %v8561_v1 = vld [vmem:[#allocation3 + $0x38] sm:$0xff] }
 0x664   : > { %v16261_v38 = vpop.permute.xlu1 %16260  ;;  %14484 = vmatprep.mubr.msk.bf16.mxu1 %vm835_vm2, %v19571_v60  ;;  %v9465_v62 = vld [vmem:[#allocation3 + $0x58] sm:$0xff] }
 0x665   : > { %v16263_v46 = vunpack.i.h.bf16 %v16261_v38  ;;  %v16262_v3 = vunpack.i.l.bf16 %v16261_v38  ;;  %v21315_v38 = vld [vmem:[#allocation51_spill] sm:$0xff] }
 0x667   : > { %v7755_v0 = vmax.f32 %v21303_v57, %v16263_v46  ;;  %v7754_v12 = vmax.f32 %v21304_v55, %v16262_v3  ;;  %v19583_v53 = vld [vmem:[#allocation3 + $0xe8] sm:$0xff]  ;;  %v21317_v3 = vld [vmem:[#allocation54_spill] sm:$0xff]  ;;  %v19672_v57 = vld [vmem:[#allocation3 + $0x40] sm:$0xff] }
 0x668   : > { %v16266_v45 = vpop.permute.xlu1 %16265  ;;  %14485 = vmatmul.mubr.msk.bf16.gmra.mrb[164].mxu1 %vm835_vm2, %v19583_v53  ;;  %v21316_v46 = vld [vmem:[#allocation53_spill] sm:$0xff] }
 0x669   : > { %v7811_v56 = vmax.f32 %v7751_v63, %v7755_v0  ;;  %v7810_v58 = vmax.f32 %v7750_v41, %v7754_v12  ;;  %v16268_v25 = vunpack.i.h.bf16 %v16266_v45  ;;  %v16267_v5 = vunpack.i.l.bf16 %v16266_v45  ;;  %14494 = vmatprep.mubr.msk.bf16.mxu1 %vm835_vm2, %v7870_v4  ;;  %v8559_v63 = vld [vmem:[#allocation3 + $0x28] sm:$0xff]  ;;  %v16519_v41 = vld [vmem:[%s20707_s3 + $0x60] sm:$0xff]   ;;  %v16521_v4 = vld [vmem:[%s20707_s3 + $0x70] sm:$0x1f]  }
 0x66a   : > { %v16520_v12 = vld [vmem:[%s20707_s3 + $0x68] sm:$0xff]   ;;  %v9599_v45 = vsel %vm8014_vm3, %v16521_v4, 0 }
 0x66b   : > { %v7840_v42 = vpack.c.bf16 %v7811_v56, %v7810_v58  ;;  %v7757_v39 = vmax.f32 %v21307_v34, %v16268_v25  ;;  %v7756_v51 = vmax.f32 %v21308_v18, %v16267_v5  ;;  %v9013_v56 = vld [vmem:[#allocation3 + $0x48] sm:$0xff]  ;;  %v9014_v58 = vld [vmem:[#allocation3 + $0x50] sm:$0xff]  ;;  %v9036_v25 = vld [vmem:[#allocation3 + $0x100] sm:$0xff] }
 0x66c   : > { %v9037_v5 = vld [vmem:[#allocation3 + $0x108] sm:$0xff] }
 0x66d   : > { %7868 = vst.msk [vmem:[#allocation3 + $0xf0] sm:$0xff] %vm835_vm2, %v7840_v42  ;;  %v7813_v36 = vmax.f32 %v7753_v10, %v7757_v39  ;;  %v7812_v19 = vmax.f32 %v7752_v24, %v7756_v51 }
 0x66f   : > { %v7841_v30 = vpack.c.bf16 %v7813_v36, %v7812_v19 }
 0x670   : > { %14495 = vmatmul.mubr.msk.bf16.vlgmr.msra.gmra.mrb[112].mxu1 %vm835_vm2, %v7871_v33 }
 0x671   : > { %7869 = vst.msk [vmem:[#allocation3 + $0xf8] sm:$0xff] %vm835_vm2, %v7841_v30  ;;  %14551 = vmatpush3.bf16.msra.mxu1 %v21309_v54  ;;  %14498 = vmatprep.mubr.msk.bf16.mxu1 %vm835_vm2, %v16594_v7 }
 0x672   : > { %14552 = vmatprep.subr.bf16.mxu1 %v16514_v35 }
 0x674   : > { %v19718_v0 = vld [vmem:[#allocation3 + $0xf0] sm:$0xff] }
 0x675   : > { %14553 = vmatpush3.bf16.msra.mxu1 %v16514_v35 }
 0x676   : > { %15948 = vmatprep.subr.msk.bf16.mxu1 %vm8014_vm3, %v16515_v11 }
 0x678   : > { %14499 = vmatmul.mubr.msk.bf16.gmra.mrb[116].mxu1 %vm835_vm2, %v16595_v14  ;;  %v19722_v55 = vld [vmem:[#allocation3 + $0xf8] sm:$0xff] }
 0x679   : > { %14502 = vmatprep.mubr.msk.bf16.mxu1 %vm835_vm2, %v16596_v49  ;;  %14555 = vmatpush3.bf16.msra.mxu1 %v8695_v29 }
 0x67a   : > { %14612 = vmatprep.subr.bf16.mxu1 %v16516_v31 }
 0x680   : > { %14503 = vmatmul.mubr.msk.bf16.gmra.mrb[120].mxu1 %vm835_vm2, %v16597_v50 }
 0x681   : > { %14506 = vmatprep.mubr.msk.bf16.mxu1 %vm835_vm2, %v16598_v17 }
 0x688   : > { %14507 = vmatmul.mubr.msk.bf16.gmra.mrb[124].mxu1 %vm835_vm2, %v16599_v48 }
 0x689   : > { %14510 = vmatprep.mubr.msk.bf16.mxu1 %vm835_vm2, %v21310_v22 }
 0x690   : > { %14511 = vmatmul.mubr.msk.bf16.gmra.mrb[128].mxu1 %vm835_vm2, %v21311_v2 }
 0x691   : > { %14514 = vmatprep.mubr.msk.bf16.mxu1 %vm835_vm2, %v21312_v23 }
 0x698   : > { %14515 = vmatmul.mubr.msk.bf16.gmra.mrb[132].mxu1 %vm835_vm2, %v21313_v15 }
 0x699   : > { %14518 = vmatprep.mubr.msk.bf16.mxu1 %vm835_vm2, %v21314_v32 }
 0x6a0   : > { %14519 = vmatmul.mubr.msk.bf16.gmra.mrb[136].mxu1 %vm835_vm2, %v21315_v38 }
 0x6a1   : > { %14522 = vmatprep.mubr.msk.bf16.mxu1 %vm835_vm2, %v21316_v46 }
 0x6a8   : > { %14523 = vmatmul.mubr.msk.bf16.gmra.mrb[140].mxu1 %vm835_vm2, %v19401_v6 }
 0x6a9   : > { %14526 = vmatprep.mubr.msk.bf16.mxu1 %vm835_vm2, %v21317_v3 }
 0x6b0   : > { %14527 = vmatmul.mubr.msk.bf16.gmra.mrb[144].mxu1 %vm835_vm2, %v19427_v16 }
 0x6b1   : > { %14530 = vmatprep.mubr.msk.bf16.mxu1 %vm835_vm2, %v19441_v13 }
 0x6b8   : > { %14531 = vmatmul.mubr.msk.bf16.gmra.mrb[148].mxu1 %vm835_vm2, %v19453_v20 }
 0x6b9   : > { %14534 = vmatprep.mubr.msk.bf16.mxu1 %vm835_vm2, %v19467_v47 }
 0x6c0   : > { %14535 = vmatmul.mubr.msk.bf16.gmra.mrb[152].mxu1 %vm835_vm2, %v19479_v27 }
 0x6c1   : > { %14538 = vmatprep.mubr.msk.bf16.mxu1 %vm835_vm2, %v19493_v59 }
 0x6c8   : > { %14539 = vmatmul.mubr.msk.bf16.gmra.mrb[156].mxu1 %vm835_vm2, %v19505_v44 }
 0x6c9   : > { %14542 = vmatprep.mubr.msk.bf16.mxu1 %vm835_vm2, %v19519_v26 }
 0x6d0   : > { %14543 = vmatmul.mubr.msk.bf16.gmra.mrb[160].mxu1 %vm835_vm2, %v19531_v40 }
 0x6d1   : > { %14546 = vmatprep.mubr.msk.bf16.mxu1 %vm835_vm2, %v19545_v52 }
 0x6d8   : > { %14547 = vmatmul.mubr.msk.bf16.gmra.mrb[164].mxu1 %vm835_vm2, %v19557_v28 }
 0x6d9   : > { %14556 = vmatprep.mubr.msk.bf16.mxu1 %vm835_vm2, %v8558_v43 }
 0x6e0   : > { %14557 = vmatmul.mubr.msk.bf16.vlgmr.msra.gmra.mrb[112].mxu1 %vm835_vm2, %v8559_v63 }
 0x6e1   : > { %14560 = vmatprep.mubr.msk.bf16.mxu1 %vm835_vm2, %v8560_v9  ;;  %14613 = vmatpush3.bf16.msra.mxu1 %v16516_v31 }
 0x6e2   : > { %14614 = vmatprep.subr.bf16.mxu1 %v16517_v61 }
 0x6e5   : > { %14615 = vmatpush3.bf16.msra.mxu1 %v16517_v61 }
 0x6e6   : > { %15949 = vmatprep.subr.msk.bf16.mxu1 %vm8014_vm3, %v16518_v8 }
 0x6e8   : > { %14561 = vmatmul.mubr.msk.bf16.gmra.mrb[116].mxu1 %vm835_vm2, %v8561_v1 }
 0x6e9   : > { %14564 = vmatprep.mubr.msk.bf16.mxu1 %vm835_vm2, %v19672_v57  ;;  %14617 = vmatpush3.bf16.msra.mxu1 %v9147_v21 }
 0x6ea   : > { %14674 = vmatprep.subr.bf16.mxu1 %v16519_v41 }
 0x6f0   : > { %14565 = vmatmul.mubr.msk.bf16.gmra.mrb[120].mxu1 %vm835_vm2, %v21311_v2 }
 0x6f1   : > { %14568 = vmatprep.mubr.msk.bf16.mxu1 %vm835_vm2, %v21312_v23 }
 0x6f8   : > { %14569 = vmatmul.mubr.msk.bf16.gmra.mrb[124].mxu1 %vm835_vm2, %v21313_v15 }
 0x6f9   : > { %14572 = vmatprep.mubr.msk.bf16.mxu1 %vm835_vm2, %v21314_v32 }
 0x700   : > { %14573 = vmatmul.mubr.msk.bf16.gmra.mrb[128].mxu1 %vm835_vm2, %v21315_v38 }
 0x701   : > { %14576 = vmatprep.mubr.msk.bf16.mxu1 %vm835_vm2, %v21316_v46 }
 0x708   : > { %14577 = vmatmul.mubr.msk.bf16.gmra.mrb[132].mxu1 %vm835_vm2, %v19401_v6 }
 0x709   : > { %14580 = vmatprep.mubr.msk.bf16.mxu1 %vm835_vm2, %v21317_v3 }
 0x710   : > { %14581 = vmatmul.mubr.msk.bf16.gmra.mrb[136].mxu1 %vm835_vm2, %v19427_v16 }
 0x711   : > { %14584 = vmatprep.mubr.msk.bf16.mxu1 %vm835_vm2, %v19441_v13 }
 0x718   : > { %14585 = vmatmul.mubr.msk.bf16.gmra.mrb[140].mxu1 %vm835_vm2, %v19453_v20 }
 0x719   : > { %14588 = vmatprep.mubr.msk.bf16.mxu1 %vm835_vm2, %v19467_v47 }
 0x720   : > { %14589 = vmatmul.mubr.msk.bf16.gmra.mrb[144].mxu1 %vm835_vm2, %v19479_v27 }
 0x721   : > { %14592 = vmatprep.mubr.msk.bf16.mxu1 %vm835_vm2, %v19493_v59 }
 0x728   : > { %14593 = vmatmul.mubr.msk.bf16.gmra.mrb[148].mxu1 %vm835_vm2, %v19505_v44 }
 0x729   : > { %14596 = vmatprep.mubr.msk.bf16.mxu1 %vm835_vm2, %v19519_v26 }
 0x730   : > { %14597 = vmatmul.mubr.msk.bf16.gmra.mrb[152].mxu1 %vm835_vm2, %v19531_v40 }
 0x731   : > { %14600 = vmatprep.mubr.msk.bf16.mxu1 %vm835_vm2, %v19545_v52 }
 0x738   : > { %14601 = vmatmul.mubr.msk.bf16.gmra.mrb[156].mxu1 %vm835_vm2, %v19557_v28 }
 0x739   : > { %14604 = vmatprep.mubr.msk.bf16.mxu1 %vm835_vm2, %v19571_v60 }
 0x740   : > { %14605 = vmatmul.mubr.msk.bf16.gmra.mrb[160].mxu1 %vm835_vm2, %v19583_v53 }
 0x741   : > { %14608 = vmatprep.mubr.msk.bf16.mxu1 %vm835_vm2, %v19718_v0 }
 0x748   : > { %14609 = vmatmul.mubr.msk.bf16.gmra.mrb[164].mxu1 %vm835_vm2, %v19722_v55 }
 0x749   : > { %14618 = vmatprep.mubr.msk.bf16.mxu1 %vm835_vm2, %v8560_v9 }
 0x750   : > { %14619 = vmatmul.mubr.msk.bf16.vlgmr.msra.gmra.mrb[112].mxu1 %vm835_vm2, %v8561_v1 }
 0x751   : > { %14622 = vmatprep.mubr.msk.bf16.mxu1 %vm835_vm2, %v19672_v57  ;;  %14675 = vmatpush3.bf16.msra.mxu1 %v16519_v41 }
 0x752   : > { %14676 = vmatprep.subr.bf16.mxu1 %v16520_v12 }
 0x755   : > { %14677 = vmatpush3.bf16.msra.mxu1 %v16520_v12 }
 0x756   : > { %15950 = vmatprep.subr.msk.bf16.mxu1 %vm8014_vm3, %v16521_v4 }
 0x758   : > { %14623 = vmatmul.mubr.msk.bf16.gmra.mrb[116].mxu1 %vm835_vm2, %v9013_v56 }
 0x759   : > { %14626 = vmatprep.mubr.msk.bf16.mxu1 %vm835_vm2, %v9014_v58  ;;  %14679 = vmatpush3.bf16.msra.mxu1 %v9599_v45 }
 0x760   : > { %14627 = vmatmul.mubr.msk.bf16.gmra.mrb[120].mxu1 %vm835_vm2, %v21313_v15  ;;  %v16524_v15 = vld [vmem:[%s20709_s5 + $0x28] sm:$0x1f]  }
 0x761   : > { %14630 = vmatprep.mubr.msk.bf16.mxu1 %vm835_vm2, %v21314_v32 }
 0x768   : > { %14631 = vmatmul.mubr.msk.bf16.gmra.mrb[124].mxu1 %vm835_vm2, %v21315_v38 }
 0x769   : > { %14634 = vmatprep.mubr.msk.bf16.mxu1 %vm835_vm2, %v21316_v46 }
 0x770   : > { %14635 = vmatmul.mubr.msk.bf16.gmra.mrb[128].mxu1 %vm835_vm2, %v19401_v6 }
 0x771   : > { %14638 = vmatprep.mubr.msk.bf16.mxu1 %vm835_vm2, %v21317_v3 }
 0x778   : > { %14639 = vmatmul.mubr.msk.bf16.gmra.mrb[132].mxu1 %vm835_vm2, %v19427_v16 }
 0x779   : > { %14642 = vmatprep.mubr.msk.bf16.mxu1 %vm835_vm2, %v19441_v13 }
 0x780   : > { %14643 = vmatmul.mubr.msk.bf16.gmra.mrb[136].mxu1 %vm835_vm2, %v19453_v20 }
 0x781   : > { %14646 = vmatprep.mubr.msk.bf16.mxu1 %vm835_vm2, %v19467_v47 }
 0x788   : > { %14647 = vmatmul.mubr.msk.bf16.gmra.mrb[140].mxu1 %vm835_vm2, %v19479_v27 }
 0x789   : > { %14650 = vmatprep.mubr.msk.bf16.mxu1 %vm835_vm2, %v19493_v59 }
 0x790   : > { %14651 = vmatmul.mubr.msk.bf16.gmra.mrb[144].mxu1 %vm835_vm2, %v19505_v44 }
 0x791   : > { %14654 = vmatprep.mubr.msk.bf16.mxu1 %vm835_vm2, %v19519_v26 }
 0x798   : > { %14655 = vmatmul.mubr.msk.bf16.gmra.mrb[148].mxu1 %vm835_vm2, %v19531_v40 }
 0x799   : > { %14658 = vmatprep.mubr.msk.bf16.mxu1 %vm835_vm2, %v19545_v52 }
 0x7a0   : > { %14659 = vmatmul.mubr.msk.bf16.gmra.mrb[152].mxu1 %vm835_vm2, %v19557_v28 }
 0x7a1   : > { %14662 = vmatprep.mubr.msk.bf16.mxu1 %vm835_vm2, %v19571_v60 }
 0x7a8   : > { %14663 = vmatmul.mubr.msk.bf16.gmra.mrb[156].mxu1 %vm835_vm2, %v19583_v53 }
 0x7a9   : > { %14666 = vmatprep.mubr.msk.bf16.mxu1 %vm835_vm2, %v19718_v0 }
 0x7b0   : > { %14667 = vmatmul.mubr.msk.bf16.gmra.mrb[160].mxu1 %vm835_vm2, %v19722_v55 }
 0x7b1   : > { %14670 = vmatprep.mubr.msk.bf16.mxu1 %vm835_vm2, %v9036_v25 }
 0x7b8   : > { %14671 = vmatmul.mubr.msk.bf16.gmra.mrb[164].mxu1 %vm835_vm2, %v9037_v5 }
 0x7b9   : > { %14680 = vmatprep.mubr.msk.bf16.mxu1 %vm835_vm2, %v19672_v57 }
 0x7c0   : > { %14681 = vmatmul.mubr.msk.bf16.vlgmr.msra.gmra.mrb[112].mxu1 %vm835_vm2, %v9013_v56 }
 0x7c1   : > { %14684 = vmatprep.mubr.msk.bf16.mxu1 %vm835_vm2, %v9014_v58 }
 0x7c8   : > { %14685 = vmatmul.mubr.msk.bf16.gmra.mrb[116].mxu1 %vm835_vm2, %v9465_v62 }
 0x7c9   : > { %14688 = vmatprep.mubr.msk.bf16.mxu1 %vm835_vm2, %v21314_v32 }
 0x7d0   : > { %14689 = vmatmul.mubr.msk.bf16.gmra.mrb[120].mxu1 %vm835_vm2, %v21315_v38 }
 0x7d1   : > { %14692 = vmatprep.mubr.msk.bf16.mxu1 %vm835_vm2, %v21316_v46 }
 0x7d8   : > { %14693 = vmatmul.mubr.msk.bf16.gmra.mrb[124].mxu1 %vm835_vm2, %v19401_v6  ;;  %v9488_v6 = vld [vmem:[#allocation3 + $0x110] sm:$0xff] }
 0x7d9   : > { %14696 = vmatprep.mubr.msk.bf16.mxu1 %vm835_vm2, %v21317_v3  ;;  %v10458_v3 = vsel %vm8014_vm3, %v16524_v15, 0 }
 0x7e0   : > { %14697 = vmatmul.mubr.msk.bf16.gmra.mrb[128].mxu1 %vm835_vm2, %v19427_v16  ;;  %v9489_v16 = vld [vmem:[#allocation3 + $0x118] sm:$0xff] }
 0x7e1   : > { %14700 = vmatprep.mubr.msk.bf16.mxu1 %vm835_vm2, %v19441_v13  ;;  %v16522_v13 = vld [vmem:[%s20709_s5 + $0x18] sm:$0xff]  }
 0x7e2   : > { %14736 = vmatprep.subr.bf16.mxu1 %v16522_v13 }
 0x7e3   : > { %14737 = vmatpush3.bf16.msra.mxu1 %v16522_v13 }
 0x7e8   : > { %14701 = vmatmul.mubr.msk.bf16.gmra.mrb[132].mxu1 %vm835_vm2, %v19453_v20  ;;  %v19839_v20 = vld [vmem:[%s20708_s4] ss:$0 sm:$0xff] }
 0x7e9   : > { %14704 = vmatprep.mubr.msk.bf16.mxu1 %vm835_vm2, %v19467_v47  ;;  %v16523_v47 = vld [vmem:[%s20709_s5 + $0x20] sm:$0xff]  }
 0x7ea   : > { %14738 = vmatprep.subr.bf16.mxu1 %v16523_v47 }
 0x7eb   : > { %14739 = vmatpush3.bf16.msra.mxu1 %v16523_v47 }
 0x7ec   : > { %15951 = vmatprep.subr.msk.bf16.mxu1 %vm8014_vm3, %v16524_v15 }
 0x7ef   : > { %14741 = vmatpush3.bf16.msra.mxu1 %v10458_v3 }
 0x7f0   : > { %14705 = vmatmul.mubr.msk.bf16.gmra.mrb[136].mxu1 %vm835_vm2, %v19479_v27 }
 0x7f1   : > { %14708 = vmatprep.mubr.msk.bf16.mxu1 %vm835_vm2, %v19493_v59 }
 0x7f8   : > { %14709 = vmatmul.mubr.msk.bf16.gmra.mrb[140].mxu1 %vm835_vm2, %v19505_v44 }
 0x7f9   : > { %14712 = vmatprep.mubr.msk.bf16.mxu1 %vm835_vm2, %v19519_v26 }
 0x800   : > { %14713 = vmatmul.mubr.msk.bf16.gmra.mrb[144].mxu1 %vm835_vm2, %v19531_v40 }
 0x801   : > { %14716 = vmatprep.mubr.msk.bf16.mxu1 %vm835_vm2, %v19545_v52 }
 0x808   : > { %14717 = vmatmul.mubr.msk.bf16.gmra.mrb[148].mxu1 %vm835_vm2, %v19557_v28 }
 0x809   : > { %14720 = vmatprep.mubr.msk.bf16.mxu1 %vm835_vm2, %v19571_v60 }
 0x810   : > { %14721 = vmatmul.mubr.msk.bf16.gmra.mrb[152].mxu1 %vm835_vm2, %v19583_v53 }
 0x811   : > { %14724 = vmatprep.mubr.msk.bf16.mxu1 %vm835_vm2, %v19718_v0 }
 0x818   : > { %14725 = vmatmul.mubr.msk.bf16.gmra.mrb[156].mxu1 %vm835_vm2, %v19722_v55 }
 0x819   : > { %14728 = vmatprep.mubr.msk.bf16.mxu1 %vm835_vm2, %v9036_v25 }
 0x820   : > { %14729 = vmatmul.mubr.msk.bf16.gmra.mrb[160].mxu1 %vm835_vm2, %v9037_v5 }
 0x821   : > { %14732 = vmatprep.mubr.msk.bf16.mxu1 %vm835_vm2, %v9488_v6 }
 0x828   : > { %14733 = vmatmul.mubr.msk.bf16.gmra.mrb[164].mxu1 %vm835_vm2, %v9489_v16 }
 0x893   : > { %v14682_v27 = vpop.f32.mrb[112].mxu1 }
 0x894   : > { %v9635_v59 = vpop.f32.mrb[113].mxu1  ;;  %v19854_v60 = vadd.f32 %v14682_v27, %v19839_v20 }
 0x895   : > { %v19845_v44 = vadd.f32 %v19839_v20, %v9635_v59  ;;  %v14683_v26 = vpop.f32.mrb[114].mxu1 }
 0x896   : > { %v9638_v40 = vpop.f32.mrb[115].mxu1  ;;  %v19848_v52 = vadd.f32 %v14683_v26, %v19839_v20  ;;  %v20906_v39 = vmax.f32 %v19854_v60, 0.0 }
 0x897   : > { %v19851_v28 = vadd.f32 %v19839_v20, %v9638_v40  ;;  %v20914_v53 = vmax.f32 %v19845_v44, 0.0 }
 0x898   : > { %v20909_v37 = vmax.f32 %v19848_v52, 0.0 }
 0x899   : > { %v20917_v10 = vmax.f32 %v19851_v28, 0.0 }
 0x89a   : > { %v16274_v19 = vpack.i.bf16 %v20909_v37, %v20906_v39 }
 0x89b   : > { %v16269_v24 = vpack.i.bf16 %v20917_v10, %v20914_v53  ;;  %v14686_v42 = vpop.f32.mrb[116].mxu1 }
 0x89c   : > { %v9651_v34 = vpop.f32.mrb[117].mxu1  ;;  %v19879_v35 = vadd.f32 %v14686_v42, %v19839_v20 }
 0x89d   : > { %v19865_v18 = vadd.f32 %v19839_v20, %v9651_v34  ;;  %16270 = vrot.lane.b32.xlu0 %v16269_v24, %s16625_s21  ;;  %v14687_v51 = vpop.f32.mrb[118].mxu1 }
 0x89e   : > { %v9654_v36 = vpop.f32.mrb[119].mxu1  ;;  %v19873_v33 = vadd.f32 %v14687_v51, %v19839_v20  ;;  %v20902_v49 = vmax.f32 %v19879_v35, 0.0 }
 0x89f   : > { %v19876_v30 = vadd.f32 %v19839_v20, %v9654_v36  ;;  %v20910_v54 = vmax.f32 %v19865_v18, 0.0 }
 0x8a0   : > { %v20903_v11 = vmax.f32 %v19873_v33, 0.0 }
 0x8a1   : > { %v20911_v7 = vmax.f32 %v19876_v30, 0.0  ;;  %16275 = vrot.lane.b32.xlu0 %v16274_v19, %s16625_s21 }
 0x8a2   : > { %v16284_v22 = vpack.i.bf16 %v20903_v11, %v20902_v49 }
 0x8a3   : > { %v16279_v29 = vpack.i.bf16 %v20911_v7, %v20910_v54  ;;  %v14690_v31 = vpop.f32.mrb[120].mxu1 }
 0x8a4   : > { %v9667_v14 = vpop.f32.mrb[121].mxu1  ;;  %v19908_v32 = vadd.f32 %v14690_v31, %v19839_v20 }
 0x8a5   : > { %v19891_v50 = vadd.f32 %v19839_v20, %v9667_v14  ;;  %16280 = vrot.lane.b32.xlu1 %v16279_v29, %s16625_s21  ;;  %v14691_v17 = vpop.f32.mrb[122].mxu1 }
 0x8a6   : > { %v9670_v48 = vpop.f32.mrb[123].mxu1  ;;  %v19899_v2 = vadd.f32 %v14691_v17, %v19839_v20  ;;  %v20892_v8 = vmax.f32 %v19908_v32, 0.0 }
 0x8a7   : > { %v19902_v23 = vadd.f32 %v19839_v20, %v9670_v48  ;;  %v20898_v38 = vmax.f32 %v19891_v50, 0.0 }
 0x8a8   : > { %v20893_v43 = vmax.f32 %v19899_v2, 0.0 }
 0x8a9   : > { %v20901_v46 = vmax.f32 %v19902_v23, 0.0  ;;  %16285 = vrot.lane.b32.xlu1 %v16284_v22, %s16625_s21 }
 0x8aa   : > { %v16294_v57 = vpack.i.bf16 %v20893_v43, %v20892_v8 }
 0x8ab   : > { %v16289_v61 = vpack.i.bf16 %v20901_v46, %v20898_v38  ;;  %v14694_v63 = vpop.f32.mrb[124].mxu1 }
 0x8ac   : > { %v9683_v9 = vpop.f32.mrb[125].mxu1  ;;  %v19936_v12 = vadd.f32 %v14694_v63, %v19839_v20 }
 0x8ad   : > { %v19922_v21 = vadd.f32 %v19839_v20, %v9683_v9  ;;  %16290 = vrot.lane.b32.xlu0 %v16289_v61, %s16625_s21  ;;  %v14695_v41 = vpop.f32.mrb[126].mxu1 }
 0x8ae   : > { %v9686_v1 = vpop.f32.mrb[127].mxu1  ;;  %v19930_v0 = vadd.f32 %v14695_v41, %v19839_v20  ;;  %v20886_v62 = vmax.f32 %v19936_v12, 0.0 }
 0x8af   : > { %v19933_v55 = vadd.f32 %v19839_v20, %v9686_v1  ;;  %v20896_v4 = vmax.f32 %v19922_v21, 0.0 }
 0x8b0   : > { %v20889_v56 = vmax.f32 %v19930_v0, 0.0 }
 0x8b1   : > { %v20897_v45 = vmax.f32 %v19933_v55, 0.0  ;;  %16295 = vrot.lane.b32.xlu0 %v16294_v57, %s16625_s21 }
 0x8b2   : > { %v16304_v47 = vpack.i.bf16 %v20889_v56, %v20886_v62 }
 0x8b3   : > { %v16299_v58 = vpack.i.bf16 %v20897_v45, %v20896_v4  ;;  %v14698_v25 = vpop.f32.mrb[128].mxu1 }
 0x8b4   : > { %v9699_v5 = vpop.f32.mrb[129].mxu1  ;;  %v19962_v26 = vadd.f32 %v14698_v25, %v19839_v20 }
 0x8b5   : > { %v19948_v6 = vadd.f32 %v19839_v20, %v9699_v5  ;;  %16300 = vrot.lane.b32.xlu1 %v16299_v58, %s16625_s21  ;;  %v14699_v16 = vpop.f32.mrb[130].mxu1 }
 0x8b6   : > { %v9702_v13 = vpop.f32.mrb[131].mxu1  ;;  %v19956_v27 = vadd.f32 %v14699_v16, %v19839_v20  ;;  %v20876_v19 = vmax.f32 %v19962_v26, 0.0 }
 0x8b7   : > { %v19959_v59 = vadd.f32 %v19839_v20, %v9702_v13  ;;  %v20884_v40 = vmax.f32 %v19948_v6, 0.0 }
 0x8b8   : > { %v20877_v42 = vmax.f32 %v19956_v27, 0.0 }
 0x8b9   : > { %v20885_v24 = vmax.f32 %v19959_v59, 0.0  ;;  %16305 = vrot.lane.b32.xlu1 %v16304_v47, %s16625_s21 }
 0x8ba   : > { %v16314_v17 = vpack.i.bf16 %v20877_v42, %v20876_v19 }
 0x8bb   : > { %v16309_v34 = vpack.i.bf16 %v20885_v24, %v20884_v40  ;;  %v14702_v51 = vpop.f32.mrb[132].mxu1 }
 0x8bc   : > { %v9715_v36 = vpop.f32.mrb[133].mxu1  ;;  %v19988_v15 = vadd.f32 %v14702_v51, %v19839_v20 }
 0x8bd   : > { %v19974_v29 = vadd.f32 %v19839_v20, %v9715_v36  ;;  %16310 = vrot.lane.b32.xlu0 %v16309_v34, %s16625_s21  ;;  %v14703_v31 = vpop.f32.mrb[134].mxu1 }
 0x8be   : > { %v9718_v14 = vpop.f32.mrb[135].mxu1  ;;  %v19982_v48 = vadd.f32 %v14703_v31, %v19839_v20  ;;  %v20870_v57 = vmax.f32 %v19988_v15, 0.0 }
 0x8bf   : > { %v19985_v22 = vadd.f32 %v19839_v20, %v9718_v14  ;;  %v20878_v3 = vmax.f32 %v19974_v29, 0.0 }
 0x8c0   : > { %v20873_v63 = vmax.f32 %v19982_v48, 0.0 }
 0x8c1   : > { %v20881_v61 = vmax.f32 %v19985_v22, 0.0  ;;  %16315 = vrot.lane.b32.xlu0 %v16314_v17, %s16625_s21 }
 0x8c2   : > { %v16324_v16 = vpack.i.bf16 %v20873_v63, %v20870_v57 }
 0x8c3   : > { %v16319_v9 = vpack.i.bf16 %v20881_v61, %v20878_v3  ;;  %v14706_v41 = vpop.f32.mrb[136].mxu1 }
 0x8c4   : > { %v9731_v1 = vpop.f32.mrb[137].mxu1  ;;  %v20014_v34 = vadd.f32 %v14706_v41, %v19839_v20 }
 0x8c5   : > { %v20000_v58 = vadd.f32 %v19839_v20, %v9731_v1  ;;  %16320 = vrot.lane.b32.xlu1 %v16319_v9, %s16625_s21  ;;  %v14707_v25 = vpop.f32.mrb[138].mxu1 }
 0x8c6   : > { %v9734_v5 = vpop.f32.mrb[139].mxu1  ;;  %v20008_v13 = vadd.f32 %v14707_v25, %v19839_v20  ;;  %v20874_v1 = vmax.f32 %v20014_v34, 0.0 }
 0x8c7   : > { %v20011_v47 = vadd.f32 %v19839_v20, %v9734_v5  ;;  %v20871_v51 = vmax.f32 %v20000_v58, 0.0 }
 0x8c8   : > { %v20875_v31 = vmax.f32 %v20008_v13, 0.0 }
 0x8c9   : > { %v20872_v36 = vmax.f32 %v20011_v47, 0.0  ;;  %16325 = vrot.lane.b32.xlu1 %v16324_v16, %s16625_s21 }
 0x8ca   : > { %v16334_v16 = vpack.i.bf16 %v20875_v31, %v20874_v1 }
 0x8cb   : > { %v16329_v14 = vpack.i.bf16 %v20872_v36, %v20871_v51  ;;  %v14710_v17 = vpop.f32.mrb[140].mxu1 }
 0x8cc   : > { %v9747_v9 = vpop.f32.mrb[141].mxu1  ;;  %v20040_v36 = vadd.f32 %v14710_v17, %v19839_v20 }
 0x8cd   : > { %v20026_v41 = vadd.f32 %v19839_v20, %v9747_v9  ;;  %16330 = vrot.lane.b32.xlu0 %v16329_v14, %s16625_s21  ;;  %v14711_v25 = vpop.f32.mrb[142].mxu1 }
 0x8ce   : > { %v9750_v5 = vpop.f32.mrb[143].mxu1  ;;  %v20034_v57 = vadd.f32 %v14711_v25, %v19839_v20 }
 0x8cf   : > { %v20037_v51 = vadd.f32 %v19839_v20, %v9750_v5  ;;  %v20879_v9 = vmax.f32 %v20026_v41, 0.0  ;;  %v20882_v5 = vmax.f32 %v20040_v36, 0.0 }
 0x8d0   : > { %v20883_v63 = vmax.f32 %v20034_v57, 0.0 }
 0x8d1   : > { %v20880_v14 = vmax.f32 %v20037_v51, 0.0  ;;  %16335 = vrot.lane.b32.xlu0 %v16334_v16, %s16625_s21 }
 0x8d2   : > { %v16344_v16 = vpack.i.bf16 %v20883_v63, %v20882_v5 }
 0x8d3   : > { %v16339_v25 = vpack.i.bf16 %v20880_v14, %v20879_v9  ;;  %v14714_v1 = vpop.f32.mrb[144].mxu1 }
 0x8d4   : > { %v9763_v31 = vpop.f32.mrb[145].mxu1  ;;  %v20066_v14 = vadd.f32 %v14714_v1, %v19839_v20 }
 0x8d5   : > { %v20052_v17 = vadd.f32 %v19839_v20, %v9763_v31  ;;  %16340 = vrot.lane.b32.xlu1 %v16339_v25, %s16625_s21  ;;  %v14715_v19 = vpop.f32.mrb[146].mxu1 }
 0x8d6   : > { %v9766_v42 = vpop.f32.mrb[147].mxu1  ;;  %v20060_v3 = vadd.f32 %v14715_v19, %v19839_v20 }
 0x8d7   : > { %v20063_v9 = vadd.f32 %v19839_v20, %v9766_v42  ;;  %v20887_v31 = vmax.f32 %v20052_v17, 0.0  ;;  %v20890_v42 = vmax.f32 %v20066_v14, 0.0 }
 0x8d8   : > { %v20891_v61 = vmax.f32 %v20060_v3, 0.0 }
 0x8d9   : > { %v20888_v25 = vmax.f32 %v20063_v9, 0.0  ;;  %16345 = vrot.lane.b32.xlu1 %v16344_v16, %s16625_s21 }
 0x8da   : > { %v16354_v16 = vpack.i.bf16 %v20891_v61, %v20890_v42 }
 0x8db   : > { %v16349_v19 = vpack.i.bf16 %v20888_v25, %v20887_v31  ;;  %v14718_v5 = vpop.f32.mrb[148].mxu1 }
 0x8dc   : > { %v9779_v63 = vpop.f32.mrb[149].mxu1  ;;  %v20092_v25 = vadd.f32 %v14718_v5, %v19839_v20 }
 0x8dd   : > { %v20078_v1 = vadd.f32 %v19839_v20, %v9779_v63  ;;  %16350 = vrot.lane.b32.xlu0 %v16349_v19, %s16625_s21  ;;  %v14719_v40 = vpop.f32.mrb[150].mxu1 }
 0x8de   : > { %v9782_v24 = vpop.f32.mrb[151].mxu1  ;;  %v20086_v62 = vadd.f32 %v14719_v40, %v19839_v20  ;;  %v20899_v5 = vmax.f32 %v20092_v25, 0.0 }
 0x8df   : > { %v20089_v31 = vadd.f32 %v19839_v20, %v9782_v24  ;;  %v20894_v63 = vmax.f32 %v20078_v1, 0.0  ;;  %v20105_v24 = vld [vmem:[%s20709_s5] sm:$0xff]  }
 0x8e0   : > { %v20900_v56 = vmax.f32 %v20086_v62, 0.0  ;;  %14770 = vmatprep.subr.bf16.mxu1 %v20105_v24 }
 0x8e1   : > { %v20895_v19 = vmax.f32 %v20089_v31, 0.0  ;;  %16355 = vrot.lane.b32.xlu0 %v16354_v16, %s16625_s21 }
 0x8e3   : > { %v16359_v40 = vpack.i.bf16 %v20895_v19, %v20894_v63  ;;  %v14722_v42 = vpop.f32.mrb[152].mxu1  ;;  %v16364_v63 = vpack.i.bf16 %v20900_v56, %v20899_v5 }
 0x8e4   : > { %v9795_v61 = vpop.f32.mrb[153].mxu1 }
 0x8e5   : > { %v20109_v8 = vadd.f32 %v19839_v20, %v9795_v61  ;;  %16360 = vrot.lane.b32.xlu1 %v16359_v40, %s16625_s21  ;;  %v14723_v16 = vpop.f32.mrb[154].mxu1  ;;  %v20124_v61 = vadd.f32 %v14722_v42, %v19839_v20 }
 0x8e6   : > { %v9798_v43 = vpop.f32.mrb[155].mxu1  ;;  %v20118_v19 = vadd.f32 %v14723_v16, %v19839_v20 }
 0x8e7   : > { %v20121_v4 = vadd.f32 %v19839_v20, %v9798_v43  ;;  %21319 = vst [vmem:[#allocation56_spill] sm:$0xff] %v20124_v61  ;;  %v20904_v40 = vmax.f32 %v20109_v8, 0.0  ;;  %v20907_v43 = vmax.f32 %v20124_v61, 0.0 }
 0x8e8   : > { %21318 = vst [vmem:[#allocation55_spill] sm:$0xff] %v20118_v19  ;;  %v20908_v38 = vmax.f32 %v20118_v19, 0.0 }
 0x8e9   : > { %v20905_v45 = vmax.f32 %v20121_v4, 0.0  ;;  %16365 = vrot.lane.b32.xlu1 %v16364_v63, %s16625_s21 }
 0x8ea   : > { %v16374_v63 = vpack.i.bf16 %v20908_v38, %v20907_v43 }
 0x8eb   : > { %v16369_v16 = vpack.i.bf16 %v20905_v45, %v20904_v40  ;;  %v14726_v5 = vpop.f32.mrb[156].mxu1 }
 0x8ec   : > { %v9811_v56 = vpop.f32.mrb[157].mxu1  ;;  %v20150_v45 = vadd.f32 %v14726_v5, %v19839_v20 }
 0x8ed   : > { %v20136_v42 = vadd.f32 %v19839_v20, %v9811_v56  ;;  %16370 = vrot.lane.b32.xlu0 %v16369_v16, %s16625_s21  ;;  %v14727_v46 = vpop.f32.mrb[158].mxu1 }
 0x8ee   : > { %v9814_v49 = vpop.f32.mrb[159].mxu1  ;;  %v20144_v11 = vadd.f32 %v14727_v46, %v19839_v20  ;;  %21323 = vst [vmem:[#allocation10_spill] sm:$0xff] %v20150_v45 }
 0x8ef   : > { %21320 = vst [vmem:[#allocation7_spill] sm:$0xff] %v20136_v42  ;;  %v20147_v40 = vadd.f32 %v19839_v20, %v9814_v49  ;;  %v20912_v56 = vmax.f32 %v20136_v42, 0.0  ;;  %v20915_v49 = vmax.f32 %v20150_v45, 0.0 }
 0x8f0   : > { %21321 = vst [vmem:[#allocation8_spill] sm:$0xff] %v20144_v11  ;;  %v20916_v39 = vmax.f32 %v20144_v11, 0.0 }
 0x8f1   : > { %21322 = vst [vmem:[#allocation9_spill] sm:$0xff] %v20147_v40  ;;  %v20913_v16 = vmax.f32 %v20147_v40, 0.0  ;;  %16375 = vrot.lane.b32.xlu0 %v16374_v63, %s16625_s21 }
 0x8f2   : > { %v16384_v63 = vpack.i.bf16 %v20916_v39, %v20915_v49 }
 0x8f3   : > { %v16379_v46 = vpack.i.bf16 %v20913_v16, %v20912_v56  ;;  %v14730_v43 = vpop.f32.mrb[160].mxu1 }
 0x8f4   : > { %v9827_v38 = vpop.f32.mrb[161].mxu1  ;;  %v20176_v16 = vadd.f32 %v14730_v43, %v19839_v20 }
 0x8f5   : > { %v20162_v5 = vadd.f32 %v19839_v20, %v9827_v38  ;;  %16380 = vrot.lane.b32.xlu1 %v16379_v46, %s16625_s21  ;;  %v14731_v37 = vpop.f32.mrb[162].mxu1 }
 0x8f6   : > { %v9830_v54 = vpop.f32.mrb[163].mxu1  ;;  %v20170_v7 = vadd.f32 %v14731_v37, %v19839_v20  ;;  %21327 = vst [vmem:[#allocation60_spill] sm:$0xff] %v20176_v16 }
 0x8f7   : > { %21324 = vst [vmem:[#allocation57_spill] sm:$0xff] %v20162_v5  ;;  %v20173_v56 = vadd.f32 %v19839_v20, %v9830_v54  ;;  %v20920_v38 = vmax.f32 %v20162_v5, 0.0  ;;  %v20923_v54 = vmax.f32 %v20176_v16, 0.0 }
 0x8f8   : > { %21325 = vst [vmem:[#allocation58_spill] sm:$0xff] %v20170_v7  ;;  %v20924_v53 = vmax.f32 %v20170_v7, 0.0 }
 0x8f9   : > { %21326 = vst [vmem:[#allocation59_spill] sm:$0xff] %v20173_v56  ;;  %v20921_v46 = vmax.f32 %v20173_v56, 0.0  ;;  %16385 = vrot.lane.b32.xlu1 %v16384_v63, %s16625_s21 }
 0x8fa   : > { %v16399_v63 = vpack.i.bf16 %v20924_v53, %v20923_v54 }
 0x8fb   : > { %v16389_v37 = vpack.i.bf16 %v20921_v46, %v20920_v38  ;;  %v14734_v49 = vpop.f32.mrb[164].mxu1 }
 0x8fc   : > { %v9843_v39 = vpop.f32.mrb[165].mxu1  ;;  %v20202_v46 = vadd.f32 %v14734_v49, %v19839_v20 }
 0x8fd   : > { %v20188_v43 = vadd.f32 %v19839_v20, %v9843_v39  ;;  %16390 = vrot.lane.b32.xlu0 %v16389_v37, %s16625_s21  ;;  %v14735_v10 = vpop.f32.mrb[166].mxu1 }
 0x8fe   : > { %v9846_v45 = vpop.f32.mrb[167].mxu1  ;;  %v20196_v5 = vadd.f32 %v14735_v10, %v19839_v20  ;;  %21331 = vst [vmem:[#allocation64_spill] sm:$0xff] %v20202_v46  ;;  %v20934_v54 = vmax.f32 %v20202_v46, 0.0 }
 0x8ff   : > { %21328 = vst [vmem:[#allocation61_spill] sm:$0xff] %v20188_v43  ;;  %v20199_v38 = vadd.f32 %v19839_v20, %v9846_v45  ;;  %v20928_v39 = vmax.f32 %v20188_v43, 0.0 }
 0x900   : > { %21329 = vst [vmem:[#allocation62_spill] sm:$0xff] %v20196_v5  ;;  %v20935_v16 = vmax.f32 %v20196_v5, 0.0  ;;  %v21334_v5 = vmax.f32 %v19876_v30, 0.0  ;;  %v21339_v30 = vmax.f32 %v19879_v35, 0.0  ;;  %v21340_v35 = vmax.f32 %v19902_v23, 0.0 }
 0x901   : > { %21330 = vst [vmem:[#allocation63_spill] sm:$0xff] %v20199_v38  ;;  %v20929_v37 = vmax.f32 %v20199_v38, 0.0  ;;  %16400 = vrot.lane.b32.xlu0 %v16399_v63, %s16625_s21 }
 0x902   : > { %v16404_v20 = vpack.i.bf16 %v20935_v16, %v20934_v54 }
 0x903   : > { %v16394_v10 = vpack.i.bf16 %v20929_v37, %v20928_v39  ;;  %v21332_v39 = vmax.f32 %v19851_v28, 0.0 }
 0x905   : > { %16395 = vrot.lane.b32.xlu1 %v16394_v10, %s16625_s21  ;;  %v21333_v10 = vmax.f32 %v19845_v44, 0.0 }
 0x909   : > { %16405 = vrot.lane.b32.xlu1 %v16404_v20, %s16625_s21  ;;  %v21335_v20 = vmax.f32 %v19865_v18, 0.0  ;;  %s11933_s21 = sshll.u32 %s11926_s12, 2 }
 0x90a   : > { %p816_p8 = scmp.lt.s32.totalorder %s11933_s21, 7 }
 0x90c   : > { %s21406_s21 = smov (!%p816_p8, %s11933_s21), 7 }
 0x90d   : > { %s11934_s28 = sshll.u32 %s21406_s21, 3 }
 0x90e   : > { %s819_s17 = scalar_lea.vmem %s20713_s9, %s11934_s28 }
 0x90f   : > { %v16271_v45 = vpop.permute.xlu0 %16270 }
 0x910   : > { %v16273_v49 = vunpack.i.h.bf16 %v16271_v45  ;;  %v16272_v63 = vunpack.i.l.bf16 %v16271_v45 }
 0x912   : > { %v10258_v37 = vmax.f32 %v21332_v39, %v16273_v49  ;;  %v10257_v11 = vmax.f32 %v21333_v10, %v16272_v63  ;;  %v21337_v39 = vmax.f32 %v19854_v60, 0.0  ;;  %v21342_v10 = vmax.f32 %v19933_v55, 0.0 }
 0x913   : > { %v16276_v53 = vpop.permute.xlu0 %16275 }
 0x914   : > { %v16278_v38 = vunpack.i.h.bf16 %v16276_v53  ;;  %v16277_v46 = vunpack.i.l.bf16 %v16276_v53  ;;  %v21338_v53 = vmax.f32 %v19873_v33, 0.0 }
 0x916   : > { %v10259_v49 = vmax.f32 %v21337_v39, %v16277_v46 }
 0x917   : > { %v16281_v7 = vpop.permute.xlu1 %16280 }
 0x918   : > { %v16283_v43 = vunpack.i.h.bf16 %v16281_v7  ;;  %v16282_v56 = vunpack.i.l.bf16 %v16281_v7  ;;  %v21336_v7 = vmax.f32 %v19848_v52, 0.0 }
 0x91a   : > { %v10262_v54 = vmax.f32 %v21334_v5, %v16283_v43  ;;  %v10261_v16 = vmax.f32 %v21335_v20, %v16282_v56  ;;  %v10260_v28 = vmax.f32 %v21336_v7, %v16278_v38 }
 0x91b   : > { %v16286_v61 = vpop.permute.xlu1 %16285 }
 0x91c   : > { %v10314_v45 = vmax.f32 %v10258_v37, %v10262_v54  ;;  %v10313_v19 = vmax.f32 %v10257_v11, %v10261_v16  ;;  %v16288_v42 = vunpack.i.h.bf16 %v16286_v61  ;;  %v16287_v40 = vunpack.i.l.bf16 %v16286_v61 }
 0x91d   : > { %v21341_v54 = vmax.f32 %v19891_v50, 0.0  ;;  %v21344_v50 = vmax.f32 %v19899_v2, 0.0 }
 0x91e   : > { %v10341_v44 = vpack.c.bf16 %v10314_v45, %v10313_v19  ;;  %v10264_v63 = vmax.f32 %v21338_v53, %v16288_v42  ;;  %v10263_v5 = vmax.f32 %v21339_v30, %v16287_v40  ;;  %v21343_v45 = vmax.f32 %v19922_v21, 0.0 }
 0x91f   : > { %v16291_v11 = vpop.permute.xlu0 %16290  ;;  %v21345_v21 = vmax.f32 %v19908_v32, 0.0 }
 0x920   : > { %10355 = vst.msk [vmem:[#allocation4 + $0x10] sm:$0xff] %vm835_vm2, %v10341_v44  ;;  %v10316_v18 = vmax.f32 %v10260_v28, %v10264_v63  ;;  %v10315_v56 = vmax.f32 %v10259_v49, %v10263_v5  ;;  %v16293_v52 = vunpack.i.h.bf16 %v16291_v11  ;;  %v16292_v61 = vunpack.i.l.bf16 %v16291_v11  ;;  %v16526_v28 = vld [vmem:[%s20709_s5 + $0x8] sm:$0xff]  }
 0x921   : > { %v21347_v11 = vmax.f32 %v19936_v12, 0.0  ;;  %v20274_v12 = vld [vmem:[%s20709_s5 + $0x30] sm:$0xff]  }
 0x922   : > { %v10342_v16 = vpack.c.bf16 %v10316_v18, %v10315_v56  ;;  %v10266_v40 = vmax.f32 %v21340_v35, %v16293_v52  ;;  %v10265_v43 = vmax.f32 %v21341_v54, %v16292_v61  ;;  %v21346_v18 = vmax.f32 %v19930_v0, 0.0  ;;  %v16527_v52 = vld [vmem:[%s20709_s5 + $0x10] sm:$0x1f]  }
 0x923   : > { %v16296_v38 = vpop.permute.xlu0 %16295  ;;  %v10629_v0 = vsel %vm8014_vm3, %v16527_v52, 0  ;;  %v21348_v54 = vmax.f32 %v19959_v59, 0.0 }
 0x924   : > { %10356 = vst.msk [vmem:[#allocation4 + $0x18] sm:$0xff] %vm835_vm2, %v10342_v16  ;;  %v16298_v42 = vunpack.i.h.bf16 %v16296_v38  ;;  %v16297_v37 = vunpack.i.l.bf16 %v16296_v38 }
 0x926   : > { %v10268_v55 = vmax.f32 %v21344_v50, %v16298_v42  ;;  %v10267_v30 = vmax.f32 %v21345_v21, %v16297_v37 }
 0x927   : > { %v16301_v60 = vpop.permute.xlu1 %16300  ;;  %v20237_v46 = vld [vmem:[#allocation4 + $0x10] sm:$0xff] }
 0x928   : > { %v16303_v19 = vunpack.i.h.bf16 %v16301_v60  ;;  %v16302_v33 = vunpack.i.l.bf16 %v16301_v60  ;;  %14742 = vmatprep.mubr.msk.bf16.mxu1 %vm835_vm2, %v20237_v46 }
 0x92a   : > { %v10270_v20 = vmax.f32 %v21342_v10, %v16303_v19  ;;  %v10269_v7 = vmax.f32 %v21343_v45, %v16302_v33  ;;  %v21349_v10 = vmax.f32 %v19948_v6, 0.0  ;;  %v21352_v6 = vmax.f32 %v19956_v27, 0.0 }
 0x92b   : > { %v16306_v39 = vpop.permute.xlu1 %16305  ;;  %v20252_v49 = vld [vmem:[#allocation4 + $0x18] sm:$0xff] }
 0x92c   : > { %v10318_v23 = vmax.f32 %v10266_v40, %v10270_v20  ;;  %v10317_v44 = vmax.f32 %v10265_v43, %v10269_v7  ;;  %v16308_v53 = vunpack.i.h.bf16 %v16306_v39  ;;  %v16307_v63 = vunpack.i.l.bf16 %v16306_v39  ;;  %14743 = vmatmul.mubr.msk.bf16.vlgmr.msra.gmra.mrb[168].mxu1 %vm835_vm2, %v20252_v49 }
 0x92d   : > { %14771 = vmatpush3.bf16.msra.mxu1 %v20105_v24  ;;  %v21350_v7 = vmax.f32 %v19985_v22, 0.0  ;;  %v21351_v39 = vmax.f32 %v19974_v29, 0.0  ;;  %v21354_v29 = vmax.f32 %v19982_v48, 0.0 }
 0x92e   : > { %v10343_v5 = vpack.c.bf16 %v10318_v23, %v10317_v44  ;;  %v10272_v56 = vmax.f32 %v21346_v18, %v16308_v53  ;;  %v10271_v16 = vmax.f32 %v21347_v11, %v16307_v63  ;;  %14772 = vmatprep.subr.bf16.mxu1 %v16526_v28 }
 0x92f   : > { %v16311_v24 = vpop.permute.xlu0 %16310 }
 0x930   : > { %10357 = vst.msk [vmem:[#allocation4 + $0x20] sm:$0xff] %vm835_vm2, %v10343_v5  ;;  %v10320_v2 = vmax.f32 %v10268_v55, %v10272_v56  ;;  %v10319_v61 = vmax.f32 %v10267_v30, %v10271_v16  ;;  %v16313_v38 = vunpack.i.h.bf16 %v16311_v24  ;;  %v16312_v60 = vunpack.i.l.bf16 %v16311_v24 }
 0x931   : > { %14773 = vmatpush3.bf16.msra.mxu1 %v16526_v28  ;;  %v21353_v30 = vmax.f32 %v19962_v26, 0.0  ;;  %v21355_v56 = vmax.f32 %v19988_v15, 0.0  ;;  %v21356_v15 = vmax.f32 %v20011_v47, 0.0 }
 0x932   : > { %v10344_v32 = vpack.c.bf16 %v10320_v2, %v10319_v61  ;;  %15952 = vmatprep.subr.msk.bf16.mxu1 %vm8014_vm3, %v16527_v52  ;;  %v10274_v43 = vmax.f32 %v21348_v54, %v16313_v38  ;;  %v10273_v20 = vmax.f32 %v21349_v10, %v16312_v60  ;;  %v21358_v54 = vmax.f32 %v20037_v51, 0.0 }
 0x933   : > { %v16316_v19 = vpop.permute.xlu0 %16315 }
 0x934   : > { %10358 = vst.msk [vmem:[#allocation4 + $0x28] sm:$0xff] %vm835_vm2, %v10344_v32  ;;  %v16318_v37 = vunpack.i.h.bf16 %v16316_v19  ;;  %v16317_v45 = vunpack.i.l.bf16 %v16316_v19 }
 0x935   : > { %14775 = vmatpush3.bf16.msra.mxu1 %v10629_v0 }
 0x936   : > { %14804 = vmatprep.subr.bf16.mxu1 %v20274_v12  ;;  %v10276_v59 = vmax.f32 %v21352_v6, %v16318_v37  ;;  %v10275_v22 = vmax.f32 %v21353_v30, %v16317_v45  ;;  %v21359_v37 = vmax.f32 %v20026_v41, 0.0  ;;  %v21362_v41 = vmax.f32 %v20034_v57, 0.0 }
 0x937   : > { %v16321_v33 = vpop.permute.xlu1 %16320  ;;  %v20278_v35 = vld [vmem:[#allocation4 + $0x20] sm:$0xff] }
 0x938   : > { %v16323_v40 = vunpack.i.h.bf16 %v16321_v33  ;;  %v16322_v42 = vunpack.i.l.bf16 %v16321_v33  ;;  %14746 = vmatprep.mubr.msk.bf16.mxu1 %vm835_vm2, %v20278_v35  ;;  %v21357_v33 = vmax.f32 %v20000_v58, 0.0  ;;  %v21360_v58 = vmax.f32 %v20008_v13, 0.0 }
 0x93a   : > { %v10278_v28 = vmax.f32 %v21350_v7, %v16323_v40  ;;  %v10277_v23 = vmax.f32 %v21351_v39, %v16322_v42 }
 0x93b   : > { %v16326_v44 = vpop.permute.xlu1 %16325  ;;  %v20290_v53 = vld [vmem:[#allocation4 + $0x28] sm:$0xff] }
 0x93c   : > { %v10322_v63 = vmax.f32 %v10274_v43, %v10278_v28  ;;  %v10321_v50 = vmax.f32 %v10273_v20, %v10277_v23  ;;  %v16328_v55 = vunpack.i.h.bf16 %v16326_v44  ;;  %v16327_v21 = vunpack.i.l.bf16 %v16326_v44  ;;  %14747 = vmatmul.mubr.msk.bf16.gmra.mrb[172].mxu1 %vm835_vm2, %v20290_v53 }
 0x93d   : > { %v21361_v44 = vmax.f32 %v20014_v34, 0.0 }
 0x93e   : > { %v10345_v5 = vpack.c.bf16 %v10322_v63, %v10321_v50  ;;  %v10280_v18 = vmax.f32 %v21354_v29, %v16328_v55  ;;  %v10279_v11 = vmax.f32 %v21355_v56, %v16327_v21  ;;  %v21363_v55 = vmax.f32 %v20040_v36, 0.0 }
 0x93f   : > { %v16331_v2 = vpop.permute.xlu0 %16330  ;;  %v21364_v36 = vmax.f32 %v20063_v9, 0.0  ;;  %v21368_v9 = vmax.f32 %v20060_v3, 0.0 }
 0x940   : > { %10359 = vst.msk [vmem:[#allocation4 + $0x30] sm:$0xff] %vm835_vm2, %v10345_v5  ;;  %v10324_v16 = vmax.f32 %v10276_v59, %v10280_v18  ;;  %v10323_v52 = vmax.f32 %v10275_v22, %v10279_v11  ;;  %v16333_v27 = vunpack.i.h.bf16 %v16331_v2  ;;  %v16332_v24 = vunpack.i.l.bf16 %v16331_v2 }
 0x942   : > { %v10346_v61 = vpack.c.bf16 %v10324_v16, %v10323_v52  ;;  %v10282_v60 = vmax.f32 %v21356_v15, %v16333_v27  ;;  %v10281_v40 = vmax.f32 %v21357_v33, %v16332_v24  ;;  %v21365_v52 = vmax.f32 %v20052_v17, 0.0 }
 0x943   : > { %v16336_v32 = vpop.permute.xlu0 %16335  ;;  %v21366_v27 = vmax.f32 %v20089_v31, 0.0 }
 0x944   : > { %10360 = vst.msk [vmem:[#allocation4 + $0x38] sm:$0xff] %vm835_vm2, %v10346_v61  ;;  %v16338_v19 = vunpack.i.h.bf16 %v16336_v32  ;;  %v16337_v42 = vunpack.i.l.bf16 %v16336_v32  ;;  %v21367_v32 = vmax.f32 %v20078_v1, 0.0  ;;  %v21370_v1 = vmax.f32 %v20086_v62, 0.0 }
 0x946   : > { %v10284_v47 = vmax.f32 %v21360_v58, %v16338_v19  ;;  %v10283_v51 = vmax.f32 %v21361_v44, %v16337_v42 }
 0x947   : > { %v16341_v26 = vpop.permute.xlu1 %16340  ;;  %v20304_v0 = vld [vmem:[#allocation4 + $0x30] sm:$0xff] }
 0x948   : > { %v16343_v38 = vunpack.i.h.bf16 %v16341_v26  ;;  %v16342_v48 = vunpack.i.l.bf16 %v16341_v26  ;;  %14750 = vmatprep.mubr.msk.bf16.mxu1 %vm835_vm2, %v20304_v0 }
 0x94a   : > { %v10286_v43 = vmax.f32 %v21358_v54, %v16343_v38  ;;  %v10285_v10 = vmax.f32 %v21359_v37, %v16342_v48 }
 0x94b   : > { %v16346_v20 = vpop.permute.xlu1 %16345  ;;  %v20316_v45 = vld [vmem:[#allocation4 + $0x38] sm:$0xff] }
 0x94c   : > { %v10326_v7 = vmax.f32 %v10282_v60, %v10286_v43  ;;  %v10325_v28 = vmax.f32 %v10281_v40, %v10285_v10  ;;  %v16348_v39 = vunpack.i.h.bf16 %v16346_v20  ;;  %v16347_v23 = vunpack.i.l.bf16 %v16346_v20  ;;  %14751 = vmatmul.mubr.msk.bf16.gmra.mrb[176].mxu1 %vm835_vm2, %v20316_v45 }
 0x94d   : > { %v21369_v40 = vmax.f32 %v20066_v14, 0.0  ;;  %v21371_v43 = vmax.f32 %v20092_v25, 0.0  ;;  %v21372_v25 = vmax.f32 %v20121_v4, 0.0  ;;  %v21378_v4 = vld [vmem:[#allocation55_spill] sm:$0xff] }
 0x94e   : > { %v10347_v63 = vpack.c.bf16 %v10326_v7, %v10325_v28  ;;  %v10288_v50 = vmax.f32 %v21362_v41, %v16348_v39  ;;  %v10287_v21 = vmax.f32 %v21363_v55, %v16347_v23  ;;  %v21374_v55 = vld [vmem:[#allocation9_spill] sm:$0xff] }
 0x94f   : > { %v16351_v30 = vpop.permute.xlu0 %16350 }
 0x950   : > { %10361 = vst.msk [vmem:[#allocation4 + $0x40] sm:$0xff] %vm835_vm2, %v10347_v63  ;;  %v10328_v6 = vmax.f32 %v10284_v47, %v10288_v50  ;;  %v10327_v59 = vmax.f32 %v10283_v51, %v10287_v21  ;;  %v16353_v13 = vunpack.i.h.bf16 %v16351_v30  ;;  %v16352_v5 = vunpack.i.l.bf16 %v16351_v30 }
 0x951   : > { %v21373_v63 = vmax.f32 %v20109_v8, 0.0  ;;  %v21375_v21 = vmax.f32 %v21374_v55, 0.0  ;;  %v21379_v8 = vmax.f32 %v21378_v4, 0.0 }
 0x952   : > { %v10348_v22 = vpack.c.bf16 %v10328_v6, %v10327_v59  ;;  %v10290_v11 = vmax.f32 %v21364_v36, %v16353_v13  ;;  %v10289_v2 = vmax.f32 %v21365_v52, %v16352_v5  ;;  %v21376_v59 = vld [vmem:[#allocation7_spill] sm:$0xff] }
 0x953   : > { %v16356_v29 = vpop.permute.xlu0 %16355  ;;  %v21377_v30 = vmax.f32 %v21376_v59, 0.0 }
 0x954   : > { %10362 = vst.msk [vmem:[#allocation4 + $0x48] sm:$0xff] %vm835_vm2, %v10348_v22  ;;  %v16358_v16 = vunpack.i.h.bf16 %v16356_v29  ;;  %v16357_v61 = vunpack.i.l.bf16 %v16356_v29 }
 0x956   : > { %v10292_v17 = vmax.f32 %v21368_v9, %v16358_v16  ;;  %v10291_v31 = vmax.f32 %v21369_v40, %v16357_v61  ;;  %v21382_v61 = vld [vmem:[#allocation8_spill] sm:$0xff] }
 0x957   : > { %v16361_v34 = vpop.permute.xlu1 %16360  ;;  %v20330_v18 = vld [vmem:[#allocation4 + $0x40] sm:$0xff] }
 0x958   : > { %v16363_v56 = vunpack.i.h.bf16 %v16361_v34  ;;  %v16362_v57 = vunpack.i.l.bf16 %v16361_v34  ;;  %14754 = vmatprep.mubr.msk.bf16.mxu1 %vm835_vm2, %v20330_v18 }
 0x95a   : > { %v10294_v24 = vmax.f32 %v21366_v27, %v16363_v56  ;;  %v10293_v26 = vmax.f32 %v21367_v32, %v16362_v57  ;;  %v21383_v27 = vmax.f32 %v21382_v61, 0.0  ;;  %v21384_v32 = vld [vmem:[#allocation10_spill] sm:$0xff] }
 0x95b   : > { %v16366_v38 = vpop.permute.xlu1 %16365  ;;  %v20342_v48 = vld [vmem:[#allocation4 + $0x48] sm:$0xff] }
 0x95c   : > { %v10330_v15 = vmax.f32 %v10290_v11, %v10294_v24  ;;  %v10329_v60 = vmax.f32 %v10289_v2, %v10293_v26  ;;  %v16368_v19 = vunpack.i.h.bf16 %v16366_v38  ;;  %v16367_v33 = vunpack.i.l.bf16 %v16366_v38  ;;  %14755 = vmatmul.mubr.msk.bf16.gmra.mrb[180].mxu1 %vm835_vm2, %v20342_v48  ;;  %v21380_v11 = vld [vmem:[#allocation56_spill] sm:$0xff] }
 0x95d   : > { %v21381_v16 = vmax.f32 %v21380_v11, 0.0  ;;  %v21385_v26 = vmax.f32 %v21384_v32, 0.0  ;;  %v10370_v32 = vld [vmem:[#allocation4 + $0x8] sm:$0xff] }
 0x95e   : > { %v10349_v42 = vpack.c.bf16 %v10330_v15, %v10329_v60  ;;  %v10296_v54 = vmax.f32 %v21370_v1, %v16368_v19  ;;  %v10295_v37 = vmax.f32 %v21371_v43, %v16367_v33  ;;  %v21386_v43 = vld [vmem:[#allocation59_spill] sm:$0xff] }
 0x95f   : > { %v16371_v7 = vpop.permute.xlu0 %16370 }
 0x960   : > { %10363 = vst.msk [vmem:[#allocation4 + $0x50] sm:$0xff] %vm835_vm2, %v10349_v42  ;;  %v10332_v10 = vmax.f32 %v10292_v17, %v10296_v54  ;;  %v10331_v20 = vmax.f32 %v10291_v31, %v10295_v37  ;;  %v16373_v3 = vunpack.i.h.bf16 %v16371_v7  ;;  %v16372_v39 = vunpack.i.l.bf16 %v16371_v7  ;;  %v21388_v7 = vld [vmem:[#allocation57_spill] sm:$0xff] }
 0x961   : > { %v21387_v37 = vmax.f32 %v21386_v43, 0.0 }
 0x962   : > { %v10350_v28 = vpack.c.bf16 %v10332_v10, %v10331_v20  ;;  %v10298_v44 = vmax.f32 %v21372_v25, %v16373_v3  ;;  %v10297_v41 = vmax.f32 %v21373_v63, %v16372_v39 }
 0x963   : > { %v16376_v23 = vpop.permute.xlu0 %16375 }
 0x964   : > { %10364 = vst.msk [vmem:[#allocation4 + $0x58] sm:$0xff] %vm835_vm2, %v10350_v28  ;;  %v16378_v51 = vunpack.i.h.bf16 %v16376_v23  ;;  %v16377_v50 = vunpack.i.l.bf16 %v16376_v23  ;;  %v21389_v28 = vmax.f32 %v21388_v7, 0.0  ;;  %v21390_v23 = vld [vmem:[#allocation63_spill] sm:$0xff] }
 0x966   : > { %v10300_v36 = vmax.f32 %v21379_v8, %v16378_v51  ;;  %v10299_v52 = vmax.f32 %v21381_v16, %v16377_v50  ;;  %v21400_v8 = vld [vmem:[#allocation64_spill] sm:$0xff] }
 0x967   : > { %v16381_v14 = vpop.permute.xlu1 %16380  ;;  %v20356_v58 = vld [vmem:[#allocation4 + $0x50] sm:$0xff] }
 0x968   : > { %v16383_v47 = vunpack.i.h.bf16 %v16381_v14  ;;  %v16382_v62 = vunpack.i.l.bf16 %v16381_v14  ;;  %14758 = vmatprep.mubr.msk.bf16.mxu1 %vm835_vm2, %v20356_v58  ;;  %v21391_v14 = vmax.f32 %v21390_v23, 0.0 }
 0x96a   : > { %v10302_v6 = vmax.f32 %v21375_v21, %v16383_v47  ;;  %v10301_v22 = vmax.f32 %v21377_v30, %v16382_v62  ;;  %v21392_v62 = vld [vmem:[#allocation61_spill] sm:$0xff] }
 0x96b   : > { %v16386_v13 = vpop.permute.xlu1 %16385  ;;  %v20368_v5 = vld [vmem:[#allocation4 + $0x58] sm:$0xff]  ;;  %v21393_v25 = vmax.f32 %v21392_v62, 0.0 }
 0x96c   : > { %v10334_v29 = vmax.f32 %v10298_v44, %v10302_v6  ;;  %v10333_v34 = vmax.f32 %v10297_v41, %v10301_v22  ;;  %v16388_v56 = vunpack.i.h.bf16 %v16386_v13  ;;  %v16387_v57 = vunpack.i.l.bf16 %v16386_v13  ;;  %14759 = vmatmul.mubr.msk.bf16.gmra.mrb[184].mxu1 %vm835_vm2, %v20368_v5  ;;  %v21394_v6 = vld [vmem:[#allocation58_spill] sm:$0xff]  ;;  %v21396_v22 = vld [vmem:[#allocation60_spill] sm:$0xff] }
 0x96d   : > { %v21395_v59 = vmax.f32 %v21394_v6, 0.0  ;;  %v21397_v13 = vmax.f32 %v21396_v22, 0.0 }
 0x96e   : > { %v10351_v2 = vpack.c.bf16 %v10334_v29, %v10333_v34  ;;  %v10304_v24 = vmax.f32 %v21383_v27, %v16388_v56  ;;  %v10303_v38 = vmax.f32 %v21385_v26, %v16387_v57  ;;  %v21398_v56 = vld [vmem:[#allocation62_spill] sm:$0xff]  ;;  %v10369_v27 = vld [vmem:[#allocation4] sm:$0xff]  ;;  %v16529_v26 = vld [vmem:[%s20709_s5 + $0x38] sm:$0xff]  }
 0x96f   : > { %v16391_v19 = vpop.permute.xlu0 %16390  ;;  %v21399_v57 = vmax.f32 %v21398_v56, 0.0 }
 0x970   : > { %10365 = vst.msk [vmem:[#allocation4 + $0x60] sm:$0xff] %vm835_vm2, %v10351_v2  ;;  %v10336_v15 = vmax.f32 %v10300_v36, %v10304_v24  ;;  %v10335_v60 = vmax.f32 %v10299_v52, %v10303_v38  ;;  %v16393_v9 = vunpack.i.h.bf16 %v16391_v19  ;;  %v16392_v17 = vunpack.i.l.bf16 %v16391_v19  ;;  %v16530_v38 = vld [vmem:[%s20709_s5 + $0x40] sm:$0x1f]  }
 0x971   : > { %v21401_v36 = vmax.f32 %v21400_v8, 0.0 }
 0x972   : > { %v10352_v33 = vpack.c.bf16 %v10336_v15, %v10335_v60  ;;  %v10306_v10 = vmax.f32 %v21387_v37, %v16393_v9  ;;  %v10305_v3 = vmax.f32 %v21389_v28, %v16392_v17  ;;  %v10857_v15 = vsel %vm8014_vm3, %v16530_v38, 0  ;;  %v16531_v60 = vld [vmem:[%s20711_s7 + $0x2c] sm:$0xff]  }
 0x973   : > { %v16401_v40 = vpop.permute.xlu0 %16400 }
 0x974   : > { %10366 = vst.msk [vmem:[#allocation4 + $0x68] sm:$0xff] %vm835_vm2, %v10352_v33  ;;  %v16403_v20 = vunpack.i.h.bf16 %v16401_v40  ;;  %v16402_v39 = vunpack.i.l.bf16 %v16401_v40 }
 0x976   : > { %v10308_v30 = vmax.f32 %v21395_v59, %v16403_v20  ;;  %v10307_v29 = vmax.f32 %v21397_v13, %v16402_v39  ;;  %v16538_v59 = vld [vmem:[%s20711_s7 + $0x8] sm:$0xff]  }
 0x977   : > { %v16396_v31 = vpop.permute.xlu1 %16395  ;;  %v20382_v42 = vld [vmem:[#allocation4 + $0x60] sm:$0xff] }
 0x978   : > { %v16398_v1 = vunpack.i.h.bf16 %v16396_v31  ;;  %v16397_v54 = vunpack.i.l.bf16 %v16396_v31  ;;  %14762 = vmatprep.mubr.msk.bf16.mxu1 %vm835_vm2, %v20382_v42 }
 0x97a   : > { %v10310_v47 = vmax.f32 %v21391_v14, %v16398_v1  ;;  %v10309_v44 = vmax.f32 %v21393_v25, %v16397_v54 }
 0x97b   : > { %v16406_v51 = vpop.permute.xlu1 %16405  ;;  %v20394_v63 = vld [vmem:[#allocation4 + $0x68] sm:$0xff] }
 0x97c   : > { %v10338_v41 = vmax.f32 %v10306_v10, %v10310_v47  ;;  %v10337_v50 = vmax.f32 %v10305_v3, %v10309_v44  ;;  %v16408_v55 = vunpack.i.h.bf16 %v16406_v51  ;;  %v16407_v21 = vunpack.i.l.bf16 %v16406_v51  ;;  %14763 = vmatmul.mubr.msk.bf16.gmra.mrb[188].mxu1 %vm835_vm2, %v20394_v63 }
 0x97e   : > { %v10353_v34 = vpack.c.bf16 %v10338_v41, %v10337_v50  ;;  %v10312_v4 = vmax.f32 %v21399_v57, %v16408_v55  ;;  %v10311_v11 = vmax.f32 %v21401_v36, %v16407_v21 }
 0x980   : > { %10367 = vst.msk [vmem:[#allocation4 + $0x70] sm:$0xff] %vm835_vm2, %v10353_v34  ;;  %v10340_v16 = vmax.f32 %v10308_v30, %v10312_v4  ;;  %v10339_v52 = vmax.f32 %v10307_v29, %v10311_v11  ;;  %v16539_v4 = vld [vmem:[%s20711_s7 + $0x10] sm:$0xff]  }
 0x982   : > { %v10354_v2 = vpack.c.bf16 %v10340_v16, %v10339_v52 }
 0x984   : > { %10368 = vst.msk [vmem:[#allocation4 + $0x78] sm:$0xff] %vm835_vm2, %v10354_v2 }
 0x987   : > { %v10389_v61 = vld [vmem:[#allocation4 + $0x70] sm:$0xff] }
 0x988   : > { %14766 = vmatprep.mubr.msk.bf16.mxu1 %vm835_vm2, %v10389_v61 }
 0x98b   : > { %v10390_v24 = vld [vmem:[#allocation4 + $0x78] sm:$0xff] }
 0x98c   : > { %14767 = vmatmul.mubr.msk.bf16.gmra.mrb[192].mxu1 %vm835_vm2, %v10390_v24 }
 0x98d   : > { %14776 = vmatprep.mubr.msk.bf16.mxu1 %vm835_vm2, %v10369_v27  ;;  %v16540_v27 = vld [vmem:[%s20711_s7 + $0x18] sm:$0xff]  }
 0x994   : > { %14777 = vmatmul.mubr.msk.bf16.vlgmr.msra.gmra.mrb[168].mxu1 %vm835_vm2, %v10370_v32 }
 0x995   : > { %14780 = vmatprep.mubr.msk.bf16.mxu1 %vm835_vm2, %v20237_v46  ;;  %14805 = vmatpush3.bf16.msra.mxu1 %v20274_v12  ;;  %v16532_v46 = vld [vmem:[%s20711_s7 + $0x34] sm:$0xff]   ;;  %v16534_v12 = vld [vmem:[%s20711_s7 + $0x44] sm:$0xff]  }
 0x996   : > { %14806 = vmatprep.subr.bf16.mxu1 %v16529_v26 }
 0x999   : > { %14807 = vmatpush3.bf16.msra.mxu1 %v16529_v26 }
 0x99a   : > { %15953 = vmatprep.subr.msk.bf16.mxu1 %vm8014_vm3, %v16530_v38 }
 0x99c   : > { %14781 = vmatmul.mubr.msk.bf16.gmra.mrb[172].mxu1 %vm835_vm2, %v20252_v49  ;;  %v16533_v49 = vld [vmem:[%s20711_s7 + $0x3c] sm:$0xff]  }
 0x99d   : > { %14784 = vmatprep.mubr.msk.bf16.mxu1 %vm835_vm2, %v20278_v35  ;;  %14809 = vmatpush3.bf16.msra.mxu1 %v10857_v15 }
 0x99e   : > { %14838 = vmatprep.subr.bf16.mxu1 %v16531_v60 }
 0x9a4   : > { %14785 = vmatmul.mubr.msk.bf16.gmra.mrb[176].mxu1 %vm835_vm2, %v20290_v53 }
 0x9a5   : > { %14788 = vmatprep.mubr.msk.bf16.mxu1 %vm835_vm2, %v20304_v0 }
 0x9ac   : > { %14789 = vmatmul.mubr.msk.bf16.gmra.mrb[180].mxu1 %vm835_vm2, %v20316_v45 }
 0x9ad   : > { %14792 = vmatprep.mubr.msk.bf16.mxu1 %vm835_vm2, %v20330_v18 }
 0x9b4   : > { %14793 = vmatmul.mubr.msk.bf16.gmra.mrb[184].mxu1 %vm835_vm2, %v20342_v48 }
 0x9b5   : > { %14796 = vmatprep.mubr.msk.bf16.mxu1 %vm835_vm2, %v20356_v58 }
 0x9bc   : > { %14797 = vmatmul.mubr.msk.bf16.gmra.mrb[188].mxu1 %vm835_vm2, %v20368_v5 }
 0x9bd   : > { %14800 = vmatprep.mubr.msk.bf16.mxu1 %vm835_vm2, %v20382_v42 }
 0x9c4   : > { %14801 = vmatmul.mubr.msk.bf16.gmra.mrb[192].mxu1 %vm835_vm2, %v20394_v63 }
 0x9c5   : > { %14810 = vmatprep.mubr.msk.bf16.mxu1 %vm835_vm2, %v20278_v35  ;;  %v10788_v35 = vld [vmem:[#allocation4 + $0x80] sm:$0xff] }
 0x9cc   : > { %14811 = vmatmul.mubr.msk.bf16.vlgmr.msra.gmra.mrb[168].mxu1 %vm835_vm2, %v20290_v53  ;;  %v10789_v53 = vld [vmem:[#allocation4 + $0x88] sm:$0xff] }
 0x9cd   : > { %14814 = vmatprep.mubr.msk.bf16.mxu1 %vm835_vm2, %v20304_v0  ;;  %14839 = vmatpush3.bf16.msra.mxu1 %v16531_v60  ;;  %v16535_v0 = vld [vmem:[%s20711_s7 + $0x4c] sm:$0xff]  }
 0x9ce   : > { %14840 = vmatprep.subr.bf16.mxu1 %v16532_v46 }
 0x9d1   : > { %14841 = vmatpush3.bf16.msra.mxu1 %v16532_v46 }
 0x9d2   : > { %14842 = vmatprep.subr.bf16.mxu1 %v16533_v49 }
 0x9d4   : > { %14815 = vmatmul.mubr.msk.bf16.gmra.mrb[172].mxu1 %vm835_vm2, %v20316_v45  ;;  %v16536_v45 = vld [vmem:[%s20711_s7 + $0x54] ss:$0 sps:$4 sm:$0x33]  }
 0x9d5   : > { %14818 = vmatprep.mubr.msk.bf16.mxu1 %vm835_vm2, %v20330_v18  ;;  %14843 = vmatpush3.bf16.msra.mxu1 %v16533_v49  ;;  %v11162_v18 = vsel %vm1634_vm1, %v16536_v45, 0  ;;  %v16541_v49 = vld [vmem:[%s20711_s7 + $0x20] sm:$0xff]  }
 0x9d6   : > { %14844 = vmatprep.subr.bf16.mxu1 %v16534_v12 }
 0x9d9   : > { %14845 = vmatpush3.bf16.msra.mxu1 %v16534_v12 }
 0x9da   : > { %14846 = vmatprep.subr.bf16.mxu1 %v16535_v0 }
 0x9dc   : > { %14819 = vmatmul.mubr.msk.bf16.gmra.mrb[176].mxu1 %vm835_vm2, %v20342_v48  ;;  %v16537_v48 = vld [vmem:[%s20711_s7] sm:$0xff]  }
 0x9dd   : > { %14822 = vmatprep.mubr.msk.bf16.mxu1 %vm835_vm2, %v20356_v58  ;;  %14847 = vmatpush3.bf16.msra.mxu1 %v16535_v0  ;;  %v20495_v58 = vld [vmem:[%s20710_s6] ss:$0 sm:$0xff] }
 0x9de   : > { %15954 = vmatprep.subr.msk.bf16.mxu1 %vm1634_vm1, %v16536_v45 }
 0x9e1   : > { %14849 = vmatpush3.bf16.msra.mxu1 %v11162_v18 }
 0x9e2   : > { %14854 = vmatprep.subr.bf16.mxu1 %v16537_v48 }
 0x9e4   : > { %14823 = vmatmul.mubr.msk.bf16.gmra.mrb[180].mxu1 %vm835_vm2, %v20368_v5 }
 0x9e5   : > { %14826 = vmatprep.mubr.msk.bf16.mxu1 %vm835_vm2, %v20382_v42 }
 0x9ec   : > { %14827 = vmatmul.mubr.msk.bf16.gmra.mrb[184].mxu1 %vm835_vm2, %v20394_v63 }
 0x9ed   : > { %14830 = vmatprep.mubr.msk.bf16.mxu1 %vm835_vm2, %v10389_v61 }
 0x9f4   : > { %14831 = vmatmul.mubr.msk.bf16.gmra.mrb[188].mxu1 %vm835_vm2, %v10390_v24 }
 0x9f5   : > { %14834 = vmatprep.mubr.msk.bf16.mxu1 %vm835_vm2, %v10788_v35 }
 0x9fc   : > { %14835 = vmatmul.mubr.msk.bf16.gmra.mrb[192].mxu1 %vm835_vm2, %v10789_v53 }
 0xa9f   : > { %v14812_v5 = vpop.f32.mrb[168].mxu1 }
 0xaa0   : > { %v11041_v19 = vadd.f32 %v14812_v5, %v20495_v58  ;;  %v10893_v33 = vpop.f32.mrb[169].mxu1  ;;  %v16542_v5 = vld [vmem:[%s20711_s7 + $0x28] ss:$0 sps:$4 sm:$0x33]  }
 0xaa1   : > { %v11039_v9 = vadd.f32 %v20495_v58, %v10893_v33  ;;  %v14813_v17 = vpop.f32.mrb[170].mxu1 }
 0xaa2   : > { %v11042_v40 = vadd.f32 %v14813_v17, %v20495_v58  ;;  %v10896_v31 = vpop.f32.mrb[171].mxu1  ;;  %v11069_v1 = vmax.f32 %v11041_v19, 0.0 }
 0xaa3   : > { %v11040_v42 = vadd.f32 %v20495_v58, %v10896_v31  ;;  %v11067_v43 = vmax.f32 %v11039_v9, 0.0 }
 0xaa4   : > { %v11070_v54 = vmax.f32 %v11042_v40, 0.0 }
 0xaa5   : > { %v11068_v37 = vmax.f32 %v11040_v42, 0.0 }
 0xaa6   : > { %v20501_v10 = vpack.c.bf16 %v11070_v54, %v11069_v1  ;;  %v11253_v1 = vsel %vm1634_vm1, %v16542_v5, 0  ;;  %v16543_v54 = vld [vmem:[%s20711_s7 + $0x58] sm:$0xff]  }
 0xaa7   : > { %v11095_v20 = vpack.c.bf16 %v11068_v37, %v11067_v43  ;;  %v14816_v7 = vpop.f32.mrb[172].mxu1 }
 0xaa8   : > { %v11045_v28 = vadd.f32 %v14816_v7, %v20495_v58  ;;  %v10909_v3 = vpop.f32.mrb[173].mxu1 }
 0xaa9   : > { %v11043_v39 = vadd.f32 %v20495_v58, %v10909_v3  ;;  %v14817_v23 = vpop.f32.mrb[174].mxu1 }
 0xaaa   : > { %v11046_v14 = vadd.f32 %v14817_v23, %v20495_v58  ;;  %v10912_v47 = vpop.f32.mrb[175].mxu1  ;;  %v11073_v25 = vmax.f32 %v11045_v28, 0.0  ;;  %v16544_v23 = vld [vmem:[%s20711_s7 + $0x60] sm:$0xff]  }
 0xaab   : > { %v11044_v62 = vadd.f32 %v20495_v58, %v10912_v47  ;;  %v11071_v51 = vmax.f32 %v11043_v39, 0.0 }
 0xaac   : > { %v11074_v44 = vmax.f32 %v11046_v14, 0.0 }
 0xaad   : > { %v11072_v63 = vmax.f32 %v11044_v62, 0.0 }
 0xaae   : > { %v11109_v41 = vpack.c.bf16 %v11074_v44, %v11073_v25 }
 0xaaf   : > { %v11108_v50 = vpack.c.bf16 %v11072_v63, %v11071_v51  ;;  %v14820_v55 = vpop.f32.mrb[176].mxu1 }
 0xab0   : > { %v11049_v21 = vadd.f32 %v14820_v55, %v20495_v58  ;;  %v10925_v6 = vpop.f32.mrb[177].mxu1 }
 0xab1   : > { %v11047_v30 = vadd.f32 %v20495_v58, %v10925_v6  ;;  %v14821_v22 = vpop.f32.mrb[178].mxu1  ;;  %14850 = vmatprep.mubr.msk.bf16.mxu1 %vm822_vm0, %v11108_v50 }
 0xab2   : > { %v11050_v13 = vadd.f32 %v14821_v22, %v20495_v58  ;;  %v10928_v29 = vpop.f32.mrb[179].mxu1  ;;  %14851 = vmatmul.mubr.msk.bf16.vlgmr.msra.gmra.mrb[196].mxu1 %vm822_vm0, %v11109_v41  ;;  %v11077_v56 = vmax.f32 %v11049_v21, 0.0  ;;  %v16545_v41 = vld [vmem:[%s20711_s7 + $0x68] sm:$0xff]   ;;  %v16546_v22 = vld [vmem:[%s20711_s7 + $0x70] sm:$0xff]  }
 0xab3   : > { %v11048_v34 = vadd.f32 %v20495_v58, %v10928_v29  ;;  %14855 = vmatpush3.bf16.msra.mxu1 %v16537_v48  ;;  %14866 = vmatprep.mubr.msk.bf16.mxu1 %vm822_vm0, %v11095_v20  ;;  %v11075_v8 = vmax.f32 %v11047_v30, 0.0 }
 0xab4   : > { %v11078_v57 = vmax.f32 %v11050_v13, 0.0  ;;  %14856 = vmatprep.subr.bf16.mxu1 %v16538_v59 }
 0xab5   : > { %v11076_v36 = vmax.f32 %v11048_v34, 0.0 }
 0xab6   : > { %v20520_v11 = vpack.c.bf16 %v11078_v57, %v11077_v56 }
 0xab7   : > { %v11304_v16 = vpack.c.bf16 %v11076_v36, %v11075_v8  ;;  %14857 = vmatpush3.bf16.msra.mxu1 %v16538_v59  ;;  %v14824_v52 = vpop.f32.mrb[180].mxu1  ;;  %v16547_v36 = vld [vmem:[%s20711_s7 + $0x78] sm:$0xff]  }
 0xab8   : > { %v11053_v2 = vadd.f32 %v14824_v52, %v20495_v58  ;;  %v10941_v61 = vpop.f32.mrb[181].mxu1  ;;  %14858 = vmatprep.subr.bf16.mxu1 %v16539_v4 }
 0xab9   : > { %v11051_v24 = vadd.f32 %v20495_v58, %v10941_v61  ;;  %v14825_v32 = vpop.f32.mrb[182].mxu1 }
 0xaba   : > { %v11054_v26 = vadd.f32 %v14825_v32, %v20495_v58  ;;  %v10944_v38 = vpop.f32.mrb[183].mxu1  ;;  %v11081_v60 = vmax.f32 %v11053_v2, 0.0  ;;  %v16550_v32 = vld [vmem:[%s20711_s7 + $0x8c] sm:$0xff]  }
 0xabb   : > { %v11052_v15 = vadd.f32 %v20495_v58, %v10944_v38  ;;  %14859 = vmatpush3.bf16.msra.mxu1 %v16539_v4  ;;  %v11079_v12 = vmax.f32 %v11051_v24, 0.0  ;;  %v16549_v24 = vld [vmem:[%s20711_s7 + $0x84] sm:$0xff]   ;;  %v16552_v38 = vld [vmem:[%s20711_s7 + $0x9c] sm:$0xff]  }
 0xabc   : > { %v11082_v46 = vmax.f32 %v11054_v26, 0.0  ;;  %14860 = vmatprep.subr.bf16.mxu1 %v16540_v27  ;;  %v16551_v26 = vld [vmem:[%s20711_s7 + $0x94] sm:$0xff]  }
 0xabd   : > { %v11080_v35 = vmax.f32 %v11052_v15, 0.0  ;;  %v16554_v15 = vld [vmem:[%s20711_s7 + $0xac] ss:$0 sps:$4 sm:$0x33]  }
 0xabe   : > { %v20532_v53 = vpack.c.bf16 %v11082_v46, %v11081_v60  ;;  %v11467_v60 = vsel %vm1634_vm1, %v16554_v15, 0  ;;  %v16555_v46 = vld [vmem:[%s20711_s7 + $0xb0] sm:$0xff]  }
 0xabf   : > { %v20534_v0 = vpack.c.bf16 %v11080_v35, %v11079_v12  ;;  %14861 = vmatpush3.bf16.msra.mxu1 %v16540_v27  ;;  %v14828_v45 = vpop.f32.mrb[184].mxu1  ;;  %v16557_v12 = vld [vmem:[%s20711_s7 + $0xc0] sm:$0xff]   ;;  %v16558_v35 = vld [vmem:[%s20711_s7 + $0xc8] sm:$0xff]  }
 0xac0   : > { %v11057_v18 = vadd.f32 %v14828_v45, %v20495_v58  ;;  %v10957_v48 = vpop.f32.mrb[185].mxu1  ;;  %14862 = vmatprep.subr.bf16.mxu1 %v16541_v49 }
 0xac1   : > { %v11055_v19 = vadd.f32 %v20495_v58, %v10957_v48  ;;  %v14829_v33 = vpop.f32.mrb[186].mxu1  ;;  %v16562_v48 = vld [vmem:[%s20711_s7 + $0xe4] sm:$0xff]  }
 0xac2   : > { %v11058_v9 = vadd.f32 %v14829_v33, %v20495_v58  ;;  %v10960_v17 = vpop.f32.mrb[187].mxu1  ;;  %v11085_v31 = vmax.f32 %v11057_v18, 0.0  ;;  %v16561_v18 = vld [vmem:[%s20711_s7 + $0xdc] sm:$0xff]  }
 0xac3   : > { %v11056_v40 = vadd.f32 %v20495_v58, %v10960_v17  ;;  %14863 = vmatpush3.bf16.msra.mxu1 %v16541_v49  ;;  %v11083_v43 = vmax.f32 %v11055_v19, 0.0  ;;  %v16556_v49 = vld [vmem:[%s20711_s7 + $0xb8] sm:$0xff]  }
 0xac4   : > { %v11086_v42 = vmax.f32 %v11058_v9, 0.0  ;;  %15955 = vmatprep.subr.msk.bf16.mxu1 %vm1634_vm1, %v16542_v5  ;;  %v16563_v5 = vld [vmem:[%s20711_s7 + $0xec] sm:$0xff]   ;;  %v16564_v19 = vld [vmem:[%s20711_s7 + $0xf4] sm:$0xff]   ;;  %v16565_v33 = vld [vmem:[%s20711_s7 + $0xfc] sm:$0xff]  }
 0xac5   : > { %v11084_v37 = vmax.f32 %v11056_v40, 0.0  ;;  %v16566_v9 = vld [vmem:[%s20711_s7 + $0x104] ss:$0 sps:$4 sm:$0x33]   ;;  %v16567_v40 = vld [vmem:[%s20711_s7 + $0x108] sm:$0xff]  }
 0xac6   : > { %v20548_v20 = vpack.c.bf16 %v11086_v42, %v11085_v31  ;;  %v11685_v17 = vsel %vm1634_vm1, %v16566_v9, 0  ;;  %v16568_v31 = vld [vmem:[%s20711_s7 + $0x110] sm:$0xff]   ;;  %v16569_v42 = vld [vmem:[%s20711_s7 + $0x118] sm:$0xff]  }
 0xac7   : > { %v20550_v7 = vpack.c.bf16 %v11084_v37, %v11083_v43  ;;  %14865 = vmatpush3.bf16.msra.mxu1 %v11253_v1  ;;  %v14832_v28 = vpop.f32.mrb[188].mxu1  ;;  %v16570_v1 = vld [vmem:[%s20711_s7 + $0x120] sm:$0xff]   ;;  %v16572_v43 = vld [vmem:[%s20711_s7 + $0x130] ss:$0 sps:$4 sm:$0x33]  }
 0xac8   : > { %v11061_v3 = vadd.f32 %v14832_v28, %v20495_v58  ;;  %v10973_v39 = vpop.f32.mrb[189].mxu1  ;;  %14870 = vmatprep.subr.bf16.mxu1 %v16543_v54  ;;  %v11794_v37 = vsel %vm1634_vm1, %v16572_v43, 0 }
 0xac9   : > { %v11059_v14 = vadd.f32 %v20495_v58, %v10973_v39  ;;  %v14833_v47 = vpop.f32.mrb[190].mxu1 }
 0xaca   : > { %v11062_v62 = vadd.f32 %v14833_v47, %v20495_v58  ;;  %14867 = vmatmul.mubr.msk.bf16.vlgmr.msra.gmra.mrb[196].mxu1 %vm822_vm0, %v20501_v10  ;;  %v10976_v25 = vpop.f32.mrb[191].mxu1  ;;  %v11089_v51 = vmax.f32 %v11061_v3, 0.0 }
 0xacb   : > { %v11060_v44 = vadd.f32 %v20495_v58, %v10976_v25  ;;  %14871 = vmatpush3.bf16.msra.mxu1 %v16543_v54  ;;  %14882 = vmatprep.mubr.msk.bf16.mxu1 %vm822_vm0, %v11304_v16  ;;  %v11087_v50 = vmax.f32 %v11059_v14, 0.0  ;;  %v16571_v54 = vld [vmem:[%s20711_s7 + $0x128] sm:$0xff]  }
 0xacc   : > { %v11090_v63 = vmax.f32 %v11062_v62, 0.0  ;;  %14872 = vmatprep.subr.bf16.mxu1 %v16544_v23 }
 0xacd   : > { %v11088_v55 = vmax.f32 %v11060_v44, 0.0 }
 0xace   : > { %v20565_v21 = vpack.c.bf16 %v11090_v63, %v11089_v51 }
 0xacf   : > { %v20567_v6 = vpack.c.bf16 %v11088_v55, %v11087_v50  ;;  %14873 = vmatpush3.bf16.msra.mxu1 %v16544_v23  ;;  %v14836_v10 = vpop.f32.mrb[192].mxu1 }
 0xad0   : > { %v11065_v59 = vadd.f32 %v14836_v10, %v20495_v58  ;;  %v10989_v30 = vpop.f32.mrb[193].mxu1  ;;  %14874 = vmatprep.subr.bf16.mxu1 %v16545_v41 }
 0xad1   : > { %v11063_v13 = vadd.f32 %v20495_v58, %v10989_v30  ;;  %v14837_v29 = vpop.f32.mrb[194].mxu1 }
 0xad2   : > { %v11066_v34 = vadd.f32 %v14837_v29, %v20495_v58  ;;  %v10992_v56 = vpop.f32.mrb[195].mxu1  ;;  %v11093_v4 = vmax.f32 %v11065_v59, 0.0 }
 0xad3   : > { %v11064_v57 = vadd.f32 %v20495_v58, %v10992_v56  ;;  %14875 = vmatpush3.bf16.msra.mxu1 %v16545_v41  ;;  %v11091_v16 = vmax.f32 %v11063_v13, 0.0  ;;  %v16548_v58 = vld [vmem:[%s20711_s7 + $0x80] ss:$0 sps:$4 sm:$0x33]  }
 0xad4   : > { %v11094_v8 = vmax.f32 %v11066_v34, 0.0  ;;  %14876 = vmatprep.subr.bf16.mxu1 %v16546_v22  ;;  %v11358_v27 = vsel %vm1634_vm1, %v16548_v58, 0 }
 0xad5   : > { %v11092_v52 = vmax.f32 %v11064_v57, 0.0 }
 0xad6   : > { %v20579_v2 = vpack.c.bf16 %v11094_v8, %v11093_v4 }
 0xad7   : > { %v20581_v61 = vpack.c.bf16 %v11092_v52, %v11091_v16  ;;  %14877 = vmatpush3.bf16.msra.mxu1 %v16546_v22 }
 0xad8   : > { %14878 = vmatprep.subr.bf16.mxu1 %v16547_v36 }
 0xadb   : > { %14879 = vmatpush3.bf16.msra.mxu1 %v16547_v36 }
 0xadc   : > { %15956 = vmatprep.subr.msk.bf16.mxu1 %vm1634_vm1, %v16548_v58 }
 0xadf   : > { %14881 = vmatpush3.bf16.msra.mxu1 %v11358_v27 }
 0xae0   : > { %14886 = vmatprep.subr.bf16.mxu1 %v16549_v24 }
 0xae2   : > { %14883 = vmatmul.mubr.msk.bf16.vlgmr.msra.gmra.mrb[196].mxu1 %vm822_vm0, %v20520_v11  ;;  %v16553_v11 = vld [vmem:[%s20711_s7 + $0xa4] sm:$0xff]  }
 0xae3   : > { %14887 = vmatpush3.bf16.msra.mxu1 %v16549_v24  ;;  %14898 = vmatprep.mubr.msk.bf16.mxu1 %vm822_vm0, %v20534_v0  ;;  %v16560_v0 = vld [vmem:[%s20711_s7 + $0xd8] ss:$0 sps:$4 sm:$0x33]  }
 0xae4   : > { %14888 = vmatprep.subr.bf16.mxu1 %v16550_v32  ;;  %v11576_v45 = vsel %vm1634_vm1, %v16560_v0, 0 }
 0xae7   : > { %14889 = vmatpush3.bf16.msra.mxu1 %v16550_v32 }
 0xae8   : > { %14890 = vmatprep.subr.bf16.mxu1 %v16551_v26 }
 0xaeb   : > { %14891 = vmatpush3.bf16.msra.mxu1 %v16551_v26 }
 0xaec   : > { %14892 = vmatprep.subr.bf16.mxu1 %v16552_v38 }
 0xaef   : > { %14893 = vmatpush3.bf16.msra.mxu1 %v16552_v38 }
 0xaf0   : > { %14894 = vmatprep.subr.bf16.mxu1 %v16553_v11 }
 0xaf3   : > { %14895 = vmatpush3.bf16.msra.mxu1 %v16553_v11 }
 0xaf4   : > { %15957 = vmatprep.subr.msk.bf16.mxu1 %vm1634_vm1, %v16554_v15 }
 0xaf7   : > { %14897 = vmatpush3.bf16.msra.mxu1 %v11467_v60 }
 0xaf8   : > { %14902 = vmatprep.subr.bf16.mxu1 %v16555_v46 }
 0xafa   : > { %14899 = vmatmul.mubr.msk.bf16.vlgmr.msra.gmra.mrb[196].mxu1 %vm822_vm0, %v20532_v53  ;;  %v16559_v53 = vld [vmem:[%s20711_s7 + $0xd0] sm:$0xff]  }
 0xafb   : > { %14903 = vmatpush3.bf16.msra.mxu1 %v16555_v46  ;;  %14914 = vmatprep.mubr.msk.bf16.mxu1 %vm822_vm0, %v20550_v7 }
 0xafc   : > { %14904 = vmatprep.subr.bf16.mxu1 %v16556_v49 }
 0xaff   : > { %14905 = vmatpush3.bf16.msra.mxu1 %v16556_v49 }
 0xb00   : > { %14906 = vmatprep.subr.bf16.mxu1 %v16557_v12 }
 0xb03   : > { %14907 = vmatpush3.bf16.msra.mxu1 %v16557_v12 }
 0xb04   : > { %14908 = vmatprep.subr.bf16.mxu1 %v16558_v35 }
 0xb07   : > { %14909 = vmatpush3.bf16.msra.mxu1 %v16558_v35 }
 0xb08   : > { %14910 = vmatprep.subr.bf16.mxu1 %v16559_v53 }
 0xb0b   : > { %14911 = vmatpush3.bf16.msra.mxu1 %v16559_v53 }
 0xb0c   : > { %15958 = vmatprep.subr.msk.bf16.mxu1 %vm1634_vm1, %v16560_v0 }
 0xb0f   : > { %14913 = vmatpush3.bf16.msra.mxu1 %v11576_v45 }
 0xb10   : > { %14918 = vmatprep.subr.bf16.mxu1 %v16561_v18 }
 0xb12   : > { %14915 = vmatmul.mubr.msk.bf16.vlgmr.msra.gmra.mrb[196].mxu1 %vm822_vm0, %v20548_v20  ;;  %v12858_v20 = vld [vmem:[%s20712_s8] ss:$0 sm:$0xff] }
 0xb13   : > { %14919 = vmatpush3.bf16.msra.mxu1 %v16561_v18  ;;  %14930 = vmatprep.mubr.msk.bf16.mxu1 %vm822_vm0, %v20567_v6 }
 0xb14   : > { %14920 = vmatprep.subr.bf16.mxu1 %v16562_v48 }
 0xb17   : > { %14921 = vmatpush3.bf16.msra.mxu1 %v16562_v48 }
 0xb18   : > { %14922 = vmatprep.subr.bf16.mxu1 %v16563_v5 }
 0xb1b   : > { %14923 = vmatpush3.bf16.msra.mxu1 %v16563_v5 }
 0xb1c   : > { %14924 = vmatprep.subr.bf16.mxu1 %v16564_v19 }
 0xb1f   : > { %14925 = vmatpush3.bf16.msra.mxu1 %v16564_v19 }
 0xb20   : > { %14926 = vmatprep.subr.bf16.mxu1 %v16565_v33 }
 0xb23   : > { %14927 = vmatpush3.bf16.msra.mxu1 %v16565_v33 }
 0xb24   : > { %15959 = vmatprep.subr.msk.bf16.mxu1 %vm1634_vm1, %v16566_v9 }
 0xb27   : > { %14929 = vmatpush3.bf16.msra.mxu1 %v11685_v17 }
 0xb28   : > { %14934 = vmatprep.subr.bf16.mxu1 %v16567_v40 }
 0xb2a   : > { %14931 = vmatmul.mubr.msk.bf16.vlgmr.msra.gmra.mrb[196].mxu1 %vm822_vm0, %v20565_v21 }
 0xb2b   : > { %14935 = vmatpush3.bf16.msra.mxu1 %v16567_v40  ;;  %14946 = vmatprep.mubr.msk.bf16.mxu1 %vm822_vm0, %v20581_v61 }
 0xb2c   : > { %14936 = vmatprep.subr.bf16.mxu1 %v16568_v31 }
 0xb2f   : > { %14937 = vmatpush3.bf16.msra.mxu1 %v16568_v31 }
 0xb30   : > { %14938 = vmatprep.subr.bf16.mxu1 %v16569_v42 }
 0xb33   : > { %14939 = vmatpush3.bf16.msra.mxu1 %v16569_v42 }
 0xb34   : > { %14940 = vmatprep.subr.bf16.mxu1 %v16570_v1 }
 0xb37   : > { %14941 = vmatpush3.bf16.msra.mxu1 %v16570_v1 }
 0xb38   : > { %14942 = vmatprep.subr.bf16.mxu1 %v16571_v54 }
 0xb3b   : > { %14943 = vmatpush3.bf16.msra.mxu1 %v16571_v54 }
 0xb3c   : > { %15960 = vmatprep.subr.msk.bf16.mxu1 %vm1634_vm1, %v16572_v43 }
 0xb3f   : > { %14945 = vmatpush3.bf16.msra.mxu1 %v11794_v37 }
 0xb42   : > { %14947 = vmatmul.mubr.msk.bf16.vlgmr.msra.gmra.mrb[196].mxu1 %vm822_vm0, %v20579_v2 }
 0xc15   : > { %v14948_v7 = vpop.f32.mrb[196].mxu1 }
 0xc16   : > { %v11830_v28 = vpop.f32.mrb[197].mxu1  ;;  %v11858_v47 = vadd.f32 %v14948_v7, %v12858_v20 }
 0xc17   : > { %v11856_v3 = vadd.f32 %v12858_v20, %v11830_v28  ;;  %v14949_v39 = vpop.f32.mrb[198].mxu1 }
 0xc18   : > { %v11833_v23 = vpop.f32.mrb[199].mxu1  ;;  %v11859_v62 = vadd.f32 %v14949_v39, %v12858_v20  ;;  %11862 = vst [vmem:[%s819_s17 + $0x10] sm:$0xff] %v11858_v47 }
 0xc19   : > { %11860 = vst [vmem:[%s819_s17] sm:$0xff] %v11856_v3  ;;  %v11857_v14 = vadd.f32 %v12858_v20, %v11833_v23 }
 0xc1a   : > { %11863 = vst [vmem:[%s819_s17 + $0x18] sm:$0xff] %v11859_v62 }
 0xc1b   : > { %11861 = vst [vmem:[%s819_s17 + $0x8] sm:$0xff] %v11857_v14 }
 0xc1c PF: > { %p16_p9 = scmp.ge.s32.totalorder %s16693_s13, 4   ;;  %s21402_s30 = smov %s16618_s10 }
 0xc1d   : > { %s21403_s10 = smov %s16702_s16  ;;  %s21404_s11 = smov %s16693_s13 }
 0xc1e   :  { %18 = sbr.rel (!%p16_p9) target bundleno = 2 (0x2), region = 150 }

</bundles_post_ra>
